<compile_context>
chip_gen: v7x
topology: tpu7x:2x2x1
jax: 0.10.0
libtpu: 0.0.40
codegen_flags: <defaults>
</compile_context>

<pallas_src>
from functools import partial

import jax
import jax.numpy as jnp
from jax.experimental import pallas as pl
from jax.experimental.pallas import tpu as pltpu

LRELU_SLOPE = 0.1


# ----------------------------- in-kernel helpers ----------------------------

def _dot(a, w):
    """MXU matmul: f32 activation cast to bf16, bf16 weight, f32 accumulation."""
    return jnp.dot(a.astype(jnp.bfloat16), w, preferred_element_type=jnp.float32)


def _leaky(x, slope):
    return jnp.where(x >= 0, x, x * slope)


def _pad_time(x, left, right):
    """Zero-pad a (T, C) value along the time (sublane) axis."""
    parts = []
    c = x.shape[1]
    if left:
        parts.append(jnp.zeros((left, c), x.dtype))
    parts.append(x)
    if right:
        parts.append(jnp.zeros((right, c), x.dtype))
    return jnp.concatenate(parts, axis=0) if len(parts) > 1 else x


def _wspec(a):
    """Full-array BlockSpec for a weight (re-used across the B grid)."""
    nd = a.ndim
    return pl.BlockSpec(a.shape, lambda b, _nd=nd: (0,) * _nd)


# ---------------------- flow: residual coupling (reverse) -------------------

def _coupling_reverse_kernel(x_ref, m_ref, pre_w_ref, pre_b_ref, in_w_ref,
                             in_b_ref, rs_w_ref, rs_b_ref, post_w_ref,
                             post_b_ref, o_ref, *, half, hidden, n_layers,
                             ksize, dilation_rate):
    x = x_ref[0]                      # (T, 2*half) f32
    mask = m_ref[0]                   # (T, 1) f32
    T = x.shape[0]

    x0 = x[:, :half]
    x1 = x[:, half:]

    # pre 1x1 conv
    h = (_dot(x0, pre_w_ref[...]) + pre_b_ref[...]) * mask        # (T, hidden)

    in_b = in_b_ref[...]              # (n_layers, 2*hidden) f32
    rs_b = rs_b_ref[...]              # (n_layers, 2*hidden) f32
    output = jnp.zeros((T, hidden), jnp.float32)

    for i in range(n_layers):
        dil = dilation_rate ** i
        pad = dil * (ksize - 1) // 2
        hp = _pad_time(h, pad, pad)
        x_in = in_b[i:i + 1, :]                                    # (1, 2*hidden)
        for k in range(ksize):
            x_in = x_in + _dot(hp[k * dil:k * dil + T], in_w_ref[i * ksize + k])
        # fused_add_tanh_sigmoid_multiply (g = None)
        acts = jnp.tanh(x_in[:, :hidden]) * jax.nn.sigmoid(x_in[:, hidden:])
        rs = _dot(acts, rs_w_ref[i]) + rs_b[i:i + 1, :]            # (T, 2*hidden)
        h = (h + rs[:, :hidden]) * mask
        output = output + rs[:, hidden:]

    output = output * mask
    # post 1x1 (mean_only=True -> logs = 0)
    stats = (_dot(output, post_w_ref[...]) + post_b_ref[...]) * mask
    x1n = (x1 - stats) * mask
    o_ref[0] = jnp.concatenate([x0, x1n], axis=-1)


def pallas_coupling_reverse(x, mask, p, cfg):
    B, T, C = x.shape
    half = C // 2
    kern = partial(_coupling_reverse_kernel, half=half,
                   hidden=cfg["hidden_channels"],
                   n_layers=cfg["flow_wn_layers"],
                   ksize=cfg["flow_kernel_size"],
                   dilation_rate=cfg["flow_dilation_rate"])
    return pl.pallas_call(
        kern,
        out_shape=jax.ShapeDtypeStruct((B, T, C), jnp.float32),
        grid=(B,),
        in_specs=[pl.BlockSpec((1, T, C), lambda b: (b, 0, 0)),
                  pl.BlockSpec((1, T, 1), lambda b: (b, 0, 0)),
                  _wspec(p["pre_w"]), _wspec(p["pre_b"]),
                  _wspec(p["in_w"]), _wspec(p["in_b"]),
                  _wspec(p["rs_w"]), _wspec(p["rs_b"]),
                  _wspec(p["post_w"]), _wspec(p["post_b"])],
        out_specs=pl.BlockSpec((1, T, C), lambda b: (b, 0, 0)),
        compiler_params=pltpu.CompilerParams(dimension_semantics=("parallel",)),
    )(x, mask, p["pre_w"], p["pre_b"], p["in_w"], p["in_b"],
      p["rs_w"], p["rs_b"], p["post_w"], p["post_b"])


def residual_coupling_block_reverse(x, mask, flow_params, cfg):
    # flows = [coupling_0, flip_0, ..., coupling_{n-1}, flip_{n-1}]; reversed.
    for p in reversed(flow_params):
        x = x[..., ::-1]                      # Flip (channel reversal)
        x = pallas_coupling_reverse(x, mask, p, cfg)
    return x


# ------------------------------ generator -----------------------------------

def _mask_conv_pre_kernel(x_ref, m_ref, w_ref, b_ref, o_ref, *, ksize):
    x = x_ref[0] * m_ref[0]                  # z * y_mask fused in
    T = x.shape[0]
    pad = (ksize - 1) // 2
    xp = _pad_time(x, pad, pad)
    acc = b_ref[...]                          # (1, Cout)
    for k in range(ksize):
        acc = acc + _dot(xp[k:k + T], w_ref[k])
    o_ref[0] = acc


def pallas_mask_conv_pre(x, mask, w, b, ksize):
    B, T, Cin = x.shape
    Cout = w.shape[-1]
    return pl.pallas_call(
        partial(_mask_conv_pre_kernel, ksize=ksize),
        out_shape=jax.ShapeDtypeStruct((B, T, Cout), jnp.float32),
        grid=(B,),
        in_specs=[pl.BlockSpec((1, T, Cin), lambda b: (b, 0, 0)),
                  pl.BlockSpec((1, T, 1), lambda b: (b, 0, 0)),
                  _wspec(w), _wspec(b)],
        out_specs=pl.BlockSpec((1, T, Cout), lambda b: (b, 0, 0)),
        compiler_params=pltpu.CompilerParams(dimension_semantics=("parallel",)),
    )(x, mask, w, b)


def _upsample_kernel(x_ref, w_ref, b_ref, o_ref, *, taps, left, right, prescale):
    # prescale folds the previous stage's xs / num_kernels into this kernel.
    x = _leaky(x_ref[0] * prescale, LRELU_SLOPE)
    T = x.shape[0]
    xp = _pad_time(x, left, right)
    outs = []
    for phase_taps in taps:                   # one output phase per stride step
        acc = b_ref[...]                      # (1, Cout)
        for (k, m) in phase_taps:
            acc = acc + _dot(xp[m + left:m + left + T], w_ref[k])
        outs.append(acc)                      # (T, Cout)
    # phases packed along lanes -> host reshape to (T*stride, Cout) is free.
    o_ref[0] = jnp.concatenate(outs, axis=-1)


def pallas_upsample(x, p, stride, ksize, prescale):
    B, T, Cin = x.shape
    Cout = p["w"].shape[-1]
    pad = (ksize - stride) // 2
    assert ksize >= stride
    taps, ms = [], []
    for r in range(stride):
        pr = []
        for k in range(ksize):
            if (r + pad - k) % stride == 0:
                m = (r + pad - k) // stride
                pr.append((k, m))
                ms.append(m)
        taps.append(tuple(pr))
    left = max(0, -min(ms))
    right = max(0, max(ms))
    kern = partial(_upsample_kernel, taps=tuple(taps), left=left, right=right,
                   prescale=prescale)
    out = pl.pallas_call(
        kern,
        out_shape=jax.ShapeDtypeStruct((B, T, stride * Cout), jnp.float32),
        grid=(B,),
        in_specs=[pl.BlockSpec((1, T, Cin), lambda b: (b, 0, 0)),
                  _wspec(p["w"]), _wspec(p["b"])],
        out_specs=pl.BlockSpec((1, T, stride * Cout), lambda b: (b, 0, 0)),
        compiler_params=pltpu.CompilerParams(dimension_semantics=("parallel",)),
    )(x, p["w"], p["b"])
    return out.reshape(B, T * stride, Cout)


def _conv_taps(x, w_ref, b_row, w_off, ksize, dil, T):
    pad = dil * (ksize - 1) // 2
    xp = _pad_time(x, pad, pad)
    acc = b_row                               # (1, C)
    for k in range(ksize):
        acc = acc + _dot(xp[k * dil:k * dil + T], w_ref[w_off + k])
    return acc


def _resblock1_kernel(x_ref, c1_w_ref, c1_b_ref, c2_w_ref, c2_b_ref, o_ref,
                      *, ksize, dilations):
    x = x_ref[0]
    T = x.shape[0]
    c1_b = c1_b_ref[...]
    c2_b = c2_b_ref[...]
    for i, d in enumerate(dilations):
        xt = _leaky(x, LRELU_SLOPE)
        xt = _conv_taps(xt, c1_w_ref, c1_b[i:i + 1, :], i * ksize, ksize, d, T)
        xt = _leaky(xt, LRELU_SLOPE)
        xt = _conv_taps(xt, c2_w_ref, c2_b[i:i + 1, :], i * ksize, ksize, 1, T)
        x = xt + x
    o_ref[0] = x


def pallas_resblock1(x, p, ksize, dilations):
    B, T, C = x.shape
    kern = partial(_resblock1_kernel, ksize=ksize, dilations=tuple(dilations))
    return pl.pallas_call(
        kern,
        out_shape=jax.ShapeDtypeStruct((B, T, C), jnp.float32),
        grid=(B,),
        in_specs=[pl.BlockSpec((1, T, C), lambda b: (b, 0, 0)),
                  _wspec(p["c1_w"]), _wspec(p["c1_b"]),
                  _wspec(p["c2_w"]), _wspec(p["c2_b"])],
        out_specs=pl.BlockSpec((1, T, C), lambda b: (b, 0, 0)),
        compiler_params=pltpu.CompilerParams(dimension_semantics=("parallel",)),
    )(x, p["c1_w"], p["c1_b"], p["c2_w"], p["c2_b"])


def _final_kernel(x_ref, w_ref, o_ref, *, ksize, prescale):
    # xs / num_kernels -> leaky_relu(default 0.01) -> conv_post (C->1) -> tanh
    x = _leaky(x_ref[0] * prescale, 0.01)
    T = x.shape[0]
    pad = (ksize - 1) // 2
    xp = _pad_time(x, pad, pad)
    w = w_ref[...]                            # (ksize, C) f32, bias-free
    acc = jnp.zeros((T, 1), jnp.float32)
    for k in range(ksize):
        acc = acc + jnp.sum(xp[k:k + T] * w[k:k + 1, :], axis=-1, keepdims=True)
    o_ref[0] = jnp.tanh(acc)


def pallas_final(x, w, ksize, prescale):
    B, T, C = x.shape
    kern = partial(_final_kernel, ksize=ksize, prescale=prescale)
    return pl.pallas_call(
        kern,
        out_shape=jax.ShapeDtypeStruct((B, T, 1), jnp.float32),
        grid=(B,),
        in_specs=[pl.BlockSpec((1, T, C), lambda b: (b, 0, 0)), _wspec(w)],
        out_specs=pl.BlockSpec((1, T, 1), lambda b: (b, 0, 0)),
        compiler_params=pltpu.CompilerParams(dimension_semantics=("parallel",)),
    )(x, w)


def generator_forward(z, mask, gp, cfg):
    num_kernels = len(cfg["resblock_kernel_sizes"])
    x = pallas_mask_conv_pre(z, mask, gp["pre_w"], gp["pre_b"], ksize=7)
    for i, (u, k) in enumerate(zip(cfg["upsample_rates"],
                                   cfg["upsample_kernel_sizes"])):
        prescale = 1.0 if i == 0 else 1.0 / num_kernels
        x = pallas_upsample(x, gp["ups"][i], u, k, prescale)
        xs = None
        for j in range(num_kernels):
            r = pallas_resblock1(x, gp["resblocks"][i][j],
                                 cfg["resblock_kernel_sizes"][j],
                                 cfg["resblock_dilation_sizes"][j])
            xs = r if xs is None else xs + r
        x = xs
    return pallas_final(x, gp["post_w"], ksize=7, prescale=1.0 / num_kernels)


# ------------------------------ full decoder --------------------------------

def vits_decoder_infer(z_p, y_mask, params, cfg):
    """z_p: (B, inter_channels, T_y) NCW; y_mask: (B, 1, T_y). Returns o.squeeze()."""
    x = jnp.transpose(z_p, (0, 2, 1)).astype(jnp.float32)       # (B, T, C)
    mask = jnp.transpose(y_mask, (0, 2, 1)).astype(jnp.float32)  # (B, T, 1)
    z = residual_coupling_block_reverse(x, mask, params["flow"], cfg)
    o = generator_forward(z, mask, params["dec"], cfg)           # (B, T_audio, 1)
    return jnp.squeeze(o)                                        # matches torch .squeeze()


# --------------------------- deterministic params ---------------------------

def init_params(key, cfg):
    inter = cfg["inter_channels"]
    hidden = cfg["hidden_channels"]
    half = inter // 2
    kf = cfg["flow_kernel_size"]
    nl = cfg["flow_wn_layers"]
    keys = iter(jax.random.split(key, 1024))

    def nrm(shape, std):
        return jax.random.normal(next(keys), shape, jnp.float32) * std

    def wbf(shape, std):
        return nrm(shape, std).astype(jnp.bfloat16)

    flow = []
    for _ in range(cfg["n_flows"]):
        # last WN layer's res_skip conv outputs only the skip half -> zero the
        # res part so the stacked (hidden, 2*hidden) layout matches PyTorch.
        rs_w = nrm((nl, hidden, 2 * hidden), hidden ** -0.5)
        rs_w = rs_w.at[nl - 1, :, :hidden].set(0.0)
        rs_b = nrm((nl, 2 * hidden), 0.01).at[nl - 1, :hidden].set(0.0)
        flow.append(dict(
            pre_w=wbf((half, hidden), max(half, 1) ** -0.5),
            pre_b=nrm((1, hidden), 0.01),
            in_w=wbf((nl * kf, hidden, 2 * hidden), (hidden * kf) ** -0.5),
            in_b=nrm((nl, 2 * hidden), 0.01),
            rs_w=rs_w.astype(jnp.bfloat16),
            rs_b=rs_b,
            post_w=wbf((hidden, half), hidden ** -0.5),
            post_b=nrm((1, half), 0.01),
        ))

    up_init = cfg["upsample_initial_channel"]
    ups, resblocks = [], []
    cin = up_init
    for i, (u, k) in enumerate(zip(cfg["upsample_rates"],
                                   cfg["upsample_kernel_sizes"])):
        cout = up_init // (2 ** (i + 1))
        # ConvTranspose1d weight (Cin, Cout, K) stored tap-major as (K, Cin, Cout)
        ups.append(dict(w=wbf((k, cin, cout), (cin * k) ** -0.5),
                        b=nrm((1, cout), 0.01)))
        stage_rb = []
        for kj, dj in zip(cfg["resblock_kernel_sizes"],
                          cfg["resblock_dilation_sizes"]):
            nd = len(dj)
            stage_rb.append(dict(
                c1_w=wbf((nd * kj, cout, cout), (cout * kj) ** -0.5),
                c1_b=nrm((nd, cout), 0.01),
                c2_w=wbf((nd * kj, cout, cout), (cout * kj) ** -0.5),
                c2_b=nrm((nd, cout), 0.01)))
        resblocks.append(stage_rb)
        cin = cout

    dec = dict(
        pre_w=wbf((7, inter, up_init), (inter * 7) ** -0.5),
        pre_b=nrm((1, up_init), 0.01),
        ups=ups,
        resblocks=resblocks,
        post_w=nrm((7, cin), (cin * 7) ** -0.5),   # conv_post, bias=False, f32
    )
    return dict(flow=flow, dec=dec)


# ---------------------------------- main -------------------------------------

if __name__ == "__main__":
    cfg = dict(
        inter_channels=8,
        hidden_channels=32,
        flow_kernel_size=5,        # ResidualCouplingBlock(inter, hidden, 5, 1, 4)
        flow_dilation_rate=1,
        flow_wn_layers=4,
        n_flows=4,
        resblock="1",
        resblock_kernel_sizes=[3, 5],
        resblock_dilation_sizes=[[1, 3], [1, 3]],
        upsample_rates=[2, 2],
        upsample_initial_channel=32,
        upsample_kernel_sizes=[4, 4],
    )

    key = jax.random.PRNGKey(0)
    kp, kz = jax.random.split(key)
    params = init_params(kp, cfg)

    B, T = 2, 16
    z_p = jax.random.normal(kz, (B, cfg["inter_channels"], T), jnp.float32)
    lengths = jnp.array([T, T - 4], jnp.int32)
    y_mask = (jnp.arange(T)[None, :] < lengths[:, None]).astype(
        jnp.float32)[:, None, :]                                   # (B, 1, T)

    infer = jax.jit(lambda zp, ym, p: vits_decoder_infer(zp, ym, p, cfg))
    o = infer(z_p, y_mask, params)
    jax.block_until_ready(o)
    print("KERNEL_OK")
</pallas_src>

<mosaic_0001>
module attributes {stable_mosaic.version = 11 : i64} {
  func.func @_mask_conv_pre_kernel(%arg0: i32, %arg1: memref<1x16x8xf32, #tpu.memory_space<vmem>>, %arg2: memref<1x16x1xf32, #tpu.memory_space<vmem>>, %arg3: memref<7x8x32xbf16, #tpu.memory_space<vmem>>, %arg4: memref<1x32xf32, #tpu.memory_space<vmem>>, %arg5: memref<1x16x32xf32, #tpu.memory_space<vmem>>) attributes {dimension_semantics = [#tpu.dimension_semantics<parallel>], iteration_bounds = array<i64: 2>, scalar_prefetch = 0 : i64, scratch_operands = 0 : i64, tpu.core_type = #tpu.core_type<tc>, window_params = [{transform_indices = @transform_0, window_bounds = array<i64: 1, 16, 8>}, {transform_indices = @transform_1, window_bounds = array<i64: 1, 16, 1>}, {pipeline_mode = #tpu.pipeline_mode<synchronous>, transform_indices = @transform_2, window_bounds = array<i64: 7, 8, 32>}, {pipeline_mode = #tpu.pipeline_mode<synchronous>, transform_indices = @transform_3, window_bounds = array<i64: 1, 32>}, {transform_indices = @transform_4, window_bounds = array<i64: 1, 16, 32>}]} {
    %c0 = arith.constant 0 : index
    %c0_0 = arith.constant 0 : index
    %c0_1 = arith.constant 0 : index
    %0 = vector.load %arg1[%c0, %c0_0, %c0_1] : memref<1x16x8xf32, #tpu.memory_space<vmem>>, vector<1x16x8xf32>
    %1 = vector.shape_cast %0 : vector<1x16x8xf32> to vector<16x8xf32>
    %c0_2 = arith.constant 0 : index
    %c0_3 = arith.constant 0 : index
    %c0_4 = arith.constant 0 : index
    %2 = vector.load %arg2[%c0_2, %c0_3, %c0_4] : memref<1x16x1xf32, #tpu.memory_space<vmem>>, vector<1x16x1xf32>
    %3 = vector.shape_cast %2 : vector<1x16x1xf32> to vector<16x1xf32>
    %4 = vector.broadcast %3 : vector<16x1xf32> to vector<16x8xf32>
    %5 = arith.mulf %1, %4 : vector<16x8xf32>
    %cst = arith.constant 0.000000e+00 : f32
    %6 = vector.broadcast %cst : f32 to vector<3x8xf32>
    %cst_5 = arith.constant 0.000000e+00 : f32
    %7 = vector.broadcast %cst_5 : f32 to vector<3x8xf32>
    %8 = tpu.concatenate %6, %5, %7 in 0 : vector<3x8xf32>, vector<16x8xf32>, vector<3x8xf32> -> vector<22x8xf32>
    %c0_6 = arith.constant 0 : index
    %c0_7 = arith.constant 0 : index
    %9 = vector.load %arg4[%c0_6, %c0_7] : memref<1x32xf32, #tpu.memory_space<vmem>>, vector<1x32xf32>
    %10 = vector.extract_strided_slice %8 {offsets = [0, 0], sizes = [16, 8], strides = [1, 1]} : vector<22x8xf32> to vector<16x8xf32>
    %c0_8 = arith.constant 0 : index
    %c0_9 = arith.constant 0 : index
    %c0_10 = arith.constant 0 : index
    %11 = vector.load %arg3[%c0_8, %c0_9, %c0_10] : memref<7x8x32xbf16, #tpu.memory_space<vmem>>, vector<1x8x32xbf16>
    %12 = vector.shape_cast %11 : vector<1x8x32xbf16> to vector<8x32xbf16>
    %13 = arith.truncf %10 : vector<16x8xf32> to vector<16x8xbf16>
    %cst_11 = arith.constant dense<0.000000e+00> : vector<16x32xf32>
    %14 = tpu.matmul %13, %12, %cst_11 {dimension_numbers = #tpu.dot_dimension_numbers<[1], [0], [0], [1], [0, 0, 1, 1], [], []>} : vector<16x8xbf16>, vector<8x32xbf16>, vector<16x32xf32> -> vector<16x32xf32>
    %15 = vector.broadcast %9 : vector<1x32xf32> to vector<16x32xf32>
    %16 = arith.addf %15, %14 : vector<16x32xf32>
    %17 = vector.extract_strided_slice %8 {offsets = [1, 0], sizes = [16, 8], strides = [1, 1]} : vector<22x8xf32> to vector<16x8xf32>
    %c1 = arith.constant 1 : index
    %c0_12 = arith.constant 0 : index
    %c0_13 = arith.constant 0 : index
    %18 = vector.load %arg3[%c1, %c0_12, %c0_13] : memref<7x8x32xbf16, #tpu.memory_space<vmem>>, vector<1x8x32xbf16>
    %19 = vector.shape_cast %18 : vector<1x8x32xbf16> to vector<8x32xbf16>
    %20 = arith.truncf %17 : vector<16x8xf32> to vector<16x8xbf16>
    %cst_14 = arith.constant dense<0.000000e+00> : vector<16x32xf32>
    %21 = tpu.matmul %20, %19, %cst_14 {dimension_numbers = #tpu.dot_dimension_numbers<[1], [0], [0], [1], [0, 0, 1, 1], [], []>} : vector<16x8xbf16>, vector<8x32xbf16>, vector<16x32xf32> -> vector<16x32xf32>
    %22 = arith.addf %16, %21 : vector<16x32xf32>
    %23 = vector.extract_strided_slice %8 {offsets = [2, 0], sizes = [16, 8], strides = [1, 1]} : vector<22x8xf32> to vector<16x8xf32>
    %c2 = arith.constant 2 : index
    %c0_15 = arith.constant 0 : index
    %c0_16 = arith.constant 0 : index
    %24 = vector.load %arg3[%c2, %c0_15, %c0_16] : memref<7x8x32xbf16, #tpu.memory_space<vmem>>, vector<1x8x32xbf16>
    %25 = vector.shape_cast %24 : vector<1x8x32xbf16> to vector<8x32xbf16>
    %26 = arith.truncf %23 : vector<16x8xf32> to vector<16x8xbf16>
    %cst_17 = arith.constant dense<0.000000e+00> : vector<16x32xf32>
    %27 = tpu.matmul %26, %25, %cst_17 {dimension_numbers = #tpu.dot_dimension_numbers<[1], [0], [0], [1], [0, 0, 1, 1], [], []>} : vector<16x8xbf16>, vector<8x32xbf16>, vector<16x32xf32> -> vector<16x32xf32>
    %28 = arith.addf %22, %27 : vector<16x32xf32>
    %29 = vector.extract_strided_slice %8 {offsets = [3, 0], sizes = [16, 8], strides = [1, 1]} : vector<22x8xf32> to vector<16x8xf32>
    %c3 = arith.constant 3 : index
    %c0_18 = arith.constant 0 : index
    %c0_19 = arith.constant 0 : index
    %30 = vector.load %arg3[%c3, %c0_18, %c0_19] : memref<7x8x32xbf16, #tpu.memory_space<vmem>>, vector<1x8x32xbf16>
    %31 = vector.shape_cast %30 : vector<1x8x32xbf16> to vector<8x32xbf16>
    %32 = arith.truncf %29 : vector<16x8xf32> to vector<16x8xbf16>
    %cst_20 = arith.constant dense<0.000000e+00> : vector<16x32xf32>
    %33 = tpu.matmul %32, %31, %cst_20 {dimension_numbers = #tpu.dot_dimension_numbers<[1], [0], [0], [1], [0, 0, 1, 1], [], []>} : vector<16x8xbf16>, vector<8x32xbf16>, vector<16x32xf32> -> vector<16x32xf32>
    %34 = arith.addf %28, %33 : vector<16x32xf32>
    %35 = vector.extract_strided_slice %8 {offsets = [4, 0], sizes = [16, 8], strides = [1, 1]} : vector<22x8xf32> to vector<16x8xf32>
    %c4 = arith.constant 4 : index
    %c0_21 = arith.constant 0 : index
    %c0_22 = arith.constant 0 : index
    %36 = vector.load %arg3[%c4, %c0_21, %c0_22] : memref<7x8x32xbf16, #tpu.memory_space<vmem>>, vector<1x8x32xbf16>
    %37 = vector.shape_cast %36 : vector<1x8x32xbf16> to vector<8x32xbf16>
    %38 = arith.truncf %35 : vector<16x8xf32> to vector<16x8xbf16>
    %cst_23 = arith.constant dense<0.000000e+00> : vector<16x32xf32>
    %39 = tpu.matmul %38, %37, %cst_23 {dimension_numbers = #tpu.dot_dimension_numbers<[1], [0], [0], [1], [0, 0, 1, 1], [], []>} : vector<16x8xbf16>, vector<8x32xbf16>, vector<16x32xf32> -> vector<16x32xf32>
    %40 = arith.addf %34, %39 : vector<16x32xf32>
    %41 = vector.extract_strided_slice %8 {offsets = [5, 0], sizes = [16, 8], strides = [1, 1]} : vector<22x8xf32> to vector<16x8xf32>
    %c5 = arith.constant 5 : index
    %c0_24 = arith.constant 0 : index
    %c0_25 = arith.constant 0 : index
    %42 = vector.load %arg3[%c5, %c0_24, %c0_25] : memref<7x8x32xbf16, #tpu.memory_space<vmem>>, vector<1x8x32xbf16>
    %43 = vector.shape_cast %42 : vector<1x8x32xbf16> to vector<8x32xbf16>
    %44 = arith.truncf %41 : vector<16x8xf32> to vector<16x8xbf16>
    %cst_26 = arith.constant dense<0.000000e+00> : vector<16x32xf32>
    %45 = tpu.matmul %44, %43, %cst_26 {dimension_numbers = #tpu.dot_dimension_numbers<[1], [0], [0], [1], [0, 0, 1, 1], [], []>} : vector<16x8xbf16>, vector<8x32xbf16>, vector<16x32xf32> -> vector<16x32xf32>
    %46 = arith.addf %40, %45 : vector<16x32xf32>
    %47 = vector.extract_strided_slice %8 {offsets = [6, 0], sizes = [16, 8], strides = [1, 1]} : vector<22x8xf32> to vector<16x8xf32>
    %c6 = arith.constant 6 : index
    %c0_27 = arith.constant 0 : index
    %c0_28 = arith.constant 0 : index
    %48 = vector.load %arg3[%c6, %c0_27, %c0_28] : memref<7x8x32xbf16, #tpu.memory_space<vmem>>, vector<1x8x32xbf16>
    %49 = vector.shape_cast %48 : vector<1x8x32xbf16> to vector<8x32xbf16>
    %50 = arith.truncf %47 : vector<16x8xf32> to vector<16x8xbf16>
    %cst_29 = arith.constant dense<0.000000e+00> : vector<16x32xf32>
    %51 = tpu.matmul %50, %49, %cst_29 {dimension_numbers = #tpu.dot_dimension_numbers<[1], [0], [0], [1], [0, 0, 1, 1], [], []>} : vector<16x8xbf16>, vector<8x32xbf16>, vector<16x32xf32> -> vector<16x32xf32>
    %52 = arith.addf %46, %51 : vector<16x32xf32>
    %c0_30 = arith.constant 0 : index
    %c0_31 = arith.constant 0 : index
    %c0_32 = arith.constant 0 : index
    %53 = vector.load %arg5[%c0_30, %c0_31, %c0_32] : memref<1x16x32xf32, #tpu.memory_space<vmem>>, vector<1x16x32xf32>
    %54 = vector.shape_cast %53 : vector<1x16x32xf32> to vector<16x32xf32>
    %55 = vector.shape_cast %52 : vector<16x32xf32> to vector<1x16x32xf32>
    tpu.vector_store %arg5[%c0_30, %c0_31, %c0_32], %55 {strides = array<i32>} : memref<1x16x32xf32, #tpu.memory_space<vmem>>, vector<1x16x32xf32>,
    return
  }
  func.func @transform_0(%arg0: i32) -> (i32, i32, i32) {
    %c0_i32 = arith.constant 0 : i32
    %c0_i32_0 = arith.constant 0 : i32
    %c0_i32_1 = arith.constant 0 : i32
    return %arg0, %c0_i32, %c0_i32_0 : i32, i32, i32
  }
  func.func @transform_1(%arg0: i32) -> (i32, i32, i32) {
    %c0_i32 = arith.constant 0 : i32
    %c0_i32_0 = arith.constant 0 : i32
    %c0_i32_1 = arith.constant 0 : i32
    return %arg0, %c0_i32, %c0_i32_0 : i32, i32, i32
  }
  func.func @transform_2(%arg0: i32) -> (i32, i32, i32) {
    %c0_i32 = arith.constant 0 : i32
    %c0_i32_0 = arith.constant 0 : i32
    %c0_i32_1 = arith.constant 0 : i32
    %c0_i32_2 = arith.constant 0 : i32
    return %c0_i32, %c0_i32_0, %c0_i32_1 : i32, i32, i32
  }
  func.func @transform_3(%arg0: i32) -> (i32, i32) {
    %c0_i32 = arith.constant 0 : i32
    %c0_i32_0 = arith.constant 0 : i32
    %c0_i32_1 = arith.constant 0 : i32
    return %c0_i32, %c0_i32_0 : i32, i32
  }
  func.func @transform_4(%arg0: i32) -> (i32, i32, i32) {
    %c0_i32 = arith.constant 0 : i32
    %c0_i32_0 = arith.constant 0 : i32
    %c0_i32_1 = arith.constant 0 : i32
    return %arg0, %c0_i32, %c0_i32_0 : i32, i32, i32
  }
}

module attributes {stable_mosaic.version = 11 : i64} {
  func.func @_upsample_kernel(%arg0: i32, %arg1: memref<1x16x32xf32, #tpu.memory_space<vmem>>, %arg2: memref<4x32x16xbf16, #tpu.memory_space<vmem>>, %arg3: memref<1x16xf32, #tpu.memory_space<vmem>>, %arg4: memref<1x16x32xf32, #tpu.memory_space<vmem>>) attributes {dimension_semantics = [#tpu.dimension_semantics<parallel>], iteration_bounds = array<i64: 2>, scalar_prefetch = 0 : i64, scratch_operands = 0 : i64, tpu.core_type = #tpu.core_type<tc>, window_params = [{transform_indices = @transform_0, window_bounds = array<i64: 1, 16, 32>}, {pipeline_mode = #tpu.pipeline_mode<synchronous>, transform_indices = @transform_1, window_bounds = array<i64: 4, 32, 16>}, {pipeline_mode = #tpu.pipeline_mode<synchronous>, transform_indices = @transform_2, window_bounds = array<i64: 1, 16>}, {transform_indices = @transform_3, window_bounds = array<i64: 1, 16, 32>}]} {
    %c0 = arith.constant 0 : index
    %c0_0 = arith.constant 0 : index
    %c0_1 = arith.constant 0 : index
    %0 = vector.load %arg1[%c0, %c0_0, %c0_1] : memref<1x16x32xf32, #tpu.memory_space<vmem>>, vector<1x16x32xf32>
    %1 = vector.shape_cast %0 : vector<1x16x32xf32> to vector<16x32xf32>
    %cst = arith.constant 1.000000e+00 : f32
    %2 = vector.broadcast %cst : f32 to vector<16x32xf32>
    %3 = arith.mulf %1, %2 : vector<16x32xf32>
    %cst_2 = arith.constant 0.000000e+00 : f32
    %4 = vector.broadcast %cst_2 : f32 to vector<16x32xf32>
    %5 = arith.cmpf oge, %3, %4 : vector<16x32xf32>
    %cst_3 = arith.constant 1.000000e-01 : f32
    %6 = vector.broadcast %cst_3 : f32 to vector<16x32xf32>
    %7 = arith.mulf %3, %6 : vector<16x32xf32>
    %8 = arith.select %5, %3, %7 : vector<16x32xi1>, vector<16x32xf32>
    %cst_4 = arith.constant 0.000000e+00 : f32
    %9 = vector.broadcast %cst_4 : f32 to vector<1x32xf32>
    %cst_5 = arith.constant 0.000000e+00 : f32
    %10 = vector.broadcast %cst_5 : f32 to vector<1x32xf32>
    %11 = tpu.concatenate %9, %8, %10 in 0 : vector<1x32xf32>, vector<16x32xf32>, vector<1x32xf32> -> vector<18x32xf32>
    %c0_6 = arith.constant 0 : index
    %c0_7 = arith.constant 0 : index
    %12 = vector.load %arg3[%c0_6, %c0_7] : memref<1x16xf32, #tpu.memory_space<vmem>>, vector<1x16xf32>
    %13 = vector.extract_strided_slice %11 {offsets = [1, 0], sizes = [16, 32], strides = [1, 1]} : vector<18x32xf32> to vector<16x32xf32>
    %c1 = arith.constant 1 : index
    %c0_8 = arith.constant 0 : index
    %c0_9 = arith.constant 0 : index
    %14 = vector.load %arg2[%c1, %c0_8, %c0_9] : memref<4x32x16xbf16, #tpu.memory_space<vmem>>, vector<1x32x16xbf16>
    %15 = vector.shape_cast %14 : vector<1x32x16xbf16> to vector<32x16xbf16>
    %16 = arith.truncf %13 : vector<16x32xf32> to vector<16x32xbf16>
    %cst_10 = arith.constant dense<0.000000e+00> : vector<16x16xf32>
    %17 = tpu.matmul %16, %15, %cst_10 {dimension_numbers = #tpu.dot_dimension_numbers<[1], [0], [0], [1], [0, 0, 1, 1], [], []>} : vector<16x32xbf16>, vector<32x16xbf16>, vector<16x16xf32> -> vector<16x16xf32>
    %18 = vector.broadcast %12 : vector<1x16xf32> to vector<16x16xf32>
    %19 = arith.addf %18, %17 : vector<16x16xf32>
    %20 = vector.extract_strided_slice %11 {offsets = [0, 0], sizes = [16, 32], strides = [1, 1]} : vector<18x32xf32> to vector<16x32xf32>
    %c3 = arith.constant 3 : index
    %c0_11 = arith.constant 0 : index
    %c0_12 = arith.constant 0 : index
    %21 = vector.load %arg2[%c3, %c0_11, %c0_12] : memref<4x32x16xbf16, #tpu.memory_space<vmem>>, vector<1x32x16xbf16>
    %22 = vector.shape_cast %21 : vector<1x32x16xbf16> to vector<32x16xbf16>
    %23 = arith.truncf %20 : vector<16x32xf32> to vector<16x32xbf16>
    %cst_13 = arith.constant dense<0.000000e+00> : vector<16x16xf32>
    %24 = tpu.matmul %23, %22, %cst_13 {dimension_numbers = #tpu.dot_dimension_numbers<[1], [0], [0], [1], [0, 0, 1, 1], [], []>} : vector<16x32xbf16>, vector<32x16xbf16>, vector<16x16xf32> -> vector<16x16xf32>
    %25 = arith.addf %19, %24 : vector<16x16xf32>
    %c0_14 = arith.constant 0 : index
    %c0_15 = arith.constant 0 : index
    %26 = vector.load %arg3[%c0_14, %c0_15] : memref<1x16xf32, #tpu.memory_space<vmem>>, vector<1x16xf32>
    %27 = vector.extract_strided_slice %11 {offsets = [2, 0], sizes = [16, 32], strides = [1, 1]} : vector<18x32xf32> to vector<16x32xf32>
    %c0_16 = arith.constant 0 : index
    %c0_17 = arith.constant 0 : index
    %c0_18 = arith.constant 0 : index
    %28 = vector.load %arg2[%c0_16, %c0_17, %c0_18] : memref<4x32x16xbf16, #tpu.memory_space<vmem>>, vector<1x32x16xbf16>
    %29 = vector.shape_cast %28 : vector<1x32x16xbf16> to vector<32x16xbf16>
    %30 = arith.truncf %27 : vector<16x32xf32> to vector<16x32xbf16>
    %cst_19 = arith.constant dense<0.000000e+00> : vector<16x16xf32>
    %31 = tpu.matmul %30, %29, %cst_19 {dimension_numbers = #tpu.dot_dimension_numbers<[1], [0], [0], [1], [0, 0, 1, 1], [], []>} : vector<16x32xbf16>, vector<32x16xbf16>, vector<16x16xf32> -> vector<16x16xf32>
    %32 = vector.broadcast %26 : vector<1x16xf32> to vector<16x16xf32>
    %33 = arith.addf %32, %31 : vector<16x16xf32>
    %34 = vector.extract_strided_slice %11 {offsets = [1, 0], sizes = [16, 32], strides = [1, 1]} : vector<18x32xf32> to vector<16x32xf32>
    %c2 = arith.constant 2 : index
    %c0_20 = arith.constant 0 : index
    %c0_21 = arith.constant 0 : index
    %35 = vector.load %arg2[%c2, %c0_20, %c0_21] : memref<4x32x16xbf16, #tpu.memory_space<vmem>>, vector<1x32x16xbf16>
    %36 = vector.shape_cast %35 : vector<1x32x16xbf16> to vector<32x16xbf16>
    %37 = arith.truncf %34 : vector<16x32xf32> to vector<16x32xbf16>
    %cst_22 = arith.constant dense<0.000000e+00> : vector<16x16xf32>
    %38 = tpu.matmul %37, %36, %cst_22 {dimension_numbers = #tpu.dot_dimension_numbers<[1], [0], [0], [1], [0, 0, 1, 1], [], []>} : vector<16x32xbf16>, vector<32x16xbf16>, vector<16x16xf32> -> vector<16x16xf32>
    %39 = arith.addf %33, %38 : vector<16x16xf32>
    %40 = tpu.concatenate %25, %39 in 1 : vector<16x16xf32>, vector<16x16xf32> -> vector<16x32xf32>
    %c0_23 = arith.constant 0 : index
    %c0_24 = arith.constant 0 : index
    %c0_25 = arith.constant 0 : index
    %41 = vector.load %arg4[%c0_23, %c0_24, %c0_25] : memref<1x16x32xf32, #tpu.memory_space<vmem>>, vector<1x16x32xf32>
    %42 = vector.shape_cast %41 : vector<1x16x32xf32> to vector<16x32xf32>
    %43 = vector.shape_cast %40 : vector<16x32xf32> to vector<1x16x32xf32>
    tpu.vector_store %arg4[%c0_23, %c0_24, %c0_25], %43 {strides = array<i32>} : memref<1x16x32xf32, #tpu.memory_space<vmem>>, vector<1x16x32xf32>,
    return
  }
  func.func @transform_0(%arg0: i32) -> (i32, i32, i32) {
    %c0_i32 = arith.constant 0 : i32
    %c0_i32_0 = arith.constant 0 : i32
    %c0_i32_1 = arith.constant 0 : i32
    return %arg0, %c0_i32, %c0_i32_0 : i32, i32, i32
  }
  func.func @transform_1(%arg0: i32) -> (i32, i32, i32) {
    %c0_i32 = arith.constant 0 : i32
    %c0_i32_0 = arith.constant 0 : i32
    %c0_i32_1 = arith.constant 0 : i32
    %c0_i32_2 = arith.constant 0 : i32
    return %c0_i32, %c0_i32_0, %c0_i32_1 : i32, i32, i32
  }
  func.func @transform_2(%arg0: i32) -> (i32, i32) {
    %c0_i32 = arith.constant 0 : i32
    %c0_i32_0 = arith.constant 0 : i32
    %c0_i32_1 = arith.constant 0 : i32
    return %c0_i32, %c0_i32_0 : i32, i32
  }
  func.func @transform_3(%arg0: i32) -> (i32, i32, i32) {
    %c0_i32 = arith.constant 0 : i32
    %c0_i32_0 = arith.constant 0 : i32
    %c0_i32_1 = arith.constant 0 : i32
    return %arg0, %c0_i32, %c0_i32_0 : i32, i32, i32
  }
}

module attributes {stable_mosaic.version = 11 : i64} {
  func.func @_resblock1_kernel(%arg0: i32, %arg1: memref<1x32x16xf32, #tpu.memory_space<vmem>>, %arg2: memref<10x16x16xbf16, #tpu.memory_space<vmem>>, %arg3: memref<2x16xf32, #tpu.memory_space<vmem>>, %arg4: memref<10x16x16xbf16, #tpu.memory_space<vmem>>, %arg5: memref<2x16xf32, #tpu.memory_space<vmem>>, %arg6: memref<1x32x16xf32, #tpu.memory_space<vmem>>) attributes {dimension_semantics = [#tpu.dimension_semantics<parallel>], iteration_bounds = array<i64: 2>, scalar_prefetch = 0 : i64, scratch_operands = 0 : i64, tpu.core_type = #tpu.core_type<tc>, window_params = [{transform_indices = @transform_0, window_bounds = array<i64: 1, 32, 16>}, {pipeline_mode = #tpu.pipeline_mode<synchronous>, transform_indices = @transform_1, window_bounds = array<i64: 10, 16, 16>}, {pipeline_mode = #tpu.pipeline_mode<synchronous>, transform_indices = @transform_2, window_bounds = array<i64: 2, 16>}, {pipeline_mode = #tpu.pipeline_mode<synchronous>, transform_indices = @transform_3, window_bounds = array<i64: 10, 16, 16>}, {pipeline_mode = #tpu.pipeline_mode<synchronous>, transform_indices = @transform_4, window_bounds = array<i64: 2, 16>}, {transform_indices = @transform_5, window_bounds = array<i64: 1, 32, 16>}]} {
    %c0 = arith.constant 0 : index
    %c0_0 = arith.constant 0 : index
    %c0_1 = arith.constant 0 : index
    %0 = vector.load %arg1[%c0, %c0_0, %c0_1] : memref<1x32x16xf32, #tpu.memory_space<vmem>>, vector<1x32x16xf32>
    %1 = vector.shape_cast %0 : vector<1x32x16xf32> to vector<32x16xf32>
    %c0_2 = arith.constant 0 : index
    %c0_3 = arith.constant 0 : index
    %2 = vector.load %arg3[%c0_2, %c0_3] : memref<2x16xf32, #tpu.memory_space<vmem>>, vector<2x16xf32>
    %c0_4 = arith.constant 0 : index
    %c0_5 = arith.constant 0 : index
    %3 = vector.load %arg5[%c0_4, %c0_5] : memref<2x16xf32, #tpu.memory_space<vmem>>, vector<2x16xf32>
    %cst = arith.constant 0.000000e+00 : f32
    %4 = vector.broadcast %cst : f32 to vector<32x16xf32>
    %5 = arith.cmpf oge, %1, %4 : vector<32x16xf32>
    %cst_6 = arith.constant 1.000000e-01 : f32
    %6 = vector.broadcast %cst_6 : f32 to vector<32x16xf32>
    %7 = arith.mulf %1, %6 : vector<32x16xf32>
    %8 = arith.select %5, %1, %7 : vector<32x16xi1>, vector<32x16xf32>
    %9 = vector.extract_strided_slice %2 {offsets = [0, 0], sizes = [1, 16], strides = [1, 1]} : vector<2x16xf32> to vector<1x16xf32>
    %cst_7 = arith.constant 0.000000e+00 : f32
    %10 = vector.broadcast %cst_7 : f32 to vector<2x16xf32>
    %cst_8 = arith.constant 0.000000e+00 : f32
    %11 = vector.broadcast %cst_8 : f32 to vector<2x16xf32>
    %12 = tpu.concatenate %10, %8, %11 in 0 : vector<2x16xf32>, vector<32x16xf32>, vector<2x16xf32> -> vector<36x16xf32>
    %13 = vector.extract_strided_slice %12 {offsets = [0, 0], sizes = [32, 16], strides = [1, 1]} : vector<36x16xf32> to vector<32x16xf32>
    %c0_9 = arith.constant 0 : index
    %c0_10 = arith.constant 0 : index
    %c0_11 = arith.constant 0 : index
    %14 = vector.load %arg2[%c0_9, %c0_10, %c0_11] : memref<10x16x16xbf16, #tpu.memory_space<vmem>>, vector<1x16x16xbf16>
    %15 = vector.shape_cast %14 : vector<1x16x16xbf16> to vector<16x16xbf16>
    %16 = arith.truncf %13 : vector<32x16xf32> to vector<32x16xbf16>
    %cst_12 = arith.constant dense<0.000000e+00> : vector<32x16xf32>
    %17 = tpu.matmul %16, %15, %cst_12 {dimension_numbers = #tpu.dot_dimension_numbers<[1], [0], [0], [1], [0, 0, 1, 1], [], []>} : vector<32x16xbf16>, vector<16x16xbf16>, vector<32x16xf32> -> vector<32x16xf32>
    %18 = vector.broadcast %9 : vector<1x16xf32> to vector<32x16xf32>
    %19 = arith.addf %18, %17 : vector<32x16xf32>
    %20 = vector.extract_strided_slice %12 {offsets = [1, 0], sizes = [32, 16], strides = [1, 1]} : vector<36x16xf32> to vector<32x16xf32>
    %c1 = arith.constant 1 : index
    %c0_13 = arith.constant 0 : index
    %c0_14 = arith.constant 0 : index
    %21 = vector.load %arg2[%c1, %c0_13, %c0_14] : memref<10x16x16xbf16, #tpu.memory_space<vmem>>, vector<1x16x16xbf16>
    %22 = vector.shape_cast %21 : vector<1x16x16xbf16> to vector<16x16xbf16>
    %23 = arith.truncf %20 : vector<32x16xf32> to vector<32x16xbf16>
    %cst_15 = arith.constant dense<0.000000e+00> : vector<32x16xf32>
    %24 = tpu.matmul %23, %22, %cst_15 {dimension_numbers = #tpu.dot_dimension_numbers<[1], [0], [0], [1], [0, 0, 1, 1], [], []>} : vector<32x16xbf16>, vector<16x16xbf16>, vector<32x16xf32> -> vector<32x16xf32>
    %25 = arith.addf %19, %24 : vector<32x16xf32>
    %26 = vector.extract_strided_slice %12 {offsets = [2, 0], sizes = [32, 16], strides = [1, 1]} : vector<36x16xf32> to vector<32x16xf32>
    %c2 = arith.constant 2 : index
    %c0_16 = arith.constant 0 : index
    %c0_17 = arith.constant 0 : index
    %27 = vector.load %arg2[%c2, %c0_16, %c0_17] : memref<10x16x16xbf16, #tpu.memory_space<vmem>>, vector<1x16x16xbf16>
    %28 = vector.shape_cast %27 : vector<1x16x16xbf16> to vector<16x16xbf16>
    %29 = arith.truncf %26 : vector<32x16xf32> to vector<32x16xbf16>
    %cst_18 = arith.constant dense<0.000000e+00> : vector<32x16xf32>
    %30 = tpu.matmul %29, %28, %cst_18 {dimension_numbers = #tpu.dot_dimension_numbers<[1], [0], [0], [1], [0, 0, 1, 1], [], []>} : vector<32x16xbf16>, vector<16x16xbf16>, vector<32x16xf32> -> vector<32x16xf32>
    %31 = arith.addf %25, %30 : vector<32x16xf32>
    %32 = vector.extract_strided_slice %12 {offsets = [3, 0], sizes = [32, 16], strides = [1, 1]} : vector<36x16xf32> to vector<32x16xf32>
    %c3 = arith.constant 3 : index
    %c0_19 = arith.constant 0 : index
    %c0_20 = arith.constant 0 : index
    %33 = vector.load %arg2[%c3, %c0_19, %c0_20] : memref<10x16x16xbf16, #tpu.memory_space<vmem>>, vector<1x16x16xbf16>
    %34 = vector.shape_cast %33 : vector<1x16x16xbf16> to vector<16x16xbf16>
    %35 = arith.truncf %32 : vector<32x16xf32> to vector<32x16xbf16>
    %cst_21 = arith.constant dense<0.000000e+00> : vector<32x16xf32>
    %36 = tpu.matmul %35, %34, %cst_21 {dimension_numbers = #tpu.dot_dimension_numbers<[1], [0], [0], [1], [0, 0, 1, 1], [], []>} : vector<32x16xbf16>, vector<16x16xbf16>, vector<32x16xf32> -> vector<32x16xf32>
    %37 = arith.addf %31, %36 : vector<32x16xf32>
    %38 = vector.extract_strided_slice %12 {offsets = [4, 0], sizes = [32, 16], strides = [1, 1]} : vector<36x16xf32> to vector<32x16xf32>
    %c4 = arith.constant 4 : index
    %c0_22 = arith.constant 0 : index
    %c0_23 = arith.constant 0 : index
    %39 = vector.load %arg2[%c4, %c0_22, %c0_23] : memref<10x16x16xbf16, #tpu.memory_space<vmem>>, vector<1x16x16xbf16>
    %40 = vector.shape_cast %39 : vector<1x16x16xbf16> to vector<16x16xbf16>
    %41 = arith.truncf %38 : vector<32x16xf32> to vector<32x16xbf16>
    %cst_24 = arith.constant dense<0.000000e+00> : vector<32x16xf32>
    %42 = tpu.matmul %41, %40, %cst_24 {dimension_numbers = #tpu.dot_dimension_numbers<[1], [0], [0], [1], [0, 0, 1, 1], [], []>} : vector<32x16xbf16>, vector<16x16xbf16>, vector<32x16xf32> -> vector<32x16xf32>
    %43 = arith.addf %37, %42 : vector<32x16xf32>
    %cst_25 = arith.constant 0.000000e+00 : f32
    %44 = vector.broadcast %cst_25 : f32 to vector<32x16xf32>
    %45 = arith.cmpf oge, %43, %44 : vector<32x16xf32>
    %cst_26 = arith.constant 1.000000e-01 : f32
    %46 = vector.broadcast %cst_26 : f32 to vector<32x16xf32>
    %47 = arith.mulf %43, %46 : vector<32x16xf32>
    %48 = arith.select %45, %43, %47 : vector<32x16xi1>, vector<32x16xf32>
    %49 = vector.extract_strided_slice %3 {offsets = [0, 0], sizes = [1, 16], strides = [1, 1]} : vector<2x16xf32> to vector<1x16xf32>
    %cst_27 = arith.constant 0.000000e+00 : f32
    %50 = vector.broadcast %cst_27 : f32 to vector<2x16xf32>
    %cst_28 = arith.constant 0.000000e+00 : f32
    %51 = vector.broadcast %cst_28 : f32 to vector<2x16xf32>
    %52 = tpu.concatenate %50, %48, %51 in 0 : vector<2x16xf32>, vector<32x16xf32>, vector<2x16xf32> -> vector<36x16xf32>
    %53 = vector.extract_strided_slice %52 {offsets = [0, 0], sizes = [32, 16], strides = [1, 1]} : vector<36x16xf32> to vector<32x16xf32>
    %c0_29 = arith.constant 0 : index
    %c0_30 = arith.constant 0 : index
    %c0_31 = arith.constant 0 : index
    %54 = vector.load %arg4[%c0_29, %c0_30, %c0_31] : memref<10x16x16xbf16, #tpu.memory_space<vmem>>, vector<1x16x16xbf16>
    %55 = vector.shape_cast %54 : vector<1x16x16xbf16> to vector<16x16xbf16>
    %56 = arith.truncf %53 : vector<32x16xf32> to vector<32x16xbf16>
    %cst_32 = arith.constant dense<0.000000e+00> : vector<32x16xf32>
    %57 = tpu.matmul %56, %55, %cst_32 {dimension_numbers = #tpu.dot_dimension_numbers<[1], [0], [0], [1], [0, 0, 1, 1], [], []>} : vector<32x16xbf16>, vector<16x16xbf16>, vector<32x16xf32> -> vector<32x16xf32>
    %58 = vector.broadcast %49 : vector<1x16xf32> to vector<32x16xf32>
    %59 = arith.addf %58, %57 : vector<32x16xf32>
    %60 = vector.extract_strided_slice %52 {offsets = [1, 0], sizes = [32, 16], strides = [1, 1]} : vector<36x16xf32> to vector<32x16xf32>
    %c1_33 = arith.constant 1 : index
    %c0_34 = arith.constant 0 : index
    %c0_35 = arith.constant 0 : index
    %61 = vector.load %arg4[%c1_33, %c0_34, %c0_35] : memref<10x16x16xbf16, #tpu.memory_space<vmem>>, vector<1x16x16xbf16>
    %62 = vector.shape_cast %61 : vector<1x16x16xbf16> to vector<16x16xbf16>
    %63 = arith.truncf %60 : vector<32x16xf32> to vector<32x16xbf16>
    %cst_36 = arith.constant dense<0.000000e+00> : vector<32x16xf32>
    %64 = tpu.matmul %63, %62, %cst_36 {dimension_numbers = #tpu.dot_dimension_numbers<[1], [0], [0], [1], [0, 0, 1, 1], [], []>} : vector<32x16xbf16>, vector<16x16xbf16>, vector<32x16xf32> -> vector<32x16xf32>
    %65 = arith.addf %59, %64 : vector<32x16xf32>
    %66 = vector.extract_strided_slice %52 {offsets = [2, 0], sizes = [32, 16], strides = [1, 1]} : vector<36x16xf32> to vector<32x16xf32>
    %c2_37 = arith.constant 2 : index
    %c0_38 = arith.constant 0 : index
    %c0_39 = arith.constant 0 : index
    %67 = vector.load %arg4[%c2_37, %c0_38, %c0_39] : memref<10x16x16xbf16, #tpu.memory_space<vmem>>, vector<1x16x16xbf16>
    %68 = vector.shape_cast %67 : vector<1x16x16xbf16> to vector<16x16xbf16>
    %69 = arith.truncf %66 : vector<32x16xf32> to vector<32x16xbf16>
    %cst_40 = arith.constant dense<0.000000e+00> : vector<32x16xf32>
    %70 = tpu.matmul %69, %68, %cst_40 {dimension_numbers = #tpu.dot_dimension_numbers<[1], [0], [0], [1], [0, 0, 1, 1], [], []>} : vector<32x16xbf16>, vector<16x16xbf16>, vector<32x16xf32> -> vector<32x16xf32>
    %71 = arith.addf %65, %70 : vector<32x16xf32>
    %72 = vector.extract_strided_slice %52 {offsets = [3, 0], sizes = [32, 16], strides = [1, 1]} : vector<36x16xf32> to vector<32x16xf32>
    %c3_41 = arith.constant 3 : index
    %c0_42 = arith.constant 0 : index
    %c0_43 = arith.constant 0 : index
    %73 = vector.load %arg4[%c3_41, %c0_42, %c0_43] : memref<10x16x16xbf16, #tpu.memory_space<vmem>>, vector<1x16x16xbf16>
    %74 = vector.shape_cast %73 : vector<1x16x16xbf16> to vector<16x16xbf16>
    %75 = arith.truncf %72 : vector<32x16xf32> to vector<32x16xbf16>
    %cst_44 = arith.constant dense<0.000000e+00> : vector<32x16xf32>
    %76 = tpu.matmul %75, %74, %cst_44 {dimension_numbers = #tpu.dot_dimension_numbers<[1], [0], [0], [1], [0, 0, 1, 1], [], []>} : vector<32x16xbf16>, vector<16x16xbf16>, vector<32x16xf32> -> vector<32x16xf32>
    %77 = arith.addf %71, %76 : vector<32x16xf32>
    %78 = vector.extract_strided_slice %52 {offsets = [4, 0], sizes = [32, 16], strides = [1, 1]} : vector<36x16xf32> to vector<32x16xf32>
    %c4_45 = arith.constant 4 : index
    %c0_46 = arith.constant 0 : index
    %c0_47 = arith.constant 0 : index
    %79 = vector.load %arg4[%c4_45, %c0_46, %c0_47] : memref<10x16x16xbf16, #tpu.memory_space<vmem>>, vector<1x16x16xbf16>
    %80 = vector.shape_cast %79 : vector<1x16x16xbf16> to vector<16x16xbf16>
    %81 = arith.truncf %78 : vector<32x16xf32> to vector<32x16xbf16>
    %cst_48 = arith.constant dense<0.000000e+00> : vector<32x16xf32>
    %82 = tpu.matmul %81, %80, %cst_48 {dimension_numbers = #tpu.dot_dimension_numbers<[1], [0], [0], [1], [0, 0, 1, 1], [], []>} : vector<32x16xbf16>, vector<16x16xbf16>, vector<32x16xf32> -> vector<32x16xf32>
    %83 = arith.addf %77, %82 : vector<32x16xf32>
    %84 = arith.addf %83, %1 : vector<32x16xf32>
    %cst_49 = arith.constant 0.000000e+00 : f32
    %85 = vector.broadcast %cst_49 : f32 to vector<32x16xf32>
    %86 = arith.cmpf oge, %84, %85 : vector<32x16xf32>
    %cst_50 = arith.constant 1.000000e-01 : f32
    %87 = vector.broadcast %cst_50 : f32 to vector<32x16xf32>
    %88 = arith.mulf %84, %87 : vector<32x16xf32>
    %89 = arith.select %86, %84, %88 : vector<32x16xi1>, vector<32x16xf32>
    %90 = vector.extract_strided_slice %2 {offsets = [1, 0], sizes = [1, 16], strides = [1, 1]} : vector<2x16xf32> to vector<1x16xf32>
    %cst_51 = arith.constant 0.000000e+00 : f32
    %91 = vector.broadcast %cst_51 : f32 to vector<6x16xf32>
    %cst_52 = arith.constant 0.000000e+00 : f32
    %92 = vector.broadcast %cst_52 : f32 to vector<6x16xf32>
    %93 = tpu.concatenate %91, %89, %92 in 0 : vector<6x16xf32>, vector<32x16xf32>, vector<6x16xf32> -> vector<44x16xf32>
    %94 = vector.extract_strided_slice %93 {offsets = [0, 0], sizes = [32, 16], strides = [1, 1]} : vector<44x16xf32> to vector<32x16xf32>
    %c5 = arith.constant 5 : index
    %c0_53 = arith.constant 0 : index
    %c0_54 = arith.constant 0 : index
    %95 = vector.load %arg2[%c5, %c0_53, %c0_54] : memref<10x16x16xbf16, #tpu.memory_space<vmem>>, vector<1x16x16xbf16>
    %96 = vector.shape_cast %95 : vector<1x16x16xbf16> to vector<16x16xbf16>
    %97 = arith.truncf %94 : vector<32x16xf32> to vector<32x16xbf16>
    %cst_55 = arith.constant dense<0.000000e+00> : vector<32x16xf32>
    %98 = tpu.matmul %97, %96, %cst_55 {dimension_numbers = #tpu.dot_dimension_numbers<[1], [0], [0], [1], [0, 0, 1, 1], [], []>} : vector<32x16xbf16>, vector<16x16xbf16>, vector<32x16xf32> -> vector<32x16xf32>
    %99 = vector.broadcast %90 : vector<1x16xf32> to vector<32x16xf32>
    %100 = arith.addf %99, %98 : vector<32x16xf32>
    %101 = vector.extract_strided_slice %93 {offsets = [3, 0], sizes = [32, 16], strides = [1, 1]} : vector<44x16xf32> to vector<32x16xf32>
    %c6 = arith.constant 6 : index
    %c0_56 = arith.constant 0 : index
    %c0_57 = arith.constant 0 : index
    %102 = vector.load %arg2[%c6, %c0_56, %c0_57] : memref<10x16x16xbf16, #tpu.memory_space<vmem>>, vector<1x16x16xbf16>
    %103 = vector.shape_cast %102 : vector<1x16x16xbf16> to vector<16x16xbf16>
    %104 = arith.truncf %101 : vector<32x16xf32> to vector<32x16xbf16>
    %cst_58 = arith.constant dense<0.000000e+00> : vector<32x16xf32>
    %105 = tpu.matmul %104, %103, %cst_58 {dimension_numbers = #tpu.dot_dimension_numbers<[1], [0], [0], [1], [0, 0, 1, 1], [], []>} : vector<32x16xbf16>, vector<16x16xbf16>, vector<32x16xf32> -> vector<32x16xf32>
    %106 = arith.addf %100, %105 : vector<32x16xf32>
    %107 = vector.extract_strided_slice %93 {offsets = [6, 0], sizes = [32, 16], strides = [1, 1]} : vector<44x16xf32> to vector<32x16xf32>
    %c7 = arith.constant 7 : index
    %c0_59 = arith.constant 0 : index
    %c0_60 = arith.constant 0 : index
    %108 = vector.load %arg2[%c7, %c0_59, %c0_60] : memref<10x16x16xbf16, #tpu.memory_space<vmem>>, vector<1x16x16xbf16>
    %109 = vector.shape_cast %108 : vector<1x16x16xbf16> to vector<16x16xbf16>
    %110 = arith.truncf %107 : vector<32x16xf32> to vector<32x16xbf16>
    %cst_61 = arith.constant dense<0.000000e+00> : vector<32x16xf32>
    %111 = tpu.matmul %110, %109, %cst_61 {dimension_numbers = #tpu.dot_dimension_numbers<[1], [0], [0], [1], [0, 0, 1, 1], [], []>} : vector<32x16xbf16>, vector<16x16xbf16>, vector<32x16xf32> -> vector<32x16xf32>
    %112 = arith.addf %106, %111 : vector<32x16xf32>
    %113 = vector.extract_strided_slice %93 {offsets = [9, 0], sizes = [32, 16], strides = [1, 1]} : vector<44x16xf32> to vector<32x16xf32>
    %c8 = arith.constant 8 : index
    %c0_62 = arith.constant 0 : index
    %c0_63 = arith.constant 0 : index
    %114 = vector.load %arg2[%c8, %c0_62, %c0_63] : memref<10x16x16xbf16, #tpu.memory_space<vmem>>, vector<1x16x16xbf16>
    %115 = vector.shape_cast %114 : vector<1x16x16xbf16> to vector<16x16xbf16>
    %116 = arith.truncf %113 : vector<32x16xf32> to vector<32x16xbf16>
    %cst_64 = arith.constant dense<0.000000e+00> : vector<32x16xf32>
    %117 = tpu.matmul %116, %115, %cst_64 {dimension_numbers = #tpu.dot_dimension_numbers<[1], [0], [0], [1], [0, 0, 1, 1], [], []>} : vector<32x16xbf16>, vector<16x16xbf16>, vector<32x16xf32> -> vector<32x16xf32>
    %118 = arith.addf %112, %117 : vector<32x16xf32>
    %119 = vector.extract_strided_slice %93 {offsets = [12, 0], sizes = [32, 16], strides = [1, 1]} : vector<44x16xf32> to vector<32x16xf32>
    %c9 = arith.constant 9 : index
    %c0_65 = arith.constant 0 : index
    %c0_66 = arith.constant 0 : index
    %120 = vector.load %arg2[%c9, %c0_65, %c0_66] : memref<10x16x16xbf16, #tpu.memory_space<vmem>>, vector<1x16x16xbf16>
    %121 = vector.shape_cast %120 : vector<1x16x16xbf16> to vector<16x16xbf16>
    %122 = arith.truncf %119 : vector<32x16xf32> to vector<32x16xbf16>
    %cst_67 = arith.constant dense<0.000000e+00> : vector<32x16xf32>
    %123 = tpu.matmul %122, %121, %cst_67 {dimension_numbers = #tpu.dot_dimension_numbers<[1], [0], [0], [1], [0, 0, 1, 1], [], []>} : vector<32x16xbf16>, vector<16x16xbf16>, vector<32x16xf32> -> vector<32x16xf32>
    %124 = arith.addf %118, %123 : vector<32x16xf32>
    %cst_68 = arith.constant 0.000000e+00 : f32
    %125 = vector.broadcast %cst_68 : f32 to vector<32x16xf32>
    %126 = arith.cmpf oge, %124, %125 : vector<32x16xf32>
    %cst_69 = arith.constant 1.000000e-01 : f32
    %127 = vector.broadcast %cst_69 : f32 to vector<32x16xf32>
    %128 = arith.mulf %124, %127 : vector<32x16xf32>
    %129 = arith.select %126, %124, %128 : vector<32x16xi1>, vector<32x16xf32>
    %130 = vector.extract_strided_slice %3 {offsets = [1, 0], sizes = [1, 16], strides = [1, 1]} : vector<2x16xf32> to vector<1x16xf32>
    %cst_70 = arith.constant 0.000000e+00 : f32
    %131 = vector.broadcast %cst_70 : f32 to vector<2x16xf32>
    %cst_71 = arith.constant 0.000000e+00 : f32
    %132 = vector.broadcast %cst_71 : f32 to vector<2x16xf32>
    %133 = tpu.concatenate %131, %129, %132 in 0 : vector<2x16xf32>, vector<32x16xf32>, vector<2x16xf32> -> vector<36x16xf32>
    %134 = vector.extract_strided_slice %133 {offsets = [0, 0], sizes = [32, 16], strides = [1, 1]} : vector<36x16xf32> to vector<32x16xf32>
    %c5_72 = arith.constant 5 : index
    %c0_73 = arith.constant 0 : index
    %c0_74 = arith.constant 0 : index
    %135 = vector.load %arg4[%c5_72, %c0_73, %c0_74] : memref<10x16x16xbf16, #tpu.memory_space<vmem>>, vector<1x16x16xbf16>
    %136 = vector.shape_cast %135 : vector<1x16x16xbf16> to vector<16x16xbf16>
    %137 = arith.truncf %134 : vector<32x16xf32> to vector<32x16xbf16>
    %cst_75 = arith.constant dense<0.000000e+00> : vector<32x16xf32>
    %138 = tpu.matmul %137, %136, %cst_75 {dimension_numbers = #tpu.dot_dimension_numbers<[1], [0], [0], [1], [0, 0, 1, 1], [], []>} : vector<32x16xbf16>, vector<16x16xbf16>, vector<32x16xf32> -> vector<32x16xf32>
    %139 = vector.broadcast %130 : vector<1x16xf32> to vector<32x16xf32>
    %140 = arith.addf %139, %138 : vector<32x16xf32>
    %141 = vector.extract_strided_slice %133 {offsets = [1, 0], sizes = [32, 16], strides = [1, 1]} : vector<36x16xf32> to vector<32x16xf32>
    %c6_76 = arith.constant 6 : index
    %c0_77 = arith.constant 0 : index
    %c0_78 = arith.constant 0 : index
    %142 = vector.load %arg4[%c6_76, %c0_77, %c0_78] : memref<10x16x16xbf16, #tpu.memory_space<vmem>>, vector<1x16x16xbf16>
    %143 = vector.shape_cast %142 : vector<1x16x16xbf16> to vector<16x16xbf16>
    %144 = arith.truncf %141 : vector<32x16xf32> to vector<32x16xbf16>
    %cst_79 = arith.constant dense<0.000000e+00> : vector<32x16xf32>
    %145 = tpu.matmul %144, %143, %cst_79 {dimension_numbers = #tpu.dot_dimension_numbers<[1], [0], [0], [1], [0, 0, 1, 1], [], []>} : vector<32x16xbf16>, vector<16x16xbf16>, vector<32x16xf32> -> vector<32x16xf32>
    %146 = arith.addf %140, %145 : vector<32x16xf32>
    %147 = vector.extract_strided_slice %133 {offsets = [2, 0], sizes = [32, 16], strides = [1, 1]} : vector<36x16xf32> to vector<32x16xf32>
    %c7_80 = arith.constant 7 : index
    %c0_81 = arith.constant 0 : index
    %c0_82 = arith.constant 0 : index
    %148 = vector.load %arg4[%c7_80, %c0_81, %c0_82] : memref<10x16x16xbf16, #tpu.memory_space<vmem>>, vector<1x16x16xbf16>
    %149 = vector.shape_cast %148 : vector<1x16x16xbf16> to vector<16x16xbf16>
    %150 = arith.truncf %147 : vector<32x16xf32> to vector<32x16xbf16>
    %cst_83 = arith.constant dense<0.000000e+00> : vector<32x16xf32>
    %151 = tpu.matmul %150, %149, %cst_83 {dimension_numbers = #tpu.dot_dimension_numbers<[1], [0], [0], [1], [0, 0, 1, 1], [], []>} : vector<32x16xbf16>, vector<16x16xbf16>, vector<32x16xf32> -> vector<32x16xf32>
    %152 = arith.addf %146, %151 : vector<32x16xf32>
    %153 = vector.extract_strided_slice %133 {offsets = [3, 0], sizes = [32, 16], strides = [1, 1]} : vector<36x16xf32> to vector<32x16xf32>
    %c8_84 = arith.constant 8 : index
    %c0_85 = arith.constant 0 : index
    %c0_86 = arith.constant 0 : index
    %154 = vector.load %arg4[%c8_84, %c0_85, %c0_86] : memref<10x16x16xbf16, #tpu.memory_space<vmem>>, vector<1x16x16xbf16>
    %155 = vector.shape_cast %154 : vector<1x16x16xbf16> to vector<16x16xbf16>
    %156 = arith.truncf %153 : vector<32x16xf32> to vector<32x16xbf16>
    %cst_87 = arith.constant dense<0.000000e+00> : vector<32x16xf32>
    %157 = tpu.matmul %156, %155, %cst_87 {dimension_numbers = #tpu.dot_dimension_numbers<[1], [0], [0], [1], [0, 0, 1, 1], [], []>} : vector<32x16xbf16>, vector<16x16xbf16>, vector<32x16xf32> -> vector<32x16xf32>
    %158 = arith.addf %152, %157 : vector<32x16xf32>
    %159 = vector.extract_strided_slice %133 {offsets = [4, 0], sizes = [32, 16], strides = [1, 1]} : vector<36x16xf32> to vector<32x16xf32>
    %c9_88 = arith.constant 9 : index
    %c0_89 = arith.constant 0 : index
    %c0_90 = arith.constant 0 : index
    %160 = vector.load %arg4[%c9_88, %c0_89, %c0_90] : memref<10x16x16xbf16, #tpu.memory_space<vmem>>, vector<1x16x16xbf16>
    %161 = vector.shape_cast %160 : vector<1x16x16xbf16> to vector<16x16xbf16>
    %162 = arith.truncf %159 : vector<32x16xf32> to vector<32x16xbf16>
    %cst_91 = arith.constant dense<0.000000e+00> : vector<32x16xf32>
    %163 = tpu.matmul %162, %161, %cst_91 {dimension_numbers = #tpu.dot_dimension_numbers<[1], [0], [0], [1], [0, 0, 1, 1], [], []>} : vector<32x16xbf16>, vector<16x16xbf16>, vector<32x16xf32> -> vector<32x16xf32>
    %164 = arith.addf %158, %163 : vector<32x16xf32>
    %165 = arith.addf %164, %84 : vector<32x16xf32>
    %c0_92 = arith.constant 0 : index
    %c0_93 = arith.constant 0 : index
    %c0_94 = arith.constant 0 : index
    %166 = vector.load %arg6[%c0_92, %c0_93, %c0_94] : memref<1x32x16xf32, #tpu.memory_space<vmem>>, vector<1x32x16xf32>
    %167 = vector.shape_cast %166 : vector<1x32x16xf32> to vector<32x16xf32>
    %168 = vector.shape_cast %165 : vector<32x16xf32> to vector<1x32x16xf32>
    tpu.vector_store %arg6[%c0_92, %c0_93, %c0_94], %168 {strides = array<i32>} : memref<1x32x16xf32, #tpu.memory_space<vmem>>, vector<1x32x16xf32>,
    return
  }
  func.func @transform_0(%arg0: i32) -> (i32, i32, i32) {
    %c0_i32 = arith.constant 0 : i32
    %c0_i32_0 = arith.constant 0 : i32
    %c0_i32_1 = arith.constant 0 : i32
    return %arg0, %c0_i32, %c0_i32_0 : i32, i32, i32
  }
  func.func @transform_1(%arg0: i32) -> (i32, i32, i32) {
    %c0_i32 = arith.constant 0 : i32
    %c0_i32_0 = arith.constant 0 : i32
    %c0_i32_1 = arith.constant 0 : i32
    %c0_i32_2 = arith.constant 0 : i32
    return %c0_i32, %c0_i32_0, %c0_i32_1 : i32, i32, i32
  }
  func.func @transform_2(%arg0: i32) -> (i32, i32) {
    %c0_i32 = arith.constant 0 : i32
    %c0_i32_0 = arith.constant 0 : i32
    %c0_i32_1 = arith.constant 0 : i32
    return %c0_i32, %c0_i32_0 : i32, i32
  }
  func.func @transform_3(%arg0: i32) -> (i32, i32, i32) {
    %c0_i32 = arith.constant 0 : i32
    %c0_i32_0 = arith.constant 0 : i32
    %c0_i32_1 = arith.constant 0 : i32
    %c0_i32_2 = arith.constant 0 : i32
    return %c0_i32, %c0_i32_0, %c0_i32_1 : i32, i32, i32
  }
  func.func @transform_4(%arg0: i32) -> (i32, i32) {
    %c0_i32 = arith.constant 0 : i32
    %c0_i32_0 = arith.constant 0 : i32
    %c0_i32_1 = arith.constant 0 : i32
    return %c0_i32, %c0_i32_0 : i32, i32
  }
  func.func @transform_5(%arg0: i32) -> (i32, i32, i32) {
    %c0_i32 = arith.constant 0 : i32
    %c0_i32_0 = arith.constant 0 : i32
    %c0_i32_1 = arith.constant 0 : i32
    return %arg0, %c0_i32, %c0_i32_0 : i32, i32, i32
  }
}

module attributes {stable_mosaic.version = 11 : i64} {
  func.func @_coupling_reverse_kernel(%arg0: i32, %arg1: memref<1x16x8xf32, #tpu.memory_space<vmem>>, %arg2: memref<1x16x1xf32, #tpu.memory_space<vmem>>, %arg3: memref<4x32xbf16, #tpu.memory_space<vmem>>, %arg4: memref<1x32xf32, #tpu.memory_space<vmem>>, %arg5: memref<20x32x64xbf16, #tpu.memory_space<vmem>>, %arg6: memref<4x64xf32, #tpu.memory_space<vmem>>, %arg7: memref<4x32x64xbf16, #tpu.memory_space<vmem>>, %arg8: memref<4x64xf32, #tpu.memory_space<vmem>>, %arg9: memref<32x4xbf16, #tpu.memory_space<vmem>>, %arg10: memref<1x4xf32, #tpu.memory_space<vmem>>, %arg11: memref<1x16x8xf32, #tpu.memory_space<vmem>>) attributes {dimension_semantics = [#tpu.dimension_semantics<parallel>], iteration_bounds = array<i64: 2>, scalar_prefetch = 0 : i64, scratch_operands = 0 : i64, tpu.core_type = #tpu.core_type<tc>, window_params = [{transform_indices = @transform_0, window_bounds = array<i64: 1, 16, 8>}, {transform_indices = @transform_1, window_bounds = array<i64: 1, 16, 1>}, {pipeline_mode = #tpu.pipeline_mode<synchronous>, transform_indices = @transform_2, window_bounds = array<i64: 4, 32>}, {pipeline_mode = #tpu.pipeline_mode<synchronous>, transform_indices = @transform_3, window_bounds = array<i64: 1, 32>}, {pipeline_mode = #tpu.pipeline_mode<synchronous>, transform_indices = @transform_4, window_bounds = array<i64: 20, 32, 64>}, {pipeline_mode = #tpu.pipeline_mode<synchronous>, transform_indices = @transform_5, window_bounds = array<i64: 4, 64>}, {pipeline_mode = #tpu.pipeline_mode<synchronous>, transform_indices = @transform_6, window_bounds = array<i64: 4, 32, 64>}, {pipeline_mode = #tpu.pipeline_mode<synchronous>, transform_indices = @transform_7, window_bounds = array<i64: 4, 64>}, {pipeline_mode = #tpu.pipeline_mode<synchronous>, transform_indices = @transform_8, window_bounds = array<i64: 32, 4>}, {pipeline_mode = #tpu.pipeline_mode<synchronous>, transform_indices = @transform_9, window_bounds = array<i64: 1, 4>}, {transform_indices = @transform_10, window_bounds = array<i64: 1, 16, 8>}]} {
    %c0 = arith.constant 0 : index
    %c0_0 = arith.constant 0 : index
    %c0_1 = arith.constant 0 : index
    %0 = vector.load %arg1[%c0, %c0_0, %c0_1] : memref<1x16x8xf32, #tpu.memory_space<vmem>>, vector<1x16x8xf32>
    %1 = vector.shape_cast %0 : vector<1x16x8xf32> to vector<16x8xf32>
    %c0_2 = arith.constant 0 : index
    %c0_3 = arith.constant 0 : index
    %c0_4 = arith.constant 0 : index
    %2 = vector.load %arg2[%c0_2, %c0_3, %c0_4] : memref<1x16x1xf32, #tpu.memory_space<vmem>>, vector<1x16x1xf32>
    %3 = vector.shape_cast %2 : vector<1x16x1xf32> to vector<16x1xf32>
    %4 = vector.extract_strided_slice %1 {offsets = [0, 0], sizes = [16, 4], strides = [1, 1]} : vector<16x8xf32> to vector<16x4xf32>
    %5 = vector.extract_strided_slice %1 {offsets = [0, 4], sizes = [16, 4], strides = [1, 1]} : vector<16x8xf32> to vector<16x4xf32>
    %c0_5 = arith.constant 0 : index
    %c0_6 = arith.constant 0 : index
    %6 = vector.load %arg3[%c0_5, %c0_6] : memref<4x32xbf16, #tpu.memory_space<vmem>>, vector<4x32xbf16>
    %7 = arith.truncf %4 : vector<16x4xf32> to vector<16x4xbf16>
    %cst = arith.constant dense<0.000000e+00> : vector<16x32xf32>
    %8 = tpu.matmul %7, %6, %cst {dimension_numbers = #tpu.dot_dimension_numbers<[1], [0], [0], [1], [0, 0, 1, 1], [], []>} : vector<16x4xbf16>, vector<4x32xbf16>, vector<16x32xf32> -> vector<16x32xf32>
    %c0_7 = arith.constant 0 : index
    %c0_8 = arith.constant 0 : index
    %9 = vector.load %arg4[%c0_7, %c0_8] : memref<1x32xf32, #tpu.memory_space<vmem>>, vector<1x32xf32>
    %10 = vector.broadcast %9 : vector<1x32xf32> to vector<16x32xf32>
    %11 = arith.addf %8, %10 : vector<16x32xf32>
    %12 = vector.broadcast %3 : vector<16x1xf32> to vector<16x32xf32>
    %13 = arith.mulf %11, %12 : vector<16x32xf32>
    %c0_9 = arith.constant 0 : index
    %c0_10 = arith.constant 0 : index
    %14 = vector.load %arg6[%c0_9, %c0_10] : memref<4x64xf32, #tpu.memory_space<vmem>>, vector<4x64xf32>
    %c0_11 = arith.constant 0 : index
    %c0_12 = arith.constant 0 : index
    %15 = vector.load %arg8[%c0_11, %c0_12] : memref<4x64xf32, #tpu.memory_space<vmem>>, vector<4x64xf32>
    %cst_13 = arith.constant 0.000000e+00 : f32
    %16 = vector.broadcast %cst_13 : f32 to vector<16x32xf32>
    %cst_14 = arith.constant 0.000000e+00 : f32
    %17 = vector.broadcast %cst_14 : f32 to vector<2x32xf32>
    %cst_15 = arith.constant 0.000000e+00 : f32
    %18 = vector.broadcast %cst_15 : f32 to vector<2x32xf32>
    %19 = tpu.concatenate %17, %13, %18 in 0 : vector<2x32xf32>, vector<16x32xf32>, vector<2x32xf32> -> vector<20x32xf32>
    %20 = vector.extract_strided_slice %14 {offsets = [0, 0], sizes = [1, 64], strides = [1, 1]} : vector<4x64xf32> to vector<1x64xf32>
    %21 = vector.extract_strided_slice %19 {offsets = [0, 0], sizes = [16, 32], strides = [1, 1]} : vector<20x32xf32> to vector<16x32xf32>
    %c0_16 = arith.constant 0 : index
    %c0_17 = arith.constant 0 : index
    %c0_18 = arith.constant 0 : index
    %22 = vector.load %arg5[%c0_16, %c0_17, %c0_18] : memref<20x32x64xbf16, #tpu.memory_space<vmem>>, vector<1x32x64xbf16>
    %23 = vector.shape_cast %22 : vector<1x32x64xbf16> to vector<32x64xbf16>
    %24 = arith.truncf %21 : vector<16x32xf32> to vector<16x32xbf16>
    %cst_19 = arith.constant dense<0.000000e+00> : vector<16x64xf32>
    %25 = tpu.matmul %24, %23, %cst_19 {dimension_numbers = #tpu.dot_dimension_numbers<[1], [0], [0], [1], [0, 0, 1, 1], [], []>} : vector<16x32xbf16>, vector<32x64xbf16>, vector<16x64xf32> -> vector<16x64xf32>
    %26 = vector.broadcast %20 : vector<1x64xf32> to vector<16x64xf32>
    %27 = arith.addf %26, %25 : vector<16x64xf32>
    %28 = vector.extract_strided_slice %19 {offsets = [1, 0], sizes = [16, 32], strides = [1, 1]} : vector<20x32xf32> to vector<16x32xf32>
    %c1 = arith.constant 1 : index
    %c0_20 = arith.constant 0 : index
    %c0_21 = arith.constant 0 : index
    %29 = vector.load %arg5[%c1, %c0_20, %c0_21] : memref<20x32x64xbf16, #tpu.memory_space<vmem>>, vector<1x32x64xbf16>
    %30 = vector.shape_cast %29 : vector<1x32x64xbf16> to vector<32x64xbf16>
    %31 = arith.truncf %28 : vector<16x32xf32> to vector<16x32xbf16>
    %cst_22 = arith.constant dense<0.000000e+00> : vector<16x64xf32>
    %32 = tpu.matmul %31, %30, %cst_22 {dimension_numbers = #tpu.dot_dimension_numbers<[1], [0], [0], [1], [0, 0, 1, 1], [], []>} : vector<16x32xbf16>, vector<32x64xbf16>, vector<16x64xf32> -> vector<16x64xf32>
    %33 = arith.addf %27, %32 : vector<16x64xf32>
    %34 = vector.extract_strided_slice %19 {offsets = [2, 0], sizes = [16, 32], strides = [1, 1]} : vector<20x32xf32> to vector<16x32xf32>
    %c2 = arith.constant 2 : index
    %c0_23 = arith.constant 0 : index
    %c0_24 = arith.constant 0 : index
    %35 = vector.load %arg5[%c2, %c0_23, %c0_24] : memref<20x32x64xbf16, #tpu.memory_space<vmem>>, vector<1x32x64xbf16>
    %36 = vector.shape_cast %35 : vector<1x32x64xbf16> to vector<32x64xbf16>
    %37 = arith.truncf %34 : vector<16x32xf32> to vector<16x32xbf16>
    %cst_25 = arith.constant dense<0.000000e+00> : vector<16x64xf32>
    %38 = tpu.matmul %37, %36, %cst_25 {dimension_numbers = #tpu.dot_dimension_numbers<[1], [0], [0], [1], [0, 0, 1, 1], [], []>} : vector<16x32xbf16>, vector<32x64xbf16>, vector<16x64xf32> -> vector<16x64xf32>
    %39 = arith.addf %33, %38 : vector<16x64xf32>
    %40 = vector.extract_strided_slice %19 {offsets = [3, 0], sizes = [16, 32], strides = [1, 1]} : vector<20x32xf32> to vector<16x32xf32>
    %c3 = arith.constant 3 : index
    %c0_26 = arith.constant 0 : index
    %c0_27 = arith.constant 0 : index
    %41 = vector.load %arg5[%c3, %c0_26, %c0_27] : memref<20x32x64xbf16, #tpu.memory_space<vmem>>, vector<1x32x64xbf16>
    %42 = vector.shape_cast %41 : vector<1x32x64xbf16> to vector<32x64xbf16>
    %43 = arith.truncf %40 : vector<16x32xf32> to vector<16x32xbf16>
    %cst_28 = arith.constant dense<0.000000e+00> : vector<16x64xf32>
    %44 = tpu.matmul %43, %42, %cst_28 {dimension_numbers = #tpu.dot_dimension_numbers<[1], [0], [0], [1], [0, 0, 1, 1], [], []>} : vector<16x32xbf16>, vector<32x64xbf16>, vector<16x64xf32> -> vector<16x64xf32>
    %45 = arith.addf %39, %44 : vector<16x64xf32>
    %46 = vector.extract_strided_slice %19 {offsets = [4, 0], sizes = [16, 32], strides = [1, 1]} : vector<20x32xf32> to vector<16x32xf32>
    %c4 = arith.constant 4 : index
    %c0_29 = arith.constant 0 : index
    %c0_30 = arith.constant 0 : index
    %47 = vector.load %arg5[%c4, %c0_29, %c0_30] : memref<20x32x64xbf16, #tpu.memory_space<vmem>>, vector<1x32x64xbf16>
    %48 = vector.shape_cast %47 : vector<1x32x64xbf16> to vector<32x64xbf16>
    %49 = arith.truncf %46 : vector<16x32xf32> to vector<16x32xbf16>
    %cst_31 = arith.constant dense<0.000000e+00> : vector<16x64xf32>
    %50 = tpu.matmul %49, %48, %cst_31 {dimension_numbers = #tpu.dot_dimension_numbers<[1], [0], [0], [1], [0, 0, 1, 1], [], []>} : vector<16x32xbf16>, vector<32x64xbf16>, vector<16x64xf32> -> vector<16x64xf32>
    %51 = arith.addf %45, %50 : vector<16x64xf32>
    %52 = vector.extract_strided_slice %51 {offsets = [0, 0], sizes = [16, 32], strides = [1, 1]} : vector<16x64xf32> to vector<16x32xf32>
    %53 = math.tanh %52 : vector<16x32xf32>
    %54 = vector.extract_strided_slice %51 {offsets = [0, 32], sizes = [16, 32], strides = [1, 1]} : vector<16x64xf32> to vector<16x32xf32>
    %55 = arith.negf %54 : vector<16x32xf32>
    %56 = math.exp %55 : vector<16x32xf32>
    %cst_32 = arith.constant 1.000000e+00 : f32
    %57 = vector.broadcast %cst_32 : f32 to vector<16x32xf32>
    %58 = arith.addf %57, %56 : vector<16x32xf32>
    %59 = arith.divf %57, %58 : vector<16x32xf32>
    %60 = arith.mulf %53, %59 : vector<16x32xf32>
    %c0_33 = arith.constant 0 : index
    %c0_34 = arith.constant 0 : index
    %c0_35 = arith.constant 0 : index
    %61 = vector.load %arg7[%c0_33, %c0_34, %c0_35] : memref<4x32x64xbf16, #tpu.memory_space<vmem>>, vector<1x32x64xbf16>
    %62 = vector.shape_cast %61 : vector<1x32x64xbf16> to vector<32x64xbf16>
    %63 = arith.truncf %60 : vector<16x32xf32> to vector<16x32xbf16>
    %cst_36 = arith.constant dense<0.000000e+00> : vector<16x64xf32>
    %64 = tpu.matmul %63, %62, %cst_36 {dimension_numbers = #tpu.dot_dimension_numbers<[1], [0], [0], [1], [0, 0, 1, 1], [], []>} : vector<16x32xbf16>, vector<32x64xbf16>, vector<16x64xf32> -> vector<16x64xf32>
    %65 = vector.extract_strided_slice %15 {offsets = [0, 0], sizes = [1, 64], strides = [1, 1]} : vector<4x64xf32> to vector<1x64xf32>
    %66 = vector.broadcast %65 : vector<1x64xf32> to vector<16x64xf32>
    %67 = arith.addf %64, %66 : vector<16x64xf32>
    %68 = vector.extract_strided_slice %67 {offsets = [0, 0], sizes = [16, 32], strides = [1, 1]} : vector<16x64xf32> to vector<16x32xf32>
    %69 = arith.addf %13, %68 : vector<16x32xf32>
    %70 = vector.broadcast %3 : vector<16x1xf32> to vector<16x32xf32>
    %71 = arith.mulf %69, %70 : vector<16x32xf32>
    %72 = vector.extract_strided_slice %67 {offsets = [0, 32], sizes = [16, 32], strides = [1, 1]} : vector<16x64xf32> to vector<16x32xf32>
    %73 = arith.addf %16, %72 : vector<16x32xf32>
    %cst_37 = arith.constant 0.000000e+00 : f32
    %74 = vector.broadcast %cst_37 : f32 to vector<2x32xf32>
    %cst_38 = arith.constant 0.000000e+00 : f32
    %75 = vector.broadcast %cst_38 : f32 to vector<2x32xf32>
    %76 = tpu.concatenate %74, %71, %75 in 0 : vector<2x32xf32>, vector<16x32xf32>, vector<2x32xf32> -> vector<20x32xf32>
    %77 = vector.extract_strided_slice %14 {offsets = [1, 0], sizes = [1, 64], strides = [1, 1]} : vector<4x64xf32> to vector<1x64xf32>
    %78 = vector.extract_strided_slice %76 {offsets = [0, 0], sizes = [16, 32], strides = [1, 1]} : vector<20x32xf32> to vector<16x32xf32>
    %c5 = arith.constant 5 : index
    %c0_39 = arith.constant 0 : index
    %c0_40 = arith.constant 0 : index
    %79 = vector.load %arg5[%c5, %c0_39, %c0_40] : memref<20x32x64xbf16, #tpu.memory_space<vmem>>, vector<1x32x64xbf16>
    %80 = vector.shape_cast %79 : vector<1x32x64xbf16> to vector<32x64xbf16>
    %81 = arith.truncf %78 : vector<16x32xf32> to vector<16x32xbf16>
    %cst_41 = arith.constant dense<0.000000e+00> : vector<16x64xf32>
    %82 = tpu.matmul %81, %80, %cst_41 {dimension_numbers = #tpu.dot_dimension_numbers<[1], [0], [0], [1], [0, 0, 1, 1], [], []>} : vector<16x32xbf16>, vector<32x64xbf16>, vector<16x64xf32> -> vector<16x64xf32>
    %83 = vector.broadcast %77 : vector<1x64xf32> to vector<16x64xf32>
    %84 = arith.addf %83, %82 : vector<16x64xf32>
    %85 = vector.extract_strided_slice %76 {offsets = [1, 0], sizes = [16, 32], strides = [1, 1]} : vector<20x32xf32> to vector<16x32xf32>
    %c6 = arith.constant 6 : index
    %c0_42 = arith.constant 0 : index
    %c0_43 = arith.constant 0 : index
    %86 = vector.load %arg5[%c6, %c0_42, %c0_43] : memref<20x32x64xbf16, #tpu.memory_space<vmem>>, vector<1x32x64xbf16>
    %87 = vector.shape_cast %86 : vector<1x32x64xbf16> to vector<32x64xbf16>
    %88 = arith.truncf %85 : vector<16x32xf32> to vector<16x32xbf16>
    %cst_44 = arith.constant dense<0.000000e+00> : vector<16x64xf32>
    %89 = tpu.matmul %88, %87, %cst_44 {dimension_numbers = #tpu.dot_dimension_numbers<[1], [0], [0], [1], [0, 0, 1, 1], [], []>} : vector<16x32xbf16>, vector<32x64xbf16>, vector<16x64xf32> -> vector<16x64xf32>
    %90 = arith.addf %84, %89 : vector<16x64xf32>
    %91 = vector.extract_strided_slice %76 {offsets = [2, 0], sizes = [16, 32], strides = [1, 1]} : vector<20x32xf32> to vector<16x32xf32>
    %c7 = arith.constant 7 : index
    %c0_45 = arith.constant 0 : index
    %c0_46 = arith.constant 0 : index
    %92 = vector.load %arg5[%c7, %c0_45, %c0_46] : memref<20x32x64xbf16, #tpu.memory_space<vmem>>, vector<1x32x64xbf16>
    %93 = vector.shape_cast %92 : vector<1x32x64xbf16> to vector<32x64xbf16>
    %94 = arith.truncf %91 : vector<16x32xf32> to vector<16x32xbf16>
    %cst_47 = arith.constant dense<0.000000e+00> : vector<16x64xf32>
    %95 = tpu.matmul %94, %93, %cst_47 {dimension_numbers = #tpu.dot_dimension_numbers<[1], [0], [0], [1], [0, 0, 1, 1], [], []>} : vector<16x32xbf16>, vector<32x64xbf16>, vector<16x64xf32> -> vector<16x64xf32>
    %96 = arith.addf %90, %95 : vector<16x64xf32>
    %97 = vector.extract_strided_slice %76 {offsets = [3, 0], sizes = [16, 32], strides = [1, 1]} : vector<20x32xf32> to vector<16x32xf32>
    %c8 = arith.constant 8 : index
    %c0_48 = arith.constant 0 : index
    %c0_49 = arith.constant 0 : index
    %98 = vector.load %arg5[%c8, %c0_48, %c0_49] : memref<20x32x64xbf16, #tpu.memory_space<vmem>>, vector<1x32x64xbf16>
    %99 = vector.shape_cast %98 : vector<1x32x64xbf16> to vector<32x64xbf16>
    %100 = arith.truncf %97 : vector<16x32xf32> to vector<16x32xbf16>
    %cst_50 = arith.constant dense<0.000000e+00> : vector<16x64xf32>
    %101 = tpu.matmul %100, %99, %cst_50 {dimension_numbers = #tpu.dot_dimension_numbers<[1], [0], [0], [1], [0, 0, 1, 1], [], []>} : vector<16x32xbf16>, vector<32x64xbf16>, vector<16x64xf32> -> vector<16x64xf32>
    %102 = arith.addf %96, %101 : vector<16x64xf32>
    %103 = vector.extract_strided_slice %76 {offsets = [4, 0], sizes = [16, 32], strides = [1, 1]} : vector<20x32xf32> to vector<16x32xf32>
    %c9 = arith.constant 9 : index
    %c0_51 = arith.constant 0 : index
    %c0_52 = arith.constant 0 : index
    %104 = vector.load %arg5[%c9, %c0_51, %c0_52] : memref<20x32x64xbf16, #tpu.memory_space<vmem>>, vector<1x32x64xbf16>
    %105 = vector.shape_cast %104 : vector<1x32x64xbf16> to vector<32x64xbf16>
    %106 = arith.truncf %103 : vector<16x32xf32> to vector<16x32xbf16>
    %cst_53 = arith.constant dense<0.000000e+00> : vector<16x64xf32>
    %107 = tpu.matmul %106, %105, %cst_53 {dimension_numbers = #tpu.dot_dimension_numbers<[1], [0], [0], [1], [0, 0, 1, 1], [], []>} : vector<16x32xbf16>, vector<32x64xbf16>, vector<16x64xf32> -> vector<16x64xf32>
    %108 = arith.addf %102, %107 : vector<16x64xf32>
    %109 = vector.extract_strided_slice %108 {offsets = [0, 0], sizes = [16, 32], strides = [1, 1]} : vector<16x64xf32> to vector<16x32xf32>
    %110 = math.tanh %109 : vector<16x32xf32>
    %111 = vector.extract_strided_slice %108 {offsets = [0, 32], sizes = [16, 32], strides = [1, 1]} : vector<16x64xf32> to vector<16x32xf32>
    %112 = arith.negf %111 : vector<16x32xf32>
    %113 = math.exp %112 : vector<16x32xf32>
    %cst_54 = arith.constant 1.000000e+00 : f32
    %114 = vector.broadcast %cst_54 : f32 to vector<16x32xf32>
    %115 = arith.addf %114, %113 : vector<16x32xf32>
    %116 = arith.divf %114, %115 : vector<16x32xf32>
    %117 = arith.mulf %110, %116 : vector<16x32xf32>
    %c1_55 = arith.constant 1 : index
    %c0_56 = arith.constant 0 : index
    %c0_57 = arith.constant 0 : index
    %118 = vector.load %arg7[%c1_55, %c0_56, %c0_57] : memref<4x32x64xbf16, #tpu.memory_space<vmem>>, vector<1x32x64xbf16>
    %119 = vector.shape_cast %118 : vector<1x32x64xbf16> to vector<32x64xbf16>
    %120 = arith.truncf %117 : vector<16x32xf32> to vector<16x32xbf16>
    %cst_58 = arith.constant dense<0.000000e+00> : vector<16x64xf32>
    %121 = tpu.matmul %120, %119, %cst_58 {dimension_numbers = #tpu.dot_dimension_numbers<[1], [0], [0], [1], [0, 0, 1, 1], [], []>} : vector<16x32xbf16>, vector<32x64xbf16>, vector<16x64xf32> -> vector<16x64xf32>
    %122 = vector.extract_strided_slice %15 {offsets = [1, 0], sizes = [1, 64], strides = [1, 1]} : vector<4x64xf32> to vector<1x64xf32>
    %123 = vector.broadcast %122 : vector<1x64xf32> to vector<16x64xf32>
    %124 = arith.addf %121, %123 : vector<16x64xf32>
    %125 = vector.extract_strided_slice %124 {offsets = [0, 0], sizes = [16, 32], strides = [1, 1]} : vector<16x64xf32> to vector<16x32xf32>
    %126 = arith.addf %71, %125 : vector<16x32xf32>
    %127 = vector.broadcast %3 : vector<16x1xf32> to vector<16x32xf32>
    %128 = arith.mulf %126, %127 : vector<16x32xf32>
    %129 = vector.extract_strided_slice %124 {offsets = [0, 32], sizes = [16, 32], strides = [1, 1]} : vector<16x64xf32> to vector<16x32xf32>
    %130 = arith.addf %73, %129 : vector<16x32xf32>
    %cst_59 = arith.constant 0.000000e+00 : f32
    %131 = vector.broadcast %cst_59 : f32 to vector<2x32xf32>
    %cst_60 = arith.constant 0.000000e+00 : f32
    %132 = vector.broadcast %cst_60 : f32 to vector<2x32xf32>
    %133 = tpu.concatenate %131, %128, %132 in 0 : vector<2x32xf32>, vector<16x32xf32>, vector<2x32xf32> -> vector<20x32xf32>
    %134 = vector.extract_strided_slice %14 {offsets = [2, 0], sizes = [1, 64], strides = [1, 1]} : vector<4x64xf32> to vector<1x64xf32>
    %135 = vector.extract_strided_slice %133 {offsets = [0, 0], sizes = [16, 32], strides = [1, 1]} : vector<20x32xf32> to vector<16x32xf32>
    %c10 = arith.constant 10 : index
    %c0_61 = arith.constant 0 : index
    %c0_62 = arith.constant 0 : index
    %136 = vector.load %arg5[%c10, %c0_61, %c0_62] : memref<20x32x64xbf16, #tpu.memory_space<vmem>>, vector<1x32x64xbf16>
    %137 = vector.shape_cast %136 : vector<1x32x64xbf16> to vector<32x64xbf16>
    %138 = arith.truncf %135 : vector<16x32xf32> to vector<16x32xbf16>
    %cst_63 = arith.constant dense<0.000000e+00> : vector<16x64xf32>
    %139 = tpu.matmul %138, %137, %cst_63 {dimension_numbers = #tpu.dot_dimension_numbers<[1], [0], [0], [1], [0, 0, 1, 1], [], []>} : vector<16x32xbf16>, vector<32x64xbf16>, vector<16x64xf32> -> vector<16x64xf32>
    %140 = vector.broadcast %134 : vector<1x64xf32> to vector<16x64xf32>
    %141 = arith.addf %140, %139 : vector<16x64xf32>
    %142 = vector.extract_strided_slice %133 {offsets = [1, 0], sizes = [16, 32], strides = [1, 1]} : vector<20x32xf32> to vector<16x32xf32>
    %c11 = arith.constant 11 : index
    %c0_64 = arith.constant 0 : index
    %c0_65 = arith.constant 0 : index
    %143 = vector.load %arg5[%c11, %c0_64, %c0_65] : memref<20x32x64xbf16, #tpu.memory_space<vmem>>, vector<1x32x64xbf16>
    %144 = vector.shape_cast %143 : vector<1x32x64xbf16> to vector<32x64xbf16>
    %145 = arith.truncf %142 : vector<16x32xf32> to vector<16x32xbf16>
    %cst_66 = arith.constant dense<0.000000e+00> : vector<16x64xf32>
    %146 = tpu.matmul %145, %144, %cst_66 {dimension_numbers = #tpu.dot_dimension_numbers<[1], [0], [0], [1], [0, 0, 1, 1], [], []>} : vector<16x32xbf16>, vector<32x64xbf16>, vector<16x64xf32> -> vector<16x64xf32>
    %147 = arith.addf %141, %146 : vector<16x64xf32>
    %148 = vector.extract_strided_slice %133 {offsets = [2, 0], sizes = [16, 32], strides = [1, 1]} : vector<20x32xf32> to vector<16x32xf32>
    %c12 = arith.constant 12 : index
    %c0_67 = arith.constant 0 : index
    %c0_68 = arith.constant 0 : index
    %149 = vector.load %arg5[%c12, %c0_67, %c0_68] : memref<20x32x64xbf16, #tpu.memory_space<vmem>>, vector<1x32x64xbf16>
    %150 = vector.shape_cast %149 : vector<1x32x64xbf16> to vector<32x64xbf16>
    %151 = arith.truncf %148 : vector<16x32xf32> to vector<16x32xbf16>
    %cst_69 = arith.constant dense<0.000000e+00> : vector<16x64xf32>
    %152 = tpu.matmul %151, %150, %cst_69 {dimension_numbers = #tpu.dot_dimension_numbers<[1], [0], [0], [1], [0, 0, 1, 1], [], []>} : vector<16x32xbf16>, vector<32x64xbf16>, vector<16x64xf32> -> vector<16x64xf32>
    %153 = arith.addf %147, %152 : vector<16x64xf32>
    %154 = vector.extract_strided_slice %133 {offsets = [3, 0], sizes = [16, 32], strides = [1, 1]} : vector<20x32xf32> to vector<16x32xf32>
    %c13 = arith.constant 13 : index
    %c0_70 = arith.constant 0 : index
    %c0_71 = arith.constant 0 : index
    %155 = vector.load %arg5[%c13, %c0_70, %c0_71] : memref<20x32x64xbf16, #tpu.memory_space<vmem>>, vector<1x32x64xbf16>
    %156 = vector.shape_cast %155 : vector<1x32x64xbf16> to vector<32x64xbf16>
    %157 = arith.truncf %154 : vector<16x32xf32> to vector<16x32xbf16>
    %cst_72 = arith.constant dense<0.000000e+00> : vector<16x64xf32>
    %158 = tpu.matmul %157, %156, %cst_72 {dimension_numbers = #tpu.dot_dimension_numbers<[1], [0], [0], [1], [0, 0, 1, 1], [], []>} : vector<16x32xbf16>, vector<32x64xbf16>, vector<16x64xf32> -> vector<16x64xf32>
    %159 = arith.addf %153, %158 : vector<16x64xf32>
    %160 = vector.extract_strided_slice %133 {offsets = [4, 0], sizes = [16, 32], strides = [1, 1]} : vector<20x32xf32> to vector<16x32xf32>
    %c14 = arith.constant 14 : index
    %c0_73 = arith.constant 0 : index
    %c0_74 = arith.constant 0 : index
    %161 = vector.load %arg5[%c14, %c0_73, %c0_74] : memref<20x32x64xbf16, #tpu.memory_space<vmem>>, vector<1x32x64xbf16>
    %162 = vector.shape_cast %161 : vector<1x32x64xbf16> to vector<32x64xbf16>
    %163 = arith.truncf %160 : vector<16x32xf32> to vector<16x32xbf16>
    %cst_75 = arith.constant dense<0.000000e+00> : vector<16x64xf32>
    %164 = tpu.matmul %163, %162, %cst_75 {dimension_numbers = #tpu.dot_dimension_numbers<[1], [0], [0], [1], [0, 0, 1, 1], [], []>} : vector<16x32xbf16>, vector<32x64xbf16>, vector<16x64xf32> -> vector<16x64xf32>
    %165 = arith.addf %159, %164 : vector<16x64xf32>
    %166 = vector.extract_strided_slice %165 {offsets = [0, 0], sizes = [16, 32], strides = [1, 1]} : vector<16x64xf32> to vector<16x32xf32>
    %167 = math.tanh %166 : vector<16x32xf32>
    %168 = vector.extract_strided_slice %165 {offsets = [0, 32], sizes = [16, 32], strides = [1, 1]} : vector<16x64xf32> to vector<16x32xf32>
    %169 = arith.negf %168 : vector<16x32xf32>
    %170 = math.exp %169 : vector<16x32xf32>
    %cst_76 = arith.constant 1.000000e+00 : f32
    %171 = vector.broadcast %cst_76 : f32 to vector<16x32xf32>
    %172 = arith.addf %171, %170 : vector<16x32xf32>
    %173 = arith.divf %171, %172 : vector<16x32xf32>
    %174 = arith.mulf %167, %173 : vector<16x32xf32>
    %c2_77 = arith.constant 2 : index
    %c0_78 = arith.constant 0 : index
    %c0_79 = arith.constant 0 : index
    %175 = vector.load %arg7[%c2_77, %c0_78, %c0_79] : memref<4x32x64xbf16, #tpu.memory_space<vmem>>, vector<1x32x64xbf16>
    %176 = vector.shape_cast %175 : vector<1x32x64xbf16> to vector<32x64xbf16>
    %177 = arith.truncf %174 : vector<16x32xf32> to vector<16x32xbf16>
    %cst_80 = arith.constant dense<0.000000e+00> : vector<16x64xf32>
    %178 = tpu.matmul %177, %176, %cst_80 {dimension_numbers = #tpu.dot_dimension_numbers<[1], [0], [0], [1], [0, 0, 1, 1], [], []>} : vector<16x32xbf16>, vector<32x64xbf16>, vector<16x64xf32> -> vector<16x64xf32>
    %179 = vector.extract_strided_slice %15 {offsets = [2, 0], sizes = [1, 64], strides = [1, 1]} : vector<4x64xf32> to vector<1x64xf32>
    %180 = vector.broadcast %179 : vector<1x64xf32> to vector<16x64xf32>
    %181 = arith.addf %178, %180 : vector<16x64xf32>
    %182 = vector.extract_strided_slice %181 {offsets = [0, 0], sizes = [16, 32], strides = [1, 1]} : vector<16x64xf32> to vector<16x32xf32>
    %183 = arith.addf %128, %182 : vector<16x32xf32>
    %184 = vector.broadcast %3 : vector<16x1xf32> to vector<16x32xf32>
    %185 = arith.mulf %183, %184 : vector<16x32xf32>
    %186 = vector.extract_strided_slice %181 {offsets = [0, 32], sizes = [16, 32], strides = [1, 1]} : vector<16x64xf32> to vector<16x32xf32>
    %187 = arith.addf %130, %186 : vector<16x32xf32>
    %cst_81 = arith.constant 0.000000e+00 : f32
    %188 = vector.broadcast %cst_81 : f32 to vector<2x32xf32>
    %cst_82 = arith.constant 0.000000e+00 : f32
    %189 = vector.broadcast %cst_82 : f32 to vector<2x32xf32>
    %190 = tpu.concatenate %188, %185, %189 in 0 : vector<2x32xf32>, vector<16x32xf32>, vector<2x32xf32> -> vector<20x32xf32>
    %191 = vector.extract_strided_slice %14 {offsets = [3, 0], sizes = [1, 64], strides = [1, 1]} : vector<4x64xf32> to vector<1x64xf32>
    %192 = vector.extract_strided_slice %190 {offsets = [0, 0], sizes = [16, 32], strides = [1, 1]} : vector<20x32xf32> to vector<16x32xf32>
    %c15 = arith.constant 15 : index
    %c0_83 = arith.constant 0 : index
    %c0_84 = arith.constant 0 : index
    %193 = vector.load %arg5[%c15, %c0_83, %c0_84] : memref<20x32x64xbf16, #tpu.memory_space<vmem>>, vector<1x32x64xbf16>
    %194 = vector.shape_cast %193 : vector<1x32x64xbf16> to vector<32x64xbf16>
    %195 = arith.truncf %192 : vector<16x32xf32> to vector<16x32xbf16>
    %cst_85 = arith.constant dense<0.000000e+00> : vector<16x64xf32>
    %196 = tpu.matmul %195, %194, %cst_85 {dimension_numbers = #tpu.dot_dimension_numbers<[1], [0], [0], [1], [0, 0, 1, 1], [], []>} : vector<16x32xbf16>, vector<32x64xbf16>, vector<16x64xf32> -> vector<16x64xf32>
    %197 = vector.broadcast %191 : vector<1x64xf32> to vector<16x64xf32>
    %198 = arith.addf %197, %196 : vector<16x64xf32>
    %199 = vector.extract_strided_slice %190 {offsets = [1, 0], sizes = [16, 32], strides = [1, 1]} : vector<20x32xf32> to vector<16x32xf32>
    %c16 = arith.constant 16 : index
    %c0_86 = arith.constant 0 : index
    %c0_87 = arith.constant 0 : index
    %200 = vector.load %arg5[%c16, %c0_86, %c0_87] : memref<20x32x64xbf16, #tpu.memory_space<vmem>>, vector<1x32x64xbf16>
    %201 = vector.shape_cast %200 : vector<1x32x64xbf16> to vector<32x64xbf16>
    %202 = arith.truncf %199 : vector<16x32xf32> to vector<16x32xbf16>
    %cst_88 = arith.constant dense<0.000000e+00> : vector<16x64xf32>
    %203 = tpu.matmul %202, %201, %cst_88 {dimension_numbers = #tpu.dot_dimension_numbers<[1], [0], [0], [1], [0, 0, 1, 1], [], []>} : vector<16x32xbf16>, vector<32x64xbf16>, vector<16x64xf32> -> vector<16x64xf32>
    %204 = arith.addf %198, %203 : vector<16x64xf32>
    %205 = vector.extract_strided_slice %190 {offsets = [2, 0], sizes = [16, 32], strides = [1, 1]} : vector<20x32xf32> to vector<16x32xf32>
    %c17 = arith.constant 17 : index
    %c0_89 = arith.constant 0 : index
    %c0_90 = arith.constant 0 : index
    %206 = vector.load %arg5[%c17, %c0_89, %c0_90] : memref<20x32x64xbf16, #tpu.memory_space<vmem>>, vector<1x32x64xbf16>
    %207 = vector.shape_cast %206 : vector<1x32x64xbf16> to vector<32x64xbf16>
    %208 = arith.truncf %205 : vector<16x32xf32> to vector<16x32xbf16>
    %cst_91 = arith.constant dense<0.000000e+00> : vector<16x64xf32>
    %209 = tpu.matmul %208, %207, %cst_91 {dimension_numbers = #tpu.dot_dimension_numbers<[1], [0], [0], [1], [0, 0, 1, 1], [], []>} : vector<16x32xbf16>, vector<32x64xbf16>, vector<16x64xf32> -> vector<16x64xf32>
    %210 = arith.addf %204, %209 : vector<16x64xf32>
    %211 = vector.extract_strided_slice %190 {offsets = [3, 0], sizes = [16, 32], strides = [1, 1]} : vector<20x32xf32> to vector<16x32xf32>
    %c18 = arith.constant 18 : index
    %c0_92 = arith.constant 0 : index
    %c0_93 = arith.constant 0 : index
    %212 = vector.load %arg5[%c18, %c0_92, %c0_93] : memref<20x32x64xbf16, #tpu.memory_space<vmem>>, vector<1x32x64xbf16>
    %213 = vector.shape_cast %212 : vector<1x32x64xbf16> to vector<32x64xbf16>
    %214 = arith.truncf %211 : vector<16x32xf32> to vector<16x32xbf16>
    %cst_94 = arith.constant dense<0.000000e+00> : vector<16x64xf32>
    %215 = tpu.matmul %214, %213, %cst_94 {dimension_numbers = #tpu.dot_dimension_numbers<[1], [0], [0], [1], [0, 0, 1, 1], [], []>} : vector<16x32xbf16>, vector<32x64xbf16>, vector<16x64xf32> -> vector<16x64xf32>
    %216 = arith.addf %210, %215 : vector<16x64xf32>
    %217 = vector.extract_strided_slice %190 {offsets = [4, 0], sizes = [16, 32], strides = [1, 1]} : vector<20x32xf32> to vector<16x32xf32>
    %c19 = arith.constant 19 : index
    %c0_95 = arith.constant 0 : index
    %c0_96 = arith.constant 0 : index
    %218 = vector.load %arg5[%c19, %c0_95, %c0_96] : memref<20x32x64xbf16, #tpu.memory_space<vmem>>, vector<1x32x64xbf16>
    %219 = vector.shape_cast %218 : vector<1x32x64xbf16> to vector<32x64xbf16>
    %220 = arith.truncf %217 : vector<16x32xf32> to vector<16x32xbf16>
    %cst_97 = arith.constant dense<0.000000e+00> : vector<16x64xf32>
    %221 = tpu.matmul %220, %219, %cst_97 {dimension_numbers = #tpu.dot_dimension_numbers<[1], [0], [0], [1], [0, 0, 1, 1], [], []>} : vector<16x32xbf16>, vector<32x64xbf16>, vector<16x64xf32> -> vector<16x64xf32>
    %222 = arith.addf %216, %221 : vector<16x64xf32>
    %223 = vector.extract_strided_slice %222 {offsets = [0, 0], sizes = [16, 32], strides = [1, 1]} : vector<16x64xf32> to vector<16x32xf32>
    %224 = math.tanh %223 : vector<16x32xf32>
    %225 = vector.extract_strided_slice %222 {offsets = [0, 32], sizes = [16, 32], strides = [1, 1]} : vector<16x64xf32> to vector<16x32xf32>
    %226 = arith.negf %225 : vector<16x32xf32>
    %227 = math.exp %226 : vector<16x32xf32>
    %cst_98 = arith.constant 1.000000e+00 : f32
    %228 = vector.broadcast %cst_98 : f32 to vector<16x32xf32>
    %229 = arith.addf %228, %227 : vector<16x32xf32>
    %230 = arith.divf %228, %229 : vector<16x32xf32>
    %231 = arith.mulf %224, %230 : vector<16x32xf32>
    %c3_99 = arith.constant 3 : index
    %c0_100 = arith.constant 0 : index
    %c0_101 = arith.constant 0 : index
    %232 = vector.load %arg7[%c3_99, %c0_100, %c0_101] : memref<4x32x64xbf16, #tpu.memory_space<vmem>>, vector<1x32x64xbf16>
    %233 = vector.shape_cast %232 : vector<1x32x64xbf16> to vector<32x64xbf16>
    %234 = arith.truncf %231 : vector<16x32xf32> to vector<16x32xbf16>
    %cst_102 = arith.constant dense<0.000000e+00> : vector<16x64xf32>
    %235 = tpu.matmul %234, %233, %cst_102 {dimension_numbers = #tpu.dot_dimension_numbers<[1], [0], [0], [1], [0, 0, 1, 1], [], []>} : vector<16x32xbf16>, vector<32x64xbf16>, vector<16x64xf32> -> vector<16x64xf32>
    %236 = vector.extract_strided_slice %15 {offsets = [3, 0], sizes = [1, 64], strides = [1, 1]} : vector<4x64xf32> to vector<1x64xf32>
    %237 = vector.broadcast %236 : vector<1x64xf32> to vector<16x64xf32>
    %238 = arith.addf %235, %237 : vector<16x64xf32>
    %239 = vector.extract_strided_slice %238 {offsets = [0, 32], sizes = [16, 32], strides = [1, 1]} : vector<16x64xf32> to vector<16x32xf32>
    %240 = arith.addf %187, %239 : vector<16x32xf32>
    %241 = vector.broadcast %3 : vector<16x1xf32> to vector<16x32xf32>
    %242 = arith.mulf %240, %241 : vector<16x32xf32>
    %c0_103 = arith.constant 0 : index
    %c0_104 = arith.constant 0 : index
    %243 = vector.load %arg9[%c0_103, %c0_104] : memref<32x4xbf16, #tpu.memory_space<vmem>>, vector<32x4xbf16>
    %244 = arith.truncf %242 : vector<16x32xf32> to vector<16x32xbf16>
    %cst_105 = arith.constant dense<0.000000e+00> : vector<16x4xf32>
    %245 = tpu.matmul %244, %243, %cst_105 {dimension_numbers = #tpu.dot_dimension_numbers<[1], [0], [0], [1], [0, 0, 1, 1], [], []>} : vector<16x32xbf16>, vector<32x4xbf16>, vector<16x4xf32> -> vector<16x4xf32>
    %c0_106 = arith.constant 0 : index
    %c0_107 = arith.constant 0 : index
    %246 = vector.load %arg10[%c0_106, %c0_107] : memref<1x4xf32, #tpu.memory_space<vmem>>, vector<1x4xf32>
    %247 = vector.broadcast %246 : vector<1x4xf32> to vector<16x4xf32>
    %248 = arith.addf %245, %247 : vector<16x4xf32>
    %249 = vector.broadcast %3 : vector<16x1xf32> to vector<16x4xf32>
    %250 = arith.mulf %248, %249 : vector<16x4xf32>
    %251 = arith.subf %5, %250 : vector<16x4xf32>
    %252 = vector.broadcast %3 : vector<16x1xf32> to vector<16x4xf32>
    %253 = arith.mulf %251, %252 : vector<16x4xf32>
    %254 = tpu.concatenate %4, %253 in 1 : vector<16x4xf32>, vector<16x4xf32> -> vector<16x8xf32>
    %c0_108 = arith.constant 0 : index
    %c0_109 = arith.constant 0 : index
    %c0_110 = arith.constant 0 : index
    %255 = vector.load %arg11[%c0_108, %c0_109, %c0_110] : memref<1x16x8xf32, #tpu.memory_space<vmem>>, vector<1x16x8xf32>
    %256 = vector.shape_cast %255 : vector<1x16x8xf32> to vector<16x8xf32>
    %257 = vector.shape_cast %254 : vector<16x8xf32> to vector<1x16x8xf32>
    tpu.vector_store %arg11[%c0_108, %c0_109, %c0_110], %257 {strides = array<i32>} : memref<1x16x8xf32, #tpu.memory_space<vmem>>, vector<1x16x8xf32>,
    return
  }
  func.func @transform_0(%arg0: i32) -> (i32, i32, i32) {
    %c0_i32 = arith.constant 0 : i32
    %c0_i32_0 = arith.constant 0 : i32
    %c0_i32_1 = arith.constant 0 : i32
    return %arg0, %c0_i32, %c0_i32_0 : i32, i32, i32
  }
  func.func @transform_1(%arg0: i32) -> (i32, i32, i32) {
    %c0_i32 = arith.constant 0 : i32
    %c0_i32_0 = arith.constant 0 : i32
    %c0_i32_1 = arith.constant 0 : i32
    return %arg0, %c0_i32, %c0_i32_0 : i32, i32, i32
  }
  func.func @transform_2(%arg0: i32) -> (i32, i32) {
    %c0_i32 = arith.constant 0 : i32
    %c0_i32_0 = arith.constant 0 : i32
    %c0_i32_1 = arith.constant 0 : i32
    return %c0_i32, %c0_i32_0 : i32, i32
  }
  func.func @transform_3(%arg0: i32) -> (i32, i32) {
    %c0_i32 = arith.constant 0 : i32
    %c0_i32_0 = arith.constant 0 : i32
    %c0_i32_1 = arith.constant 0 : i32
    return %c0_i32, %c0_i32_0 : i32, i32
  }
  func.func @transform_4(%arg0: i32) -> (i32, i32, i32) {
    %c0_i32 = arith.constant 0 : i32
    %c0_i32_0 = arith.constant 0 : i32
    %c0_i32_1 = arith.constant 0 : i32
    %c0_i32_2 = arith.constant 0 : i32
    return %c0_i32, %c0_i32_0, %c0_i32_1 : i32, i32, i32
  }
  func.func @transform_5(%arg0: i32) -> (i32, i32) {
    %c0_i32 = arith.constant 0 : i32
    %c0_i32_0 = arith.constant 0 : i32
    %c0_i32_1 = arith.constant 0 : i32
    return %c0_i32, %c0_i32_0 : i32, i32
  }
  func.func @transform_6(%arg0: i32) -> (i32, i32, i32) {
    %c0_i32 = arith.constant 0 : i32
    %c0_i32_0 = arith.constant 0 : i32
    %c0_i32_1 = arith.constant 0 : i32
    %c0_i32_2 = arith.constant 0 : i32
    return %c0_i32, %c0_i32_0, %c0_i32_1 : i32, i32, i32
  }
  func.func @transform_7(%arg0: i32) -> (i32, i32) {
    %c0_i32 = arith.constant 0 : i32
    %c0_i32_0 = arith.constant 0 : i32
    %c0_i32_1 = arith.constant 0 : i32
    return %c0_i32, %c0_i32_0 : i32, i32
  }
  func.func @transform_8(%arg0: i32) -> (i32, i32) {
    %c0_i32 = arith.constant 0 : i32
    %c0_i32_0 = arith.constant 0 : i32
    %c0_i32_1 = arith.constant 0 : i32
    return %c0_i32, %c0_i32_0 : i32, i32
  }
  func.func @transform_9(%arg0: i32) -> (i32, i32) {
    %c0_i32 = arith.constant 0 : i32
    %c0_i32_0 = arith.constant 0 : i32
    %c0_i32_1 = arith.constant 0 : i32
    return %c0_i32, %c0_i32_0 : i32, i32
  }
  func.func @transform_10(%arg0: i32) -> (i32, i32, i32) {
    %c0_i32 = arith.constant 0 : i32
    %c0_i32_0 = arith.constant 0 : i32
    %c0_i32_1 = arith.constant 0 : i32
    return %arg0, %c0_i32, %c0_i32_0 : i32, i32, i32
  }
}

module attributes {stable_mosaic.version = 11 : i64} {
  func.func @_resblock1_kernel(%arg0: i32, %arg1: memref<1x32x16xf32, #tpu.memory_space<vmem>>, %arg2: memref<6x16x16xbf16, #tpu.memory_space<vmem>>, %arg3: memref<2x16xf32, #tpu.memory_space<vmem>>, %arg4: memref<6x16x16xbf16, #tpu.memory_space<vmem>>, %arg5: memref<2x16xf32, #tpu.memory_space<vmem>>, %arg6: memref<1x32x16xf32, #tpu.memory_space<vmem>>) attributes {dimension_semantics = [#tpu.dimension_semantics<parallel>], iteration_bounds = array<i64: 2>, scalar_prefetch = 0 : i64, scratch_operands = 0 : i64, tpu.core_type = #tpu.core_type<tc>, window_params = [{transform_indices = @transform_0, window_bounds = array<i64: 1, 32, 16>}, {pipeline_mode = #tpu.pipeline_mode<synchronous>, transform_indices = @transform_1, window_bounds = array<i64: 6, 16, 16>}, {pipeline_mode = #tpu.pipeline_mode<synchronous>, transform_indices = @transform_2, window_bounds = array<i64: 2, 16>}, {pipeline_mode = #tpu.pipeline_mode<synchronous>, transform_indices = @transform_3, window_bounds = array<i64: 6, 16, 16>}, {pipeline_mode = #tpu.pipeline_mode<synchronous>, transform_indices = @transform_4, window_bounds = array<i64: 2, 16>}, {transform_indices = @transform_5, window_bounds = array<i64: 1, 32, 16>}]} {
    %c0 = arith.constant 0 : index
    %c0_0 = arith.constant 0 : index
    %c0_1 = arith.constant 0 : index
    %0 = vector.load %arg1[%c0, %c0_0, %c0_1] : memref<1x32x16xf32, #tpu.memory_space<vmem>>, vector<1x32x16xf32>
    %1 = vector.shape_cast %0 : vector<1x32x16xf32> to vector<32x16xf32>
    %c0_2 = arith.constant 0 : index
    %c0_3 = arith.constant 0 : index
    %2 = vector.load %arg3[%c0_2, %c0_3] : memref<2x16xf32, #tpu.memory_space<vmem>>, vector<2x16xf32>
    %c0_4 = arith.constant 0 : index
    %c0_5 = arith.constant 0 : index
    %3 = vector.load %arg5[%c0_4, %c0_5] : memref<2x16xf32, #tpu.memory_space<vmem>>, vector<2x16xf32>
    %cst = arith.constant 0.000000e+00 : f32
    %4 = vector.broadcast %cst : f32 to vector<32x16xf32>
    %5 = arith.cmpf oge, %1, %4 : vector<32x16xf32>
    %cst_6 = arith.constant 1.000000e-01 : f32
    %6 = vector.broadcast %cst_6 : f32 to vector<32x16xf32>
    %7 = arith.mulf %1, %6 : vector<32x16xf32>
    %8 = arith.select %5, %1, %7 : vector<32x16xi1>, vector<32x16xf32>
    %9 = vector.extract_strided_slice %2 {offsets = [0, 0], sizes = [1, 16], strides = [1, 1]} : vector<2x16xf32> to vector<1x16xf32>
    %cst_7 = arith.constant 0.000000e+00 : f32
    %10 = vector.broadcast %cst_7 : f32 to vector<1x16xf32>
    %cst_8 = arith.constant 0.000000e+00 : f32
    %11 = vector.broadcast %cst_8 : f32 to vector<1x16xf32>
    %12 = tpu.concatenate %10, %8, %11 in 0 : vector<1x16xf32>, vector<32x16xf32>, vector<1x16xf32> -> vector<34x16xf32>
    %13 = vector.extract_strided_slice %12 {offsets = [0, 0], sizes = [32, 16], strides = [1, 1]} : vector<34x16xf32> to vector<32x16xf32>
    %c0_9 = arith.constant 0 : index
    %c0_10 = arith.constant 0 : index
    %c0_11 = arith.constant 0 : index
    %14 = vector.load %arg2[%c0_9, %c0_10, %c0_11] : memref<6x16x16xbf16, #tpu.memory_space<vmem>>, vector<1x16x16xbf16>
    %15 = vector.shape_cast %14 : vector<1x16x16xbf16> to vector<16x16xbf16>
    %16 = arith.truncf %13 : vector<32x16xf32> to vector<32x16xbf16>
    %cst_12 = arith.constant dense<0.000000e+00> : vector<32x16xf32>
    %17 = tpu.matmul %16, %15, %cst_12 {dimension_numbers = #tpu.dot_dimension_numbers<[1], [0], [0], [1], [0, 0, 1, 1], [], []>} : vector<32x16xbf16>, vector<16x16xbf16>, vector<32x16xf32> -> vector<32x16xf32>
    %18 = vector.broadcast %9 : vector<1x16xf32> to vector<32x16xf32>
    %19 = arith.addf %18, %17 : vector<32x16xf32>
    %20 = vector.extract_strided_slice %12 {offsets = [1, 0], sizes = [32, 16], strides = [1, 1]} : vector<34x16xf32> to vector<32x16xf32>
    %c1 = arith.constant 1 : index
    %c0_13 = arith.constant 0 : index
    %c0_14 = arith.constant 0 : index
    %21 = vector.load %arg2[%c1, %c0_13, %c0_14] : memref<6x16x16xbf16, #tpu.memory_space<vmem>>, vector<1x16x16xbf16>
    %22 = vector.shape_cast %21 : vector<1x16x16xbf16> to vector<16x16xbf16>
    %23 = arith.truncf %20 : vector<32x16xf32> to vector<32x16xbf16>
    %cst_15 = arith.constant dense<0.000000e+00> : vector<32x16xf32>
    %24 = tpu.matmul %23, %22, %cst_15 {dimension_numbers = #tpu.dot_dimension_numbers<[1], [0], [0], [1], [0, 0, 1, 1], [], []>} : vector<32x16xbf16>, vector<16x16xbf16>, vector<32x16xf32> -> vector<32x16xf32>
    %25 = arith.addf %19, %24 : vector<32x16xf32>
    %26 = vector.extract_strided_slice %12 {offsets = [2, 0], sizes = [32, 16], strides = [1, 1]} : vector<34x16xf32> to vector<32x16xf32>
    %c2 = arith.constant 2 : index
    %c0_16 = arith.constant 0 : index
    %c0_17 = arith.constant 0 : index
    %27 = vector.load %arg2[%c2, %c0_16, %c0_17] : memref<6x16x16xbf16, #tpu.memory_space<vmem>>, vector<1x16x16xbf16>
    %28 = vector.shape_cast %27 : vector<1x16x16xbf16> to vector<16x16xbf16>
    %29 = arith.truncf %26 : vector<32x16xf32> to vector<32x16xbf16>
    %cst_18 = arith.constant dense<0.000000e+00> : vector<32x16xf32>
    %30 = tpu.matmul %29, %28, %cst_18 {dimension_numbers = #tpu.dot_dimension_numbers<[1], [0], [0], [1], [0, 0, 1, 1], [], []>} : vector<32x16xbf16>, vector<16x16xbf16>, vector<32x16xf32> -> vector<32x16xf32>
    %31 = arith.addf %25, %30 : vector<32x16xf32>
    %cst_19 = arith.constant 0.000000e+00 : f32
    %32 = vector.broadcast %cst_19 : f32 to vector<32x16xf32>
    %33 = arith.cmpf oge, %31, %32 : vector<32x16xf32>
    %cst_20 = arith.constant 1.000000e-01 : f32
    %34 = vector.broadcast %cst_20 : f32 to vector<32x16xf32>
    %35 = arith.mulf %31, %34 : vector<32x16xf32>
    %36 = arith.select %33, %31, %35 : vector<32x16xi1>, vector<32x16xf32>
    %37 = vector.extract_strided_slice %3 {offsets = [0, 0], sizes = [1, 16], strides = [1, 1]} : vector<2x16xf32> to vector<1x16xf32>
    %cst_21 = arith.constant 0.000000e+00 : f32
    %38 = vector.broadcast %cst_21 : f32 to vector<1x16xf32>
    %cst_22 = arith.constant 0.000000e+00 : f32
    %39 = vector.broadcast %cst_22 : f32 to vector<1x16xf32>
    %40 = tpu.concatenate %38, %36, %39 in 0 : vector<1x16xf32>, vector<32x16xf32>, vector<1x16xf32> -> vector<34x16xf32>
    %41 = vector.extract_strided_slice %40 {offsets = [0, 0], sizes = [32, 16], strides = [1, 1]} : vector<34x16xf32> to vector<32x16xf32>
    %c0_23 = arith.constant 0 : index
    %c0_24 = arith.constant 0 : index
    %c0_25 = arith.constant 0 : index
    %42 = vector.load %arg4[%c0_23, %c0_24, %c0_25] : memref<6x16x16xbf16, #tpu.memory_space<vmem>>, vector<1x16x16xbf16>
    %43 = vector.shape_cast %42 : vector<1x16x16xbf16> to vector<16x16xbf16>
    %44 = arith.truncf %41 : vector<32x16xf32> to vector<32x16xbf16>
    %cst_26 = arith.constant dense<0.000000e+00> : vector<32x16xf32>
    %45 = tpu.matmul %44, %43, %cst_26 {dimension_numbers = #tpu.dot_dimension_numbers<[1], [0], [0], [1], [0, 0, 1, 1], [], []>} : vector<32x16xbf16>, vector<16x16xbf16>, vector<32x16xf32> -> vector<32x16xf32>
    %46 = vector.broadcast %37 : vector<1x16xf32> to vector<32x16xf32>
    %47 = arith.addf %46, %45 : vector<32x16xf32>
    %48 = vector.extract_strided_slice %40 {offsets = [1, 0], sizes = [32, 16], strides = [1, 1]} : vector<34x16xf32> to vector<32x16xf32>
    %c1_27 = arith.constant 1 : index
    %c0_28 = arith.constant 0 : index
    %c0_29 = arith.constant 0 : index
    %49 = vector.load %arg4[%c1_27, %c0_28, %c0_29] : memref<6x16x16xbf16, #tpu.memory_space<vmem>>, vector<1x16x16xbf16>
    %50 = vector.shape_cast %49 : vector<1x16x16xbf16> to vector<16x16xbf16>
    %51 = arith.truncf %48 : vector<32x16xf32> to vector<32x16xbf16>
    %cst_30 = arith.constant dense<0.000000e+00> : vector<32x16xf32>
    %52 = tpu.matmul %51, %50, %cst_30 {dimension_numbers = #tpu.dot_dimension_numbers<[1], [0], [0], [1], [0, 0, 1, 1], [], []>} : vector<32x16xbf16>, vector<16x16xbf16>, vector<32x16xf32> -> vector<32x16xf32>
    %53 = arith.addf %47, %52 : vector<32x16xf32>
    %54 = vector.extract_strided_slice %40 {offsets = [2, 0], sizes = [32, 16], strides = [1, 1]} : vector<34x16xf32> to vector<32x16xf32>
    %c2_31 = arith.constant 2 : index
    %c0_32 = arith.constant 0 : index
    %c0_33 = arith.constant 0 : index
    %55 = vector.load %arg4[%c2_31, %c0_32, %c0_33] : memref<6x16x16xbf16, #tpu.memory_space<vmem>>, vector<1x16x16xbf16>
    %56 = vector.shape_cast %55 : vector<1x16x16xbf16> to vector<16x16xbf16>
    %57 = arith.truncf %54 : vector<32x16xf32> to vector<32x16xbf16>
    %cst_34 = arith.constant dense<0.000000e+00> : vector<32x16xf32>
    %58 = tpu.matmul %57, %56, %cst_34 {dimension_numbers = #tpu.dot_dimension_numbers<[1], [0], [0], [1], [0, 0, 1, 1], [], []>} : vector<32x16xbf16>, vector<16x16xbf16>, vector<32x16xf32> -> vector<32x16xf32>
    %59 = arith.addf %53, %58 : vector<32x16xf32>
    %60 = arith.addf %59, %1 : vector<32x16xf32>
    %cst_35 = arith.constant 0.000000e+00 : f32
    %61 = vector.broadcast %cst_35 : f32 to vector<32x16xf32>
    %62 = arith.cmpf oge, %60, %61 : vector<32x16xf32>
    %cst_36 = arith.constant 1.000000e-01 : f32
    %63 = vector.broadcast %cst_36 : f32 to vector<32x16xf32>
    %64 = arith.mulf %60, %63 : vector<32x16xf32>
    %65 = arith.select %62, %60, %64 : vector<32x16xi1>, vector<32x16xf32>
    %66 = vector.extract_strided_slice %2 {offsets = [1, 0], sizes = [1, 16], strides = [1, 1]} : vector<2x16xf32> to vector<1x16xf32>
    %cst_37 = arith.constant 0.000000e+00 : f32
    %67 = vector.broadcast %cst_37 : f32 to vector<3x16xf32>
    %cst_38 = arith.constant 0.000000e+00 : f32
    %68 = vector.broadcast %cst_38 : f32 to vector<3x16xf32>
    %69 = tpu.concatenate %67, %65, %68 in 0 : vector<3x16xf32>, vector<32x16xf32>, vector<3x16xf32> -> vector<38x16xf32>
    %70 = vector.extract_strided_slice %69 {offsets = [0, 0], sizes = [32, 16], strides = [1, 1]} : vector<38x16xf32> to vector<32x16xf32>
    %c3 = arith.constant 3 : index
    %c0_39 = arith.constant 0 : index
    %c0_40 = arith.constant 0 : index
    %71 = vector.load %arg2[%c3, %c0_39, %c0_40] : memref<6x16x16xbf16, #tpu.memory_space<vmem>>, vector<1x16x16xbf16>
    %72 = vector.shape_cast %71 : vector<1x16x16xbf16> to vector<16x16xbf16>
    %73 = arith.truncf %70 : vector<32x16xf32> to vector<32x16xbf16>
    %cst_41 = arith.constant dense<0.000000e+00> : vector<32x16xf32>
    %74 = tpu.matmul %73, %72, %cst_41 {dimension_numbers = #tpu.dot_dimension_numbers<[1], [0], [0], [1], [0, 0, 1, 1], [], []>} : vector<32x16xbf16>, vector<16x16xbf16>, vector<32x16xf32> -> vector<32x16xf32>
    %75 = vector.broadcast %66 : vector<1x16xf32> to vector<32x16xf32>
    %76 = arith.addf %75, %74 : vector<32x16xf32>
    %77 = vector.extract_strided_slice %69 {offsets = [3, 0], sizes = [32, 16], strides = [1, 1]} : vector<38x16xf32> to vector<32x16xf32>
    %c4 = arith.constant 4 : index
    %c0_42 = arith.constant 0 : index
    %c0_43 = arith.constant 0 : index
    %78 = vector.load %arg2[%c4, %c0_42, %c0_43] : memref<6x16x16xbf16, #tpu.memory_space<vmem>>, vector<1x16x16xbf16>
    %79 = vector.shape_cast %78 : vector<1x16x16xbf16> to vector<16x16xbf16>
    %80 = arith.truncf %77 : vector<32x16xf32> to vector<32x16xbf16>
    %cst_44 = arith.constant dense<0.000000e+00> : vector<32x16xf32>
    %81 = tpu.matmul %80, %79, %cst_44 {dimension_numbers = #tpu.dot_dimension_numbers<[1], [0], [0], [1], [0, 0, 1, 1], [], []>} : vector<32x16xbf16>, vector<16x16xbf16>, vector<32x16xf32> -> vector<32x16xf32>
    %82 = arith.addf %76, %81 : vector<32x16xf32>
    %83 = vector.extract_strided_slice %69 {offsets = [6, 0], sizes = [32, 16], strides = [1, 1]} : vector<38x16xf32> to vector<32x16xf32>
    %c5 = arith.constant 5 : index
    %c0_45 = arith.constant 0 : index
    %c0_46 = arith.constant 0 : index
    %84 = vector.load %arg2[%c5, %c0_45, %c0_46] : memref<6x16x16xbf16, #tpu.memory_space<vmem>>, vector<1x16x16xbf16>
    %85 = vector.shape_cast %84 : vector<1x16x16xbf16> to vector<16x16xbf16>
    %86 = arith.truncf %83 : vector<32x16xf32> to vector<32x16xbf16>
    %cst_47 = arith.constant dense<0.000000e+00> : vector<32x16xf32>
    %87 = tpu.matmul %86, %85, %cst_47 {dimension_numbers = #tpu.dot_dimension_numbers<[1], [0], [0], [1], [0, 0, 1, 1], [], []>} : vector<32x16xbf16>, vector<16x16xbf16>, vector<32x16xf32> -> vector<32x16xf32>
    %88 = arith.addf %82, %87 : vector<32x16xf32>
    %cst_48 = arith.constant 0.000000e+00 : f32
    %89 = vector.broadcast %cst_48 : f32 to vector<32x16xf32>
    %90 = arith.cmpf oge, %88, %89 : vector<32x16xf32>
    %cst_49 = arith.constant 1.000000e-01 : f32
    %91 = vector.broadcast %cst_49 : f32 to vector<32x16xf32>
    %92 = arith.mulf %88, %91 : vector<32x16xf32>
    %93 = arith.select %90, %88, %92 : vector<32x16xi1>, vector<32x16xf32>
    %94 = vector.extract_strided_slice %3 {offsets = [1, 0], sizes = [1, 16], strides = [1, 1]} : vector<2x16xf32> to vector<1x16xf32>
    %cst_50 = arith.constant 0.000000e+00 : f32
    %95 = vector.broadcast %cst_50 : f32 to vector<1x16xf32>
    %cst_51 = arith.constant 0.000000e+00 : f32
    %96 = vector.broadcast %cst_51 : f32 to vector<1x16xf32>
    %97 = tpu.concatenate %95, %93, %96 in 0 : vector<1x16xf32>, vector<32x16xf32>, vector<1x16xf32> -> vector<34x16xf32>
    %98 = vector.extract_strided_slice %97 {offsets = [0, 0], sizes = [32, 16], strides = [1, 1]} : vector<34x16xf32> to vector<32x16xf32>
    %c3_52 = arith.constant 3 : index
    %c0_53 = arith.constant 0 : index
    %c0_54 = arith.constant 0 : index
    %99 = vector.load %arg4[%c3_52, %c0_53, %c0_54] : memref<6x16x16xbf16, #tpu.memory_space<vmem>>, vector<1x16x16xbf16>
    %100 = vector.shape_cast %99 : vector<1x16x16xbf16> to vector<16x16xbf16>
    %101 = arith.truncf %98 : vector<32x16xf32> to vector<32x16xbf16>
    %cst_55 = arith.constant dense<0.000000e+00> : vector<32x16xf32>
    %102 = tpu.matmul %101, %100, %cst_55 {dimension_numbers = #tpu.dot_dimension_numbers<[1], [0], [0], [1], [0, 0, 1, 1], [], []>} : vector<32x16xbf16>, vector<16x16xbf16>, vector<32x16xf32> -> vector<32x16xf32>
    %103 = vector.broadcast %94 : vector<1x16xf32> to vector<32x16xf32>
    %104 = arith.addf %103, %102 : vector<32x16xf32>
    %105 = vector.extract_strided_slice %97 {offsets = [1, 0], sizes = [32, 16], strides = [1, 1]} : vector<34x16xf32> to vector<32x16xf32>
    %c4_56 = arith.constant 4 : index
    %c0_57 = arith.constant 0 : index
    %c0_58 = arith.constant 0 : index
    %106 = vector.load %arg4[%c4_56, %c0_57, %c0_58] : memref<6x16x16xbf16, #tpu.memory_space<vmem>>, vector<1x16x16xbf16>
    %107 = vector.shape_cast %106 : vector<1x16x16xbf16> to vector<16x16xbf16>
    %108 = arith.truncf %105 : vector<32x16xf32> to vector<32x16xbf16>
    %cst_59 = arith.constant dense<0.000000e+00> : vector<32x16xf32>
    %109 = tpu.matmul %108, %107, %cst_59 {dimension_numbers = #tpu.dot_dimension_numbers<[1], [0], [0], [1], [0, 0, 1, 1], [], []>} : vector<32x16xbf16>, vector<16x16xbf16>, vector<32x16xf32> -> vector<32x16xf32>
    %110 = arith.addf %104, %109 : vector<32x16xf32>
    %111 = vector.extract_strided_slice %97 {offsets = [2, 0], sizes = [32, 16], strides = [1, 1]} : vector<34x16xf32> to vector<32x16xf32>
    %c5_60 = arith.constant 5 : index
    %c0_61 = arith.constant 0 : index
    %c0_62 = arith.constant 0 : index
    %112 = vector.load %arg4[%c5_60, %c0_61, %c0_62] : memref<6x16x16xbf16, #tpu.memory_space<vmem>>, vector<1x16x16xbf16>
    %113 = vector.shape_cast %112 : vector<1x16x16xbf16> to vector<16x16xbf16>
    %114 = arith.truncf %111 : vector<32x16xf32> to vector<32x16xbf16>
    %cst_63 = arith.constant dense<0.000000e+00> : vector<32x16xf32>
    %115 = tpu.matmul %114, %113, %cst_63 {dimension_numbers = #tpu.dot_dimension_numbers<[1], [0], [0], [1], [0, 0, 1, 1], [], []>} : vector<32x16xbf16>, vector<16x16xbf16>, vector<32x16xf32> -> vector<32x16xf32>
    %116 = arith.addf %110, %115 : vector<32x16xf32>
    %117 = arith.addf %116, %60 : vector<32x16xf32>
    %c0_64 = arith.constant 0 : index
    %c0_65 = arith.constant 0 : index
    %c0_66 = arith.constant 0 : index
    %118 = vector.load %arg6[%c0_64, %c0_65, %c0_66] : memref<1x32x16xf32, #tpu.memory_space<vmem>>, vector<1x32x16xf32>
    %119 = vector.shape_cast %118 : vector<1x32x16xf32> to vector<32x16xf32>
    %120 = vector.shape_cast %117 : vector<32x16xf32> to vector<1x32x16xf32>
    tpu.vector_store %arg6[%c0_64, %c0_65, %c0_66], %120 {strides = array<i32>} : memref<1x32x16xf32, #tpu.memory_space<vmem>>, vector<1x32x16xf32>,
    return
  }
  func.func @transform_0(%arg0: i32) -> (i32, i32, i32) {
    %c0_i32 = arith.constant 0 : i32
    %c0_i32_0 = arith.constant 0 : i32
    %c0_i32_1 = arith.constant 0 : i32
    return %arg0, %c0_i32, %c0_i32_0 : i32, i32, i32
  }
  func.func @transform_1(%arg0: i32) -> (i32, i32, i32) {
    %c0_i32 = arith.constant 0 : i32
    %c0_i32_0 = arith.constant 0 : i32
    %c0_i32_1 = arith.constant 0 : i32
    %c0_i32_2 = arith.constant 0 : i32
    return %c0_i32, %c0_i32_0, %c0_i32_1 : i32, i32, i32
  }
  func.func @transform_2(%arg0: i32) -> (i32, i32) {
    %c0_i32 = arith.constant 0 : i32
    %c0_i32_0 = arith.constant 0 : i32
    %c0_i32_1 = arith.constant 0 : i32
    return %c0_i32, %c0_i32_0 : i32, i32
  }
  func.func @transform_3(%arg0: i32) -> (i32, i32, i32) {
    %c0_i32 = arith.constant 0 : i32
    %c0_i32_0 = arith.constant 0 : i32
    %c0_i32_1 = arith.constant 0 : i32
    %c0_i32_2 = arith.constant 0 : i32
    return %c0_i32, %c0_i32_0, %c0_i32_1 : i32, i32, i32
  }
  func.func @transform_4(%arg0: i32) -> (i32, i32) {
    %c0_i32 = arith.constant 0 : i32
    %c0_i32_0 = arith.constant 0 : i32
    %c0_i32_1 = arith.constant 0 : i32
    return %c0_i32, %c0_i32_0 : i32, i32
  }
  func.func @transform_5(%arg0: i32) -> (i32, i32, i32) {
    %c0_i32 = arith.constant 0 : i32
    %c0_i32_0 = arith.constant 0 : i32
    %c0_i32_1 = arith.constant 0 : i32
    return %arg0, %c0_i32, %c0_i32_0 : i32, i32, i32
  }
}

module attributes {stable_mosaic.version = 11 : i64} {
  func.func @_upsample_kernel(%arg0: i32, %arg1: memref<1x32x16xf32, #tpu.memory_space<vmem>>, %arg2: memref<4x16x8xbf16, #tpu.memory_space<vmem>>, %arg3: memref<1x8xf32, #tpu.memory_space<vmem>>, %arg4: memref<1x32x16xf32, #tpu.memory_space<vmem>>) attributes {dimension_semantics = [#tpu.dimension_semantics<parallel>], iteration_bounds = array<i64: 2>, scalar_prefetch = 0 : i64, scratch_operands = 0 : i64, tpu.core_type = #tpu.core_type<tc>, window_params = [{transform_indices = @transform_0, window_bounds = array<i64: 1, 32, 16>}, {pipeline_mode = #tpu.pipeline_mode<synchronous>, transform_indices = @transform_1, window_bounds = array<i64: 4, 16, 8>}, {pipeline_mode = #tpu.pipeline_mode<synchronous>, transform_indices = @transform_2, window_bounds = array<i64: 1, 8>}, {transform_indices = @transform_3, window_bounds = array<i64: 1, 32, 16>}]} {
    %c0 = arith.constant 0 : index
    %c0_0 = arith.constant 0 : index
    %c0_1 = arith.constant 0 : index
    %0 = vector.load %arg1[%c0, %c0_0, %c0_1] : memref<1x32x16xf32, #tpu.memory_space<vmem>>, vector<1x32x16xf32>
    %1 = vector.shape_cast %0 : vector<1x32x16xf32> to vector<32x16xf32>
    %cst = arith.constant 5.000000e-01 : f32
    %2 = vector.broadcast %cst : f32 to vector<32x16xf32>
    %3 = arith.mulf %1, %2 : vector<32x16xf32>
    %cst_2 = arith.constant 0.000000e+00 : f32
    %4 = vector.broadcast %cst_2 : f32 to vector<32x16xf32>
    %5 = arith.cmpf oge, %3, %4 : vector<32x16xf32>
    %cst_3 = arith.constant 1.000000e-01 : f32
    %6 = vector.broadcast %cst_3 : f32 to vector<32x16xf32>
    %7 = arith.mulf %3, %6 : vector<32x16xf32>
    %8 = arith.select %5, %3, %7 : vector<32x16xi1>, vector<32x16xf32>
    %cst_4 = arith.constant 0.000000e+00 : f32
    %9 = vector.broadcast %cst_4 : f32 to vector<1x16xf32>
    %cst_5 = arith.constant 0.000000e+00 : f32
    %10 = vector.broadcast %cst_5 : f32 to vector<1x16xf32>
    %11 = tpu.concatenate %9, %8, %10 in 0 : vector<1x16xf32>, vector<32x16xf32>, vector<1x16xf32> -> vector<34x16xf32>
    %c0_6 = arith.constant 0 : index
    %c0_7 = arith.constant 0 : index
    %12 = vector.load %arg3[%c0_6, %c0_7] : memref<1x8xf32, #tpu.memory_space<vmem>>, vector<1x8xf32>
    %13 = vector.extract_strided_slice %11 {offsets = [1, 0], sizes = [32, 16], strides = [1, 1]} : vector<34x16xf32> to vector<32x16xf32>
    %c1 = arith.constant 1 : index
    %c0_8 = arith.constant 0 : index
    %c0_9 = arith.constant 0 : index
    %14 = vector.load %arg2[%c1, %c0_8, %c0_9] : memref<4x16x8xbf16, #tpu.memory_space<vmem>>, vector<1x16x8xbf16>
    %15 = vector.shape_cast %14 : vector<1x16x8xbf16> to vector<16x8xbf16>
    %16 = arith.truncf %13 : vector<32x16xf32> to vector<32x16xbf16>
    %cst_10 = arith.constant dense<0.000000e+00> : vector<32x8xf32>
    %17 = tpu.matmul %16, %15, %cst_10 {dimension_numbers = #tpu.dot_dimension_numbers<[1], [0], [0], [1], [0, 0, 1, 1], [], []>} : vector<32x16xbf16>, vector<16x8xbf16>, vector<32x8xf32> -> vector<32x8xf32>
    %18 = vector.broadcast %12 : vector<1x8xf32> to vector<32x8xf32>
    %19 = arith.addf %18, %17 : vector<32x8xf32>
    %20 = vector.extract_strided_slice %11 {offsets = [0, 0], sizes = [32, 16], strides = [1, 1]} : vector<34x16xf32> to vector<32x16xf32>
    %c3 = arith.constant 3 : index
    %c0_11 = arith.constant 0 : index
    %c0_12 = arith.constant 0 : index
    %21 = vector.load %arg2[%c3, %c0_11, %c0_12] : memref<4x16x8xbf16, #tpu.memory_space<vmem>>, vector<1x16x8xbf16>
    %22 = vector.shape_cast %21 : vector<1x16x8xbf16> to vector<16x8xbf16>
    %23 = arith.truncf %20 : vector<32x16xf32> to vector<32x16xbf16>
    %cst_13 = arith.constant dense<0.000000e+00> : vector<32x8xf32>
    %24 = tpu.matmul %23, %22, %cst_13 {dimension_numbers = #tpu.dot_dimension_numbers<[1], [0], [0], [1], [0, 0, 1, 1], [], []>} : vector<32x16xbf16>, vector<16x8xbf16>, vector<32x8xf32> -> vector<32x8xf32>
    %25 = arith.addf %19, %24 : vector<32x8xf32>
    %c0_14 = arith.constant 0 : index
    %c0_15 = arith.constant 0 : index
    %26 = vector.load %arg3[%c0_14, %c0_15] : memref<1x8xf32, #tpu.memory_space<vmem>>, vector<1x8xf32>
    %27 = vector.extract_strided_slice %11 {offsets = [2, 0], sizes = [32, 16], strides = [1, 1]} : vector<34x16xf32> to vector<32x16xf32>
    %c0_16 = arith.constant 0 : index
    %c0_17 = arith.constant 0 : index
    %c0_18 = arith.constant 0 : index
    %28 = vector.load %arg2[%c0_16, %c0_17, %c0_18] : memref<4x16x8xbf16, #tpu.memory_space<vmem>>, vector<1x16x8xbf16>
    %29 = vector.shape_cast %28 : vector<1x16x8xbf16> to vector<16x8xbf16>
    %30 = arith.truncf %27 : vector<32x16xf32> to vector<32x16xbf16>
    %cst_19 = arith.constant dense<0.000000e+00> : vector<32x8xf32>
    %31 = tpu.matmul %30, %29, %cst_19 {dimension_numbers = #tpu.dot_dimension_numbers<[1], [0], [0], [1], [0, 0, 1, 1], [], []>} : vector<32x16xbf16>, vector<16x8xbf16>, vector<32x8xf32> -> vector<32x8xf32>
    %32 = vector.broadcast %26 : vector<1x8xf32> to vector<32x8xf32>
    %33 = arith.addf %32, %31 : vector<32x8xf32>
    %34 = vector.extract_strided_slice %11 {offsets = [1, 0], sizes = [32, 16], strides = [1, 1]} : vector<34x16xf32> to vector<32x16xf32>
    %c2 = arith.constant 2 : index
    %c0_20 = arith.constant 0 : index
    %c0_21 = arith.constant 0 : index
    %35 = vector.load %arg2[%c2, %c0_20, %c0_21] : memref<4x16x8xbf16, #tpu.memory_space<vmem>>, vector<1x16x8xbf16>
    %36 = vector.shape_cast %35 : vector<1x16x8xbf16> to vector<16x8xbf16>
    %37 = arith.truncf %34 : vector<32x16xf32> to vector<32x16xbf16>
    %cst_22 = arith.constant dense<0.000000e+00> : vector<32x8xf32>
    %38 = tpu.matmul %37, %36, %cst_22 {dimension_numbers = #tpu.dot_dimension_numbers<[1], [0], [0], [1], [0, 0, 1, 1], [], []>} : vector<32x16xbf16>, vector<16x8xbf16>, vector<32x8xf32> -> vector<32x8xf32>
    %39 = arith.addf %33, %38 : vector<32x8xf32>
    %40 = tpu.concatenate %25, %39 in 1 : vector<32x8xf32>, vector<32x8xf32> -> vector<32x16xf32>
    %c0_23 = arith.constant 0 : index
    %c0_24 = arith.constant 0 : index
    %c0_25 = arith.constant 0 : index
    %41 = vector.load %arg4[%c0_23, %c0_24, %c0_25] : memref<1x32x16xf32, #tpu.memory_space<vmem>>, vector<1x32x16xf32>
    %42 = vector.shape_cast %41 : vector<1x32x16xf32> to vector<32x16xf32>
    %43 = vector.shape_cast %40 : vector<32x16xf32> to vector<1x32x16xf32>
    tpu.vector_store %arg4[%c0_23, %c0_24, %c0_25], %43 {strides = array<i32>} : memref<1x32x16xf32, #tpu.memory_space<vmem>>, vector<1x32x16xf32>,
    return
  }
  func.func @transform_0(%arg0: i32) -> (i32, i32, i32) {
    %c0_i32 = arith.constant 0 : i32
    %c0_i32_0 = arith.constant 0 : i32
    %c0_i32_1 = arith.constant 0 : i32
    return %arg0, %c0_i32, %c0_i32_0 : i32, i32, i32
  }
  func.func @transform_1(%arg0: i32) -> (i32, i32, i32) {
    %c0_i32 = arith.constant 0 : i32
    %c0_i32_0 = arith.constant 0 : i32
    %c0_i32_1 = arith.constant 0 : i32
    %c0_i32_2 = arith.constant 0 : i32
    return %c0_i32, %c0_i32_0, %c0_i32_1 : i32, i32, i32
  }
  func.func @transform_2(%arg0: i32) -> (i32, i32) {
    %c0_i32 = arith.constant 0 : i32
    %c0_i32_0 = arith.constant 0 : i32
    %c0_i32_1 = arith.constant 0 : i32
    return %c0_i32, %c0_i32_0 : i32, i32
  }
  func.func @transform_3(%arg0: i32) -> (i32, i32, i32) {
    %c0_i32 = arith.constant 0 : i32
    %c0_i32_0 = arith.constant 0 : i32
    %c0_i32_1 = arith.constant 0 : i32
    return %arg0, %c0_i32, %c0_i32_0 : i32, i32, i32
  }
}

module attributes {stable_mosaic.version = 11 : i64} {
  func.func @_resblock1_kernel(%arg0: i32, %arg1: memref<1x64x8xf32, #tpu.memory_space<vmem>>, %arg2: memref<10x8x8xbf16, #tpu.memory_space<vmem>>, %arg3: memref<2x8xf32, #tpu.memory_space<vmem>>, %arg4: memref<10x8x8xbf16, #tpu.memory_space<vmem>>, %arg5: memref<2x8xf32, #tpu.memory_space<vmem>>, %arg6: memref<1x64x8xf32, #tpu.memory_space<vmem>>) attributes {dimension_semantics = [#tpu.dimension_semantics<parallel>], iteration_bounds = array<i64: 2>, scalar_prefetch = 0 : i64, scratch_operands = 0 : i64, tpu.core_type = #tpu.core_type<tc>, window_params = [{transform_indices = @transform_0, window_bounds = array<i64: 1, 64, 8>}, {pipeline_mode = #tpu.pipeline_mode<synchronous>, transform_indices = @transform_1, window_bounds = array<i64: 10, 8, 8>}, {pipeline_mode = #tpu.pipeline_mode<synchronous>, transform_indices = @transform_2, window_bounds = array<i64: 2, 8>}, {pipeline_mode = #tpu.pipeline_mode<synchronous>, transform_indices = @transform_3, window_bounds = array<i64: 10, 8, 8>}, {pipeline_mode = #tpu.pipeline_mode<synchronous>, transform_indices = @transform_4, window_bounds = array<i64: 2, 8>}, {transform_indices = @transform_5, window_bounds = array<i64: 1, 64, 8>}]} {
    %c0 = arith.constant 0 : index
    %c0_0 = arith.constant 0 : index
    %c0_1 = arith.constant 0 : index
    %0 = vector.load %arg1[%c0, %c0_0, %c0_1] : memref<1x64x8xf32, #tpu.memory_space<vmem>>, vector<1x64x8xf32>
    %1 = vector.shape_cast %0 : vector<1x64x8xf32> to vector<64x8xf32>
    %c0_2 = arith.constant 0 : index
    %c0_3 = arith.constant 0 : index
    %2 = vector.load %arg3[%c0_2, %c0_3] : memref<2x8xf32, #tpu.memory_space<vmem>>, vector<2x8xf32>
    %c0_4 = arith.constant 0 : index
    %c0_5 = arith.constant 0 : index
    %3 = vector.load %arg5[%c0_4, %c0_5] : memref<2x8xf32, #tpu.memory_space<vmem>>, vector<2x8xf32>
    %cst = arith.constant 0.000000e+00 : f32
    %4 = vector.broadcast %cst : f32 to vector<64x8xf32>
    %5 = arith.cmpf oge, %1, %4 : vector<64x8xf32>
    %cst_6 = arith.constant 1.000000e-01 : f32
    %6 = vector.broadcast %cst_6 : f32 to vector<64x8xf32>
    %7 = arith.mulf %1, %6 : vector<64x8xf32>
    %8 = arith.select %5, %1, %7 : vector<64x8xi1>, vector<64x8xf32>
    %9 = vector.extract_strided_slice %2 {offsets = [0, 0], sizes = [1, 8], strides = [1, 1]} : vector<2x8xf32> to vector<1x8xf32>
    %cst_7 = arith.constant 0.000000e+00 : f32
    %10 = vector.broadcast %cst_7 : f32 to vector<2x8xf32>
    %cst_8 = arith.constant 0.000000e+00 : f32
    %11 = vector.broadcast %cst_8 : f32 to vector<2x8xf32>
    %12 = tpu.concatenate %10, %8, %11 in 0 : vector<2x8xf32>, vector<64x8xf32>, vector<2x8xf32> -> vector<68x8xf32>
    %13 = vector.extract_strided_slice %12 {offsets = [0, 0], sizes = [64, 8], strides = [1, 1]} : vector<68x8xf32> to vector<64x8xf32>
    %c0_9 = arith.constant 0 : index
    %c0_10 = arith.constant 0 : index
    %c0_11 = arith.constant 0 : index
    %14 = vector.load %arg2[%c0_9, %c0_10, %c0_11] : memref<10x8x8xbf16, #tpu.memory_space<vmem>>, vector<1x8x8xbf16>
    %15 = vector.shape_cast %14 : vector<1x8x8xbf16> to vector<8x8xbf16>
    %16 = arith.truncf %13 : vector<64x8xf32> to vector<64x8xbf16>
    %cst_12 = arith.constant dense<0.000000e+00> : vector<64x8xf32>
    %17 = tpu.matmul %16, %15, %cst_12 {dimension_numbers = #tpu.dot_dimension_numbers<[1], [0], [0], [1], [0, 0, 1, 1], [], []>} : vector<64x8xbf16>, vector<8x8xbf16>, vector<64x8xf32> -> vector<64x8xf32>
    %18 = vector.broadcast %9 : vector<1x8xf32> to vector<64x8xf32>
    %19 = arith.addf %18, %17 : vector<64x8xf32>
    %20 = vector.extract_strided_slice %12 {offsets = [1, 0], sizes = [64, 8], strides = [1, 1]} : vector<68x8xf32> to vector<64x8xf32>
    %c1 = arith.constant 1 : index
    %c0_13 = arith.constant 0 : index
    %c0_14 = arith.constant 0 : index
    %21 = vector.load %arg2[%c1, %c0_13, %c0_14] : memref<10x8x8xbf16, #tpu.memory_space<vmem>>, vector<1x8x8xbf16>
    %22 = vector.shape_cast %21 : vector<1x8x8xbf16> to vector<8x8xbf16>
    %23 = arith.truncf %20 : vector<64x8xf32> to vector<64x8xbf16>
    %cst_15 = arith.constant dense<0.000000e+00> : vector<64x8xf32>
    %24 = tpu.matmul %23, %22, %cst_15 {dimension_numbers = #tpu.dot_dimension_numbers<[1], [0], [0], [1], [0, 0, 1, 1], [], []>} : vector<64x8xbf16>, vector<8x8xbf16>, vector<64x8xf32> -> vector<64x8xf32>
    %25 = arith.addf %19, %24 : vector<64x8xf32>
    %26 = vector.extract_strided_slice %12 {offsets = [2, 0], sizes = [64, 8], strides = [1, 1]} : vector<68x8xf32> to vector<64x8xf32>
    %c2 = arith.constant 2 : index
    %c0_16 = arith.constant 0 : index
    %c0_17 = arith.constant 0 : index
    %27 = vector.load %arg2[%c2, %c0_16, %c0_17] : memref<10x8x8xbf16, #tpu.memory_space<vmem>>, vector<1x8x8xbf16>
    %28 = vector.shape_cast %27 : vector<1x8x8xbf16> to vector<8x8xbf16>
    %29 = arith.truncf %26 : vector<64x8xf32> to vector<64x8xbf16>
    %cst_18 = arith.constant dense<0.000000e+00> : vector<64x8xf32>
    %30 = tpu.matmul %29, %28, %cst_18 {dimension_numbers = #tpu.dot_dimension_numbers<[1], [0], [0], [1], [0, 0, 1, 1], [], []>} : vector<64x8xbf16>, vector<8x8xbf16>, vector<64x8xf32> -> vector<64x8xf32>
    %31 = arith.addf %25, %30 : vector<64x8xf32>
    %32 = vector.extract_strided_slice %12 {offsets = [3, 0], sizes = [64, 8], strides = [1, 1]} : vector<68x8xf32> to vector<64x8xf32>
    %c3 = arith.constant 3 : index
    %c0_19 = arith.constant 0 : index
    %c0_20 = arith.constant 0 : index
    %33 = vector.load %arg2[%c3, %c0_19, %c0_20] : memref<10x8x8xbf16, #tpu.memory_space<vmem>>, vector<1x8x8xbf16>
    %34 = vector.shape_cast %33 : vector<1x8x8xbf16> to vector<8x8xbf16>
    %35 = arith.truncf %32 : vector<64x8xf32> to vector<64x8xbf16>
    %cst_21 = arith.constant dense<0.000000e+00> : vector<64x8xf32>
    %36 = tpu.matmul %35, %34, %cst_21 {dimension_numbers = #tpu.dot_dimension_numbers<[1], [0], [0], [1], [0, 0, 1, 1], [], []>} : vector<64x8xbf16>, vector<8x8xbf16>, vector<64x8xf32> -> vector<64x8xf32>
    %37 = arith.addf %31, %36 : vector<64x8xf32>
    %38 = vector.extract_strided_slice %12 {offsets = [4, 0], sizes = [64, 8], strides = [1, 1]} : vector<68x8xf32> to vector<64x8xf32>
    %c4 = arith.constant 4 : index
    %c0_22 = arith.constant 0 : index
    %c0_23 = arith.constant 0 : index
    %39 = vector.load %arg2[%c4, %c0_22, %c0_23] : memref<10x8x8xbf16, #tpu.memory_space<vmem>>, vector<1x8x8xbf16>
    %40 = vector.shape_cast %39 : vector<1x8x8xbf16> to vector<8x8xbf16>
    %41 = arith.truncf %38 : vector<64x8xf32> to vector<64x8xbf16>
    %cst_24 = arith.constant dense<0.000000e+00> : vector<64x8xf32>
    %42 = tpu.matmul %41, %40, %cst_24 {dimension_numbers = #tpu.dot_dimension_numbers<[1], [0], [0], [1], [0, 0, 1, 1], [], []>} : vector<64x8xbf16>, vector<8x8xbf16>, vector<64x8xf32> -> vector<64x8xf32>
    %43 = arith.addf %37, %42 : vector<64x8xf32>
    %cst_25 = arith.constant 0.000000e+00 : f32
    %44 = vector.broadcast %cst_25 : f32 to vector<64x8xf32>
    %45 = arith.cmpf oge, %43, %44 : vector<64x8xf32>
    %cst_26 = arith.constant 1.000000e-01 : f32
    %46 = vector.broadcast %cst_26 : f32 to vector<64x8xf32>
    %47 = arith.mulf %43, %46 : vector<64x8xf32>
    %48 = arith.select %45, %43, %47 : vector<64x8xi1>, vector<64x8xf32>
    %49 = vector.extract_strided_slice %3 {offsets = [0, 0], sizes = [1, 8], strides = [1, 1]} : vector<2x8xf32> to vector<1x8xf32>
    %cst_27 = arith.constant 0.000000e+00 : f32
    %50 = vector.broadcast %cst_27 : f32 to vector<2x8xf32>
    %cst_28 = arith.constant 0.000000e+00 : f32
    %51 = vector.broadcast %cst_28 : f32 to vector<2x8xf32>
    %52 = tpu.concatenate %50, %48, %51 in 0 : vector<2x8xf32>, vector<64x8xf32>, vector<2x8xf32> -> vector<68x8xf32>
    %53 = vector.extract_strided_slice %52 {offsets = [0, 0], sizes = [64, 8], strides = [1, 1]} : vector<68x8xf32> to vector<64x8xf32>
    %c0_29 = arith.constant 0 : index
    %c0_30 = arith.constant 0 : index
    %c0_31 = arith.constant 0 : index
    %54 = vector.load %arg4[%c0_29, %c0_30, %c0_31] : memref<10x8x8xbf16, #tpu.memory_space<vmem>>, vector<1x8x8xbf16>
    %55 = vector.shape_cast %54 : vector<1x8x8xbf16> to vector<8x8xbf16>
    %56 = arith.truncf %53 : vector<64x8xf32> to vector<64x8xbf16>
    %cst_32 = arith.constant dense<0.000000e+00> : vector<64x8xf32>
    %57 = tpu.matmul %56, %55, %cst_32 {dimension_numbers = #tpu.dot_dimension_numbers<[1], [0], [0], [1], [0, 0, 1, 1], [], []>} : vector<64x8xbf16>, vector<8x8xbf16>, vector<64x8xf32> -> vector<64x8xf32>
    %58 = vector.broadcast %49 : vector<1x8xf32> to vector<64x8xf32>
    %59 = arith.addf %58, %57 : vector<64x8xf32>
    %60 = vector.extract_strided_slice %52 {offsets = [1, 0], sizes = [64, 8], strides = [1, 1]} : vector<68x8xf32> to vector<64x8xf32>
    %c1_33 = arith.constant 1 : index
    %c0_34 = arith.constant 0 : index
    %c0_35 = arith.constant 0 : index
    %61 = vector.load %arg4[%c1_33, %c0_34, %c0_35] : memref<10x8x8xbf16, #tpu.memory_space<vmem>>, vector<1x8x8xbf16>
    %62 = vector.shape_cast %61 : vector<1x8x8xbf16> to vector<8x8xbf16>
    %63 = arith.truncf %60 : vector<64x8xf32> to vector<64x8xbf16>
    %cst_36 = arith.constant dense<0.000000e+00> : vector<64x8xf32>
    %64 = tpu.matmul %63, %62, %cst_36 {dimension_numbers = #tpu.dot_dimension_numbers<[1], [0], [0], [1], [0, 0, 1, 1], [], []>} : vector<64x8xbf16>, vector<8x8xbf16>, vector<64x8xf32> -> vector<64x8xf32>
    %65 = arith.addf %59, %64 : vector<64x8xf32>
    %66 = vector.extract_strided_slice %52 {offsets = [2, 0], sizes = [64, 8], strides = [1, 1]} : vector<68x8xf32> to vector<64x8xf32>
    %c2_37 = arith.constant 2 : index
    %c0_38 = arith.constant 0 : index
    %c0_39 = arith.constant 0 : index
    %67 = vector.load %arg4[%c2_37, %c0_38, %c0_39] : memref<10x8x8xbf16, #tpu.memory_space<vmem>>, vector<1x8x8xbf16>
    %68 = vector.shape_cast %67 : vector<1x8x8xbf16> to vector<8x8xbf16>
    %69 = arith.truncf %66 : vector<64x8xf32> to vector<64x8xbf16>
    %cst_40 = arith.constant dense<0.000000e+00> : vector<64x8xf32>
    %70 = tpu.matmul %69, %68, %cst_40 {dimension_numbers = #tpu.dot_dimension_numbers<[1], [0], [0], [1], [0, 0, 1, 1], [], []>} : vector<64x8xbf16>, vector<8x8xbf16>, vector<64x8xf32> -> vector<64x8xf32>
    %71 = arith.addf %65, %70 : vector<64x8xf32>
    %72 = vector.extract_strided_slice %52 {offsets = [3, 0], sizes = [64, 8], strides = [1, 1]} : vector<68x8xf32> to vector<64x8xf32>
    %c3_41 = arith.constant 3 : index
    %c0_42 = arith.constant 0 : index
    %c0_43 = arith.constant 0 : index
    %73 = vector.load %arg4[%c3_41, %c0_42, %c0_43] : memref<10x8x8xbf16, #tpu.memory_space<vmem>>, vector<1x8x8xbf16>
    %74 = vector.shape_cast %73 : vector<1x8x8xbf16> to vector<8x8xbf16>
    %75 = arith.truncf %72 : vector<64x8xf32> to vector<64x8xbf16>
    %cst_44 = arith.constant dense<0.000000e+00> : vector<64x8xf32>
    %76 = tpu.matmul %75, %74, %cst_44 {dimension_numbers = #tpu.dot_dimension_numbers<[1], [0], [0], [1], [0, 0, 1, 1], [], []>} : vector<64x8xbf16>, vector<8x8xbf16>, vector<64x8xf32> -> vector<64x8xf32>
    %77 = arith.addf %71, %76 : vector<64x8xf32>
    %78 = vector.extract_strided_slice %52 {offsets = [4, 0], sizes = [64, 8], strides = [1, 1]} : vector<68x8xf32> to vector<64x8xf32>
    %c4_45 = arith.constant 4 : index
    %c0_46 = arith.constant 0 : index
    %c0_47 = arith.constant 0 : index
    %79 = vector.load %arg4[%c4_45, %c0_46, %c0_47] : memref<10x8x8xbf16, #tpu.memory_space<vmem>>, vector<1x8x8xbf16>
    %80 = vector.shape_cast %79 : vector<1x8x8xbf16> to vector<8x8xbf16>
    %81 = arith.truncf %78 : vector<64x8xf32> to vector<64x8xbf16>
    %cst_48 = arith.constant dense<0.000000e+00> : vector<64x8xf32>
    %82 = tpu.matmul %81, %80, %cst_48 {dimension_numbers = #tpu.dot_dimension_numbers<[1], [0], [0], [1], [0, 0, 1, 1], [], []>} : vector<64x8xbf16>, vector<8x8xbf16>, vector<64x8xf32> -> vector<64x8xf32>
    %83 = arith.addf %77, %82 : vector<64x8xf32>
    %84 = arith.addf %83, %1 : vector<64x8xf32>
    %cst_49 = arith.constant 0.000000e+00 : f32
    %85 = vector.broadcast %cst_49 : f32 to vector<64x8xf32>
    %86 = arith.cmpf oge, %84, %85 : vector<64x8xf32>
    %cst_50 = arith.constant 1.000000e-01 : f32
    %87 = vector.broadcast %cst_50 : f32 to vector<64x8xf32>
    %88 = arith.mulf %84, %87 : vector<64x8xf32>
    %89 = arith.select %86, %84, %88 : vector<64x8xi1>, vector<64x8xf32>
    %90 = vector.extract_strided_slice %2 {offsets = [1, 0], sizes = [1, 8], strides = [1, 1]} : vector<2x8xf32> to vector<1x8xf32>
    %cst_51 = arith.constant 0.000000e+00 : f32
    %91 = vector.broadcast %cst_51 : f32 to vector<6x8xf32>
    %cst_52 = arith.constant 0.000000e+00 : f32
    %92 = vector.broadcast %cst_52 : f32 to vector<6x8xf32>
    %93 = tpu.concatenate %91, %89, %92 in 0 : vector<6x8xf32>, vector<64x8xf32>, vector<6x8xf32> -> vector<76x8xf32>
    %94 = vector.extract_strided_slice %93 {offsets = [0, 0], sizes = [64, 8], strides = [1, 1]} : vector<76x8xf32> to vector<64x8xf32>
    %c5 = arith.constant 5 : index
    %c0_53 = arith.constant 0 : index
    %c0_54 = arith.constant 0 : index
    %95 = vector.load %arg2[%c5, %c0_53, %c0_54] : memref<10x8x8xbf16, #tpu.memory_space<vmem>>, vector<1x8x8xbf16>
    %96 = vector.shape_cast %95 : vector<1x8x8xbf16> to vector<8x8xbf16>
    %97 = arith.truncf %94 : vector<64x8xf32> to vector<64x8xbf16>
    %cst_55 = arith.constant dense<0.000000e+00> : vector<64x8xf32>
    %98 = tpu.matmul %97, %96, %cst_55 {dimension_numbers = #tpu.dot_dimension_numbers<[1], [0], [0], [1], [0, 0, 1, 1], [], []>} : vector<64x8xbf16>, vector<8x8xbf16>, vector<64x8xf32> -> vector<64x8xf32>
    %99 = vector.broadcast %90 : vector<1x8xf32> to vector<64x8xf32>
    %100 = arith.addf %99, %98 : vector<64x8xf32>
    %101 = vector.extract_strided_slice %93 {offsets = [3, 0], sizes = [64, 8], strides = [1, 1]} : vector<76x8xf32> to vector<64x8xf32>
    %c6 = arith.constant 6 : index
    %c0_56 = arith.constant 0 : index
    %c0_57 = arith.constant 0 : index
    %102 = vector.load %arg2[%c6, %c0_56, %c0_57] : memref<10x8x8xbf16, #tpu.memory_space<vmem>>, vector<1x8x8xbf16>
    %103 = vector.shape_cast %102 : vector<1x8x8xbf16> to vector<8x8xbf16>
    %104 = arith.truncf %101 : vector<64x8xf32> to vector<64x8xbf16>
    %cst_58 = arith.constant dense<0.000000e+00> : vector<64x8xf32>
    %105 = tpu.matmul %104, %103, %cst_58 {dimension_numbers = #tpu.dot_dimension_numbers<[1], [0], [0], [1], [0, 0, 1, 1], [], []>} : vector<64x8xbf16>, vector<8x8xbf16>, vector<64x8xf32> -> vector<64x8xf32>
    %106 = arith.addf %100, %105 : vector<64x8xf32>
    %107 = vector.extract_strided_slice %93 {offsets = [6, 0], sizes = [64, 8], strides = [1, 1]} : vector<76x8xf32> to vector<64x8xf32>
    %c7 = arith.constant 7 : index
    %c0_59 = arith.constant 0 : index
    %c0_60 = arith.constant 0 : index
    %108 = vector.load %arg2[%c7, %c0_59, %c0_60] : memref<10x8x8xbf16, #tpu.memory_space<vmem>>, vector<1x8x8xbf16>
    %109 = vector.shape_cast %108 : vector<1x8x8xbf16> to vector<8x8xbf16>
    %110 = arith.truncf %107 : vector<64x8xf32> to vector<64x8xbf16>
    %cst_61 = arith.constant dense<0.000000e+00> : vector<64x8xf32>
    %111 = tpu.matmul %110, %109, %cst_61 {dimension_numbers = #tpu.dot_dimension_numbers<[1], [0], [0], [1], [0, 0, 1, 1], [], []>} : vector<64x8xbf16>, vector<8x8xbf16>, vector<64x8xf32> -> vector<64x8xf32>
    %112 = arith.addf %106, %111 : vector<64x8xf32>
    %113 = vector.extract_strided_slice %93 {offsets = [9, 0], sizes = [64, 8], strides = [1, 1]} : vector<76x8xf32> to vector<64x8xf32>
    %c8 = arith.constant 8 : index
    %c0_62 = arith.constant 0 : index
    %c0_63 = arith.constant 0 : index
    %114 = vector.load %arg2[%c8, %c0_62, %c0_63] : memref<10x8x8xbf16, #tpu.memory_space<vmem>>, vector<1x8x8xbf16>
    %115 = vector.shape_cast %114 : vector<1x8x8xbf16> to vector<8x8xbf16>
    %116 = arith.truncf %113 : vector<64x8xf32> to vector<64x8xbf16>
    %cst_64 = arith.constant dense<0.000000e+00> : vector<64x8xf32>
    %117 = tpu.matmul %116, %115, %cst_64 {dimension_numbers = #tpu.dot_dimension_numbers<[1], [0], [0], [1], [0, 0, 1, 1], [], []>} : vector<64x8xbf16>, vector<8x8xbf16>, vector<64x8xf32> -> vector<64x8xf32>
    %118 = arith.addf %112, %117 : vector<64x8xf32>
    %119 = vector.extract_strided_slice %93 {offsets = [12, 0], sizes = [64, 8], strides = [1, 1]} : vector<76x8xf32> to vector<64x8xf32>
    %c9 = arith.constant 9 : index
    %c0_65 = arith.constant 0 : index
    %c0_66 = arith.constant 0 : index
    %120 = vector.load %arg2[%c9, %c0_65, %c0_66] : memref<10x8x8xbf16, #tpu.memory_space<vmem>>, vector<1x8x8xbf16>
    %121 = vector.shape_cast %120 : vector<1x8x8xbf16> to vector<8x8xbf16>
    %122 = arith.truncf %119 : vector<64x8xf32> to vector<64x8xbf16>
    %cst_67 = arith.constant dense<0.000000e+00> : vector<64x8xf32>
    %123 = tpu.matmul %122, %121, %cst_67 {dimension_numbers = #tpu.dot_dimension_numbers<[1], [0], [0], [1], [0, 0, 1, 1], [], []>} : vector<64x8xbf16>, vector<8x8xbf16>, vector<64x8xf32> -> vector<64x8xf32>
    %124 = arith.addf %118, %123 : vector<64x8xf32>
    %cst_68 = arith.constant 0.000000e+00 : f32
    %125 = vector.broadcast %cst_68 : f32 to vector<64x8xf32>
    %126 = arith.cmpf oge, %124, %125 : vector<64x8xf32>
    %cst_69 = arith.constant 1.000000e-01 : f32
    %127 = vector.broadcast %cst_69 : f32 to vector<64x8xf32>
    %128 = arith.mulf %124, %127 : vector<64x8xf32>
    %129 = arith.select %126, %124, %128 : vector<64x8xi1>, vector<64x8xf32>
    %130 = vector.extract_strided_slice %3 {offsets = [1, 0], sizes = [1, 8], strides = [1, 1]} : vector<2x8xf32> to vector<1x8xf32>
    %cst_70 = arith.constant 0.000000e+00 : f32
    %131 = vector.broadcast %cst_70 : f32 to vector<2x8xf32>
    %cst_71 = arith.constant 0.000000e+00 : f32
    %132 = vector.broadcast %cst_71 : f32 to vector<2x8xf32>
    %133 = tpu.concatenate %131, %129, %132 in 0 : vector<2x8xf32>, vector<64x8xf32>, vector<2x8xf32> -> vector<68x8xf32>
    %134 = vector.extract_strided_slice %133 {offsets = [0, 0], sizes = [64, 8], strides = [1, 1]} : vector<68x8xf32> to vector<64x8xf32>
    %c5_72 = arith.constant 5 : index
    %c0_73 = arith.constant 0 : index
    %c0_74 = arith.constant 0 : index
    %135 = vector.load %arg4[%c5_72, %c0_73, %c0_74] : memref<10x8x8xbf16, #tpu.memory_space<vmem>>, vector<1x8x8xbf16>
    %136 = vector.shape_cast %135 : vector<1x8x8xbf16> to vector<8x8xbf16>
    %137 = arith.truncf %134 : vector<64x8xf32> to vector<64x8xbf16>
    %cst_75 = arith.constant dense<0.000000e+00> : vector<64x8xf32>
    %138 = tpu.matmul %137, %136, %cst_75 {dimension_numbers = #tpu.dot_dimension_numbers<[1], [0], [0], [1], [0, 0, 1, 1], [], []>} : vector<64x8xbf16>, vector<8x8xbf16>, vector<64x8xf32> -> vector<64x8xf32>
    %139 = vector.broadcast %130 : vector<1x8xf32> to vector<64x8xf32>
    %140 = arith.addf %139, %138 : vector<64x8xf32>
    %141 = vector.extract_strided_slice %133 {offsets = [1, 0], sizes = [64, 8], strides = [1, 1]} : vector<68x8xf32> to vector<64x8xf32>
    %c6_76 = arith.constant 6 : index
    %c0_77 = arith.constant 0 : index
    %c0_78 = arith.constant 0 : index
    %142 = vector.load %arg4[%c6_76, %c0_77, %c0_78] : memref<10x8x8xbf16, #tpu.memory_space<vmem>>, vector<1x8x8xbf16>
    %143 = vector.shape_cast %142 : vector<1x8x8xbf16> to vector<8x8xbf16>
    %144 = arith.truncf %141 : vector<64x8xf32> to vector<64x8xbf16>
    %cst_79 = arith.constant dense<0.000000e+00> : vector<64x8xf32>
    %145 = tpu.matmul %144, %143, %cst_79 {dimension_numbers = #tpu.dot_dimension_numbers<[1], [0], [0], [1], [0, 0, 1, 1], [], []>} : vector<64x8xbf16>, vector<8x8xbf16>, vector<64x8xf32> -> vector<64x8xf32>
    %146 = arith.addf %140, %145 : vector<64x8xf32>
    %147 = vector.extract_strided_slice %133 {offsets = [2, 0], sizes = [64, 8], strides = [1, 1]} : vector<68x8xf32> to vector<64x8xf32>
    %c7_80 = arith.constant 7 : index
    %c0_81 = arith.constant 0 : index
    %c0_82 = arith.constant 0 : index
    %148 = vector.load %arg4[%c7_80, %c0_81, %c0_82] : memref<10x8x8xbf16, #tpu.memory_space<vmem>>, vector<1x8x8xbf16>
    %149 = vector.shape_cast %148 : vector<1x8x8xbf16> to vector<8x8xbf16>
    %150 = arith.truncf %147 : vector<64x8xf32> to vector<64x8xbf16>
    %cst_83 = arith.constant dense<0.000000e+00> : vector<64x8xf32>
    %151 = tpu.matmul %150, %149, %cst_83 {dimension_numbers = #tpu.dot_dimension_numbers<[1], [0], [0], [1], [0, 0, 1, 1], [], []>} : vector<64x8xbf16>, vector<8x8xbf16>, vector<64x8xf32> -> vector<64x8xf32>
    %152 = arith.addf %146, %151 : vector<64x8xf32>
    %153 = vector.extract_strided_slice %133 {offsets = [3, 0], sizes = [64, 8], strides = [1, 1]} : vector<68x8xf32> to vector<64x8xf32>
    %c8_84 = arith.constant 8 : index
    %c0_85 = arith.constant 0 : index
    %c0_86 = arith.constant 0 : index
    %154 = vector.load %arg4[%c8_84, %c0_85, %c0_86] : memref<10x8x8xbf16, #tpu.memory_space<vmem>>, vector<1x8x8xbf16>
    %155 = vector.shape_cast %154 : vector<1x8x8xbf16> to vector<8x8xbf16>
    %156 = arith.truncf %153 : vector<64x8xf32> to vector<64x8xbf16>
    %cst_87 = arith.constant dense<0.000000e+00> : vector<64x8xf32>
    %157 = tpu.matmul %156, %155, %cst_87 {dimension_numbers = #tpu.dot_dimension_numbers<[1], [0], [0], [1], [0, 0, 1, 1], [], []>} : vector<64x8xbf16>, vector<8x8xbf16>, vector<64x8xf32> -> vector<64x8xf32>
    %158 = arith.addf %152, %157 : vector<64x8xf32>
    %159 = vector.extract_strided_slice %133 {offsets = [4, 0], sizes = [64, 8], strides = [1, 1]} : vector<68x8xf32> to vector<64x8xf32>
    %c9_88 = arith.constant 9 : index
    %c0_89 = arith.constant 0 : index
    %c0_90 = arith.constant 0 : index
    %160 = vector.load %arg4[%c9_88, %c0_89, %c0_90] : memref<10x8x8xbf16, #tpu.memory_space<vmem>>, vector<1x8x8xbf16>
    %161 = vector.shape_cast %160 : vector<1x8x8xbf16> to vector<8x8xbf16>
    %162 = arith.truncf %159 : vector<64x8xf32> to vector<64x8xbf16>
    %cst_91 = arith.constant dense<0.000000e+00> : vector<64x8xf32>
    %163 = tpu.matmul %162, %161, %cst_91 {dimension_numbers = #tpu.dot_dimension_numbers<[1], [0], [0], [1], [0, 0, 1, 1], [], []>} : vector<64x8xbf16>, vector<8x8xbf16>, vector<64x8xf32> -> vector<64x8xf32>
    %164 = arith.addf %158, %163 : vector<64x8xf32>
    %165 = arith.addf %164, %84 : vector<64x8xf32>
    %c0_92 = arith.constant 0 : index
    %c0_93 = arith.constant 0 : index
    %c0_94 = arith.constant 0 : index
    %166 = vector.load %arg6[%c0_92, %c0_93, %c0_94] : memref<1x64x8xf32, #tpu.memory_space<vmem>>, vector<1x64x8xf32>
    %167 = vector.shape_cast %166 : vector<1x64x8xf32> to vector<64x8xf32>
    %168 = vector.shape_cast %165 : vector<64x8xf32> to vector<1x64x8xf32>
    tpu.vector_store %arg6[%c0_92, %c0_93, %c0_94], %168 {strides = array<i32>} : memref<1x64x8xf32, #tpu.memory_space<vmem>>, vector<1x64x8xf32>,
    return
  }
  func.func @transform_0(%arg0: i32) -> (i32, i32, i32) {
    %c0_i32 = arith.constant 0 : i32
    %c0_i32_0 = arith.constant 0 : i32
    %c0_i32_1 = arith.constant 0 : i32
    return %arg0, %c0_i32, %c0_i32_0 : i32, i32, i32
  }
  func.func @transform_1(%arg0: i32) -> (i32, i32, i32) {
    %c0_i32 = arith.constant 0 : i32
    %c0_i32_0 = arith.constant 0 : i32
    %c0_i32_1 = arith.constant 0 : i32
    %c0_i32_2 = arith.constant 0 : i32
    return %c0_i32, %c0_i32_0, %c0_i32_1 : i32, i32, i32
  }
  func.func @transform_2(%arg0: i32) -> (i32, i32) {
    %c0_i32 = arith.constant 0 : i32
    %c0_i32_0 = arith.constant 0 : i32
    %c0_i32_1 = arith.constant 0 : i32
    return %c0_i32, %c0_i32_0 : i32, i32
  }
  func.func @transform_3(%arg0: i32) -> (i32, i32, i32) {
    %c0_i32 = arith.constant 0 : i32
    %c0_i32_0 = arith.constant 0 : i32
    %c0_i32_1 = arith.constant 0 : i32
    %c0_i32_2 = arith.constant 0 : i32
    return %c0_i32, %c0_i32_0, %c0_i32_1 : i32, i32, i32
  }
  func.func @transform_4(%arg0: i32) -> (i32, i32) {
    %c0_i32 = arith.constant 0 : i32
    %c0_i32_0 = arith.constant 0 : i32
    %c0_i32_1 = arith.constant 0 : i32
    return %c0_i32, %c0_i32_0 : i32, i32
  }
  func.func @transform_5(%arg0: i32) -> (i32, i32, i32) {
    %c0_i32 = arith.constant 0 : i32
    %c0_i32_0 = arith.constant 0 : i32
    %c0_i32_1 = arith.constant 0 : i32
    return %arg0, %c0_i32, %c0_i32_0 : i32, i32, i32
  }
}

module attributes {stable_mosaic.version = 11 : i64} {
  func.func @_resblock1_kernel(%arg0: i32, %arg1: memref<1x64x8xf32, #tpu.memory_space<vmem>>, %arg2: memref<6x8x8xbf16, #tpu.memory_space<vmem>>, %arg3: memref<2x8xf32, #tpu.memory_space<vmem>>, %arg4: memref<6x8x8xbf16, #tpu.memory_space<vmem>>, %arg5: memref<2x8xf32, #tpu.memory_space<vmem>>, %arg6: memref<1x64x8xf32, #tpu.memory_space<vmem>>) attributes {dimension_semantics = [#tpu.dimension_semantics<parallel>], iteration_bounds = array<i64: 2>, scalar_prefetch = 0 : i64, scratch_operands = 0 : i64, tpu.core_type = #tpu.core_type<tc>, window_params = [{transform_indices = @transform_0, window_bounds = array<i64: 1, 64, 8>}, {pipeline_mode = #tpu.pipeline_mode<synchronous>, transform_indices = @transform_1, window_bounds = array<i64: 6, 8, 8>}, {pipeline_mode = #tpu.pipeline_mode<synchronous>, transform_indices = @transform_2, window_bounds = array<i64: 2, 8>}, {pipeline_mode = #tpu.pipeline_mode<synchronous>, transform_indices = @transform_3, window_bounds = array<i64: 6, 8, 8>}, {pipeline_mode = #tpu.pipeline_mode<synchronous>, transform_indices = @transform_4, window_bounds = array<i64: 2, 8>}, {transform_indices = @transform_5, window_bounds = array<i64: 1, 64, 8>}]} {
    %c0 = arith.constant 0 : index
    %c0_0 = arith.constant 0 : index
    %c0_1 = arith.constant 0 : index
    %0 = vector.load %arg1[%c0, %c0_0, %c0_1] : memref<1x64x8xf32, #tpu.memory_space<vmem>>, vector<1x64x8xf32>
    %1 = vector.shape_cast %0 : vector<1x64x8xf32> to vector<64x8xf32>
    %c0_2 = arith.constant 0 : index
    %c0_3 = arith.constant 0 : index
    %2 = vector.load %arg3[%c0_2, %c0_3] : memref<2x8xf32, #tpu.memory_space<vmem>>, vector<2x8xf32>
    %c0_4 = arith.constant 0 : index
    %c0_5 = arith.constant 0 : index
    %3 = vector.load %arg5[%c0_4, %c0_5] : memref<2x8xf32, #tpu.memory_space<vmem>>, vector<2x8xf32>
    %cst = arith.constant 0.000000e+00 : f32
    %4 = vector.broadcast %cst : f32 to vector<64x8xf32>
    %5 = arith.cmpf oge, %1, %4 : vector<64x8xf32>
    %cst_6 = arith.constant 1.000000e-01 : f32
    %6 = vector.broadcast %cst_6 : f32 to vector<64x8xf32>
    %7 = arith.mulf %1, %6 : vector<64x8xf32>
    %8 = arith.select %5, %1, %7 : vector<64x8xi1>, vector<64x8xf32>
    %9 = vector.extract_strided_slice %2 {offsets = [0, 0], sizes = [1, 8], strides = [1, 1]} : vector<2x8xf32> to vector<1x8xf32>
    %cst_7 = arith.constant 0.000000e+00 : f32
    %10 = vector.broadcast %cst_7 : f32 to vector<1x8xf32>
    %cst_8 = arith.constant 0.000000e+00 : f32
    %11 = vector.broadcast %cst_8 : f32 to vector<1x8xf32>
    %12 = tpu.concatenate %10, %8, %11 in 0 : vector<1x8xf32>, vector<64x8xf32>, vector<1x8xf32> -> vector<66x8xf32>
    %13 = vector.extract_strided_slice %12 {offsets = [0, 0], sizes = [64, 8], strides = [1, 1]} : vector<66x8xf32> to vector<64x8xf32>
    %c0_9 = arith.constant 0 : index
    %c0_10 = arith.constant 0 : index
    %c0_11 = arith.constant 0 : index
    %14 = vector.load %arg2[%c0_9, %c0_10, %c0_11] : memref<6x8x8xbf16, #tpu.memory_space<vmem>>, vector<1x8x8xbf16>
    %15 = vector.shape_cast %14 : vector<1x8x8xbf16> to vector<8x8xbf16>
    %16 = arith.truncf %13 : vector<64x8xf32> to vector<64x8xbf16>
    %cst_12 = arith.constant dense<0.000000e+00> : vector<64x8xf32>
    %17 = tpu.matmul %16, %15, %cst_12 {dimension_numbers = #tpu.dot_dimension_numbers<[1], [0], [0], [1], [0, 0, 1, 1], [], []>} : vector<64x8xbf16>, vector<8x8xbf16>, vector<64x8xf32> -> vector<64x8xf32>
    %18 = vector.broadcast %9 : vector<1x8xf32> to vector<64x8xf32>
    %19 = arith.addf %18, %17 : vector<64x8xf32>
    %20 = vector.extract_strided_slice %12 {offsets = [1, 0], sizes = [64, 8], strides = [1, 1]} : vector<66x8xf32> to vector<64x8xf32>
    %c1 = arith.constant 1 : index
    %c0_13 = arith.constant 0 : index
    %c0_14 = arith.constant 0 : index
    %21 = vector.load %arg2[%c1, %c0_13, %c0_14] : memref<6x8x8xbf16, #tpu.memory_space<vmem>>, vector<1x8x8xbf16>
    %22 = vector.shape_cast %21 : vector<1x8x8xbf16> to vector<8x8xbf16>
    %23 = arith.truncf %20 : vector<64x8xf32> to vector<64x8xbf16>
    %cst_15 = arith.constant dense<0.000000e+00> : vector<64x8xf32>
    %24 = tpu.matmul %23, %22, %cst_15 {dimension_numbers = #tpu.dot_dimension_numbers<[1], [0], [0], [1], [0, 0, 1, 1], [], []>} : vector<64x8xbf16>, vector<8x8xbf16>, vector<64x8xf32> -> vector<64x8xf32>
    %25 = arith.addf %19, %24 : vector<64x8xf32>
    %26 = vector.extract_strided_slice %12 {offsets = [2, 0], sizes = [64, 8], strides = [1, 1]} : vector<66x8xf32> to vector<64x8xf32>
    %c2 = arith.constant 2 : index
    %c0_16 = arith.constant 0 : index
    %c0_17 = arith.constant 0 : index
    %27 = vector.load %arg2[%c2, %c0_16, %c0_17] : memref<6x8x8xbf16, #tpu.memory_space<vmem>>, vector<1x8x8xbf16>
    %28 = vector.shape_cast %27 : vector<1x8x8xbf16> to vector<8x8xbf16>
    %29 = arith.truncf %26 : vector<64x8xf32> to vector<64x8xbf16>
    %cst_18 = arith.constant dense<0.000000e+00> : vector<64x8xf32>
    %30 = tpu.matmul %29, %28, %cst_18 {dimension_numbers = #tpu.dot_dimension_numbers<[1], [0], [0], [1], [0, 0, 1, 1], [], []>} : vector<64x8xbf16>, vector<8x8xbf16>, vector<64x8xf32> -> vector<64x8xf32>
    %31 = arith.addf %25, %30 : vector<64x8xf32>
    %cst_19 = arith.constant 0.000000e+00 : f32
    %32 = vector.broadcast %cst_19 : f32 to vector<64x8xf32>
    %33 = arith.cmpf oge, %31, %32 : vector<64x8xf32>
    %cst_20 = arith.constant 1.000000e-01 : f32
    %34 = vector.broadcast %cst_20 : f32 to vector<64x8xf32>
    %35 = arith.mulf %31, %34 : vector<64x8xf32>
    %36 = arith.select %33, %31, %35 : vector<64x8xi1>, vector<64x8xf32>
    %37 = vector.extract_strided_slice %3 {offsets = [0, 0], sizes = [1, 8], strides = [1, 1]} : vector<2x8xf32> to vector<1x8xf32>
    %cst_21 = arith.constant 0.000000e+00 : f32
    %38 = vector.broadcast %cst_21 : f32 to vector<1x8xf32>
    %cst_22 = arith.constant 0.000000e+00 : f32
    %39 = vector.broadcast %cst_22 : f32 to vector<1x8xf32>
    %40 = tpu.concatenate %38, %36, %39 in 0 : vector<1x8xf32>, vector<64x8xf32>, vector<1x8xf32> -> vector<66x8xf32>
    %41 = vector.extract_strided_slice %40 {offsets = [0, 0], sizes = [64, 8], strides = [1, 1]} : vector<66x8xf32> to vector<64x8xf32>
    %c0_23 = arith.constant 0 : index
    %c0_24 = arith.constant 0 : index
    %c0_25 = arith.constant 0 : index
    %42 = vector.load %arg4[%c0_23, %c0_24, %c0_25] : memref<6x8x8xbf16, #tpu.memory_space<vmem>>, vector<1x8x8xbf16>
    %43 = vector.shape_cast %42 : vector<1x8x8xbf16> to vector<8x8xbf16>
    %44 = arith.truncf %41 : vector<64x8xf32> to vector<64x8xbf16>
    %cst_26 = arith.constant dense<0.000000e+00> : vector<64x8xf32>
    %45 = tpu.matmul %44, %43, %cst_26 {dimension_numbers = #tpu.dot_dimension_numbers<[1], [0], [0], [1], [0, 0, 1, 1], [], []>} : vector<64x8xbf16>, vector<8x8xbf16>, vector<64x8xf32> -> vector<64x8xf32>
    %46 = vector.broadcast %37 : vector<1x8xf32> to vector<64x8xf32>
    %47 = arith.addf %46, %45 : vector<64x8xf32>
    %48 = vector.extract_strided_slice %40 {offsets = [1, 0], sizes = [64, 8], strides = [1, 1]} : vector<66x8xf32> to vector<64x8xf32>
    %c1_27 = arith.constant 1 : index
    %c0_28 = arith.constant 0 : index
    %c0_29 = arith.constant 0 : index
    %49 = vector.load %arg4[%c1_27, %c0_28, %c0_29] : memref<6x8x8xbf16, #tpu.memory_space<vmem>>, vector<1x8x8xbf16>
    %50 = vector.shape_cast %49 : vector<1x8x8xbf16> to vector<8x8xbf16>
    %51 = arith.truncf %48 : vector<64x8xf32> to vector<64x8xbf16>
    %cst_30 = arith.constant dense<0.000000e+00> : vector<64x8xf32>
    %52 = tpu.matmul %51, %50, %cst_30 {dimension_numbers = #tpu.dot_dimension_numbers<[1], [0], [0], [1], [0, 0, 1, 1], [], []>} : vector<64x8xbf16>, vector<8x8xbf16>, vector<64x8xf32> -> vector<64x8xf32>
    %53 = arith.addf %47, %52 : vector<64x8xf32>
    %54 = vector.extract_strided_slice %40 {offsets = [2, 0], sizes = [64, 8], strides = [1, 1]} : vector<66x8xf32> to vector<64x8xf32>
    %c2_31 = arith.constant 2 : index
    %c0_32 = arith.constant 0 : index
    %c0_33 = arith.constant 0 : index
    %55 = vector.load %arg4[%c2_31, %c0_32, %c0_33] : memref<6x8x8xbf16, #tpu.memory_space<vmem>>, vector<1x8x8xbf16>
    %56 = vector.shape_cast %55 : vector<1x8x8xbf16> to vector<8x8xbf16>
    %57 = arith.truncf %54 : vector<64x8xf32> to vector<64x8xbf16>
    %cst_34 = arith.constant dense<0.000000e+00> : vector<64x8xf32>
    %58 = tpu.matmul %57, %56, %cst_34 {dimension_numbers = #tpu.dot_dimension_numbers<[1], [0], [0], [1], [0, 0, 1, 1], [], []>} : vector<64x8xbf16>, vector<8x8xbf16>, vector<64x8xf32> -> vector<64x8xf32>
    %59 = arith.addf %53, %58 : vector<64x8xf32>
    %60 = arith.addf %59, %1 : vector<64x8xf32>
    %cst_35 = arith.constant 0.000000e+00 : f32
    %61 = vector.broadcast %cst_35 : f32 to vector<64x8xf32>
    %62 = arith.cmpf oge, %60, %61 : vector<64x8xf32>
    %cst_36 = arith.constant 1.000000e-01 : f32
    %63 = vector.broadcast %cst_36 : f32 to vector<64x8xf32>
    %64 = arith.mulf %60, %63 : vector<64x8xf32>
    %65 = arith.select %62, %60, %64 : vector<64x8xi1>, vector<64x8xf32>
    %66 = vector.extract_strided_slice %2 {offsets = [1, 0], sizes = [1, 8], strides = [1, 1]} : vector<2x8xf32> to vector<1x8xf32>
    %cst_37 = arith.constant 0.000000e+00 : f32
    %67 = vector.broadcast %cst_37 : f32 to vector<3x8xf32>
    %cst_38 = arith.constant 0.000000e+00 : f32
    %68 = vector.broadcast %cst_38 : f32 to vector<3x8xf32>
    %69 = tpu.concatenate %67, %65, %68 in 0 : vector<3x8xf32>, vector<64x8xf32>, vector<3x8xf32> -> vector<70x8xf32>
    %70 = vector.extract_strided_slice %69 {offsets = [0, 0], sizes = [64, 8], strides = [1, 1]} : vector<70x8xf32> to vector<64x8xf32>
    %c3 = arith.constant 3 : index
    %c0_39 = arith.constant 0 : index
    %c0_40 = arith.constant 0 : index
    %71 = vector.load %arg2[%c3, %c0_39, %c0_40] : memref<6x8x8xbf16, #tpu.memory_space<vmem>>, vector<1x8x8xbf16>
    %72 = vector.shape_cast %71 : vector<1x8x8xbf16> to vector<8x8xbf16>
    %73 = arith.truncf %70 : vector<64x8xf32> to vector<64x8xbf16>
    %cst_41 = arith.constant dense<0.000000e+00> : vector<64x8xf32>
    %74 = tpu.matmul %73, %72, %cst_41 {dimension_numbers = #tpu.dot_dimension_numbers<[1], [0], [0], [1], [0, 0, 1, 1], [], []>} : vector<64x8xbf16>, vector<8x8xbf16>, vector<64x8xf32> -> vector<64x8xf32>
    %75 = vector.broadcast %66 : vector<1x8xf32> to vector<64x8xf32>
    %76 = arith.addf %75, %74 : vector<64x8xf32>
    %77 = vector.extract_strided_slice %69 {offsets = [3, 0], sizes = [64, 8], strides = [1, 1]} : vector<70x8xf32> to vector<64x8xf32>
    %c4 = arith.constant 4 : index
    %c0_42 = arith.constant 0 : index
    %c0_43 = arith.constant 0 : index
    %78 = vector.load %arg2[%c4, %c0_42, %c0_43] : memref<6x8x8xbf16, #tpu.memory_space<vmem>>, vector<1x8x8xbf16>
    %79 = vector.shape_cast %78 : vector<1x8x8xbf16> to vector<8x8xbf16>
    %80 = arith.truncf %77 : vector<64x8xf32> to vector<64x8xbf16>
    %cst_44 = arith.constant dense<0.000000e+00> : vector<64x8xf32>
    %81 = tpu.matmul %80, %79, %cst_44 {dimension_numbers = #tpu.dot_dimension_numbers<[1], [0], [0], [1], [0, 0, 1, 1], [], []>} : vector<64x8xbf16>, vector<8x8xbf16>, vector<64x8xf32> -> vector<64x8xf32>
    %82 = arith.addf %76, %81 : vector<64x8xf32>
    %83 = vector.extract_strided_slice %69 {offsets = [6, 0], sizes = [64, 8], strides = [1, 1]} : vector<70x8xf32> to vector<64x8xf32>
    %c5 = arith.constant 5 : index
    %c0_45 = arith.constant 0 : index
    %c0_46 = arith.constant 0 : index
    %84 = vector.load %arg2[%c5, %c0_45, %c0_46] : memref<6x8x8xbf16, #tpu.memory_space<vmem>>, vector<1x8x8xbf16>
    %85 = vector.shape_cast %84 : vector<1x8x8xbf16> to vector<8x8xbf16>
    %86 = arith.truncf %83 : vector<64x8xf32> to vector<64x8xbf16>
    %cst_47 = arith.constant dense<0.000000e+00> : vector<64x8xf32>
    %87 = tpu.matmul %86, %85, %cst_47 {dimension_numbers = #tpu.dot_dimension_numbers<[1], [0], [0], [1], [0, 0, 1, 1], [], []>} : vector<64x8xbf16>, vector<8x8xbf16>, vector<64x8xf32> -> vector<64x8xf32>
    %88 = arith.addf %82, %87 : vector<64x8xf32>
    %cst_48 = arith.constant 0.000000e+00 : f32
    %89 = vector.broadcast %cst_48 : f32 to vector<64x8xf32>
    %90 = arith.cmpf oge, %88, %89 : vector<64x8xf32>
    %cst_49 = arith.constant 1.000000e-01 : f32
    %91 = vector.broadcast %cst_49 : f32 to vector<64x8xf32>
    %92 = arith.mulf %88, %91 : vector<64x8xf32>
    %93 = arith.select %90, %88, %92 : vector<64x8xi1>, vector<64x8xf32>
    %94 = vector.extract_strided_slice %3 {offsets = [1, 0], sizes = [1, 8], strides = [1, 1]} : vector<2x8xf32> to vector<1x8xf32>
    %cst_50 = arith.constant 0.000000e+00 : f32
    %95 = vector.broadcast %cst_50 : f32 to vector<1x8xf32>
    %cst_51 = arith.constant 0.000000e+00 : f32
    %96 = vector.broadcast %cst_51 : f32 to vector<1x8xf32>
    %97 = tpu.concatenate %95, %93, %96 in 0 : vector<1x8xf32>, vector<64x8xf32>, vector<1x8xf32> -> vector<66x8xf32>
    %98 = vector.extract_strided_slice %97 {offsets = [0, 0], sizes = [64, 8], strides = [1, 1]} : vector<66x8xf32> to vector<64x8xf32>
    %c3_52 = arith.constant 3 : index
    %c0_53 = arith.constant 0 : index
    %c0_54 = arith.constant 0 : index
    %99 = vector.load %arg4[%c3_52, %c0_53, %c0_54] : memref<6x8x8xbf16, #tpu.memory_space<vmem>>, vector<1x8x8xbf16>
    %100 = vector.shape_cast %99 : vector<1x8x8xbf16> to vector<8x8xbf16>
    %101 = arith.truncf %98 : vector<64x8xf32> to vector<64x8xbf16>
    %cst_55 = arith.constant dense<0.000000e+00> : vector<64x8xf32>
    %102 = tpu.matmul %101, %100, %cst_55 {dimension_numbers = #tpu.dot_dimension_numbers<[1], [0], [0], [1], [0, 0, 1, 1], [], []>} : vector<64x8xbf16>, vector<8x8xbf16>, vector<64x8xf32> -> vector<64x8xf32>
    %103 = vector.broadcast %94 : vector<1x8xf32> to vector<64x8xf32>
    %104 = arith.addf %103, %102 : vector<64x8xf32>
    %105 = vector.extract_strided_slice %97 {offsets = [1, 0], sizes = [64, 8], strides = [1, 1]} : vector<66x8xf32> to vector<64x8xf32>
    %c4_56 = arith.constant 4 : index
    %c0_57 = arith.constant 0 : index
    %c0_58 = arith.constant 0 : index
    %106 = vector.load %arg4[%c4_56, %c0_57, %c0_58] : memref<6x8x8xbf16, #tpu.memory_space<vmem>>, vector<1x8x8xbf16>
    %107 = vector.shape_cast %106 : vector<1x8x8xbf16> to vector<8x8xbf16>
    %108 = arith.truncf %105 : vector<64x8xf32> to vector<64x8xbf16>
    %cst_59 = arith.constant dense<0.000000e+00> : vector<64x8xf32>
    %109 = tpu.matmul %108, %107, %cst_59 {dimension_numbers = #tpu.dot_dimension_numbers<[1], [0], [0], [1], [0, 0, 1, 1], [], []>} : vector<64x8xbf16>, vector<8x8xbf16>, vector<64x8xf32> -> vector<64x8xf32>
    %110 = arith.addf %104, %109 : vector<64x8xf32>
    %111 = vector.extract_strided_slice %97 {offsets = [2, 0], sizes = [64, 8], strides = [1, 1]} : vector<66x8xf32> to vector<64x8xf32>
    %c5_60 = arith.constant 5 : index
    %c0_61 = arith.constant 0 : index
    %c0_62 = arith.constant 0 : index
    %112 = vector.load %arg4[%c5_60, %c0_61, %c0_62] : memref<6x8x8xbf16, #tpu.memory_space<vmem>>, vector<1x8x8xbf16>
    %113 = vector.shape_cast %112 : vector<1x8x8xbf16> to vector<8x8xbf16>
    %114 = arith.truncf %111 : vector<64x8xf32> to vector<64x8xbf16>
    %cst_63 = arith.constant dense<0.000000e+00> : vector<64x8xf32>
    %115 = tpu.matmul %114, %113, %cst_63 {dimension_numbers = #tpu.dot_dimension_numbers<[1], [0], [0], [1], [0, 0, 1, 1], [], []>} : vector<64x8xbf16>, vector<8x8xbf16>, vector<64x8xf32> -> vector<64x8xf32>
    %116 = arith.addf %110, %115 : vector<64x8xf32>
    %117 = arith.addf %116, %60 : vector<64x8xf32>
    %c0_64 = arith.constant 0 : index
    %c0_65 = arith.constant 0 : index
    %c0_66 = arith.constant 0 : index
    %118 = vector.load %arg6[%c0_64, %c0_65, %c0_66] : memref<1x64x8xf32, #tpu.memory_space<vmem>>, vector<1x64x8xf32>
    %119 = vector.shape_cast %118 : vector<1x64x8xf32> to vector<64x8xf32>
    %120 = vector.shape_cast %117 : vector<64x8xf32> to vector<1x64x8xf32>
    tpu.vector_store %arg6[%c0_64, %c0_65, %c0_66], %120 {strides = array<i32>} : memref<1x64x8xf32, #tpu.memory_space<vmem>>, vector<1x64x8xf32>,
    return
  }
  func.func @transform_0(%arg0: i32) -> (i32, i32, i32) {
    %c0_i32 = arith.constant 0 : i32
    %c0_i32_0 = arith.constant 0 : i32
    %c0_i32_1 = arith.constant 0 : i32
    return %arg0, %c0_i32, %c0_i32_0 : i32, i32, i32
  }
  func.func @transform_1(%arg0: i32) -> (i32, i32, i32) {
    %c0_i32 = arith.constant 0 : i32
    %c0_i32_0 = arith.constant 0 : i32
    %c0_i32_1 = arith.constant 0 : i32
    %c0_i32_2 = arith.constant 0 : i32
    return %c0_i32, %c0_i32_0, %c0_i32_1 : i32, i32, i32
  }
  func.func @transform_2(%arg0: i32) -> (i32, i32) {
    %c0_i32 = arith.constant 0 : i32
    %c0_i32_0 = arith.constant 0 : i32
    %c0_i32_1 = arith.constant 0 : i32
    return %c0_i32, %c0_i32_0 : i32, i32
  }
  func.func @transform_3(%arg0: i32) -> (i32, i32, i32) {
    %c0_i32 = arith.constant 0 : i32
    %c0_i32_0 = arith.constant 0 : i32
    %c0_i32_1 = arith.constant 0 : i32
    %c0_i32_2 = arith.constant 0 : i32
    return %c0_i32, %c0_i32_0, %c0_i32_1 : i32, i32, i32
  }
  func.func @transform_4(%arg0: i32) -> (i32, i32) {
    %c0_i32 = arith.constant 0 : i32
    %c0_i32_0 = arith.constant 0 : i32
    %c0_i32_1 = arith.constant 0 : i32
    return %c0_i32, %c0_i32_0 : i32, i32
  }
  func.func @transform_5(%arg0: i32) -> (i32, i32, i32) {
    %c0_i32 = arith.constant 0 : i32
    %c0_i32_0 = arith.constant 0 : i32
    %c0_i32_1 = arith.constant 0 : i32
    return %arg0, %c0_i32, %c0_i32_0 : i32, i32, i32
  }
}

module attributes {stable_mosaic.version = 11 : i64} {
  func.func @_final_kernel(%arg0: i32, %arg1: memref<1x64x8xf32, #tpu.memory_space<vmem>>, %arg2: memref<7x8xf32, #tpu.memory_space<vmem>>, %arg3: memref<1x64x1xf32, #tpu.memory_space<vmem>>) attributes {dimension_semantics = [#tpu.dimension_semantics<parallel>], iteration_bounds = array<i64: 2>, scalar_prefetch = 0 : i64, scratch_operands = 0 : i64, tpu.core_type = #tpu.core_type<tc>, window_params = [{transform_indices = @transform_0, window_bounds = array<i64: 1, 64, 8>}, {pipeline_mode = #tpu.pipeline_mode<synchronous>, transform_indices = @transform_1, window_bounds = array<i64: 7, 8>}, {transform_indices = @transform_2, window_bounds = array<i64: 1, 64, 1>}]} {
    %c0 = arith.constant 0 : index
    %c0_0 = arith.constant 0 : index
    %c0_1 = arith.constant 0 : index
    %0 = vector.load %arg1[%c0, %c0_0, %c0_1] : memref<1x64x8xf32, #tpu.memory_space<vmem>>, vector<1x64x8xf32>
    %1 = vector.shape_cast %0 : vector<1x64x8xf32> to vector<64x8xf32>
    %cst = arith.constant 5.000000e-01 : f32
    %2 = vector.broadcast %cst : f32 to vector<64x8xf32>
    %3 = arith.mulf %1, %2 : vector<64x8xf32>
    %cst_2 = arith.constant 0.000000e+00 : f32
    %4 = vector.broadcast %cst_2 : f32 to vector<64x8xf32>
    %5 = arith.cmpf oge, %3, %4 : vector<64x8xf32>
    %cst_3 = arith.constant 0.00999999977 : f32
    %6 = vector.broadcast %cst_3 : f32 to vector<64x8xf32>
    %7 = arith.mulf %3, %6 : vector<64x8xf32>
    %8 = arith.select %5, %3, %7 : vector<64x8xi1>, vector<64x8xf32>
    %cst_4 = arith.constant 0.000000e+00 : f32
    %9 = vector.broadcast %cst_4 : f32 to vector<3x8xf32>
    %cst_5 = arith.constant 0.000000e+00 : f32
    %10 = vector.broadcast %cst_5 : f32 to vector<3x8xf32>
    %11 = tpu.concatenate %9, %8, %10 in 0 : vector<3x8xf32>, vector<64x8xf32>, vector<3x8xf32> -> vector<70x8xf32>
    %c0_6 = arith.constant 0 : index
    %c0_7 = arith.constant 0 : index
    %12 = vector.load %arg2[%c0_6, %c0_7] : memref<7x8xf32, #tpu.memory_space<vmem>>, vector<7x8xf32>
    %cst_8 = arith.constant 0.000000e+00 : f32
    %13 = vector.broadcast %cst_8 : f32 to vector<64x1xf32>
    %14 = vector.extract_strided_slice %11 {offsets = [0, 0], sizes = [64, 8], strides = [1, 1]} : vector<70x8xf32> to vector<64x8xf32>
    %15 = vector.extract_strided_slice %12 {offsets = [0, 0], sizes = [1, 8], strides = [1, 1]} : vector<7x8xf32> to vector<1x8xf32>
    %16 = vector.broadcast %15 : vector<1x8xf32> to vector<64x8xf32>
    %17 = arith.mulf %14, %16 : vector<64x8xf32>
    %cst_9 = arith.constant dense<0.000000e+00> : vector<64xf32>
    %18 = vector.multi_reduction <add>, %17, %cst_9 [1] : vector<64x8xf32> to vector<64xf32>
    %19 = vector.shape_cast %18 : vector<64xf32> to vector<64x1xf32>
    %20 = arith.addf %13, %19 : vector<64x1xf32>
    %21 = vector.extract_strided_slice %11 {offsets = [1, 0], sizes = [64, 8], strides = [1, 1]} : vector<70x8xf32> to vector<64x8xf32>
    %22 = vector.extract_strided_slice %12 {offsets = [1, 0], sizes = [1, 8], strides = [1, 1]} : vector<7x8xf32> to vector<1x8xf32>
    %23 = vector.broadcast %22 : vector<1x8xf32> to vector<64x8xf32>
    %24 = arith.mulf %21, %23 : vector<64x8xf32>
    %cst_10 = arith.constant dense<0.000000e+00> : vector<64xf32>
    %25 = vector.multi_reduction <add>, %24, %cst_10 [1] : vector<64x8xf32> to vector<64xf32>
    %26 = vector.shape_cast %25 : vector<64xf32> to vector<64x1xf32>
    %27 = arith.addf %20, %26 : vector<64x1xf32>
    %28 = vector.extract_strided_slice %11 {offsets = [2, 0], sizes = [64, 8], strides = [1, 1]} : vector<70x8xf32> to vector<64x8xf32>
    %29 = vector.extract_strided_slice %12 {offsets = [2, 0], sizes = [1, 8], strides = [1, 1]} : vector<7x8xf32> to vector<1x8xf32>
    %30 = vector.broadcast %29 : vector<1x8xf32> to vector<64x8xf32>
    %31 = arith.mulf %28, %30 : vector<64x8xf32>
    %cst_11 = arith.constant dense<0.000000e+00> : vector<64xf32>
    %32 = vector.multi_reduction <add>, %31, %cst_11 [1] : vector<64x8xf32> to vector<64xf32>
    %33 = vector.shape_cast %32 : vector<64xf32> to vector<64x1xf32>
    %34 = arith.addf %27, %33 : vector<64x1xf32>
    %35 = vector.extract_strided_slice %11 {offsets = [3, 0], sizes = [64, 8], strides = [1, 1]} : vector<70x8xf32> to vector<64x8xf32>
    %36 = vector.extract_strided_slice %12 {offsets = [3, 0], sizes = [1, 8], strides = [1, 1]} : vector<7x8xf32> to vector<1x8xf32>
    %37 = vector.broadcast %36 : vector<1x8xf32> to vector<64x8xf32>
    %38 = arith.mulf %35, %37 : vector<64x8xf32>
    %cst_12 = arith.constant dense<0.000000e+00> : vector<64xf32>
    %39 = vector.multi_reduction <add>, %38, %cst_12 [1] : vector<64x8xf32> to vector<64xf32>
    %40 = vector.shape_cast %39 : vector<64xf32> to vector<64x1xf32>
    %41 = arith.addf %34, %40 : vector<64x1xf32>
    %42 = vector.extract_strided_slice %11 {offsets = [4, 0], sizes = [64, 8], strides = [1, 1]} : vector<70x8xf32> to vector<64x8xf32>
    %43 = vector.extract_strided_slice %12 {offsets = [4, 0], sizes = [1, 8], strides = [1, 1]} : vector<7x8xf32> to vector<1x8xf32>
    %44 = vector.broadcast %43 : vector<1x8xf32> to vector<64x8xf32>
    %45 = arith.mulf %42, %44 : vector<64x8xf32>
    %cst_13 = arith.constant dense<0.000000e+00> : vector<64xf32>
    %46 = vector.multi_reduction <add>, %45, %cst_13 [1] : vector<64x8xf32> to vector<64xf32>
    %47 = vector.shape_cast %46 : vector<64xf32> to vector<64x1xf32>
    %48 = arith.addf %41, %47 : vector<64x1xf32>
    %49 = vector.extract_strided_slice %11 {offsets = [5, 0], sizes = [64, 8], strides = [1, 1]} : vector<70x8xf32> to vector<64x8xf32>
    %50 = vector.extract_strided_slice %12 {offsets = [5, 0], sizes = [1, 8], strides = [1, 1]} : vector<7x8xf32> to vector<1x8xf32>
    %51 = vector.broadcast %50 : vector<1x8xf32> to vector<64x8xf32>
    %52 = arith.mulf %49, %51 : vector<64x8xf32>
    %cst_14 = arith.constant dense<0.000000e+00> : vector<64xf32>
    %53 = vector.multi_reduction <add>, %52, %cst_14 [1] : vector<64x8xf32> to vector<64xf32>
    %54 = vector.shape_cast %53 : vector<64xf32> to vector<64x1xf32>
    %55 = arith.addf %48, %54 : vector<64x1xf32>
    %56 = vector.extract_strided_slice %11 {offsets = [6, 0], sizes = [64, 8], strides = [1, 1]} : vector<70x8xf32> to vector<64x8xf32>
    %57 = vector.extract_strided_slice %12 {offsets = [6, 0], sizes = [1, 8], strides = [1, 1]} : vector<7x8xf32> to vector<1x8xf32>
    %58 = vector.broadcast %57 : vector<1x8xf32> to vector<64x8xf32>
    %59 = arith.mulf %56, %58 : vector<64x8xf32>
    %cst_15 = arith.constant dense<0.000000e+00> : vector<64xf32>
    %60 = vector.multi_reduction <add>, %59, %cst_15 [1] : vector<64x8xf32> to vector<64xf32>
    %61 = vector.shape_cast %60 : vector<64xf32> to vector<64x1xf32>
    %62 = arith.addf %55, %61 : vector<64x1xf32>
    %63 = math.tanh %62 : vector<64x1xf32>
    %c0_16 = arith.constant 0 : index
    %c0_17 = arith.constant 0 : index
    %c0_18 = arith.constant 0 : index
    %64 = vector.load %arg3[%c0_16, %c0_17, %c0_18] : memref<1x64x1xf32, #tpu.memory_space<vmem>>, vector<1x64x1xf32>
    %65 = vector.shape_cast %64 : vector<1x64x1xf32> to vector<64x1xf32>
    %66 = vector.shape_cast %63 : vector<64x1xf32> to vector<1x64x1xf32>
    tpu.vector_store %arg3[%c0_16, %c0_17, %c0_18], %66 {strides = array<i32>} : memref<1x64x1xf32, #tpu.memory_space<vmem>>, vector<1x64x1xf32>,
    return
  }
  func.func @transform_0(%arg0: i32) -> (i32, i32, i32) {
    %c0_i32 = arith.constant 0 : i32
    %c0_i32_0 = arith.constant 0 : i32
    %c0_i32_1 = arith.constant 0 : i32
    return %arg0, %c0_i32, %c0_i32_0 : i32, i32, i32
  }
  func.func @transform_1(%arg0: i32) -> (i32, i32) {
    %c0_i32 = arith.constant 0 : i32
    %c0_i32_0 = arith.constant 0 : i32
    %c0_i32_1 = arith.constant 0 : i32
    return %c0_i32, %c0_i32_0 : i32, i32
  }
  func.func @transform_2(%arg0: i32) -> (i32, i32, i32) {
    %c0_i32 = arith.constant 0 : i32
    %c0_i32_0 = arith.constant 0 : i32
    %c0_i32_1 = arith.constant 0 : i32
    return %arg0, %c0_i32, %c0_i32_0 : i32, i32, i32
  }
}

</mosaic_0001>

<bundles_post_ra>
// kernel: _lambda_.16
= control target key start
LH: loop header
LB: loop body
LE: loop exit
PB: predicated region body
PF: predicated region fallthrough
CT: control target
= control target key end

     0   :  { %s885_s15 = smov 0   ;;  %s984_s0 = inlined_call_operand.vmem [shape: f32[2,16,8], index: 0, kind: input, shape index: {}]   ;;  %s985_s1 = inlined_call_operand.vmem [shape: f32[2,16,1], index: 1, kind: input, shape index: {}]   ;;  %s986_s2 = inlined_call_operand.vmem [shape: bf16[7,8,32], index: 2, kind: input, shape index: {}]   ;;  %s987_s3 = inlined_call_operand.vmem [shape: f32[1,32], index: 3, kind: input, shape index: {}]   ;;  %s988_s4 = inlined_call_operand.vmem [shape: f32[2,16,32], index: 4, kind: output, shape index: {}]  }
   0x1 LB: > { %s727_s16 = sadd.s32 4294967295, %s855_s15   ;;  %p731_p0 = scmp.ge.s32.totalorder %s855_s15, 1  ;;  %s855_s15 = sphi %s885_s15, %s14_s15  }
   0x2   : > { %p172_p1 = scmp.lt.s32.totalorder %s855_s15, 3 }
   0x4   : > { %p173_p2 = pnand %p731_p0, %p172_p1 }
   0x5   : > { %p203_p3 = scmp.lt.s32.totalorder (!%p173_p2), %s727_s16, 1  ;;  %v857_v0 = vmov (!%p173_p2), 0   ;;  %v247_v3 = vld [vmem:[%s986_s2] sm:$0xf] (!%p173_p2)  ;;  %vm253_vm0 = vcmask (!%p173_p2), 1043456   ;;  %v858_v4 = vmov (!%p173_p2), 0.0  }
   0x6   : > { %176 = sbr.rel (%p173_p2) target bundleno = 416 (0x1a0), region = 36  ;;  %848 = vset.pattern.permute.xlu0 (!%p173_p2), %v857_v0  ;;  %771 = vmatprep.subr.bf16.mxu1 (!%p173_p2), %v858_v4  ;;  %v255_v5 = vsel (!%p173_p2), %vm253_vm0, %v247_v3, 0  ;;  %vm859_vm1 = vmmov (!%p173_p2), 0   ;;  %v744_v6 = vld [vmem:[%s986_s2 + $0xc] sm:$0xf] (!%p173_p2)  ;;  %vm237_vm2 = vcmask (!%p173_p2), 1042432  }
   0x7   : > { %789 = vmatprep.subr.bf16.mxu0 (!%p173_p2), %v858_v4  ;;  %772 = vmatpush3.bf16.msra.mxu1 (!%p173_p2), %v255_v5  ;;  %v443_v7 = vsel (!%p173_p2), %vm253_vm0, %v744_v6, 0  ;;  %v740_v16 = vld [vmem:[%s986_s2 + $0x4] sm:$0xf] (!%p173_p2)  ;;  %vm249_vm3 = vcmask (!%p173_p2), 64512   ;;  %v746_v31 = vld [vmem:[%s986_s2 + $0x10] sm:$0xf] (!%p173_p2) }
   0x8   : > { %777 = vmatprep.subr.bf16.mxu1 (!%p173_p2), %v858_v4  ;;  %773 = vmatprep.mubr.msk.bf16.mxu1 (!%p173_p2), %vm859_vm1, %v858_v4  ;;  %v325_v22 = vsel (!%p173_p2), %vm253_vm0, %v740_v16, 0  ;;  %vm429_vm4 = vsmask.f32 (!%p173_p2), 6400  ;;  %v498_v35 = vsel (!%p173_p2), %vm253_vm0, %v746_v31, 0  ;;  %v742_v38 = vld [vmem:[%s986_s2 + $0x8] sm:$0xf] (!%p173_p2) }
   0x9   : > { %791 = vmatprep.mubr.msk.bf16.mxu0 (!%p173_p2), %vm859_vm1, %v858_v4  ;;  %790 = vmatpush3.bf16.msra.mxu0 (!%p173_p2), %v443_v7  ;;  %vm309_vm5 = vsmask.f32 (!%p173_p2), 7424  ;;  %v382_v40 = vsel (!%p173_p2), %vm253_vm0, %v742_v38, 0  ;;  %v748_v44 = vld [vmem:[%s986_s2 + $0x14] sm:$0xf] (!%p173_p2)  ;;  %vm490_vm6 = vcmask (!%p173_p2), 1045504  }
   0xa   : > { %795 = vmatprep.subr.bf16.mxu0 (!%p173_p2), %v858_v4  ;;  %v557_v45 = vsel (!%p173_p2), %vm253_vm0, %v748_v44, 0  ;;  %vm374_vm7 = vcmask (!%p173_p2), 1046528   ;;  %v750_v56 = vld [vmem:[%s986_s2 + $0x18] sm:$0xf] (!%p173_p2)  ;;  %vm545_vm8 = vsmask.f32 (!%p173_p2), 5376 }
   0xb   : > { %v612_v57 = vsel (!%p173_p2), %vm253_vm0, %v750_v56, 0  ;;  %vm604_vm9 = vcmask (!%p173_p2), 1044480   ;;  %vm657_vm10 = vcmask (!%p173_p2), 261120  }
   0xd   : > { %s990_s16 = smov (!%p203_p3, %s727_s16), 1 }
   0xe   : > { %s893_s17 = sshll.u32 %s990_s16, 4 }
   0xf   : > { %s212_s20 = scalar_lea.vmem %s985_s1, %s893_s17  ;;  %s207_s27 = scalar_lea.vmem %s984_s0, %s893_s17 }
  0x10   : > { %v221_v1 = vld [vmem:[%s212_s20] sm:$0xff]  ;;  %v222_v2 = vld [vmem:[%s212_s20 + $0x8] sm:$0xff]  ;;  %s217_s18 = scalar_lea.vmem %s988_s4, %s893_s17 }
  0x11   : > { %225 = vperm.xlu0 %848, %v221_v1   ;;  %v219_v8 = vld [vmem:[%s207_s27] sm:$0xff]  ;;  %v220_v11 = vld [vmem:[%s207_s27 + $0x8] sm:$0xff] }
  0x15   : > { %230 = vperm.xlu0 %848, %v222_v2   ;;  %v739_v2 = vld [vmem:[%s987_s3] ss:$0 sm:$0xff] }
  0x90   : > { %v226_v9 = vpop.permute.xlu0 %225 }
  0x91   : > { %v233_v10 = vmul.f32 %v226_v9, %v219_v8 }
  0x93   : > { %v238_v13 = vrot.slane %v233_v10, 5 }
  0x94   : > { %v231_v12 = vpop.permute.xlu0 %230 }
  0x95   : > { %v234_v14 = vmul.f32 %v231_v12, %v220_v11  ;;  %v244_v17 = vsel %vm237_vm2, 0.0, %v238_v13 }
  0x97   : > { %v239_v15 = vrot.slane %v234_v14, 5 }
  0x99   : > { %v240_v18 = vsel %vm237_vm2, %v238_v13, %v239_v15  ;;  %v245_v19 = vsel %vm237_vm2, %v239_v15, 0.0 }
  0x9a   : > { %v922_v20 = vpack.c.bf16 %v240_v18, %v244_v17  ;;  %v924_v21 = vpack.c.bf16 %v245_v19, %v245_v19 }
  0x9c   : > { %774 = vmatmul.mubr.msk.bf16.vlgmr.msra.gmra.mrb[0].mxu1 %vm249_vm3, %v922_v20  ;;  %v310_v23 = vshrl.u32 %v922_v20, 16  ;;  %v312_v24 = vshll.u32 %v922_v20, 16  ;;  %v317_v25 = vshll.u32 %v924_v21, 16  ;;  %v433_v26 = vshrl.u32 %v924_v21, 16 }
  0x9d   : > { %778 = vmatpush3.bf16.msra.mxu1 %v325_v22  ;;  %779 = vmatprep.mubr.msk.bf16.mxu1 %vm859_vm1, %v858_v4  ;;  %v491_v42 = vrot.slane %v922_v20, 2  ;;  %v492_v43 = vrot.slane %v924_v21, 2  ;;  %v375_v47 = vrot.slane %v922_v20, 1  ;;  %v376_v48 = vrot.slane %v924_v21, 1 }
  0x9e   : > { %v430_v27 = vrot.slane %v310_v23, 1  ;;  %v431_v28 = vrot.slane %v312_v24, 2  ;;  %v435_v29 = vrot.slane %v433_v26, 1  ;;  %v436_v30 = vrot.slane %v317_v25, 2  ;;  %783 = vmatprep.subr.bf16.mxu1 %v858_v4 }
  0x9f   : > { %v314_v32 = vrot.slane %v312_v24, 1  ;;  %v319_v39 = vrot.slane %v317_v25, 1  ;;  %v493_v46 = vsel %vm490_vm6, %v491_v42, %v492_v43  ;;  %v546_v49 = vrot.slane %v310_v23, 2 }
  0xa0   : > { %v432_v33 = vor.u32 %v431_v28, %v430_v27  ;;  %v437_v34 = vor.u32 %v436_v30, %v435_v29  ;;  %v547_v50 = vrot.slane %v312_v24, 3  ;;  %v549_v51 = vrot.slane %v433_v26, 2 }
  0xa1   : > { %v315_v37 = vor.u32 %v314_v32, %v310_v23  ;;  %v550_v52 = vrot.slane %v317_v25, 3  ;;  %v377_v53 = vsel %vm374_vm7, %v375_v47, %v376_v48  ;;  %v605_v59 = vrot.slane %v922_v20, 3 }
  0xa2   : > { %v438_v36 = vsel %vm429_vm4, %v432_v33, %v437_v34  ;;  %v548_v54 = vor.u32 %v547_v50, %v546_v49  ;;  %v606_v60 = vrot.slane %v924_v21, 3 }
  0xa3   : > { %792 = vmatmul.mubr.msk.bf16.vlgmr.msra.gmra.mrb[0].mxu0 %vm249_vm3, %v438_v36  ;;  %v320_v41 = vsel %vm309_vm5, %v315_v37, %v319_v39  ;;  %v551_v55 = vor.u32 %v550_v52, %v549_v51 }
  0xa4   : > { %796 = vmatpush3.bf16.msra.mxu0 %v498_v35  ;;  %797 = vmatprep.mubr.msk.bf16.mxu0 %vm859_vm1, %v858_v4  ;;  %v607_v61 = vsel %vm604_vm9, %v605_v59, %v606_v60 }
  0xa5   : > { %801 = vmatprep.subr.bf16.mxu0 %v858_v4  ;;  %v552_v58 = vsel %vm545_vm8, %v548_v54, %v551_v55 }
  0xa8   : > { %780 = vmatmul.mubr.msk.bf16.vlgmr.msra.gmra.mrb[0].mxu1 %vm249_vm3, %v320_v41 }
  0xa9   : > { %784 = vmatpush3.bf16.msra.mxu1 %v382_v40  ;;  %785 = vmatprep.mubr.msk.bf16.mxu1 %vm859_vm1, %v858_v4 }
  0xaf   : > { %798 = vmatmul.mubr.msk.bf16.vlgmr.msra.gmra.mrb[0].mxu0 %vm249_vm3, %v493_v46 }
  0xb0   : > { %802 = vmatpush3.bf16.msra.mxu0 %v557_v45  ;;  %803 = vmatprep.mubr.msk.bf16.mxu0 %vm859_vm1, %v858_v4 }
  0xb1   : > { %807 = vmatprep.subr.bf16.mxu0 %v858_v4 }
  0xb4   : > { %786 = vmatmul.mubr.msk.bf16.vlgmr.msra.gmra.mrb[0].mxu1 %vm249_vm3, %v377_v53 }
  0xbb   : > { %804 = vmatmul.mubr.msk.bf16.vlgmr.msra.gmra.mrb[0].mxu0 %vm249_vm3, %v552_v58 }
  0xbc   : > { %808 = vmatpush3.bf16.msra.mxu0 %v612_v57  ;;  %809 = vmatprep.mubr.msk.bf16.mxu0 %vm859_vm1, %v858_v4 }
  0xc7   : > { %810 = vmatmul.mubr.msk.bf16.vlgmr.msra.gmra.mrb[0].mxu0 %vm249_vm3, %v607_v61 }
 0x187   : > { %v418_v62 = vpop.f32.mrb[0].mxu1 }
 0x188   : > { %v787_v63 = vpop.f32.mrb[1].mxu1  ;;  %v813_v3 = vadd.f32 %v739_v2, %v418_v62 }
 0x189   : > { %v421_v0 = vpop.f32.mrb[2].mxu1 }
 0x18a   : > { %v788_v1 = vpop.f32.mrb[3].mxu1  ;;  %v815_v5 = vadd.f32 %v739_v2, %v421_v0 }
 0x19a   : > { %v648_v4 = vpop.f32.mrb[0].mxu0 }
 0x19b   : > { %v814_v6 = vadd.f32 %v813_v3, %v648_v4  ;;  %v811_v7 = vpop.f32.mrb[1].mxu0 }
 0x19c   : > { %v651_v8 = vpop.f32.mrb[2].mxu0 }
 0x19d   : > { %658 = vst.msk [vmem:[%s217_s18] sm:$0xff] %vm657_vm10, %v814_v6  ;;  %v816_v9 = vadd.f32 %v815_v5, %v651_v8  ;;  %v812_v10 = vpop.f32.mrb[3].mxu0 }
 0x19f   : > { %659 = vst.msk [vmem:[%s217_s18 + $0x8] sm:$0xff] %vm657_vm10, %v816_v9 }
 0x1a0 PF: > { %s14_s15 = sadd.s32 1, %s855_s15  }
 0x1a1   : > { %p11_p4 = scmp.ge.s32.totalorder %s14_s15, 4  }
 0x1a3   :  { %13 = sbr.rel (!%p11_p4) target bundleno = 1 (0x1), region = 75 }

// kernel: _lambda_.17
= control target key start
LH: loop header
LB: loop body
LE: loop exit
PB: predicated region body
PF: predicated region fallthrough
CT: control target
= control target key end

     0   :  { %s679_s12 = smov 0   ;;  %s740_s0 = inlined_call_operand.vmem [shape: f32[2,16,32], index: 0, kind: input, shape index: {}]   ;;  %s741_s1 = inlined_call_operand.vmem [shape: bf16[4,32,16], index: 1, kind: input, shape index: {}]   ;;  %s742_s2 = inlined_call_operand.vmem [shape: f32[1,16], index: 2, kind: input, shape index: {}]   ;;  %s743_s3 = inlined_call_operand.vmem [shape: f32[2,16,32], index: 3, kind: output, shape index: {}]  }
   0x1 LB: > { %s535_s13 = sadd.s32 4294967295, %s654_s12   ;;  %p539_p0 = scmp.ge.s32.totalorder %s654_s12, 1  ;;  %s654_s12 = sphi %s679_s12, %s13_s12  }
   0x2   : > { %p137_p1 = scmp.lt.s32.totalorder %s654_s12, 3 }
   0x4   : > { %p138_p2 = pnand %p539_p0, %p137_p1 }
   0x5   : > { %v640_v0 = vld [vmem:[%s741_s1] sm:$0xff] (!%p138_p2)   ;;  %v656_v1 = vmov (!%p138_p2), 0.0   ;;  %v641_v2 = vld [vmem:[%s741_s1 + $0x8] sm:$0xff] (!%p138_p2)   ;;  %vm657_vm0 = vmmov (!%p138_p2), 0   ;;  %p161_p3 = scmp.lt.s32.totalorder (!%p138_p2), %s535_s13, 1  ;;  %v644_v3 = vld [vmem:[%s741_s1 + $0x10] sm:$0xff] (!%p138_p2)  }
   0x6   : > { %141 = sbr.rel (%p138_p2) target bundleno = 375 (0x177), region = 32  ;;  %601 = vmatprep.subr.bf16.mxu1 (!%p138_p2), %v656_v1  ;;  %585 = vmatprep.subr.bf16.mxu0 (!%p138_p2), %v656_v1  ;;  %v645_v4 = vld [vmem:[%s741_s1 + $0x18] sm:$0xff] (!%p138_p2)   ;;  %vm182_vm3 = vcmask (!%p138_p2), 1040384   ;;  %vm224_vm4 = vcmask (!%p138_p2), 261120   ;;  %vm345_vm5 = vcmask (!%p138_p2), 1046528   ;;  %v642_v20 = vld [vmem:[%s741_s1 + $0x20] sm:$0xff] (!%p138_p2)  }
   0x7   : > { %602 = vmatpush3.bf16.msra.mxu1 (!%p138_p2), %v640_v0  ;;  %605 = vmatprep.mubr.msk.bf16.mxu1 (!%p138_p2), %vm657_vm0, %v656_v1  ;;  %vm199_vm6 = vsmask.f32 (!%p138_p2), 7424  ;;  %v643_v27 = vld [vmem:[%s741_s1 + $0x28] sm:$0xff] (!%p138_p2)   ;;  %v646_v29 = vld [vmem:[%s741_s1 + $0x30] sm:$0xff] (!%p138_p2)   ;;  %v647_v31 = vld [vmem:[%s741_s1 + $0x38] sm:$0xff] (!%p138_p2)   ;;  %s658_s9 = smov (!%p138_p2), 16  }
   0x8   : > { %603 = vmatprep.subr.bf16.mxu1 (!%p138_p2), %v656_v1  ;;  %589 = vmatprep.mubr.msk.bf16.mxu0 (!%p138_p2), %vm657_vm0, %v656_v1  ;;  %v551_v32 = vld [vmem:[%s742_s2] ss:$0 sm:$0xff] (!%p138_p2)  ;;  %vm475_vm7 = vcmask (!%p138_p2), 130048  }
   0x9   : > { %586 = vmatpush3.bf16.msra.mxu0 (!%p138_p2), %v644_v3 }
   0xa   : > { %587 = vmatprep.subr.bf16.mxu0 (!%p138_p2), %v656_v1 }
   0xb   : > { %604 = vmatpush3.bf16.msra.mxu1 (!%p138_p2), %v641_v2 }
   0xc   : > { %609 = vmatprep.subr.bf16.mxu1 (!%p138_p2), %v656_v1 }
   0xd   : > { %s745_s13 = smov (!%p161_p3, %s535_s13), 1  ;;  %588 = vmatpush3.bf16.msra.mxu0 %v645_v4 }
   0xe   : > { %s571_s20 = sshll.u32 %s745_s13, 4  ;;  %593 = vmatprep.subr.bf16.mxu0 %v656_v1 }
   0xf   : > { %s165_s23 = scalar_lea.vmem %s740_s0, %s571_s20  ;;  %s170_s14 = scalar_lea.vmem %s743_s3, %s571_s20 }
  0x10   : > { %v172_v5 = vld [vmem:[%s165_s23] sm:$0xff]  ;;  %v173_v6 = vld [vmem:[%s165_s23 + $0x8] sm:$0xff] }
  0x11   : > { %vm174_vm1 = vcmp.ge.f32.partialorder %v172_v5, 0.0  ;;  %vm175_vm2 = vcmp.ge.f32.partialorder %v173_v6, 0.0  ;;  %v176_v7 = vmul.f32 0.1, %v172_v5  ;;  %v177_v8 = vmul.f32 0.1, %v173_v6 }
  0x13   : > { %v178_v9 = vsel %vm174_vm1, %v172_v5, %v176_v7  ;;  %v179_v10 = vsel %vm175_vm2, %v173_v6, %v177_v8 }
  0x14   : > { %v183_v11 = vrot.slane %v178_v9, 7  ;;  %v184_v12 = vrot.slane %v179_v10, 7 }
  0x16   : > { %v185_v13 = vsel %vm182_vm3, %v183_v11, %v184_v12  ;;  %v189_v14 = vsel %vm182_vm3, 0.0, %v183_v11  ;;  %v190_v15 = vsel %vm182_vm3, %v184_v12, 0.0 }
  0x17   : > { %v197_v16 = vpack.c.bf16 %v185_v13, %v189_v14  ;;  %v198_v17 = vpack.c.bf16 %v190_v15, %v190_v15 }
  0x19   : > { %v346_v18 = vrot.slane %v197_v16, 1  ;;  %v347_v19 = vrot.slane %v198_v17, 1  ;;  %v201_v21 = vshrl.u32 %v197_v16, 16  ;;  %v203_v22 = vshll.u32 %v197_v16, 16 }
  0x1a   : > { %v208_v23 = vshll.u32 %v198_v17, 16 }
  0x1b   : > { %v348_v24 = vsel %vm345_vm5, %v346_v18, %v347_v19  ;;  %v205_v25 = vrot.slane %v203_v22, 1 }
  0x1c   : > { %606 = vmatmul.mubr.msk.bf16.vlgmr.msra.gmra.mrb[0].mxu1 %vm224_vm4, %v348_v24  ;;  %v210_v26 = vrot.slane %v208_v23, 1 }
  0x1d   : > { %610 = vmatpush3.bf16.msra.mxu1 %v642_v20  ;;  %613 = vmatprep.mubr.msk.bf16.mxu1 %vm657_vm0, %v656_v1  ;;  %v206_v28 = vor.u32 %v205_v25, %v201_v21 }
  0x1e   : > { %611 = vmatprep.subr.bf16.mxu1 %v656_v1 }
  0x1f   : > { %v211_v30 = vsel %vm199_vm6, %v206_v28, %v210_v26 }
  0x20   : > { %590 = vmatmul.mubr.msk.bf16.vlgmr.msra.gmra.mrb[0].mxu0 %vm224_vm4, %v211_v30 }
  0x21   : > { %612 = vmatpush3.bf16.msra.mxu1 %v643_v27  ;;  %594 = vmatpush3.bf16.msra.mxu0 %v646_v29 }
  0x22   : > { %595 = vmatprep.subr.bf16.mxu0 %v656_v1  ;;  %597 = vmatprep.mubr.msk.bf16.mxu0 %vm657_vm0, %v656_v1 }
  0x25   : > { %596 = vmatpush3.bf16.msra.mxu0 %v647_v31 }
  0x28   : > { %614 = vmatmul.mubr.msk.bf16.vlgmr.msra.gmra.mrb[0].mxu1 %vm224_vm4, %v211_v30 }
  0x2c   : > { %598 = vmatmul.mubr.msk.bf16.vlgmr.msra.gmra.mrb[0].mxu0 %vm224_vm4, %v197_v16 }
  0xfb   : > { %v458_v33 = vpop.f32.mrb[0].mxu1 }
  0xfc   : > { %v619_v34 = vadd.f32 %v551_v32, %v458_v33  ;;  %v615_v35 = vpop.f32.mrb[1].mxu1 }
  0xfd   : > { %v461_v36 = vpop.f32.mrb[2].mxu1 }
  0xfe   : > { %469 = vrot.lane.b32.xlu0 %v619_v34, %s658_s9  ;;  %v616_v37 = vpop.f32.mrb[3].mxu1  ;;  %v620_v39 = vadd.f32 %v551_v32, %v461_v36 }
  0xff   : > { %v330_v38 = vpop.f32.mrb[0].mxu0 }
 0x100   : > { %v617_v40 = vadd.f32 %v551_v32, %v330_v38  ;;  %v599_v41 = vpop.f32.mrb[1].mxu0 }
 0x101   : > { %v333_v42 = vpop.f32.mrb[2].mxu0 }
 0x102   : > { %471 = vrot.lane.b32.xlu0 %v620_v39, %s658_s9  ;;  %v618_v43 = vadd.f32 %v551_v32, %v333_v42  ;;  %v600_v44 = vpop.f32.mrb[3].mxu0 }
 0x170   : > { %v470_v45 = vpop.permute.xlu0 %469 }
 0x171   : > { %v476_v46 = vsel %vm475_vm7, %v617_v40, %v470_v45 }
 0x172   : > { %478 = vst.msk [vmem:[%s170_s14] sm:$0xff] %vm224_vm4, %v476_v46 }
 0x174   : > { %v472_v47 = vpop.permute.xlu0 %471 }
 0x175   : > { %v477_v48 = vsel %vm475_vm7, %v618_v43, %v472_v47 }
 0x176   : > { %479 = vst.msk [vmem:[%s170_s14 + $0x8] sm:$0xff] %vm224_vm4, %v477_v48 }
 0x177 PF: > { %s13_s12 = sadd.s32 1, %s654_s12  }
 0x178   : > { %p10_p4 = scmp.ge.s32.totalorder %s13_s12, 4  }
 0x17a   :  { %12 = sbr.rel (!%p10_p4) target bundleno = 1 (0x1), region = 65 }

// kernel: _lambda_.19
= control target key start
LH: loop header
LB: loop body
LE: loop exit
PB: predicated region body
PF: predicated region fallthrough
CT: control target
= control target key end

     0   :  { %s2447_s18 = smov 0   ;;  %s2701_s0 = inlined_call_operand.vmem [shape: f32[2,32,16], index: 0, kind: input, shape index: {}]   ;;  %s2702_s1 = inlined_call_operand.vmem [shape: bf16[10,16,16], index: 1, kind: input, shape index: {}]   ;;  %s2703_s2 = inlined_call_operand.vmem [shape: f32[2,16], index: 2, kind: input, shape index: {}]   ;;  %s2704_s3 = inlined_call_operand.vmem [shape: bf16[10,16,16], index: 3, kind: input, shape index: {}]   ;;  %s2705_s4 = inlined_call_operand.vmem [shape: f32[2,16], index: 4, kind: input, shape index: {}]   ;;  %s2706_s5 = inlined_call_operand.vmem [shape: f32[2,32,16], index: 5, kind: output, shape index: {}]  }
   0x1 LB: > { %s2008_s19 = sadd.s32 4294967295, %s2413_s18   ;;  %p2012_p0 = scmp.ge.s32.totalorder %s2413_s18, 1  ;;  %s2413_s18 = sphi %s2447_s18, %s15_s18  }
   0x2   : > { %p187_p1 = scmp.lt.s32.totalorder %s2413_s18, 3 }
   0x4   : > { %p188_p2 = pnand %p2012_p0, %p187_p1 }
   0x5   : > { %v2387_v0 = vld [vmem:[%s2702_s1] sm:$0xff] (!%p188_p2)   ;;  %p215_p3 = scmp.lt.s32.totalorder (!%p188_p2), %s2008_s19, 1  ;;  %v2388_v1 = vld [vmem:[%s2702_s1 + $0x8] sm:$0xff] (!%p188_p2)   ;;  %vm248_vm2 = vcmask (!%p188_p2), 1041408   ;;  %vm273_vm5 = vcmask (!%p188_p2), 130048   ;;  %v2389_v24 = vld [vmem:[%s2702_s1 + $0x10] sm:$0xff] (!%p188_p2)  }
   0x6   : > { %191 = sbr.rel (%p188_p2) target bundleno = 1119 (0x45f), region = 40  ;;  %2177 = vmatprep.subr.bf16.mxu0 (!%p188_p2), %v2387_v0  ;;  %vm341_vm6 = vsmask.f32 (!%p188_p2), 7424  ;;  %vm431_vm7 = vcmask (!%p188_p2), 1046528   ;;  %v2390_v42 = vld [vmem:[%s2702_s1 + $0x18] sm:$0xff] (!%p188_p2)   ;;  %v2391_v53 = vld [vmem:[%s2702_s1 + $0x20] sm:$0xff] (!%p188_p2)  }
   0x7   : > { %2178 = vmatpush3.bf16.msra.mxu0 (!%p188_p2), %v2387_v0  ;;  %vm505_vm8 = vsmask.f32 (!%p188_p2), 6400  ;;  %vm587_vm9 = vcmask (!%p188_p2), 1045504   ;;  %v2392_v63 = vld [vmem:[%s2704_s3] sm:$0xff] (!%p188_p2)   ;;  %v2393_v0 = vld [vmem:[%s2704_s3 + $0x8] sm:$0xff] (!%p188_p2)  }
   0x8   : > { %2183 = vmatprep.subr.bf16.mxu0 (!%p188_p2), %v2388_v1  ;;  %2207 = vmatprep.subr.bf16.mxu1 (!%p188_p2), %v2392_v63 }
   0x9   : > { %2208 = vmatpush3.bf16.msra.mxu1 (!%p188_p2), %v2392_v63 }
   0xa   : > { %2213 = vmatprep.subr.bf16.mxu1 (!%p188_p2), %v2393_v0 }
   0xd   : > { %s2708_s19 = smov (!%p215_p3, %s2008_s19), 1 }
   0xe   : > { %s2115_s24 = sshll.u32 %s2708_s19, 5 }
   0xf   : > { %s219_s27 = scalar_lea.vmem %s2701_s0, %s2115_s24  ;;  %s224_s26 = scalar_lea.vmem %s2706_s5, %s2115_s24 }
  0x10   : > { %v2469_v2 = vld [vmem:[%s219_s27] sm:$0xff]  ;;  %v2471_v3 = vld [vmem:[%s219_s27 + $0x8] sm:$0xff]  ;;  %v2473_v4 = vld [vmem:[%s219_s27 + $0x10] sm:$0xff] }
  0x11   : > { %vm232_vm0 = vcmp.ge.f32.partialorder %v2469_v2, 0.0  ;;  %vm233_vm1 = vcmp.ge.f32.partialorder %v2471_v3, 0.0  ;;  %v236_v5 = vmul.f32 0.1, %v2469_v2  ;;  %v237_v6 = vmul.f32 0.1, %v2471_v3 }
  0x12   : > { %v2479_v7 = vld [vmem:[%s219_s27 + $0x18] sm:$0xff]  ;;  %vm234_vm3 = vcmp.ge.f32.partialorder %v2473_v4, 0.0  ;;  %v238_v8 = vmul.f32 0.1, %v2473_v4 }
  0x13   : > { %v240_v9 = vsel %vm232_vm0, %v2469_v2, %v236_v5  ;;  %v241_v10 = vsel %vm233_vm1, %v2471_v3, %v237_v6  ;;  %vm235_vm4 = vcmp.ge.f32.partialorder %v2479_v7, 0.0  ;;  %v239_v11 = vmul.f32 0.1, %v2479_v7 }
  0x14   : > { %v249_v12 = vrot.slane %v240_v9, 6  ;;  %v250_v13 = vrot.slane %v241_v10, 6  ;;  %v242_v14 = vsel %vm234_vm3, %v2473_v4, %v238_v8  ;;  %v2533_v8 = vld [vmem:[%s2703_s2] sm:$0x3]  ;;  %vm1286_vm3 = vcmask 1044480  }
  0x15   : > { %v243_v15 = vsel %vm235_vm4, %v2479_v7, %v239_v11  ;;  %v252_v16 = vrot.slane %v242_v14, 6 }
  0x16   : > { %v251_v17 = vsel %vm248_vm2, %v249_v12, %v250_v13  ;;  %v261_v18 = vsel %vm248_vm2, 0.0, %v249_v12  ;;  %v254_v19 = vrot.slane %v243_v15, 6 }
  0x17   : > { %v265_v20 = vpack.c.bf16 %v251_v17, %v261_v18  ;;  %v253_v21 = vsel %vm248_vm2, %v250_v13, %v252_v16 }
  0x18   : > { %v255_v22 = vsel %vm248_vm2, %v252_v16, %v254_v19  ;;  %v262_v23 = vsel %vm248_vm2, %v254_v19, 0.0 }
  0x19   : > { %2179 = vmatprep.mubr.msk.bf16.mxu0 %vm273_vm5, %v265_v20  ;;  %v266_v25 = vpack.c.bf16 %v255_v22, %v253_v21  ;;  %v340_v26 = vpack.c.bf16 %v262_v23, %v262_v23  ;;  %v342_v27 = vshrl.u32 %v265_v20, 16  ;;  %v344_v28 = vshll.u32 %v265_v20, 16 }
  0x1a   : > { %v432_v38 = vrot.slane %v265_v20, 1  ;;  %v588_v57 = vrot.slane %v265_v20, 2 }
  0x1b   : > { %2180 = vmatmul.mubr.msk.bf16.vlgmr.msra.gmra.mrb[0].mxu0 %vm273_vm5, %v266_v25  ;;  %v346_v29 = vrot.slane %v344_v28, 1  ;;  %v348_v30 = vshll.u32 %v266_v25, 16  ;;  %v352_v31 = vshrl.u32 %v266_v25, 16  ;;  %v356_v32 = vshll.u32 %v340_v26, 16 }
  0x1c   : > { %2184 = vmatpush3.bf16.msra.mxu0 %v2388_v1  ;;  %v433_v39 = vrot.slane %v266_v25, 1  ;;  %v506_v43 = vrot.slane %v342_v27, 1  ;;  %v507_v44 = vrot.slane %v344_v28, 2  ;;  %v435_v47 = vrot.slane %v340_v26, 1 }
  0x1d   : > { %v347_v33 = vor.u32 %v346_v29, %v342_v27  ;;  %v350_v34 = vrot.slane %v348_v30, 1  ;;  %2189 = vmatprep.subr.bf16.mxu0 %v2389_v24  ;;  %v358_v37 = vrot.slane %v356_v32, 1  ;;  %v509_v45 = vrot.slane %v352_v31, 1 }
  0x1e   : > { %v434_v41 = vsel %vm431_vm7, %v432_v38, %v433_v39  ;;  %v510_v46 = vrot.slane %v348_v30, 2  ;;  %v508_v48 = vor.u32 %v507_v44, %v506_v43  ;;  %v436_v50 = vsel %vm431_vm7, %v433_v39, %v435_v47  ;;  %v2394_v38 = vld [vmem:[%s2704_s3 + $0x10] sm:$0xff]  }
  0x1f   : > { %v351_v35 = vsel %vm341_vm6, %v347_v33, %v350_v34  ;;  %v354_v36 = vor.u32 %v352_v31, %v350_v34  ;;  %v513_v51 = vshrl.u32 %v340_v26, 16  ;;  %v516_v55 = vrot.slane %v356_v32, 2 }
  0x20   : > { %2185 = vmatprep.mubr.msk.bf16.mxu0 %vm273_vm5, %v351_v35  ;;  %v511_v49 = vor.u32 %v510_v46, %v509_v45  ;;  %v589_v58 = vrot.slane %v266_v25, 2  ;;  %v591_v61 = vrot.slane %v340_v26, 2  ;;  %v329_v1 = vlaneseq }
  0x21   : > { %v359_v40 = vsel %vm341_vm6, %v354_v36, %v358_v37  ;;  %v515_v54 = vrot.slane %v513_v51, 1 }
  0x22   : > { %v512_v52 = vsel %vm505_vm8, %v508_v48, %v511_v49  ;;  %v590_v60 = vsel %vm587_vm9, %v588_v57, %v589_v58  ;;  %v592_v62 = vsel %vm587_vm9, %v589_v58, %v591_v61  ;;  %v2527_v5 = vshrl.u32 %v329_v1, 7 }
  0x23   : > { %v517_v56 = vor.u32 %v516_v55, %v515_v54 }
  0x24   : > { %v331_v6 = vsub.s32 0, %v2527_v5 }
  0x25   : > { %v518_v59 = vsel %vm505_vm8, %v511_v49, %v517_v56 }
  0x26   : > { %v332_v9 = vrot.slane %v2533_v8, %v331_v6 }
  0x27   : > { %2186 = vmatmul.mubr.msk.bf16.vlgmr.msra.gmra.mrb[0].mxu0 %vm273_vm5, %v359_v40 }
  0x28   : > { %2190 = vmatpush3.bf16.msra.mxu0 %v2389_v24  ;;  %2191 = vmatprep.mubr.msk.bf16.mxu0 %vm273_vm5, %v434_v41 }
  0x29   : > { %2195 = vmatprep.subr.bf16.mxu0 %v2390_v42 }
  0x33   : > { %2192 = vmatmul.mubr.msk.bf16.vlgmr.msra.gmra.mrb[0].mxu0 %vm273_vm5, %v436_v50 }
  0x34   : > { %2196 = vmatpush3.bf16.msra.mxu0 %v2390_v42  ;;  %2197 = vmatprep.mubr.msk.bf16.mxu0 %vm273_vm5, %v512_v52 }
  0x35   : > { %2201 = vmatprep.subr.bf16.mxu0 %v2391_v53 }
  0x3f   : > { %2198 = vmatmul.mubr.msk.bf16.vlgmr.msra.gmra.mrb[0].mxu0 %vm273_vm5, %v518_v59 }
  0x40   : > { %2202 = vmatpush3.bf16.msra.mxu0 %v2391_v53  ;;  %2203 = vmatprep.mubr.msk.bf16.mxu0 %vm273_vm5, %v590_v60 }
  0x4b   : > { %2204 = vmatmul.mubr.msk.bf16.vlgmr.msra.gmra.mrb[0].mxu0 %vm273_vm5, %v592_v62 }
 0x11e   : > { %v2205_v10 = vpop.f32.mrb[0].mxu0 }
 0x11f   : > { %v2297_v11 = vadd.f32 %v2205_v10, %v332_v9  ;;  %v639_v12 = vpop.f32.mrb[1].mxu0 }
 0x120   : > { %v2298_v13 = vadd.f32 %v639_v12, %v332_v9  ;;  %v2206_v14 = vpop.f32.mrb[2].mxu0 }
 0x121   : > { %vm660_vm10 = vcmp.ge.f32.partialorder %v2297_v11, 0.0  ;;  %v664_v15 = vmul.f32 0.1, %v2297_v11  ;;  %v2299_v16 = vadd.f32 %v2206_v14, %v332_v9  ;;  %v642_v17 = vpop.f32.mrb[3].mxu0 }
 0x122   : > { %vm658_vm11 = vcmp.ge.f32.partialorder %v2298_v13, 0.0  ;;  %v662_v18 = vmul.f32 0.1, %v2298_v13  ;;  %v2300_v19 = vadd.f32 %v642_v17, %v332_v9  ;;  %v2396_v17 = vld [vmem:[%s2704_s3 + $0x20] sm:$0xff]  }
 0x123   : > { %v668_v20 = vsel %vm660_vm10, %v2297_v11, %v664_v15  ;;  %vm661_vm12 = vcmp.ge.f32.partialorder %v2299_v16, 0.0  ;;  %v665_v21 = vmul.f32 0.1, %v2299_v16 }
 0x124   : > { %v666_v22 = vsel %vm658_vm11, %v2298_v13, %v662_v18  ;;  %vm659_vm13 = vcmp.ge.f32.partialorder %v2300_v19, 0.0  ;;  %v663_v23 = vmul.f32 0.1, %v2300_v19  ;;  %v677_v26 = vrot.slane %v668_v20, 6  ;;  %v2397_v18 = vld [vmem:[%s2702_s1 + $0x28] sm:$0xff]  }
 0x125   : > { %v674_v24 = vrot.slane %v666_v22, 6  ;;  %v669_v25 = vsel %vm661_vm12, %v2299_v16, %v665_v21  ;;  %v2395_v16 = vld [vmem:[%s2704_s3 + $0x18] sm:$0xff]   ;;  %2237 = vmatprep.subr.bf16.mxu0 %v2397_v18  ;;  %v2579_v20 = vld [vmem:[%s2705_s4] sm:$0x3] }
 0x126   : > { %v679_v27 = vrot.slane %v669_v25, 6  ;;  %v667_v28 = vsel %vm659_vm13, %v2300_v19, %v663_v23  ;;  %2238 = vmatpush3.bf16.msra.mxu0 %v2397_v18  ;;  %v2398_v19 = vld [vmem:[%s2702_s1 + $0x30] sm:$0xff]   ;;  %v756_v21 = vrot.slane %v2579_v20, %v331_v6 }
 0x127   : > { %v675_v29 = vrot.slane %v667_v28, 6  ;;  %v686_v32 = vsel %vm248_vm2, 0.0, %v674_v24  ;;  %2243 = vmatprep.subr.bf16.mxu0 %v2398_v19 }
 0x128   : > { %v680_v30 = vsel %vm248_vm2, %v677_v26, %v679_v27  ;;  %v687_v31 = vsel %vm248_vm2, %v679_v27, 0.0 }
 0x129   : > { %v764_v33 = vpack.c.bf16 %v687_v31, %v687_v31  ;;  %v676_v34 = vsel %vm248_vm2, %v674_v24, %v675_v29  ;;  %v678_v35 = vsel %vm248_vm2, %v675_v29, %v677_v26 }
 0x12a   : > { %v690_v36 = vpack.c.bf16 %v676_v34, %v686_v32  ;;  %v691_v37 = vpack.c.bf16 %v680_v30, %v678_v35 }
 0x12b   : > { %v779_v39 = vshll.u32 %v764_v33, 16  ;;  %v857_v40 = vrot.slane %v764_v33, 1  ;;  %v934_v41 = vshrl.u32 %v764_v33, 16  ;;  %v1011_v42 = vrot.slane %v764_v33, 2 }
 0x12c   : > { %2209 = vmatprep.mubr.msk.bf16.mxu1 %vm273_vm5, %v690_v36  ;;  %v765_v43 = vshrl.u32 %v690_v36, 16  ;;  %v767_v44 = vshll.u32 %v690_v36, 16  ;;  %v771_v45 = vshll.u32 %v691_v37, 16  ;;  %v775_v46 = vshrl.u32 %v691_v37, 16 }
 0x12d   : > { %2210 = vmatmul.mubr.msk.bf16.vlgmr.msra.gmra.mrb[0].mxu1 %vm273_vm5, %v691_v37  ;;  %v781_v47 = vrot.slane %v779_v39, 1  ;;  %v854_v48 = vrot.slane %v690_v36, 1  ;;  %v855_v49 = vrot.slane %v691_v37, 1  ;;  %v936_v50 = vrot.slane %v934_v41, 1 }
 0x12e   : > { %2214 = vmatpush3.bf16.msra.mxu1 %v2393_v0  ;;  %v769_v51 = vrot.slane %v767_v44, 1  ;;  %v773_v52 = vrot.slane %v771_v45, 1  ;;  %v927_v53 = vrot.slane %v765_v43, 1  ;;  %v928_v54 = vrot.slane %v767_v44, 2 }
 0x12f   : > { %2219 = vmatprep.subr.bf16.mxu1 %v2394_v38  ;;  %v856_v55 = vsel %vm431_vm7, %v854_v48, %v855_v49  ;;  %v858_v56 = vsel %vm431_vm7, %v855_v49, %v857_v40  ;;  %v930_v57 = vrot.slane %v775_v46, 1  ;;  %v931_v58 = vrot.slane %v771_v45, 2  ;;  %v2399_v49 = vld [vmem:[%s2702_s1 + $0x38] sm:$0xff]  }
 0x130   : > { %v770_v59 = vor.u32 %v769_v51, %v765_v43  ;;  %v777_v60 = vor.u32 %v775_v46, %v773_v52  ;;  %v929_v61 = vor.u32 %v928_v54, %v927_v53  ;;  %v937_v62 = vrot.slane %v779_v39, 2 }
 0x131   : > { %v932_v63 = vor.u32 %v931_v58, %v930_v57  ;;  %v1008_v1 = vrot.slane %v690_v36, 2  ;;  %v1009_v9 = vrot.slane %v691_v37, 2 }
 0x132   : > { %v774_v0 = vsel %vm341_vm6, %v770_v59, %v773_v52  ;;  %v782_v10 = vsel %vm341_vm6, %v777_v60, %v781_v47  ;;  %v938_v11 = vor.u32 %v937_v62, %v936_v50 }
 0x133   : > { %2215 = vmatprep.mubr.msk.bf16.mxu1 %vm273_vm5, %v774_v0  ;;  %v933_v12 = vsel %vm505_vm8, %v929_v61, %v932_v63  ;;  %v1010_v13 = vsel %vm587_vm9, %v1008_v1, %v1009_v9  ;;  %v1012_v14 = vsel %vm587_vm9, %v1009_v9, %v1011_v42 }
 0x134   : > { %v939_v15 = vsel %vm505_vm8, %v932_v63, %v938_v11 }
 0x139   : > { %2216 = vmatmul.mubr.msk.bf16.vlgmr.msra.gmra.mrb[0].mxu1 %vm273_vm5, %v782_v10 }
 0x13a   : > { %2220 = vmatpush3.bf16.msra.mxu1 %v2394_v38  ;;  %2221 = vmatprep.mubr.msk.bf16.mxu1 %vm273_vm5, %v856_v55 }
 0x13b   : > { %2225 = vmatprep.subr.bf16.mxu1 %v2395_v16 }
 0x145   : > { %2222 = vmatmul.mubr.msk.bf16.vlgmr.msra.gmra.mrb[0].mxu1 %vm273_vm5, %v858_v56 }
 0x146   : > { %2226 = vmatpush3.bf16.msra.mxu1 %v2395_v16  ;;  %2227 = vmatprep.mubr.msk.bf16.mxu1 %vm273_vm5, %v933_v12  ;;  %v2400_v12 = vld [vmem:[%s2702_s1 + $0x40] sm:$0xff]  }
 0x147   : > { %2231 = vmatprep.subr.bf16.mxu1 %v2396_v17 }
 0x151   : > { %2228 = vmatmul.mubr.msk.bf16.vlgmr.msra.gmra.mrb[0].mxu1 %vm273_vm5, %v939_v15 }
 0x152   : > { %2232 = vmatpush3.bf16.msra.mxu1 %v2396_v17  ;;  %2233 = vmatprep.mubr.msk.bf16.mxu1 %vm273_vm5, %v1010_v13 }
 0x15d   : > { %2234 = vmatmul.mubr.msk.bf16.vlgmr.msra.gmra.mrb[0].mxu1 %vm273_vm5, %v1012_v14 }
 0x230   : > { %v2235_v22 = vpop.f32.mrb[0].mxu1 }
 0x231   : > { %v2301_v23 = vadd.f32 %v2235_v22, %v756_v21  ;;  %v1059_v24 = vpop.f32.mrb[1].mxu1 }
 0x232   : > { %v2302_v25 = vadd.f32 %v1059_v24, %v756_v21  ;;  %v2236_v26 = vpop.f32.mrb[2].mxu1  ;;  %v2401_v24 = vld [vmem:[%s2702_s1 + $0x48] sm:$0xff]  }
 0x233   : > { %v2585_v27 = vadd.f32 %v2301_v23, %v2473_v4  ;;  %v2303_v28 = vadd.f32 %v2236_v26, %v756_v21  ;;  %v1062_v29 = vpop.f32.mrb[3].mxu1 }
 0x234   : > { %v2588_v30 = vadd.f32 %v2302_v25, %v2469_v2  ;;  %v2304_v31 = vadd.f32 %v1062_v29, %v756_v21 }
 0x235   : > { %vm1084_vm14 = vcmp.ge.f32.partialorder %v2585_v27, 0.0  ;;  %v1088_v32 = vmul.f32 0.1, %v2585_v27  ;;  %v2593_v6 = vadd.f32 %v2303_v28, %v2479_v7 }
 0x236   : > { %vm1082_vm15 = vcmp.ge.f32.partialorder %v2588_v30, 0.0  ;;  %v1086_v33 = vmul.f32 0.1, %v2588_v30  ;;  %v2598_v4 = vadd.f32 %v2304_v31, %v2471_v3  ;;  %v2415_v31 = vmov 0  }
 0x237   : > { %v1092_v34 = vsel %vm1084_vm14, %v2585_v27, %v1088_v32  ;;  %vm1085_vm0 = vcmp.ge.f32.partialorder %v2593_v6, 0.0  ;;  %v1089_v2 = vmul.f32 0.1, %v2593_v6  ;;  %v1381_v32 = vrot.slane %v2415_v31, 1 }
 0x238   : > { %v1090_v35 = vsel %vm1082_vm15, %v2588_v30, %v1086_v33  ;;  %vm1083_vm1 = vcmp.ge.f32.partialorder %v2598_v4, 0.0  ;;  %v1087_v7 = vmul.f32 0.1, %v2598_v4  ;;  %v1102_v38 = vrot.slane %v1092_v34, 2 }
 0x239   : > { %v1093_v36 = vsel %vm1085_vm0, %v2593_v6, %v1089_v2  ;;  %v1099_v37 = vrot.slane %v1090_v35, 2 }
 0x23a   : > { %v1104_v39 = vrot.slane %v1093_v36, 2  ;;  %v1091_v3 = vsel %vm1083_vm1, %v2598_v4, %v1087_v7  ;;  %v2416_v7 = vmov 0.0|0.0  }
 0x23b   : > { %v1100_v40 = vrot.slane %v1091_v3, 2  ;;  %v1111_v46 = vsel %vm587_vm9, 0.0, %v1099_v37  ;;  %v1457_v36 = vrot.slane %v2416_v7, 2  ;;  %v1181_v3 = vsub.s32 1, %v2527_v5 }
 0x23c   : > { %v1112_v41 = vsel %vm587_vm9, %v1104_v39, 0.0  ;;  %v1105_v42 = vsel %vm587_vm9, %v1102_v38, %v1104_v39  ;;  %v2403_v39 = vld [vmem:[%s2704_s3 + $0x30] sm:$0xff]  }
 0x23d   : > { %v1190_v43 = vpack.c.bf16 %v1112_v41, %v1112_v41  ;;  %v1101_v44 = vsel %vm587_vm9, %v1099_v37, %v1100_v40  ;;  %v1103_v45 = vsel %vm587_vm9, %v1100_v40, %v1102_v38  ;;  %v1361_v16 = vpack.c.bf16 %v1112_v41, %v1105_v42  ;;  %v2402_v38 = vld [vmem:[%s2704_s3 + $0x28] sm:$0xff]  }
 0x23e   : > { %v1116_v47 = vpack.c.bf16 %v1101_v44, %v1111_v46  ;;  %v1117_v48 = vpack.c.bf16 %v1105_v42, %v1103_v45  ;;  %v1360_v0 = vpack.c.bf16 %v1103_v45, %v1101_v44  ;;  %2267 = vmatprep.subr.bf16.mxu1 %v2402_v38  ;;  %v1182_v40 = vrot.slane %v2533_v8, %v1181_v3 }
 0x23f   : > { %v1207_v50 = vshrl.u32 %v1190_v43, 16  ;;  %v1210_v51 = vshll.u32 %v1190_v43, 16  ;;  %v1290_v21 = vrot.slane %v1190_v43, 3  ;;  %v1375_v28 = vshrl.u32 %v1361_v16, 16  ;;  %2268 = vmatpush3.bf16.msra.mxu1 %v2402_v38 }
 0x240   : > { %2239 = vmatprep.mubr.msk.bf16.mxu0 %vm273_vm5, %v1116_v47  ;;  %v1191_v52 = vshrl.u32 %v1116_v47, 16  ;;  %v1194_v53 = vshll.u32 %v1116_v47, 16  ;;  %v1198_v54 = vshrl.u32 %v1117_v48, 16  ;;  %v1201_v55 = vshll.u32 %v1117_v48, 16  ;;  %2273 = vmatprep.subr.bf16.mxu1 %v2403_v39 }
 0x241   : > { %2240 = vmatmul.mubr.msk.bf16.vlgmr.msra.gmra.mrb[4].mxu0 %vm273_vm5, %v1117_v48  ;;  %v1209_v62 = vrot.slane %v1207_v50, 1  ;;  %v1212_v63 = vrot.slane %v1210_v51, 2  ;;  %v1287_v10 = vrot.slane %v1116_v47, 3  ;;  %v1288_v11 = vrot.slane %v1117_v48, 3 }
 0x242   : > { %2244 = vmatpush3.bf16.msra.mxu0 %v2398_v19  ;;  %v1193_v56 = vrot.slane %v1191_v52, 1  ;;  %v1196_v57 = vrot.slane %v1194_v53, 2  ;;  %v1200_v58 = vrot.slane %v1198_v54, 1  ;;  %v1203_v59 = vrot.slane %v1201_v55, 2 }
 0x243   : > { %2249 = vmatprep.subr.bf16.mxu0 %v2399_v49  ;;  %v1213_v9 = vor.u32 %v1212_v63, %v1209_v62  ;;  %v1289_v14 = vsel %vm1286_vm3, %v1287_v10, %v1288_v11  ;;  %v1366_v15 = vshll.u32 %v1360_v0, 16  ;;  %v1364_v18 = vshrl.u32 %v1360_v0, 16 }
 0x244   : > { %v1197_v60 = vor.u32 %v1196_v57, %v1193_v56  ;;  %v1204_v61 = vor.u32 %v1203_v59, %v1200_v58  ;;  %v1371_v19 = vshll.u32 %v1361_v16, 16  ;;  %v1291_v25 = vsel %vm1286_vm3, %v1288_v11, %v1290_v21  ;;  %v2404_v11 = vld [vmem:[%s2704_s3 + $0x38] sm:$0xff]  }
 0x245   : > { %v1368_v17 = vrot.slane %v1366_v15, 1  ;;  %v1454_v33 = vrot.slane %v1360_v0, 2  ;;  %v1455_v34 = vrot.slane %v1361_v16, 2 }
 0x246   : > { %v1205_v1 = vsel %vm505_vm8, %v1197_v60, %v1204_v61  ;;  %v1214_v13 = vsel %vm505_vm8, %v1204_v61, %v1213_v9  ;;  %v1373_v23 = vrot.slane %v1371_v19, 1 }
 0x247   : > { %2245 = vmatprep.mubr.msk.bf16.mxu0 %vm273_vm5, %v1205_v1  ;;  %v1369_v22 = vor.u32 %v1368_v17, %v1364_v18  ;;  %v1456_v35 = vsel %vm587_vm9, %v1454_v33, %v1455_v34  ;;  %v1458_v37 = vsel %vm587_vm9, %v1455_v34, %v1457_v36 }
 0x248   : > { %v1377_v29 = vor.u32 %v1375_v28, %v1373_v23 }
 0x249   : > { %v1374_v26 = vsel %vm341_vm6, %v1369_v22, %v1373_v23 }
 0x24a   : > { %v1382_v2 = vsel %vm341_vm6, %v1377_v29, %v1381_v32 }
 0x24d   : > { %2246 = vmatmul.mubr.msk.bf16.vlgmr.msra.gmra.mrb[4].mxu0 %vm273_vm5, %v1214_v13 }
 0x24e   : > { %2250 = vmatpush3.bf16.msra.mxu0 %v2399_v49  ;;  %2251 = vmatprep.mubr.msk.bf16.mxu0 %vm273_vm5, %v1289_v14 }
 0x24f   : > { %2255 = vmatprep.subr.bf16.mxu0 %v2400_v12 }
 0x259   : > { %2252 = vmatmul.mubr.msk.bf16.vlgmr.msra.gmra.mrb[4].mxu0 %vm273_vm5, %v1291_v25 }
 0x25a   : > { %2256 = vmatpush3.bf16.msra.mxu0 %v2400_v12  ;;  %2257 = vmatprep.mubr.msk.bf16.mxu0 %vm273_vm5, %v1374_v26 }
 0x25b   : > { %2261 = vmatprep.subr.bf16.mxu0 %v2401_v24 }
 0x265   : > { %2258 = vmatmul.mubr.msk.bf16.vlgmr.msra.gmra.mrb[4].mxu0 %vm273_vm5, %v1382_v2 }
 0x266   : > { %2262 = vmatpush3.bf16.msra.mxu0 %v2401_v24  ;;  %2263 = vmatprep.mubr.msk.bf16.mxu0 %vm273_vm5, %v1456_v35 }
 0x271   : > { %2264 = vmatmul.mubr.msk.bf16.vlgmr.msra.gmra.mrb[4].mxu0 %vm273_vm5, %v1458_v37 }
 0x344   : > { %v2265_v41 = vpop.f32.mrb[4].mxu0 }
 0x345   : > { %v2305_v42 = vadd.f32 %v2265_v41, %v1182_v40  ;;  %v1505_v43 = vpop.f32.mrb[5].mxu0 }
 0x346   : > { %v2306_v44 = vadd.f32 %v1505_v43, %v1182_v40  ;;  %v2266_v45 = vpop.f32.mrb[6].mxu0 }
 0x347   : > { %vm1526_vm4 = vcmp.ge.f32.partialorder %v2305_v42, 0.0  ;;  %v1530_v46 = vmul.f32 0.1, %v2305_v42  ;;  %v2307_v47 = vadd.f32 %v2266_v45, %v1182_v40  ;;  %v1508_v48 = vpop.f32.mrb[7].mxu0 }
 0x348   : > { %vm1524_vm10 = vcmp.ge.f32.partialorder %v2306_v44, 0.0  ;;  %v1528_v49 = vmul.f32 0.1, %v2306_v44  ;;  %v2308_v50 = vadd.f32 %v1508_v48, %v1182_v40  ;;  %v2406_v48 = vld [vmem:[%s2704_s3 + $0x48] sm:$0xff]  }
 0x349   : > { %v1534_v51 = vsel %vm1526_vm4, %v2305_v42, %v1530_v46  ;;  %vm1527_vm11 = vcmp.ge.f32.partialorder %v2307_v47, 0.0  ;;  %v1531_v52 = vmul.f32 0.1, %v2307_v47 }
 0x34a   : > { %v1532_v53 = vsel %vm1524_vm10, %v2306_v44, %v1528_v49  ;;  %vm1525_vm12 = vcmp.ge.f32.partialorder %v2308_v50, 0.0  ;;  %v1529_v54 = vmul.f32 0.1, %v2308_v50  ;;  %v1543_v56 = vrot.slane %v1534_v51, 6 }
 0x34b   : > { %v1540_v55 = vrot.slane %v1532_v53, 6  ;;  %v1535_v8 = vsel %vm1527_vm11, %v2307_v47, %v1531_v52  ;;  %v2405_v47 = vld [vmem:[%s2704_s3 + $0x40] sm:$0xff]   ;;  %v1623_v49 = vrot.slane %v2579_v20, %v1181_v3 }
 0x34c   : > { %v1545_v57 = vrot.slane %v1535_v8, 6  ;;  %v1533_v58 = vsel %vm1525_vm12, %v2308_v50, %v1529_v54 }
 0x34d   : > { %v1541_v59 = vrot.slane %v1533_v58, 6  ;;  %v1552_v62 = vsel %vm248_vm2, 0.0, %v1540_v55 }
 0x34e   : > { %v1546_v60 = vsel %vm248_vm2, %v1543_v56, %v1545_v57  ;;  %v1553_v61 = vsel %vm248_vm2, %v1545_v57, 0.0 }
 0x34f   : > { %v1631_v63 = vpack.c.bf16 %v1553_v61, %v1553_v61  ;;  %v1542_v1 = vsel %vm248_vm2, %v1540_v55, %v1541_v59  ;;  %v1544_v9 = vsel %vm248_vm2, %v1541_v59, %v1543_v56 }
 0x350   : > { %v1557_v0 = vpack.c.bf16 %v1542_v1, %v1552_v62  ;;  %v1558_v10 = vpack.c.bf16 %v1546_v60, %v1544_v9 }
 0x351   : > { %v1646_v12 = vshll.u32 %v1631_v63, 16  ;;  %v1724_v13 = vrot.slane %v1631_v63, 1  ;;  %v1801_v14 = vshrl.u32 %v1631_v63, 16  ;;  %v1878_v15 = vrot.slane %v1631_v63, 2 }
 0x352   : > { %2269 = vmatprep.mubr.msk.bf16.mxu1 %vm273_vm5, %v1557_v0  ;;  %v1632_v16 = vshrl.u32 %v1557_v0, 16  ;;  %v1634_v17 = vshll.u32 %v1557_v0, 16  ;;  %v1638_v18 = vshll.u32 %v1558_v10, 16  ;;  %v1642_v19 = vshrl.u32 %v1558_v10, 16 }
 0x353   : > { %2270 = vmatmul.mubr.msk.bf16.vlgmr.msra.gmra.mrb[4].mxu1 %vm273_vm5, %v1558_v10  ;;  %v1648_v21 = vrot.slane %v1646_v12, 1  ;;  %v1721_v22 = vrot.slane %v1557_v0, 1  ;;  %v1722_v23 = vrot.slane %v1558_v10, 1  ;;  %v1803_v24 = vrot.slane %v1801_v14, 1 }
 0x354   : > { %2274 = vmatpush3.bf16.msra.mxu1 %v2403_v39  ;;  %v1636_v25 = vrot.slane %v1634_v17, 1  ;;  %v1640_v26 = vrot.slane %v1638_v18, 1  ;;  %v1794_v28 = vrot.slane %v1632_v16, 1  ;;  %v1795_v29 = vrot.slane %v1634_v17, 2 }
 0x355   : > { %2279 = vmatprep.subr.bf16.mxu1 %v2404_v11  ;;  %v1723_v31 = vsel %vm431_vm7, %v1721_v22, %v1722_v23  ;;  %v1725_v32 = vsel %vm431_vm7, %v1722_v23, %v1724_v13  ;;  %v1797_v33 = vrot.slane %v1642_v19, 1  ;;  %v1798_v34 = vrot.slane %v1638_v18, 2 }
 0x356   : > { %v1637_v2 = vor.u32 %v1636_v25, %v1632_v16  ;;  %v1644_v35 = vor.u32 %v1642_v19, %v1640_v26  ;;  %v1796_v7 = vor.u32 %v1795_v29, %v1794_v28  ;;  %v1804_v36 = vrot.slane %v1646_v12, 2 }
 0x357   : > { %v1799_v37 = vor.u32 %v1798_v34, %v1797_v33  ;;  %v1875_v38 = vrot.slane %v1557_v0, 2  ;;  %v1876_v40 = vrot.slane %v1558_v10, 2 }
 0x358   : > { %v1641_v39 = vsel %vm341_vm6, %v1637_v2, %v1640_v26  ;;  %v1649_v41 = vsel %vm341_vm6, %v1644_v35, %v1648_v21  ;;  %v1805_v42 = vor.u32 %v1804_v36, %v1803_v24 }
 0x359   : > { %2275 = vmatprep.mubr.msk.bf16.mxu1 %vm273_vm5, %v1641_v39  ;;  %v1800_v43 = vsel %vm505_vm8, %v1796_v7, %v1799_v37  ;;  %v1877_v44 = vsel %vm587_vm9, %v1875_v38, %v1876_v40  ;;  %v1879_v45 = vsel %vm587_vm9, %v1876_v40, %v1878_v15 }
 0x35a   : > { %v1806_v46 = vsel %vm505_vm8, %v1799_v37, %v1805_v42 }
 0x35f   : > { %2276 = vmatmul.mubr.msk.bf16.vlgmr.msra.gmra.mrb[4].mxu1 %vm273_vm5, %v1649_v41 }
 0x360   : > { %2280 = vmatpush3.bf16.msra.mxu1 %v2404_v11  ;;  %2281 = vmatprep.mubr.msk.bf16.mxu1 %vm273_vm5, %v1723_v31 }
 0x361   : > { %2285 = vmatprep.subr.bf16.mxu1 %v2405_v47 }
 0x36b   : > { %2282 = vmatmul.mubr.msk.bf16.vlgmr.msra.gmra.mrb[4].mxu1 %vm273_vm5, %v1725_v32 }
 0x36c   : > { %2286 = vmatpush3.bf16.msra.mxu1 %v2405_v47  ;;  %2287 = vmatprep.mubr.msk.bf16.mxu1 %vm273_vm5, %v1800_v43 }
 0x36d   : > { %2291 = vmatprep.subr.bf16.mxu1 %v2406_v48 }
 0x377   : > { %2288 = vmatmul.mubr.msk.bf16.vlgmr.msra.gmra.mrb[4].mxu1 %vm273_vm5, %v1806_v46 }
 0x378   : > { %2292 = vmatpush3.bf16.msra.mxu1 %v2406_v48  ;;  %2293 = vmatprep.mubr.msk.bf16.mxu1 %vm273_vm5, %v1877_v44 }
 0x383   : > { %2294 = vmatmul.mubr.msk.bf16.vlgmr.msra.gmra.mrb[4].mxu1 %vm273_vm5, %v1879_v45 }
 0x456   : > { %v2295_v50 = vpop.f32.mrb[4].mxu1 }
 0x457   : > { %v2309_v51 = vadd.f32 %v2295_v50, %v1623_v49  ;;  %v1926_v52 = vpop.f32.mrb[5].mxu1 }
 0x458   : > { %v2310_v53 = vadd.f32 %v1926_v52, %v1623_v49  ;;  %v2296_v54 = vpop.f32.mrb[6].mxu1 }
 0x459   : > { %v1947_v55 = vadd.f32 %v2309_v51, %v2585_v27  ;;  %v2311_v8 = vadd.f32 %v2296_v54, %v1623_v49  ;;  %v1929_v56 = vpop.f32.mrb[7].mxu1 }
 0x45a   : > { %v1945_v57 = vadd.f32 %v2310_v53, %v2588_v30  ;;  %v2312_v58 = vadd.f32 %v1929_v56, %v1623_v49 }
 0x45b   : > { %1951 = vst.msk [vmem:[%s224_s26 + $0x10] sm:$0xff] %vm273_vm5, %v1947_v55  ;;  %v1948_v5 = vadd.f32 %v2311_v8, %v2593_v6 }
 0x45c   : > { %1949 = vst.msk [vmem:[%s224_s26] sm:$0xff] %vm273_vm5, %v1945_v57  ;;  %v1946_v20 = vadd.f32 %v2312_v58, %v2598_v4 }
 0x45d   : > { %1952 = vst.msk [vmem:[%s224_s26 + $0x18] sm:$0xff] %vm273_vm5, %v1948_v5 }
 0x45e   : > { %1950 = vst.msk [vmem:[%s224_s26 + $0x8] sm:$0xff] %vm273_vm5, %v1946_v20 }
 0x45f PF: > { %s15_s18 = sadd.s32 1, %s2413_s18  }
 0x460   : > { %p12_p4 = scmp.ge.s32.totalorder %s15_s18, 4  }
 0x462   :  { %14 = sbr.rel (!%p12_p4) target bundleno = 1 (0x1), region = 88 }

// kernel: _lambda_.20
= control target key start
LH: loop header
LB: loop body
LE: loop exit
PB: predicated region body
PF: predicated region fallthrough
CT: control target
= control target key end

     0   :  { %s721_s12 = smov 0   ;;  %s780_s0 = inlined_call_operand.vmem [shape: f32[2,32,16], index: 0, kind: input, shape index: {}]   ;;  %s781_s1 = inlined_call_operand.vmem [shape: bf16[4,16,8], index: 1, kind: input, shape index: {}]   ;;  %s782_s2 = inlined_call_operand.vmem [shape: f32[1,8], index: 2, kind: input, shape index: {}]   ;;  %s783_s3 = inlined_call_operand.vmem [shape: f32[2,32,16], index: 3, kind: output, shape index: {}]  }
   0x1 LB: > { %s595_s13 = sadd.s32 4294967295, %s698_s12   ;;  %p599_p0 = scmp.ge.s32.totalorder %s698_s12, 1  ;;  %s698_s12 = sphi %s721_s12, %s13_s12  }
   0x2   : > { %p137_p1 = scmp.lt.s32.totalorder %s698_s12, 3 }
   0x4   : > { %p138_p2 = pnand %p599_p0, %p137_p1 }
   0x5   : > { %v688_v0 = vld [vmem:[%s781_s1] sm:$0xff] (!%p138_p2)   ;;  %p161_p3 = scmp.lt.s32.totalorder (!%p138_p2), %s595_s13, 1  ;;  %v735_v1 = vld [vmem:[%s781_s1 + $0x10] sm:$0xff] (!%p138_p2)   ;;  %v690_v2 = vld [vmem:[%s781_s1 + $0x8] sm:$0xff] (!%p138_p2)   ;;  %vm196_vm4 = vcmask (!%p138_p2), 1040384   ;;  %vm245_vm5 = vcmask (!%p138_p2), 130048  }
   0x6   : > { %141 = sbr.rel (%p138_p2) target bundleno = 381 (0x17d), region = 32  ;;  %651 = vmatprep.subr.bf16.mxu1 (!%p138_p2), %v688_v0  ;;  %639 = vmatprep.subr.bf16.mxu0 (!%p138_p2), %v690_v2  ;;  %v747_v3 = vld [vmem:[%s781_s1 + $0x18] sm:$0xff] (!%p138_p2)   ;;  %vm382_vm6 = vcmask (!%p138_p2), 1046528   ;;  %vm218_vm7 = vsmask.f32 (!%p138_p2), 7424  ;;  %s700_s28 = smov (!%p138_p2), 8  }
   0x7   : > { %652 = vmatpush3.bf16.msra.mxu1 (!%p138_p2), %v688_v0  ;;  %640 = vmatpush3.bf16.msra.mxu0 (!%p138_p2), %v690_v2  ;;  %v609_v49 = vld [vmem:[%s782_s2] ss:$0 sm:$0xff] (!%p138_p2)  ;;  %vm531_vm8 = vcmask (!%p138_p2), 64512  }
   0x8   : > { %657 = vmatprep.subr.bf16.mxu1 (!%p138_p2), %v735_v1  ;;  %645 = vmatprep.subr.bf16.mxu0 (!%p138_p2), %v747_v3 }
   0xd   : > { %s785_s13 = smov (!%p161_p3, %s595_s13), 1 }
   0xe   : > { %s625_s20 = sshll.u32 %s785_s13, 5 }
   0xf   : > { %s165_s25 = scalar_lea.vmem %s780_s0, %s625_s20  ;;  %s170_s4 = scalar_lea.vmem %s783_s3, %s625_s20 }
  0x10   : > { %v172_v4 = vld [vmem:[%s165_s25] sm:$0xff]  ;;  %v173_v5 = vld [vmem:[%s165_s25 + $0x8] sm:$0xff]  ;;  %v174_v6 = vld [vmem:[%s165_s25 + $0x10] sm:$0xff] }
  0x11   : > { %v175_v7 = vld [vmem:[%s165_s25 + $0x18] sm:$0xff]  ;;  %v176_v8 = vmul.f32 0.5, %v172_v4  ;;  %v177_v9 = vmul.f32 0.5, %v173_v5  ;;  %v178_v10 = vmul.f32 0.5, %v174_v6 }
  0x12   : > { %v179_v11 = vmul.f32 0.5, %v175_v7 }
  0x13   : > { %vm180_vm0 = vcmp.ge.f32.partialorder %v176_v8, 0.0  ;;  %vm181_vm1 = vcmp.ge.f32.partialorder %v177_v9, 0.0  ;;  %vm182_vm2 = vcmp.ge.f32.partialorder %v178_v10, 0.0  ;;  %v184_v12 = vmul.f32 0.1, %v176_v8 }
  0x14   : > { %vm183_vm3 = vcmp.ge.f32.partialorder %v179_v11, 0.0  ;;  %v185_v13 = vmul.f32 0.1, %v177_v9  ;;  %v186_v14 = vmul.f32 0.1, %v178_v10 }
  0x15   : > { %v187_v15 = vmul.f32 0.1, %v179_v11  ;;  %v188_v16 = vsel %vm180_vm0, %v176_v8, %v184_v12 }
  0x16   : > { %v189_v17 = vsel %vm181_vm1, %v177_v9, %v185_v13  ;;  %v190_v18 = vsel %vm182_vm2, %v178_v10, %v186_v14  ;;  %v197_v19 = vrot.slane %v188_v16, 7 }
  0x17   : > { %v191_v20 = vsel %vm183_vm3, %v179_v11, %v187_v15  ;;  %v198_v21 = vrot.slane %v189_v17, 7  ;;  %v200_v22 = vrot.slane %v190_v18, 7 }
  0x18   : > { %v202_v23 = vrot.slane %v191_v20, 7  ;;  %v209_v24 = vsel %vm196_vm4, 0.0, %v197_v19 }
  0x19   : > { %v199_v25 = vsel %vm196_vm4, %v197_v19, %v198_v21  ;;  %v201_v26 = vsel %vm196_vm4, %v198_v21, %v200_v22 }
  0x1a   : > { %v203_v27 = vsel %vm196_vm4, %v200_v22, %v202_v23  ;;  %v215_v28 = vpack.c.bf16 %v199_v25, %v209_v24  ;;  %v210_v29 = vsel %vm196_vm4, %v202_v23, 0.0 }
  0x1b   : > { %v216_v30 = vpack.c.bf16 %v203_v27, %v201_v26  ;;  %v217_v31 = vpack.c.bf16 %v210_v29, %v210_v29 }
  0x1c   : > { %v383_v32 = vrot.slane %v215_v28, 1  ;;  %v220_v33 = vshrl.u32 %v215_v28, 16  ;;  %v222_v34 = vshll.u32 %v215_v28, 16 }
  0x1d   : > { %v384_v35 = vrot.slane %v216_v30, 1  ;;  %v386_v36 = vrot.slane %v217_v31, 1  ;;  %v227_v37 = vshll.u32 %v216_v30, 16  ;;  %v231_v38 = vshrl.u32 %v216_v30, 16 }
  0x1e   : > { %v224_v39 = vrot.slane %v222_v34, 1  ;;  %v235_v40 = vshll.u32 %v217_v31, 16 }
  0x1f   : > { %v385_v41 = vsel %vm382_vm6, %v383_v32, %v384_v35  ;;  %v387_v42 = vsel %vm382_vm6, %v384_v35, %v386_v36  ;;  %v229_v43 = vrot.slane %v227_v37, 1 }
  0x20   : > { %653 = vmatprep.mubr.msk.bf16.mxu1 %vm245_vm5, %v385_v41  ;;  %v225_v44 = vor.u32 %v224_v39, %v220_v33  ;;  %v237_v45 = vrot.slane %v235_v40, 1 }
  0x21   : > { %654 = vmatmul.mubr.msk.bf16.vlgmr.msra.gmra.mrb[0].mxu1 %vm245_vm5, %v387_v42  ;;  %v233_v46 = vor.u32 %v231_v38, %v229_v43 }
  0x22   : > { %658 = vmatpush3.bf16.msra.mxu1 %v735_v1  ;;  %v230_v47 = vsel %vm218_vm7, %v225_v44, %v229_v43 }
  0x23   : > { %659 = vmatprep.mubr.msk.bf16.mxu1 %vm245_vm5, %v230_v47  ;;  %v238_v48 = vsel %vm218_vm7, %v233_v46, %v237_v45  ;;  %641 = vmatprep.mubr.msk.bf16.mxu0 %vm245_vm5, %v230_v47 }
  0x24   : > { %642 = vmatmul.mubr.msk.bf16.vlgmr.msra.gmra.mrb[0].mxu0 %vm245_vm5, %v238_v48 }
  0x25   : > { %646 = vmatpush3.bf16.msra.mxu0 %v747_v3  ;;  %647 = vmatprep.mubr.msk.bf16.mxu0 %vm245_vm5, %v215_v28 }
  0x2d   : > { %660 = vmatmul.mubr.msk.bf16.vlgmr.msra.gmra.mrb[0].mxu1 %vm245_vm5, %v238_v48 }
  0x30   : > { %648 = vmatmul.mubr.msk.bf16.vlgmr.msra.gmra.mrb[0].mxu0 %vm245_vm5, %v216_v30 }
 0x100   : > { %v661_v50 = vpop.f32.mrb[0].mxu1 }
 0x101   : > { %v667_v51 = vadd.f32 %v661_v50, %v609_v49  ;;  %v496_v52 = vpop.f32.mrb[1].mxu1 }
 0x102   : > { %v668_v53 = vadd.f32 %v609_v49, %v496_v52  ;;  %v662_v54 = vpop.f32.mrb[2].mxu1 }
 0x103   : > { %523 = vrot.lane.b32.xlu1 %v667_v51, %s700_s28  ;;  %v499_v55 = vpop.f32.mrb[3].mxu1  ;;  %v649_v56 = vpop.f32.mrb[0].mxu0  ;;  %v669_v59 = vadd.f32 %v662_v54, %v609_v49 }
 0x104   : > { %519 = vrot.lane.b32.xlu0 %v668_v53, %s700_s28  ;;  %v663_v57 = vadd.f32 %v649_v56, %v609_v49  ;;  %v358_v58 = vpop.f32.mrb[1].mxu0  ;;  %v670_v62 = vadd.f32 %v609_v49, %v499_v55 }
 0x105   : > { %v664_v60 = vadd.f32 %v609_v49, %v358_v58  ;;  %v650_v61 = vpop.f32.mrb[2].mxu0 }
 0x106   : > { %v665_v63 = vadd.f32 %v650_v61, %v609_v49  ;;  %v361_v0 = vpop.f32.mrb[3].mxu0 }
 0x107   : > { %525 = vrot.lane.b32.xlu1 %v669_v59, %s700_s28  ;;  %v666_v1 = vadd.f32 %v609_v49, %v361_v0 }
 0x108   : > { %521 = vrot.lane.b32.xlu0 %v670_v62, %s700_s28 }
 0x175   : > { %v524_v2 = vpop.permute.xlu1 %523 }
 0x176   : > { %v534_v3 = vsel %vm531_vm8, %v663_v57, %v524_v2  ;;  %v520_v4 = vpop.permute.xlu0 %519 }
 0x177   : > { %538 = vst.msk [vmem:[%s170_s4 + $0x10] sm:$0xff] %vm245_vm5, %v534_v3  ;;  %v532_v5 = vsel %vm531_vm8, %v664_v60, %v520_v4 }
 0x178   : > { %536 = vst.msk [vmem:[%s170_s4] sm:$0xff] %vm245_vm5, %v532_v5 }
 0x179   : > { %v526_v6 = vpop.permute.xlu1 %525 }
 0x17a   : > { %v535_v7 = vsel %vm531_vm8, %v665_v63, %v526_v6  ;;  %v522_v8 = vpop.permute.xlu0 %521 }
 0x17b   : > { %539 = vst.msk [vmem:[%s170_s4 + $0x18] sm:$0xff] %vm245_vm5, %v535_v7  ;;  %v533_v9 = vsel %vm531_vm8, %v666_v1, %v522_v8 }
 0x17c   : > { %537 = vst.msk [vmem:[%s170_s4 + $0x8] sm:$0xff] %vm245_vm5, %v533_v9 }
 0x17d PF: > { %s13_s12 = sadd.s32 1, %s698_s12  }
 0x17e   : > { %p10_p4 = scmp.ge.s32.totalorder %s13_s12, 4  }
 0x180   :  { %12 = sbr.rel (!%p10_p4) target bundleno = 1 (0x1), region = 65 }

// kernel: _lambda_.18
= control target key start
LH: loop header
LB: loop body
LE: loop exit
PB: predicated region body
PF: predicated region fallthrough
CT: control target
= control target key end

     0   :  { %s1661_s18 = smov 0   ;;  %s1846_s0 = inlined_call_operand.vmem [shape: f32[2,32,16], index: 0, kind: input, shape index: {}]   ;;  %s1847_s1 = inlined_call_operand.vmem [shape: bf16[6,16,16], index: 1, kind: input, shape index: {}]   ;;  %s1848_s2 = inlined_call_operand.vmem [shape: f32[2,16], index: 2, kind: input, shape index: {}]   ;;  %s1849_s3 = inlined_call_operand.vmem [shape: bf16[6,16,16], index: 3, kind: input, shape index: {}]   ;;  %s1850_s4 = inlined_call_operand.vmem [shape: f32[2,16], index: 4, kind: input, shape index: {}]   ;;  %s1851_s5 = inlined_call_operand.vmem [shape: f32[2,32,16], index: 5, kind: output, shape index: {}]  }
   0x1 LB: > { %s1378_s19 = sadd.s32 4294967295, %s1629_s18   ;;  %p1382_p0 = scmp.ge.s32.totalorder %s1629_s18, 1  ;;  %s1629_s18 = sphi %s1661_s18, %s15_s18  }
   0x2   : > { %p187_p1 = scmp.lt.s32.totalorder %s1629_s18, 3 }
   0x4   : > { %p188_p2 = pnand %p1382_p0, %p187_p1 }
   0x5   : > { %v1611_v0 = vld [vmem:[%s1847_s1] sm:$0xff] (!%p188_p2)   ;;  %p215_p3 = scmp.lt.s32.totalorder (!%p188_p2), %s1378_s19, 1  ;;  %v1612_v1 = vld [vmem:[%s1847_s1 + $0x8] sm:$0xff] (!%p188_p2)   ;;  %vm248_vm0 = vcmask (!%p188_p2), 1040384   ;;  %vm273_vm5 = vcmask (!%p188_p2), 130048   ;;  %v1613_v27 = vld [vmem:[%s1847_s1 + $0x10] sm:$0xff] (!%p188_p2)   ;;  %v329_v46 = vlaneseq (!%p188_p2) }
   0x6   : > { %191 = sbr.rel (%p188_p2) target bundleno = 1023 (0x3ff), region = 40  ;;  %1483 = vmatprep.subr.bf16.mxu0 (!%p188_p2), %v1611_v0  ;;  %vm341_vm6 = vsmask.f32 (!%p188_p2), 7424  ;;  %vm431_vm7 = vcmask (!%p188_p2), 1046528   ;;  %v1614_v44 = vld [vmem:[%s1849_s3] sm:$0xff] (!%p188_p2)   ;;  %v1615_v45 = vld [vmem:[%s1849_s3 + $0x8] sm:$0xff] (!%p188_p2)  }
   0x7   : > { %1484 = vmatpush3.bf16.msra.mxu0 (!%p188_p2), %v1611_v0  ;;  %1501 = vmatprep.subr.bf16.mxu1 (!%p188_p2), %v1614_v44  ;;  %v1727_v47 = vshrl.u32 (!%p188_p2), %v329_v46, 7  ;;  %v1733_v49 = vld [vmem:[%s1848_s2] sm:$0x3] (!%p188_p2) }
   0x8   : > { %1489 = vmatprep.subr.bf16.mxu0 (!%p188_p2), %v1612_v1  ;;  %1502 = vmatpush3.bf16.msra.mxu1 (!%p188_p2), %v1614_v44 }
   0x9   : > { %1507 = vmatprep.subr.bf16.mxu1 (!%p188_p2), %v1615_v45  ;;  %v331_v48 = vsub.s32 (!%p188_p2), 0, %v1727_v47 }
   0xb   : > { %v332_v50 = vrot.slane (!%p188_p2), %v1733_v49, %v331_v48 }
   0xd   : > { %s1853_s19 = smov (!%p215_p3, %s1378_s19), 1 }
   0xe   : > { %s1445_s24 = sshll.u32 %s1853_s19, 5 }
   0xf   : > { %s219_s27 = scalar_lea.vmem %s1846_s0, %s1445_s24  ;;  %s224_s7 = scalar_lea.vmem %s1851_s5, %s1445_s24 }
  0x10   : > { %v1683_v2 = vld [vmem:[%s219_s27] sm:$0xff]  ;;  %v1685_v3 = vld [vmem:[%s219_s27 + $0x8] sm:$0xff]  ;;  %v1687_v4 = vld [vmem:[%s219_s27 + $0x10] sm:$0xff] }
  0x11   : > { %vm232_vm1 = vcmp.ge.f32.partialorder %v1683_v2, 0.0  ;;  %vm233_vm2 = vcmp.ge.f32.partialorder %v1685_v3, 0.0  ;;  %v236_v5 = vmul.f32 0.1, %v1683_v2  ;;  %v237_v6 = vmul.f32 0.1, %v1685_v3 }
  0x12   : > { %v1693_v7 = vld [vmem:[%s219_s27 + $0x18] sm:$0xff]  ;;  %vm234_vm3 = vcmp.ge.f32.partialorder %v1687_v4, 0.0  ;;  %v238_v8 = vmul.f32 0.1, %v1687_v4 }
  0x13   : > { %v240_v9 = vsel %vm232_vm1, %v1683_v2, %v236_v5  ;;  %v241_v10 = vsel %vm233_vm2, %v1685_v3, %v237_v6  ;;  %vm235_vm4 = vcmp.ge.f32.partialorder %v1693_v7, 0.0  ;;  %v239_v11 = vmul.f32 0.1, %v1693_v7 }
  0x14   : > { %v249_v12 = vrot.slane %v240_v9, 7  ;;  %v250_v13 = vrot.slane %v241_v10, 7  ;;  %v242_v14 = vsel %vm234_vm3, %v1687_v4, %v238_v8  ;;  %vm788_vm1 = vcmask 1042432  }
  0x15   : > { %v243_v15 = vsel %vm235_vm4, %v1693_v7, %v239_v11  ;;  %v252_v16 = vrot.slane %v242_v14, 7  ;;  %vm881_vm2 = vsmask.f32 6400  ;;  %vm977_vm3 = vcmask 1044480  }
  0x16   : > { %v251_v17 = vsel %vm248_vm0, %v249_v12, %v250_v13  ;;  %v261_v18 = vsel %vm248_vm0, 0.0, %v249_v12  ;;  %v254_v19 = vrot.slane %v243_v15, 7 }
  0x17   : > { %v265_v20 = vpack.c.bf16 %v251_v17, %v261_v18  ;;  %v253_v21 = vsel %vm248_vm0, %v250_v13, %v252_v16 }
  0x18   : > { %v255_v22 = vsel %vm248_vm0, %v252_v16, %v254_v19  ;;  %v262_v23 = vsel %vm248_vm0, %v254_v19, 0.0 }
  0x19   : > { %1485 = vmatprep.mubr.msk.bf16.mxu0 %vm273_vm5, %v265_v20  ;;  %v266_v24 = vpack.c.bf16 %v255_v22, %v253_v21  ;;  %v342_v25 = vshrl.u32 %v265_v20, 16  ;;  %v344_v26 = vshll.u32 %v265_v20, 16  ;;  %v340_v28 = vpack.c.bf16 %v262_v23, %v262_v23 }
  0x1a   : > { %v432_v38 = vrot.slane %v265_v20, 1  ;;  %v1616_v20 = vld [vmem:[%s1849_s3 + $0x10] sm:$0xff]  }
  0x1b   : > { %1486 = vmatmul.mubr.msk.bf16.vlgmr.msra.gmra.mrb[0].mxu0 %vm273_vm5, %v266_v24  ;;  %v346_v29 = vrot.slane %v344_v26, 1  ;;  %v348_v30 = vshll.u32 %v266_v24, 16  ;;  %v352_v31 = vshrl.u32 %v266_v24, 16  ;;  %v356_v32 = vshll.u32 %v340_v28, 16 }
  0x1c   : > { %1490 = vmatpush3.bf16.msra.mxu0 %v1612_v1  ;;  %v433_v39 = vrot.slane %v266_v24, 1  ;;  %v435_v42 = vrot.slane %v340_v28, 1 }
  0x1d   : > { %v347_v33 = vor.u32 %v346_v29, %v342_v25  ;;  %v350_v34 = vrot.slane %v348_v30, 1  ;;  %1495 = vmatprep.subr.bf16.mxu0 %v1613_v27  ;;  %v358_v37 = vrot.slane %v356_v32, 1 }
  0x1e   : > { %v434_v41 = vsel %vm431_vm7, %v432_v38, %v433_v39  ;;  %v436_v43 = vsel %vm431_vm7, %v433_v39, %v435_v42  ;;  %v1618_v38 = vld [vmem:[%s1847_s1 + $0x20] sm:$0xff]  }
  0x1f   : > { %v351_v35 = vsel %vm341_vm6, %v347_v33, %v350_v34  ;;  %v354_v36 = vor.u32 %v352_v31, %v350_v34  ;;  %v1765_v39 = vld [vmem:[%s1850_s4] sm:$0x3] }
  0x20   : > { %1491 = vmatprep.mubr.msk.bf16.mxu0 %vm273_vm5, %v351_v35 }
  0x21   : > { %v359_v40 = vsel %vm341_vm6, %v354_v36, %v358_v37  ;;  %v1617_v37 = vld [vmem:[%s1847_s1 + $0x18] sm:$0xff]  }
  0x27   : > { %1492 = vmatmul.mubr.msk.bf16.vlgmr.msra.gmra.mrb[0].mxu0 %vm273_vm5, %v359_v40  ;;  %v600_v40 = vrot.slane %v1765_v39, %v331_v48 }
  0x28   : > { %1496 = vmatpush3.bf16.msra.mxu0 %v1613_v27  ;;  %1497 = vmatprep.mubr.msk.bf16.mxu0 %vm273_vm5, %v434_v41 }
  0x29   : > { %1519 = vmatprep.subr.bf16.mxu0 %v1617_v37 }
  0x33   : > { %1498 = vmatmul.mubr.msk.bf16.vlgmr.msra.gmra.mrb[0].mxu0 %vm273_vm5, %v436_v43 }
  0x34   : > { %1520 = vmatpush3.bf16.msra.mxu0 %v1617_v37 }
  0x35   : > { %1525 = vmatprep.subr.bf16.mxu0 %v1618_v38 }
 0x106   : > { %v1499_v51 = vpop.f32.mrb[0].mxu0 }
 0x107   : > { %v1555_v52 = vadd.f32 %v1499_v51, %v332_v50  ;;  %v483_v53 = vpop.f32.mrb[1].mxu0 }
 0x108   : > { %v1556_v54 = vadd.f32 %v483_v53, %v332_v50  ;;  %v1500_v55 = vpop.f32.mrb[2].mxu0 }
 0x109   : > { %vm504_vm8 = vcmp.ge.f32.partialorder %v1555_v52, 0.0  ;;  %v508_v56 = vmul.f32 0.1, %v1555_v52  ;;  %v1557_v57 = vadd.f32 %v1500_v55, %v332_v50  ;;  %v486_v58 = vpop.f32.mrb[3].mxu0 }
 0x10a   : > { %vm502_vm9 = vcmp.ge.f32.partialorder %v1556_v54, 0.0  ;;  %v506_v59 = vmul.f32 0.1, %v1556_v54  ;;  %v1558_v60 = vadd.f32 %v486_v58, %v332_v50 }
 0x10b   : > { %v512_v61 = vsel %vm504_vm8, %v1555_v52, %v508_v56  ;;  %vm505_vm10 = vcmp.ge.f32.partialorder %v1557_v57, 0.0  ;;  %v509_v62 = vmul.f32 0.1, %v1557_v57 }
 0x10c   : > { %v510_v63 = vsel %vm502_vm9, %v1556_v54, %v506_v59  ;;  %vm503_vm11 = vcmp.ge.f32.partialorder %v1558_v60, 0.0  ;;  %v507_v0 = vmul.f32 0.1, %v1558_v60  ;;  %v521_v6 = vrot.slane %v512_v61, 7 }
 0x10d   : > { %v518_v1 = vrot.slane %v510_v63, 7  ;;  %v513_v5 = vsel %vm505_vm10, %v1557_v57, %v509_v62 }
 0x10e   : > { %v523_v8 = vrot.slane %v513_v5, 7  ;;  %v511_v9 = vsel %vm503_vm11, %v1558_v60, %v507_v0 }
 0x10f   : > { %v519_v10 = vrot.slane %v511_v9, 7  ;;  %v530_v13 = vsel %vm248_vm0, 0.0, %v518_v1 }
 0x110   : > { %v531_v11 = vsel %vm248_vm0, %v523_v8, 0.0  ;;  %v524_v12 = vsel %vm248_vm0, %v521_v6, %v523_v8 }
 0x111   : > { %v608_v14 = vpack.c.bf16 %v531_v11, %v531_v11  ;;  %v520_v15 = vsel %vm248_vm0, %v518_v1, %v519_v10  ;;  %v522_v16 = vsel %vm248_vm0, %v519_v10, %v521_v6  ;;  %v1619_v11 = vld [vmem:[%s1847_s1 + $0x28] sm:$0xff]  }
 0x112   : > { %v534_v17 = vpack.c.bf16 %v520_v15, %v530_v13  ;;  %v535_v18 = vpack.c.bf16 %v524_v12, %v522_v16 }
 0x113   : > { %v701_v19 = vrot.slane %v608_v14, 1  ;;  %v623_v21 = vshll.u32 %v608_v14, 16 }
 0x114   : > { %1503 = vmatprep.mubr.msk.bf16.mxu1 %vm273_vm5, %v534_v17  ;;  %v611_v22 = vshll.u32 %v534_v17, 16  ;;  %v615_v23 = vshll.u32 %v535_v18, 16  ;;  %v698_v24 = vrot.slane %v534_v17, 1  ;;  %v699_v25 = vrot.slane %v535_v18, 1 }
 0x115   : > { %1504 = vmatmul.mubr.msk.bf16.vlgmr.msra.gmra.mrb[0].mxu1 %vm273_vm5, %v535_v18  ;;  %v609_v26 = vshrl.u32 %v534_v17, 16  ;;  %v619_v29 = vshrl.u32 %v535_v18, 16  ;;  %v625_v32 = vrot.slane %v623_v21, 1 }
 0x116   : > { %1508 = vmatpush3.bf16.msra.mxu1 %v1615_v45  ;;  %v613_v27 = vrot.slane %v611_v22, 1  ;;  %v617_v28 = vrot.slane %v615_v23, 1  ;;  %v700_v30 = vsel %vm431_vm7, %v698_v24, %v699_v25  ;;  %v702_v31 = vsel %vm431_vm7, %v699_v25, %v701_v19 }
 0x117   : > { %1513 = vmatprep.subr.bf16.mxu1 %v1616_v20 }
 0x118   : > { %v614_v33 = vor.u32 %v613_v27, %v609_v26  ;;  %v621_v34 = vor.u32 %v619_v29, %v617_v28 }
 0x11a   : > { %v618_v35 = vsel %vm341_vm6, %v614_v33, %v617_v28  ;;  %v626_v36 = vsel %vm341_vm6, %v621_v34, %v625_v32  ;;  %v1620_v34 = vld [vmem:[%s1849_s3 + $0x18] sm:$0xff]  }
 0x11b   : > { %1509 = vmatprep.mubr.msk.bf16.mxu1 %vm273_vm5, %v618_v35  ;;  %v1621_v35 = vld [vmem:[%s1849_s3 + $0x20] sm:$0xff]  }
 0x121   : > { %1510 = vmatmul.mubr.msk.bf16.vlgmr.msra.gmra.mrb[0].mxu1 %vm273_vm5, %v626_v36  ;;  %v871_v36 = vsub.s32 1, %v1727_v47 }
 0x122   : > { %1514 = vmatpush3.bf16.msra.mxu1 %v1616_v20  ;;  %1515 = vmatprep.mubr.msk.bf16.mxu1 %vm273_vm5, %v700_v30 }
 0x123   : > { %1537 = vmatprep.subr.bf16.mxu1 %v1620_v34  ;;  %v872_v37 = vrot.slane %v1733_v49, %v871_v36 }
 0x12d   : > { %1516 = vmatmul.mubr.msk.bf16.vlgmr.msra.gmra.mrb[0].mxu1 %vm273_vm5, %v702_v31 }
 0x12e   : > { %1538 = vmatpush3.bf16.msra.mxu1 %v1620_v34 }
 0x12f   : > { %1543 = vmatprep.subr.bf16.mxu1 %v1621_v35 }
 0x200   : > { %v1517_v41 = vpop.f32.mrb[0].mxu1 }
 0x201   : > { %v1559_v42 = vadd.f32 %v1517_v41, %v600_v40  ;;  %v749_v43 = vpop.f32.mrb[1].mxu1 }
 0x202   : > { %v1560_v44 = vadd.f32 %v749_v43, %v600_v40  ;;  %v1518_v45 = vpop.f32.mrb[2].mxu1 }
 0x203   : > { %v1771_v46 = vadd.f32 %v1559_v42, %v1687_v4  ;;  %v1561_v50 = vadd.f32 %v1518_v45, %v600_v40  ;;  %v752_v51 = vpop.f32.mrb[3].mxu1 }
 0x204   : > { %v1774_v52 = vadd.f32 %v1560_v44, %v1683_v2  ;;  %v1562_v53 = vadd.f32 %v752_v51, %v600_v40 }
 0x205   : > { %vm774_vm12 = vcmp.ge.f32.partialorder %v1771_v46, 0.0  ;;  %v778_v54 = vmul.f32 0.1, %v1771_v46  ;;  %v1779_v48 = vadd.f32 %v1561_v50, %v1693_v7 }
 0x206   : > { %vm772_vm13 = vcmp.ge.f32.partialorder %v1774_v52, 0.0  ;;  %v776_v55 = vmul.f32 0.1, %v1774_v52  ;;  %v1784_v4 = vadd.f32 %v1562_v53, %v1685_v3 }
 0x207   : > { %v782_v56 = vsel %vm774_vm12, %v1771_v46, %v778_v54  ;;  %vm775_vm14 = vcmp.ge.f32.partialorder %v1779_v48, 0.0  ;;  %v779_v2 = vmul.f32 0.1, %v1779_v48 }
 0x208   : > { %v780_v57 = vsel %vm772_vm13, %v1774_v52, %v776_v55  ;;  %vm773_vm15 = vcmp.ge.f32.partialorder %v1784_v4, 0.0  ;;  %v777_v7 = vmul.f32 0.1, %v1784_v4  ;;  %v792_v60 = vrot.slane %v782_v56, 5 }
 0x209   : > { %v783_v58 = vsel %vm775_vm14, %v1779_v48, %v779_v2  ;;  %v789_v59 = vrot.slane %v780_v57, 5 }
 0x20a   : > { %v794_v61 = vrot.slane %v783_v58, 5  ;;  %v781_v3 = vsel %vm773_vm15, %v1784_v4, %v777_v7 }
 0x20b   : > { %v790_v62 = vrot.slane %v781_v3, 5  ;;  %v801_v6 = vsel %vm788_vm1, 0.0, %v789_v59 }
 0x20c   : > { %v802_v63 = vsel %vm788_vm1, %v794_v61, 0.0  ;;  %v795_v0 = vsel %vm788_vm1, %v792_v60, %v794_v61 }
 0x20d   : > { %v880_v1 = vpack.c.bf16 %v802_v63, %v802_v63  ;;  %v791_v5 = vsel %vm788_vm1, %v789_v59, %v790_v62  ;;  %v793_v8 = vsel %vm788_vm1, %v790_v62, %v792_v60 }
 0x20e   : > { %v806_v9 = vpack.c.bf16 %v791_v5, %v801_v6  ;;  %v807_v10 = vpack.c.bf16 %v795_v0, %v793_v8  ;;  %v1622_v8 = vld [vmem:[%s1849_s3 + $0x28] sm:$0xff]  }
 0x20f   : > { %v898_v12 = vshrl.u32 %v880_v1, 16  ;;  %v901_v13 = vshll.u32 %v880_v1, 16  ;;  %v981_v32 = vrot.slane %v880_v1, 3 }
 0x210   : > { %1521 = vmatprep.mubr.msk.bf16.mxu0 %vm273_vm5, %v806_v9  ;;  %v882_v14 = vshrl.u32 %v806_v9, 16  ;;  %v885_v15 = vshll.u32 %v806_v9, 16  ;;  %v889_v16 = vshrl.u32 %v807_v10, 16  ;;  %v892_v17 = vshll.u32 %v807_v10, 16 }
 0x211   : > { %1522 = vmatmul.mubr.msk.bf16.vlgmr.msra.gmra.mrb[4].mxu0 %vm273_vm5, %v807_v10  ;;  %v900_v24 = vrot.slane %v898_v12, 1  ;;  %v903_v25 = vrot.slane %v901_v13, 2  ;;  %v978_v28 = vrot.slane %v806_v9, 3  ;;  %v979_v29 = vrot.slane %v807_v10, 3 }
 0x212   : > { %1526 = vmatpush3.bf16.msra.mxu0 %v1618_v38  ;;  %v884_v18 = vrot.slane %v882_v14, 1  ;;  %v887_v19 = vrot.slane %v885_v15, 2  ;;  %v891_v20 = vrot.slane %v889_v16, 1  ;;  %v894_v21 = vrot.slane %v892_v17, 2 }
 0x213   : > { %1531 = vmatprep.subr.bf16.mxu0 %v1619_v11  ;;  %v904_v27 = vor.u32 %v903_v25, %v900_v24  ;;  %v980_v31 = vsel %vm977_vm3, %v978_v28, %v979_v29  ;;  %v982_v33 = vsel %vm977_vm3, %v979_v29, %v981_v32  ;;  %v1147_v25 = vrot.slane %v1765_v39, %v871_v36 }
 0x214   : > { %v888_v22 = vor.u32 %v887_v19, %v884_v18  ;;  %v895_v23 = vor.u32 %v894_v21, %v891_v20 }
 0x216   : > { %v896_v26 = vsel %vm881_vm2, %v888_v22, %v895_v23  ;;  %v905_v30 = vsel %vm881_vm2, %v895_v23, %v904_v27 }
 0x217   : > { %1527 = vmatprep.mubr.msk.bf16.mxu0 %vm273_vm5, %v896_v26 }
 0x21d   : > { %1528 = vmatmul.mubr.msk.bf16.vlgmr.msra.gmra.mrb[4].mxu0 %vm273_vm5, %v905_v30 }
 0x21e   : > { %1532 = vmatpush3.bf16.msra.mxu0 %v1619_v11  ;;  %1533 = vmatprep.mubr.msk.bf16.mxu0 %vm273_vm5, %v980_v31 }
 0x229   : > { %1534 = vmatmul.mubr.msk.bf16.vlgmr.msra.gmra.mrb[4].mxu0 %vm273_vm5, %v982_v33 }
 0x2fc   : > { %v1535_v38 = vpop.f32.mrb[4].mxu0 }
 0x2fd   : > { %v1563_v40 = vadd.f32 %v1535_v38, %v872_v37  ;;  %v1029_v41 = vpop.f32.mrb[5].mxu0 }
 0x2fe   : > { %v1564_v42 = vadd.f32 %v1029_v41, %v872_v37  ;;  %v1536_v43 = vpop.f32.mrb[6].mxu0 }
 0x2ff   : > { %vm1050_vm4 = vcmp.ge.f32.partialorder %v1563_v40, 0.0  ;;  %v1054_v44 = vmul.f32 0.1, %v1563_v40  ;;  %v1565_v45 = vadd.f32 %v1536_v43, %v872_v37  ;;  %v1032_v50 = vpop.f32.mrb[7].mxu0 }
 0x300   : > { %vm1048_vm8 = vcmp.ge.f32.partialorder %v1564_v42, 0.0  ;;  %v1052_v51 = vmul.f32 0.1, %v1564_v42  ;;  %v1566_v53 = vadd.f32 %v1032_v50, %v872_v37 }
 0x301   : > { %v1058_v54 = vsel %vm1050_vm4, %v1563_v40, %v1054_v44  ;;  %vm1051_vm9 = vcmp.ge.f32.partialorder %v1565_v45, 0.0  ;;  %v1055_v55 = vmul.f32 0.1, %v1565_v45 }
 0x302   : > { %v1056_v56 = vsel %vm1048_vm8, %v1564_v42, %v1052_v51  ;;  %vm1049_vm10 = vcmp.ge.f32.partialorder %v1566_v53, 0.0  ;;  %v1053_v47 = vmul.f32 0.1, %v1566_v53  ;;  %v1067_v57 = vrot.slane %v1058_v54, 7 }
 0x303   : > { %v1064_v2 = vrot.slane %v1056_v56, 7  ;;  %v1059_v49 = vsel %vm1051_vm9, %v1565_v45, %v1055_v55 }
 0x304   : > { %v1069_v7 = vrot.slane %v1059_v49, 7  ;;  %v1057_v58 = vsel %vm1049_vm10, %v1566_v53, %v1053_v47 }
 0x305   : > { %v1065_v59 = vrot.slane %v1057_v58, 7  ;;  %v1076_v3 = vsel %vm248_vm0, 0.0, %v1064_v2 }
 0x306   : > { %v1070_v60 = vsel %vm248_vm0, %v1067_v57, %v1069_v7  ;;  %v1077_v61 = vsel %vm248_vm0, %v1069_v7, 0.0 }
 0x307   : > { %v1155_v62 = vpack.c.bf16 %v1077_v61, %v1077_v61  ;;  %v1068_v63 = vsel %vm248_vm0, %v1065_v59, %v1067_v57  ;;  %v1066_v0 = vsel %vm248_vm0, %v1064_v2, %v1065_v59 }
 0x308   : > { %v1082_v1 = vpack.c.bf16 %v1070_v60, %v1068_v63  ;;  %v1081_v5 = vpack.c.bf16 %v1066_v0, %v1076_v3 }
 0x309   : > { %v1248_v6 = vrot.slane %v1155_v62, 1  ;;  %v1170_v9 = vshll.u32 %v1155_v62, 16 }
 0x30a   : > { %1539 = vmatprep.mubr.msk.bf16.mxu1 %vm273_vm5, %v1081_v5  ;;  %v1158_v10 = vshll.u32 %v1081_v5, 16  ;;  %v1162_v11 = vshll.u32 %v1082_v1, 16  ;;  %v1245_v12 = vrot.slane %v1081_v5, 1  ;;  %v1246_v13 = vrot.slane %v1082_v1, 1 }
 0x30b   : > { %1540 = vmatmul.mubr.msk.bf16.vlgmr.msra.gmra.mrb[4].mxu1 %vm273_vm5, %v1082_v1  ;;  %v1156_v14 = vshrl.u32 %v1081_v5, 16  ;;  %v1166_v17 = vshrl.u32 %v1082_v1, 16  ;;  %v1172_v20 = vrot.slane %v1170_v9, 1 }
 0x30c   : > { %1544 = vmatpush3.bf16.msra.mxu1 %v1621_v35  ;;  %v1160_v15 = vrot.slane %v1158_v10, 1  ;;  %v1164_v16 = vrot.slane %v1162_v11, 1  ;;  %v1247_v18 = vsel %vm431_vm7, %v1245_v12, %v1246_v13  ;;  %v1249_v19 = vsel %vm431_vm7, %v1246_v13, %v1248_v6 }
 0x30d   : > { %1549 = vmatprep.subr.bf16.mxu1 %v1622_v8 }
 0x30e   : > { %v1161_v21 = vor.u32 %v1160_v15, %v1156_v14  ;;  %v1168_v22 = vor.u32 %v1166_v17, %v1164_v16 }
 0x310   : > { %v1165_v23 = vsel %vm341_vm6, %v1161_v21, %v1164_v16  ;;  %v1173_v24 = vsel %vm341_vm6, %v1168_v22, %v1172_v20 }
 0x311   : > { %1545 = vmatprep.mubr.msk.bf16.mxu1 %vm273_vm5, %v1165_v23 }
 0x317   : > { %1546 = vmatmul.mubr.msk.bf16.vlgmr.msra.gmra.mrb[4].mxu1 %vm273_vm5, %v1173_v24 }
 0x318   : > { %1550 = vmatpush3.bf16.msra.mxu1 %v1622_v8  ;;  %1551 = vmatprep.mubr.msk.bf16.mxu1 %vm273_vm5, %v1247_v18 }
 0x323   : > { %1552 = vmatmul.mubr.msk.bf16.vlgmr.msra.gmra.mrb[4].mxu1 %vm273_vm5, %v1249_v19 }
 0x3f6   : > { %v1553_v26 = vpop.f32.mrb[4].mxu1 }
 0x3f7   : > { %v1567_v27 = vadd.f32 %v1553_v26, %v1147_v25  ;;  %v1296_v28 = vpop.f32.mrb[5].mxu1 }
 0x3f8   : > { %v1568_v29 = vadd.f32 %v1296_v28, %v1147_v25  ;;  %v1554_v30 = vpop.f32.mrb[6].mxu1 }
 0x3f9   : > { %v1317_v31 = vadd.f32 %v1567_v27, %v1771_v46  ;;  %v1569_v32 = vadd.f32 %v1554_v30, %v1147_v25  ;;  %v1299_v33 = vpop.f32.mrb[7].mxu1 }
 0x3fa   : > { %v1315_v34 = vadd.f32 %v1568_v29, %v1774_v52  ;;  %v1570_v35 = vadd.f32 %v1299_v33, %v1147_v25 }
 0x3fb   : > { %1321 = vst.msk [vmem:[%s224_s7 + $0x10] sm:$0xff] %vm273_vm5, %v1317_v31  ;;  %v1318_v39 = vadd.f32 %v1569_v32, %v1779_v48 }
 0x3fc   : > { %1319 = vst.msk [vmem:[%s224_s7] sm:$0xff] %vm273_vm5, %v1315_v34  ;;  %v1316_v36 = vadd.f32 %v1570_v35, %v1784_v4 }
 0x3fd   : > { %1322 = vst.msk [vmem:[%s224_s7 + $0x18] sm:$0xff] %vm273_vm5, %v1318_v39 }
 0x3fe   : > { %1320 = vst.msk [vmem:[%s224_s7 + $0x8] sm:$0xff] %vm273_vm5, %v1316_v36 }
 0x3ff PF: > { %s15_s18 = sadd.s32 1, %s1629_s18  }
 0x400   : > { %p12_p4 = scmp.ge.s32.totalorder %s15_s18, 4  }
 0x402   :  { %14 = sbr.rel (!%p12_p4) target bundleno = 1 (0x1), region = 80 }

// kernel: _lambda_.12
= control target key start
LH: loop header
LB: loop body
LE: loop exit
PB: predicated region body
PF: predicated region fallthrough
CT: control target
= control target key end

     0   :  { %s3162_s13 = smov 0   ;;  %s3609_s0 = inlined_call_operand.vmem [shape: f32[2,16,8], index: 0, kind: input, shape index: {}]   ;;  %s3610_s1 = inlined_call_operand.vmem [shape: f32[2,16,1], index: 1, kind: input, shape index: {}]   ;;  %s3611_s2 = inlined_call_operand.vmem [shape: bf16[4,32], index: 2, kind: input, shape index: {}]   ;;  %s3612_s3 = inlined_call_operand.vmem [shape: f32[1,32], index: 3, kind: input, shape index: {}]   ;;  %s3613_s4 = inlined_call_operand.vmem [shape: bf16[20,32,64], index: 4, kind: input, shape index: {}]   ;;  %s3614_s5 = inlined_call_operand.vmem [shape: f32[4,64], index: 5, kind: input, shape index: {}]   ;;  %s3615_s6 = inlined_call_operand.vmem [shape: bf16[4,32,64], index: 6, kind: input, shape index: {}]   ;;  %s3616_s7 = inlined_call_operand.vmem [shape: f32[4,64], index: 7, kind: input, shape index: {}]   ;;  %s3617_s8 = inlined_call_operand.vmem [shape: bf16[32,4], index: 8, kind: input, shape index: {}]   ;;  %s3618_s9 = inlined_call_operand.vmem [shape: f32[1,4], index: 9, kind: input, shape index: {}]   ;;  %s3619_s10 = inlined_call_operand.vmem [shape: f32[2,16,8], index: 10, kind: output, shape index: {}]  }
   0x1 LB: > { %s2435_s14 = sadd.s32 4294967295, %s3100_s13   ;;  %p2439_p0 = scmp.ge.s32.totalorder %s3100_s13, 1  ;;  %s3100_s13 = sphi %s3162_s13, %s20_s13  }
   0x2   : > { %p322_p1 = scmp.lt.s32.totalorder %s3100_s13, 3 }
   0x4   : > { %p323_p2 = pnand %p2439_p0, %p322_p1 }
   0x5   : > { %v385_v0 = vld [vmem:[%s3611_s2] sm:$0x3] (!%p323_p2)  ;;  %vm398_vm0 = vcmask (!%p323_p2), 1041408   ;;  %p365_p3 = scmp.lt.s32.totalorder (!%p323_p2), %s2435_s14, 1  ;;  %v3102_v1 = vmov (!%p323_p2), 0.0   ;;  %vm3103_vm1 = vmmov (!%p323_p2), 0   ;;  %v529_v58 = vlaneseq (!%p323_p2) }
   0x6   : > { %326 = sbr.rel (%p323_p2) target bundleno = 3231 (0xc9f), region = 60  ;;  %2702 = vmatprep.subr.bf16.mxu0 (!%p323_p2), %v3102_v1  ;;  %v400_v2 = vsel (!%p323_p2), %vm398_vm0, %v385_v0, 0  ;;  %2704 = vmatprep.mubr.msk.bf16.mxu0 (!%p323_p2), %vm3103_vm1, %v3102_v1  ;;  %v3104_v3 = vmov (!%p323_p2), 0   ;;  %vm394_vm2 = vcmask (!%p323_p2), 31744   ;;  %v2994_v9 = vld [vmem:[%s3613_s4] sm:$0xff] (!%p323_p2)   ;;  %v2995_v10 = vld [vmem:[%s3613_s4 + $0x8] sm:$0xff] (!%p323_p2)  }
   0x7   : > { %2703 = vmatpush3.bf16.msra.mxu0 (!%p323_p2), %v400_v2  ;;  %2993 = vset.pattern.permute.xlu0 (!%p323_p2), %v3104_v3  ;;  %v2446_v12 = vld [vmem:[%s3612_s3] ss:$0 sm:$0xff] (!%p323_p2)  ;;  %vm484_vm3 = vcmask (!%p323_p2), 261120   ;;  %v2996_v26 = vld [vmem:[%s3613_s4 + $0x10] sm:$0xff] (!%p323_p2)   ;;  %v2997_v31 = vld [vmem:[%s3613_s4 + $0x18] sm:$0xff] (!%p323_p2)   ;;  %vm618_vm5 = vcmask (!%p323_p2), 1046528  }
   0x8   : > { %2708 = vmatprep.subr.bf16.mxu1 (!%p323_p2), %v3102_v1  ;;  %2712 = vmatprep.mubr.msk.bf16.mxu1 (!%p323_p2), %vm3103_vm1, %v3102_v1  ;;  %vm541_vm4 = vsmask.f32 (!%p323_p2), 7424  ;;  %v2998_v37 = vld [vmem:[%s3613_s4 + $0x20] sm:$0xff] (!%p323_p2)   ;;  %v2999_v39 = vld [vmem:[%s3613_s4 + $0x28] sm:$0xff] (!%p323_p2)   ;;  %v3000_v42 = vld [vmem:[%s3613_s4 + $0x30] sm:$0xff] (!%p323_p2)   ;;  %vm758_vm7 = vcmask (!%p323_p2), 1045504  }
   0x9   : > { %2748 = vmatprep.subr.bf16.mxu0 (!%p323_p2), %v3102_v1  ;;  %2709 = vmatpush3.bf16.msra.mxu1 (!%p323_p2), %v2994_v9  ;;  %v3001_v45 = vld [vmem:[%s3613_s4 + $0x38] sm:$0xff] (!%p323_p2)   ;;  %vm685_vm6 = vsmask.f32 (!%p323_p2), 6400  ;;  %v3002_v52 = vld [vmem:[%s3613_s4 + $0x40] sm:$0xff] (!%p323_p2)   ;;  %v3003_v54 = vld [vmem:[%s3613_s4 + $0x48] sm:$0xff] (!%p323_p2)   ;;  %v3275_v59 = vshrl.u32 (!%p323_p2), %v529_v58, 7 }
   0xa   : > { %2710 = vmatprep.subr.bf16.mxu1 (!%p323_p2), %v3102_v1  ;;  %v3281_v61 = vld [vmem:[%s3614_s5] sm:$0xf] (!%p323_p2)  ;;  %s3105_s16 = smov (!%p323_p2), 96   ;;  %vm2365_vm8 = vcmask (!%p323_p2), 64512  }
   0xb   : > { %v531_v60 = vsub.s32 (!%p323_p2), 0, %v3275_v59 }
   0xd   : > { %s3621_s14 = smov (!%p365_p3, %s2435_s14), 1  ;;  %2711 = vmatpush3.bf16.msra.mxu1 %v2995_v10  ;;  %v532_v62 = vrot.slane %v3281_v61, %v531_v60  ;;  %v3004_v10 = vld [vmem:[%s3615_s6] sm:$0xff]  }
   0xe   : > { %s3180_s17 = sshll.u32 %s3621_s14, 4  ;;  %2716 = vmatprep.subr.bf16.mxu1 %v3102_v1 }
   0xf   : > { %s3187_s20 = scalar_lea.vmem %s3609_s0, %s3180_s17  ;;  %s374_s23 = scalar_lea.vmem %s3610_s1, %s3180_s17 }
  0x10   : > { %v381_v4 = vld [vmem:[%s3187_s20] sm:$0xff]  ;;  %v382_v5 = vld [vmem:[%s3187_s20 + $0x8] sm:$0xff]  ;;  %s379_s21 = scalar_lea.vmem %s3619_s10, %s3180_s17 }
  0x11   : > { %v383_v6 = vld [vmem:[%s374_s23] sm:$0xff]  ;;  %v386_v7 = vpack.c.bf16 %v382_v5, %v381_v4  ;;  %v384_v8 = vld [vmem:[%s374_s23 + $0x8] sm:$0xff] }
  0x12   : > { %445 = vperm.xlu0 %2993, %v383_v6  }
  0x13   : > { %2705 = vmatmul.mubr.msk.bf16.vlgmr.msra.gmra.mrb[0].mxu0 %vm394_vm2, %v386_v7 }
  0x14   : > { %2752 = vmatprep.mubr.msk.bf16.mxu0 %vm3103_vm1, %v3102_v1  ;;  %2749 = vmatpush3.bf16.msra.mxu0 %v3004_v10  ;;  %v3015_v10 = vld [vmem:[%s3613_s4 + $0x98] sm:$0xff]  }
  0x15   : > { %2750 = vmatprep.subr.bf16.mxu0 %v3102_v1 }
  0x16   : > { %450 = vperm.xlu0 %2993, %v384_v8  }
  0x91   : > { %v3206_v11 = vpop.permute.xlu0 %445 }
  0x95   : > { %v3214_v20 = vpop.permute.xlu0 %450 }
  0xe6   : > { %v436_v13 = vpop.f32.mrb[0].mxu0 }
  0xe7   : > { %v437_v14 = vadd.f32 %v2446_v12, %v436_v13  ;;  %v2706_v15 = vpop.f32.mrb[1].mxu0 }
  0xe8   : > { %v439_v16 = vpop.f32.mrb[2].mxu0 }
  0xe9   : > { %v3212_v17 = vmul.f32 %v3206_v11, %v437_v14  ;;  %v440_v18 = vadd.f32 %v2446_v12, %v439_v16  ;;  %v2707_v19 = vpop.f32.mrb[3].mxu0  ;;  %v3005_v14 = vld [vmem:[%s3615_s6 + $0x8] sm:$0xff]  }
  0xea   : > { %2751 = vmatpush3.bf16.msra.mxu0 %v3005_v14 }
  0xeb   : > { %v459_v21 = vrot.slane %v3212_v17, 6  ;;  %v3218_v22 = vmul.f32 %v3214_v20, %v440_v18  ;;  %2756 = vmatprep.subr.bf16.mxu0 %v3102_v1 }
  0xed   : > { %v460_v23 = vrot.slane %v3218_v22, 6  ;;  %v465_v24 = vsel %vm398_vm0, 0.0, %v459_v21 }
  0xef   : > { %v461_v25 = vsel %vm398_vm0, %v459_v21, %v460_v23  ;;  %v466_v27 = vsel %vm398_vm0, %v460_v23, 0.0 }
  0xf0   : > { %v471_v28 = vpack.c.bf16 %v461_v25, %v465_v24  ;;  %v540_v30 = vpack.c.bf16 %v466_v27, %v466_v27  ;;  %v3006_v27 = vld [vmem:[%s3613_s4 + $0x50] sm:$0xff]  }
  0xf2   : > { %2713 = vmatmul.mubr.msk.bf16.vlgmr.msra.gmra.mrb[0].mxu1 %vm484_vm3, %v471_v28  ;;  %v544_v29 = vshll.u32 %v471_v28, 16  ;;  %v542_v33 = vshrl.u32 %v471_v28, 16  ;;  %v549_v34 = vshll.u32 %v540_v30, 16  ;;  %v619_v40 = vrot.slane %v471_v28, 1 }
  0xf3   : > { %2717 = vmatpush3.bf16.msra.mxu1 %v2996_v26  ;;  %2720 = vmatprep.mubr.msk.bf16.mxu1 %vm3103_vm1, %v3102_v1  ;;  %v620_v41 = vrot.slane %v540_v30, 1  ;;  %v689_v44 = vshrl.u32 %v540_v30, 16  ;;  %v759_v55 = vrot.slane %v471_v28, 2  ;;  %v760_v56 = vrot.slane %v540_v30, 2  ;;  %v3007_v28 = vld [vmem:[%s3613_s4 + $0x58] sm:$0xff]  }
  0xf4   : > { %2718 = vmatprep.subr.bf16.mxu1 %v3102_v1  ;;  %v546_v32 = vrot.slane %v544_v29, 1  ;;  %v551_v36 = vrot.slane %v549_v34, 1  ;;  %v686_v46 = vrot.slane %v542_v33, 1  ;;  %v687_v47 = vrot.slane %v544_v29, 2  ;;  %v3308_v29 = vld [vmem:[%s3616_s7] sm:$0xf] }
  0xf5   : > { %v621_v43 = vsel %vm618_vm5, %v619_v40, %v620_v41  ;;  %v691_v48 = vrot.slane %v689_v44, 1  ;;  %v692_v49 = vrot.slane %v549_v34, 2  ;;  %v761_v57 = vsel %vm758_vm7, %v759_v55, %v760_v56  ;;  %v3008_v44 = vld [vmem:[%s3613_s4 + $0x60] sm:$0xff]   ;;  %v3011_v56 = vld [vmem:[%s3613_s4 + $0x78] sm:$0xff]  }
  0xf6   : > { %v547_v35 = vor.u32 %v546_v32, %v542_v33  ;;  %v688_v50 = vor.u32 %v687_v47, %v686_v46  ;;  %v852_v30 = vrot.slane %v3308_v29, %v531_v60  ;;  %v3012_v60 = vld [vmem:[%s3613_s4 + $0x80] sm:$0xff]  }
  0xf7   : > { %2719 = vmatpush3.bf16.msra.mxu1 %v2997_v31  ;;  %v693_v51 = vor.u32 %v692_v49, %v691_v48  ;;  %v3009_v48 = vld [vmem:[%s3613_s4 + $0x68] sm:$0xff]  }
  0xf8   : > { %2724 = vmatprep.subr.bf16.mxu1 %v3102_v1  ;;  %v552_v38 = vsel %vm541_vm4, %v547_v35, %v551_v36 }
  0xf9   : > { %v694_v53 = vsel %vm685_vm6, %v688_v50, %v693_v51 }
  0xfe   : > { %2721 = vmatmul.mubr.msk.bf16.vlgmr.msra.gmra.mrb[0].mxu1 %vm484_vm3, %v552_v38 }
  0xff   : > { %2725 = vmatpush3.bf16.msra.mxu1 %v2998_v37  ;;  %2728 = vmatprep.mubr.msk.bf16.mxu1 %vm3103_vm1, %v3102_v1 }
 0x100   : > { %2726 = vmatprep.subr.bf16.mxu1 %v3102_v1 }
 0x103   : > { %2727 = vmatpush3.bf16.msra.mxu1 %v2999_v39 }
 0x104   : > { %2732 = vmatprep.subr.bf16.mxu1 %v3102_v1 }
 0x10a   : > { %2729 = vmatmul.mubr.msk.bf16.vlgmr.msra.gmra.mrb[0].mxu1 %vm484_vm3, %v621_v43 }
 0x10b   : > { %2733 = vmatpush3.bf16.msra.mxu1 %v3000_v42  ;;  %2736 = vmatprep.mubr.msk.bf16.mxu1 %vm3103_vm1, %v3102_v1 }
 0x10c   : > { %2734 = vmatprep.subr.bf16.mxu1 %v3102_v1 }
 0x10f   : > { %2735 = vmatpush3.bf16.msra.mxu1 %v3001_v45 }
 0x110   : > { %2740 = vmatprep.subr.bf16.mxu1 %v3102_v1 }
 0x116   : > { %2737 = vmatmul.mubr.msk.bf16.vlgmr.msra.gmra.mrb[0].mxu1 %vm484_vm3, %v694_v53 }
 0x117   : > { %2741 = vmatpush3.bf16.msra.mxu1 %v3002_v52  ;;  %2744 = vmatprep.mubr.msk.bf16.mxu1 %vm3103_vm1, %v3102_v1 }
 0x118   : > { %2742 = vmatprep.subr.bf16.mxu1 %v3102_v1 }
 0x11b   : > { %2743 = vmatpush3.bf16.msra.mxu1 %v3003_v54  ;;  %v3010_v54 = vld [vmem:[%s3613_s4 + $0x70] sm:$0xff]  }
 0x11c   : > { %2796 = vmatprep.subr.bf16.mxu1 %v3102_v1 }
 0x122   : > { %2745 = vmatmul.mubr.msk.bf16.vlgmr.msra.gmra.mrb[0].mxu1 %vm484_vm3, %v761_v57 }
 0x123   : > { %2800 = vmatprep.mubr.msk.bf16.mxu1 %vm3103_vm1, %v3102_v1 }
 0x1f5   : > { %v811_v63 = vpop.f32.mrb[0].mxu1 }
 0x1f6   : > { %v2908_v0 = vadd.f32 %v811_v63, %v532_v62  ;;  %v2746_v2 = vpop.f32.mrb[1].mxu1 }
 0x1f7   : > { %v814_v3 = vpop.f32.mrb[2].mxu1 }
 0x1f8   : > { %v2479_v4 = vmul.f32 -1.442695, %v2908_v0  ;;  %v2909_v5 = vadd.f32 %v814_v3, %v532_v62  ;;  %v2747_v6 = vpop.f32.mrb[3].mxu1 }
 0x1fa   : > { %3044 = vpow2.f32 %v2479_v4  ;;  %v2480_v7 = vmul.f32 -1.442695, %v2909_v5 }
 0x1fc   : > { %3046 = vpow2.f32 %v2480_v7 }
 0x204   : > { %v3045_v8 = vpop.eup %3044 }
 0x205   : > { %v828_v9 = vadd.f32 1.0, %v3045_v8  ;;  %v3014_v8 = vld [vmem:[%s3613_s4 + $0x90] sm:$0xff]  }
 0x206   : > { %v3047_v12 = vpop.eup %3046 }
 0x207   : > { %3048 = vrcp.f32 %v828_v9  ;;  %v829_v13 = vadd.f32 1.0, %v3047_v12 }
 0x209   : > { %3050 = vrcp.f32 %v829_v13 }
 0x20a   : > { %3052 = vtanh.f32 %v2908_v0  ;;  %v3013_v0 = vld [vmem:[%s3613_s4 + $0x88] sm:$0xff]  }
 0x20b   : > { %3054 = vtanh.f32 %v2909_v5 }
 0x211   : > { %v3049_v15 = vpop.eup %3048 }
 0x212   : > { %836 = vrot.lane.b32.xlu1 %v3049_v15, %s3105_s16  ;;  %v3016_v15 = vld [vmem:[%s3615_s6 + $0x10] sm:$0xff]  }
 0x213   : > { %v3051_v16 = vpop.eup %3050  ;;  %2797 = vmatpush3.bf16.msra.mxu1 %v3016_v15 }
 0x214   : > { %v3053_v19 = vpop.eup %3052  ;;  %2798 = vmatprep.subr.bf16.mxu1 %v3102_v1 }
 0x215   : > { %v3055_v21 = vpop.eup %3054 }
 0x216   : > { %838 = vrot.lane.b32.xlu1 %v3051_v16, %s3105_s16  ;;  %v989_v16 = vsub.s32 1, %v3275_v59 }
 0x284   : > { %v837_v18 = vpop.permute.xlu1 %836 }
 0x285   : > { %v842_v24 = vmul.f32 %v3053_v19, %v837_v18  ;;  %v990_v18 = vrot.slane %v3281_v61, %v989_v16 }
 0x288   : > { %v839_v23 = vpop.permute.xlu1 %838 }
 0x289   : > { %v843_v25 = vmul.f32 %v3055_v21, %v839_v23 }
 0x28b   : > { %v848_v26 = vpack.c.bf16 %v843_v25, %v842_v24 }
 0x28d   : > { %2753 = vmatmul.mubr.msk.bf16.vlgmr.msra.gmra.mrb[4].mxu0 %vm484_vm3, %v848_v26 }
 0x28e   : > { %2760 = vmatprep.mubr.msk.bf16.mxu0 %vm3103_vm1, %v3102_v1  ;;  %2757 = vmatpush3.bf16.msra.mxu0 %v3006_v27 }
 0x28f   : > { %2758 = vmatprep.subr.bf16.mxu0 %v3102_v1 }
 0x292   : > { %2759 = vmatpush3.bf16.msra.mxu0 %v3007_v28 }
 0x293   : > { %2764 = vmatprep.subr.bf16.mxu0 %v3102_v1 }
 0x360   : > { %v902_v31 = vpop.f32.mrb[4].mxu0 }
 0x361   : > { %v3311_v32 = vadd.f32 %v902_v31, %v852_v30  ;;  %v2754_v33 = vpop.f32.mrb[5].mxu0 }
 0x362   : > { %v905_v34 = vpop.f32.mrb[6].mxu0 }
 0x363   : > { %v909_v35 = vadd.f32 %v3311_v32, %v3212_v17  ;;  %v3315_v36 = vadd.f32 %v905_v34, %v852_v30  ;;  %v2755_v37 = vpop.f32.mrb[7].mxu0 }
 0x365   : > { %v3318_v38 = vmul.f32 %v909_v35, %v3206_v11  ;;  %v910_v39 = vadd.f32 %v3315_v36, %v3218_v22  ;;  %v3017_v35 = vld [vmem:[%s3615_s6 + $0x18] sm:$0xff]  }
 0x366   : > { %2799 = vmatpush3.bf16.msra.mxu1 %v3017_v35 }
 0x367   : > { %v917_v40 = vrot.slane %v3318_v38, 6  ;;  %v3324_v41 = vmul.f32 %v910_v39, %v3214_v20  ;;  %2804 = vmatprep.subr.bf16.mxu1 %v3102_v1 }
 0x369   : > { %v918_v42 = vrot.slane %v3324_v41, 6  ;;  %v923_v43 = vsel %vm398_vm0, 0.0, %v917_v40 }
 0x36b   : > { %v919_v17 = vsel %vm398_vm0, %v917_v40, %v918_v42  ;;  %v924_v45 = vsel %vm398_vm0, %v918_v42, 0.0 }
 0x36c   : > { %v930_v46 = vpack.c.bf16 %v919_v17, %v923_v43  ;;  %v998_v47 = vpack.c.bf16 %v924_v45, %v924_v45 }
 0x36e   : > { %2761 = vmatmul.mubr.msk.bf16.vlgmr.msra.gmra.mrb[8].mxu0 %vm484_vm3, %v930_v46  ;;  %v1001_v22 = vshll.u32 %v930_v46, 16  ;;  %v999_v50 = vshrl.u32 %v930_v46, 16  ;;  %v1006_v51 = vshll.u32 %v998_v47, 16  ;;  %v1075_v57 = vrot.slane %v930_v46, 1 }
 0x36f   : > { %2765 = vmatpush3.bf16.msra.mxu0 %v3008_v44  ;;  %2768 = vmatprep.mubr.msk.bf16.mxu0 %vm3103_vm1, %v3102_v1  ;;  %v1076_v58 = vrot.slane %v998_v47, 1  ;;  %v1144_v63 = vshrl.u32 %v998_v47, 16  ;;  %v1213_v12 = vrot.slane %v930_v46, 2  ;;  %v1214_v13 = vrot.slane %v998_v47, 2  ;;  %v3019_v47 = vld [vmem:[%s3613_s4 + $0xa8] sm:$0xff]  }
 0x370   : > { %2766 = vmatprep.subr.bf16.mxu0 %v3102_v1  ;;  %v1003_v49 = vrot.slane %v1001_v22, 1  ;;  %v1008_v53 = vrot.slane %v1006_v51, 1  ;;  %v1141_v2 = vrot.slane %v999_v50, 1  ;;  %v1142_v3 = vrot.slane %v1001_v22, 2  ;;  %v3018_v22 = vld [vmem:[%s3613_s4 + $0xa0] sm:$0xff]  }
 0x371   : > { %v1077_v62 = vsel %vm618_vm5, %v1075_v57, %v1076_v58  ;;  %v1146_v4 = vrot.slane %v1144_v63, 1  ;;  %v1147_v5 = vrot.slane %v1006_v51, 2  ;;  %v1215_v14 = vsel %vm758_vm7, %v1213_v12, %v1214_v13  ;;  %v3022_v12 = vld [vmem:[%s3613_s4 + $0xc0] sm:$0xff]  }
 0x372   : > { %v1004_v52 = vor.u32 %v1003_v49, %v999_v50  ;;  %v1143_v6 = vor.u32 %v1142_v3, %v1141_v2 }
 0x373   : > { %2767 = vmatpush3.bf16.msra.mxu0 %v3009_v48  ;;  %v1148_v7 = vor.u32 %v1147_v5, %v1146_v4  ;;  %v1307_v48 = vrot.slane %v3308_v29, %v989_v16  ;;  %v3021_v5 = vld [vmem:[%s3613_s4 + $0xb8] sm:$0xff]  }
 0x374   : > { %2772 = vmatprep.subr.bf16.mxu0 %v3102_v1  ;;  %v1009_v55 = vsel %vm541_vm4, %v1004_v52, %v1008_v53 }
 0x375   : > { %v1149_v9 = vsel %vm685_vm6, %v1143_v6, %v1148_v7 }
 0x37a   : > { %2769 = vmatmul.mubr.msk.bf16.vlgmr.msra.gmra.mrb[8].mxu0 %vm484_vm3, %v1009_v55 }
 0x37b   : > { %2773 = vmatpush3.bf16.msra.mxu0 %v3010_v54  ;;  %2776 = vmatprep.mubr.msk.bf16.mxu0 %vm3103_vm1, %v3102_v1 }
 0x37c   : > { %2774 = vmatprep.subr.bf16.mxu0 %v3102_v1 }
 0x37f   : > { %2775 = vmatpush3.bf16.msra.mxu0 %v3011_v56 }
 0x380   : > { %2780 = vmatprep.subr.bf16.mxu0 %v3102_v1 }
 0x386   : > { %2777 = vmatmul.mubr.msk.bf16.vlgmr.msra.gmra.mrb[8].mxu0 %vm484_vm3, %v1077_v62 }
 0x387   : > { %2781 = vmatpush3.bf16.msra.mxu0 %v3012_v60  ;;  %2784 = vmatprep.mubr.msk.bf16.mxu0 %vm3103_vm1, %v3102_v1 }
 0x388   : > { %2782 = vmatprep.subr.bf16.mxu0 %v3102_v1 }
 0x38b   : > { %2783 = vmatpush3.bf16.msra.mxu0 %v3013_v0  ;;  %v3020_v0 = vld [vmem:[%s3613_s4 + $0xb0] sm:$0xff]  }
 0x38c   : > { %2788 = vmatprep.subr.bf16.mxu0 %v3102_v1 }
 0x392   : > { %2785 = vmatmul.mubr.msk.bf16.vlgmr.msra.gmra.mrb[8].mxu0 %vm484_vm3, %v1149_v9 }
 0x393   : > { %2789 = vmatpush3.bf16.msra.mxu0 %v3014_v8  ;;  %2792 = vmatprep.mubr.msk.bf16.mxu0 %vm3103_vm1, %v3102_v1 }
 0x394   : > { %2790 = vmatprep.subr.bf16.mxu0 %v3102_v1 }
 0x397   : > { %2791 = vmatpush3.bf16.msra.mxu0 %v3015_v10 }
 0x398   : > { %2844 = vmatprep.subr.bf16.mxu0 %v3102_v1 }
 0x39e   : > { %2793 = vmatmul.mubr.msk.bf16.vlgmr.msra.gmra.mrb[8].mxu0 %vm484_vm3, %v1215_v14  ;;  %v3023_v14 = vld [vmem:[%s3613_s4 + $0xc8] sm:$0xff]  }
 0x39f   : > { %2848 = vmatprep.mubr.msk.bf16.mxu0 %vm3103_vm1, %v3102_v1 }
 0x471   : > { %v1265_v19 = vpop.f32.mrb[8].mxu0 }
 0x472   : > { %v2910_v21 = vadd.f32 %v1265_v19, %v990_v18  ;;  %v2794_v23 = vpop.f32.mrb[9].mxu0 }
 0x473   : > { %v1268_v24 = vpop.f32.mrb[10].mxu0  ;;  %v3025_v23 = vld [vmem:[%s3613_s4 + $0xd8] sm:$0xff]  }
 0x474   : > { %v2519_v25 = vmul.f32 -1.442695, %v2910_v21  ;;  %v2911_v26 = vadd.f32 %v1268_v24, %v990_v18  ;;  %v2795_v27 = vpop.f32.mrb[11].mxu0  ;;  %v3024_v18 = vld [vmem:[%s3613_s4 + $0xd0] sm:$0xff]  }
 0x476   : > { %3056 = vpow2.f32 %v2519_v25  ;;  %v2520_v28 = vmul.f32 -1.442695, %v2911_v26 }
 0x478   : > { %3058 = vpow2.f32 %v2520_v28 }
 0x480   : > { %v3057_v30 = vpop.eup %3056 }
 0x481   : > { %v1282_v31 = vadd.f32 1.0, %v3057_v30 }
 0x482   : > { %v3059_v33 = vpop.eup %3058 }
 0x483   : > { %3060 = vrcp.f32 %v1282_v31  ;;  %v1283_v34 = vadd.f32 1.0, %v3059_v33  ;;  %v3026_v31 = vld [vmem:[%s3613_s4 + $0xe0] sm:$0xff]  }
 0x485   : > { %3062 = vrcp.f32 %v1283_v34  ;;  %v3027_v34 = vld [vmem:[%s3613_s4 + $0xe8] sm:$0xff]  }
 0x486   : > { %3064 = vtanh.f32 %v2910_v21 }
 0x487   : > { %3066 = vtanh.f32 %v2911_v26 }
 0x48d   : > { %v3061_v37 = vpop.eup %3060 }
 0x48e   : > { %1290 = vrot.lane.b32.xlu0 %v3061_v37, %s3105_s16 }
 0x48f   : > { %v3063_v39 = vpop.eup %3062 }
 0x490   : > { %1292 = vrot.lane.b32.xlu1 %v3063_v39, %s3105_s16  ;;  %v3065_v42 = vpop.eup %3064 }
 0x491   : > { %v3067_v43 = vpop.eup %3066 }
 0x500   : > { %v1291_v40 = vpop.permute.xlu0 %1290 }
 0x501   : > { %v1296_v44 = vmul.f32 %v3065_v42, %v1291_v40  ;;  %v3028_v40 = vld [vmem:[%s3615_s6 + $0x20] sm:$0xff]   ;;  %v1444_v42 = vsub.s32 2, %v3275_v59 }
 0x502   : > { %v1293_v17 = vpop.permute.xlu1 %1292  ;;  %2845 = vmatpush3.bf16.msra.mxu0 %v3028_v40 }
 0x503   : > { %v1297_v45 = vmul.f32 %v3067_v43, %v1293_v17  ;;  %2846 = vmatprep.subr.bf16.mxu0 %v3102_v1  ;;  %v1445_v43 = vrot.slane %v3281_v61, %v1444_v42 }
 0x505   : > { %v1303_v46 = vpack.c.bf16 %v1297_v45, %v1296_v44 }
 0x507   : > { %2801 = vmatmul.mubr.msk.bf16.vlgmr.msra.gmra.mrb[4].mxu1 %vm484_vm3, %v1303_v46 }
 0x508   : > { %2808 = vmatprep.mubr.msk.bf16.mxu1 %vm3103_vm1, %v3102_v1  ;;  %2805 = vmatpush3.bf16.msra.mxu1 %v3018_v22 }
 0x509   : > { %2806 = vmatprep.subr.bf16.mxu1 %v3102_v1 }
 0x50c   : > { %2807 = vmatpush3.bf16.msra.mxu1 %v3019_v47 }
 0x50d   : > { %2812 = vmatprep.subr.bf16.mxu1 %v3102_v1 }
 0x5da   : > { %v1357_v49 = vpop.f32.mrb[4].mxu1 }
 0x5db   : > { %v3405_v50 = vadd.f32 %v1357_v49, %v1307_v48  ;;  %v2802_v51 = vpop.f32.mrb[5].mxu1 }
 0x5dc   : > { %v1360_v52 = vpop.f32.mrb[6].mxu1 }
 0x5dd   : > { %v1364_v53 = vadd.f32 %v3405_v50, %v3318_v38  ;;  %v3409_v54 = vadd.f32 %v1360_v52, %v1307_v48  ;;  %v2803_v55 = vpop.f32.mrb[7].mxu1 }
 0x5df   : > { %v3412_v56 = vmul.f32 %v1364_v53, %v3206_v11  ;;  %v1365_v57 = vadd.f32 %v3409_v54, %v3324_v41 }
 0x5e1   : > { %v1372_v58 = vrot.slane %v3412_v56, 6  ;;  %v3418_v60 = vmul.f32 %v1365_v57, %v3214_v20  ;;  %v3029_v57 = vld [vmem:[%s3615_s6 + $0x28] sm:$0xff]  }
 0x5e2   : > { %2847 = vmatpush3.bf16.msra.mxu0 %v3029_v57  ;;  %v3035_v57 = vld [vmem:[%s3613_s4 + $0x118] sm:$0xff]  }
 0x5e3   : > { %v1373_v62 = vrot.slane %v3418_v60, 6  ;;  %v1378_v63 = vsel %vm398_vm0, 0.0, %v1372_v58  ;;  %2852 = vmatprep.subr.bf16.mxu0 %v3102_v1 }
 0x5e5   : > { %v1374_v38 = vsel %vm398_vm0, %v1372_v58, %v1373_v62  ;;  %v1379_v2 = vsel %vm398_vm0, %v1373_v62, 0.0 }
 0x5e6   : > { %v1385_v3 = vpack.c.bf16 %v1374_v38, %v1378_v63  ;;  %v1453_v4 = vpack.c.bf16 %v1379_v2, %v1379_v2 }
 0x5e8   : > { %2809 = vmatmul.mubr.msk.bf16.vlgmr.msra.gmra.mrb[8].mxu1 %vm484_vm3, %v1385_v3  ;;  %v1456_v41 = vshll.u32 %v1385_v3, 16  ;;  %v1454_v7 = vshrl.u32 %v1385_v3, 16  ;;  %v1461_v8 = vshll.u32 %v1453_v4, 16  ;;  %v1530_v15 = vrot.slane %v1385_v3, 1 }
 0x5e9   : > { %2813 = vmatpush3.bf16.msra.mxu1 %v3020_v0  ;;  %2816 = vmatprep.mubr.msk.bf16.mxu1 %vm3103_vm1, %v3102_v1  ;;  %v1531_v16 = vrot.slane %v1453_v4, 1  ;;  %v1599_v21 = vshrl.u32 %v1453_v4, 16  ;;  %v1668_v35 = vrot.slane %v1385_v3, 2  ;;  %v1669_v37 = vrot.slane %v1453_v4, 2 }
 0x5ea   : > { %2814 = vmatprep.subr.bf16.mxu1 %v3102_v1  ;;  %v1458_v6 = vrot.slane %v1456_v41, 1  ;;  %v1463_v10 = vrot.slane %v1461_v8, 1  ;;  %v1596_v24 = vrot.slane %v1454_v7, 1  ;;  %v1597_v25 = vrot.slane %v1456_v41, 2 }
 0x5eb   : > { %v1532_v19 = vsel %vm618_vm5, %v1530_v15, %v1531_v16  ;;  %v1601_v26 = vrot.slane %v1599_v21, 1  ;;  %v1602_v27 = vrot.slane %v1461_v8, 2  ;;  %v1670_v39 = vsel %vm758_vm7, %v1668_v35, %v1669_v37 }
 0x5ec   : > { %v1459_v9 = vor.u32 %v1458_v6, %v1454_v7  ;;  %v1598_v28 = vor.u32 %v1597_v25, %v1596_v24  ;;  %v3031_v6 = vld [vmem:[%s3613_s4 + $0xf8] sm:$0xff]   ;;  %v1762_v7 = vrot.slane %v3308_v29, %v1444_v42 }
 0x5ed   : > { %2815 = vmatpush3.bf16.msra.mxu1 %v3021_v5  ;;  %v1603_v30 = vor.u32 %v1602_v27, %v1601_v26  ;;  %v3030_v5 = vld [vmem:[%s3613_s4 + $0xf0] sm:$0xff]  }
 0x5ee   : > { %2820 = vmatprep.subr.bf16.mxu1 %v3102_v1  ;;  %v1464_v13 = vsel %vm541_vm4, %v1459_v9, %v1463_v10  ;;  %v1368_v9 = vadd.f32 %v3405_v50, %v3311_v32 }
 0x5ef   : > { %v1604_v33 = vsel %vm685_vm6, %v1598_v28, %v1603_v30 }
 0x5f4   : > { %2817 = vmatmul.mubr.msk.bf16.vlgmr.msra.gmra.mrb[8].mxu1 %vm484_vm3, %v1464_v13 }
 0x5f5   : > { %2821 = vmatpush3.bf16.msra.mxu1 %v3022_v12  ;;  %2824 = vmatprep.mubr.msk.bf16.mxu1 %vm3103_vm1, %v3102_v1 }
 0x5f6   : > { %2822 = vmatprep.subr.bf16.mxu1 %v3102_v1 }
 0x5f9   : > { %2823 = vmatpush3.bf16.msra.mxu1 %v3023_v14  ;;  %v1369_v14 = vadd.f32 %v3409_v54, %v3315_v36 }
 0x5fa   : > { %2828 = vmatprep.subr.bf16.mxu1 %v3102_v1 }
 0x600   : > { %2825 = vmatmul.mubr.msk.bf16.vlgmr.msra.gmra.mrb[8].mxu1 %vm484_vm3, %v1532_v19 }
 0x601   : > { %2829 = vmatpush3.bf16.msra.mxu1 %v3024_v18  ;;  %2832 = vmatprep.mubr.msk.bf16.mxu1 %vm3103_vm1, %v3102_v1 }
 0x602   : > { %2830 = vmatprep.subr.bf16.mxu1 %v3102_v1 }
 0x605   : > { %2831 = vmatpush3.bf16.msra.mxu1 %v3025_v23 }
 0x606   : > { %2836 = vmatprep.subr.bf16.mxu1 %v3102_v1 }
 0x60c   : > { %2833 = vmatmul.mubr.msk.bf16.vlgmr.msra.gmra.mrb[8].mxu1 %vm484_vm3, %v1604_v33 }
 0x60d   : > { %2837 = vmatpush3.bf16.msra.mxu1 %v3026_v31  ;;  %2840 = vmatprep.mubr.msk.bf16.mxu1 %vm3103_vm1, %v3102_v1 }
 0x60e   : > { %2838 = vmatprep.subr.bf16.mxu1 %v3102_v1 }
 0x611   : > { %2839 = vmatpush3.bf16.msra.mxu1 %v3027_v34  ;;  %v3033_v34 = vld [vmem:[%s3613_s4 + $0x108] sm:$0xff]  }
 0x612   : > { %2892 = vmatprep.subr.bf16.mxu1 %v3102_v1 }
 0x618   : > { %2841 = vmatmul.mubr.msk.bf16.vlgmr.msra.gmra.mrb[8].mxu1 %vm484_vm3, %v1670_v39 }
 0x619   : > { %2896 = vmatprep.mubr.msk.bf16.mxu1 %vm3103_vm1, %v3102_v1 }
 0x6eb   : > { %v1720_v17 = vpop.f32.mrb[8].mxu1 }
 0x6ec   : > { %v2912_v44 = vadd.f32 %v1720_v17, %v1445_v43  ;;  %v2842_v45 = vpop.f32.mrb[9].mxu1 }
 0x6ed   : > { %v1723_v46 = vpop.f32.mrb[10].mxu1 }
 0x6ee   : > { %v2563_v22 = vmul.f32 -1.442695, %v2912_v44  ;;  %v2913_v47 = vadd.f32 %v1723_v46, %v1445_v43  ;;  %v2843_v48 = vpop.f32.mrb[11].mxu1 }
 0x6f0   : > { %3068 = vpow2.f32 %v2563_v22  ;;  %v2564_v49 = vmul.f32 -1.442695, %v2913_v47 }
 0x6f2   : > { %3070 = vpow2.f32 %v2564_v49 }
 0x6fa   : > { %v3069_v51 = vpop.eup %3068 }
 0x6fb   : > { %v1737_v52 = vadd.f32 1.0, %v3069_v51 }
 0x6fc   : > { %v3071_v53 = vpop.eup %3070 }
 0x6fd   : > { %3072 = vrcp.f32 %v1737_v52  ;;  %v1738_v55 = vadd.f32 1.0, %v3071_v53 }
 0x6ff   : > { %3074 = vrcp.f32 %v1738_v55  ;;  %v3034_v55 = vld [vmem:[%s3613_s4 + $0x110] sm:$0xff]  }
 0x700   : > { %3076 = vtanh.f32 %v2912_v44 }
 0x701   : > { %3078 = vtanh.f32 %v2913_v47 }
 0x707   : > { %v3073_v58 = vpop.eup %3072 }
 0x708   : > { %1745 = vrot.lane.b32.xlu0 %v3073_v58, %s3105_s16  ;;  %v3036_v58 = vld [vmem:[%s3613_s4 + $0x120] sm:$0xff]  }
 0x709   : > { %v3075_v62 = vpop.eup %3074 }
 0x70a   : > { %1747 = vrot.lane.b32.xlu1 %v3075_v62, %s3105_s16  ;;  %v3077_v38 = vpop.eup %3076  ;;  %v3037_v62 = vld [vmem:[%s3613_s4 + $0x128] sm:$0xff]  }
 0x70b   : > { %v3079_v0 = vpop.eup %3078 }
 0x77a   : > { %v1746_v63 = vpop.permute.xlu0 %1745 }
 0x77b   : > { %v1751_v3 = vmul.f32 %v3077_v38, %v1746_v63  ;;  %v3038_v63 = vld [vmem:[%s3613_s4 + $0x130] sm:$0xff]   ;;  %v3039_v38 = vld [vmem:[%s3613_s4 + $0x138] sm:$0xff]  }
 0x77c   : > { %v1748_v2 = vpop.permute.xlu1 %1747 }
 0x77d   : > { %v1752_v41 = vmul.f32 %v3079_v0, %v1748_v2  ;;  %v3040_v0 = vld [vmem:[%s3615_s6 + $0x30] sm:$0xff]   ;;  %v1899_v2 = vsub.s32 3, %v3275_v59  ;;  %v3041_v59 = vld [vmem:[%s3615_s6 + $0x38] sm:$0xff]  }
 0x77e   : > { %2893 = vmatpush3.bf16.msra.mxu1 %v3040_v0 }
 0x77f   : > { %v1758_v4 = vpack.c.bf16 %v1752_v41, %v1751_v3  ;;  %2894 = vmatprep.subr.bf16.mxu1 %v3102_v1  ;;  %v1900_v3 = vrot.slane %v3281_v61, %v1899_v2 }
 0x781   : > { %2849 = vmatmul.mubr.msk.bf16.vlgmr.msra.gmra.mrb[12].mxu0 %vm484_vm3, %v1758_v4 }
 0x782   : > { %2856 = vmatprep.mubr.msk.bf16.mxu0 %vm3103_vm1, %v3102_v1  ;;  %2853 = vmatpush3.bf16.msra.mxu0 %v3030_v5 }
 0x783   : > { %2854 = vmatprep.subr.bf16.mxu0 %v3102_v1  ;;  %2895 = vmatpush3.bf16.msra.mxu1 %v3041_v59 }
 0x784   : > { %2900 = vmatprep.subr.bf16.mxu1 %v3102_v1 }
 0x786   : > { %2855 = vmatpush3.bf16.msra.mxu0 %v3031_v6 }
 0x787   : > { %2860 = vmatprep.subr.bf16.mxu0 %v3102_v1 }
 0x854   : > { %v1812_v8 = vpop.f32.mrb[12].mxu0 }
 0x855   : > { %v1813_v10 = vadd.f32 %v1812_v8, %v1762_v7  ;;  %v2850_v12 = vpop.f32.mrb[13].mxu0 }
 0x856   : > { %v1815_v13 = vpop.f32.mrb[14].mxu0 }
 0x857   : > { %v1819_v15 = vadd.f32 %v1813_v10, %v3412_v56  ;;  %v3504_v16 = vadd.f32 %v1813_v10, %v1368_v9  ;;  %v1816_v18 = vadd.f32 %v1815_v13, %v1762_v7  ;;  %v2851_v19 = vpop.f32.mrb[15].mxu0  ;;  %v3032_v56 = vld [vmem:[%s3613_s4 + $0x100] sm:$0xff]  }
 0x859   : > { %v1821_v21 = vmul.f32 %v1819_v15, %v3206_v11  ;;  %v1820_v23 = vadd.f32 %v1816_v18, %v3418_v60  ;;  %v3508_v24 = vadd.f32 %v1816_v18, %v1369_v14 }
 0x85b   : > { %v1827_v25 = vrot.slane %v1821_v21, 6  ;;  %v1822_v32 = vmul.f32 %v1820_v23, %v3214_v20 }
 0x85d   : > { %v1828_v50 = vrot.slane %v1822_v32, 6  ;;  %v1833_v26 = vsel %vm398_vm0, 0.0, %v1827_v25 }
 0x85f   : > { %v1829_v36 = vsel %vm398_vm0, %v1827_v25, %v1828_v50  ;;  %v1834_v54 = vsel %vm398_vm0, %v1828_v50, 0.0 }
 0x860   : > { %v1840_v27 = vpack.c.bf16 %v1829_v36, %v1833_v26  ;;  %v1908_v28 = vpack.c.bf16 %v1834_v54, %v1834_v54  ;;  %v3042_v36 = vld [vmem:[%s3617_s8] sm:$0xff]   ;;  %v3043_v54 = vld [vmem:[%s3617_s8 + $0x8] sm:$0xff]  }
 0x862   : > { %2857 = vmatmul.mubr.msk.bf16.vlgmr.msra.gmra.mrb[16].mxu0 %vm484_vm3, %v1840_v27  ;;  %v1909_v60 = vshrl.u32 %v1840_v27, 16  ;;  %v1911_v30 = vshll.u32 %v1840_v27, 16  ;;  %v1916_v31 = vshll.u32 %v1908_v28, 16  ;;  %v1985_v33 = vrot.slane %v1840_v27, 1 }
 0x863   : > { %2861 = vmatpush3.bf16.msra.mxu0 %v3032_v56  ;;  %2864 = vmatprep.mubr.msk.bf16.mxu0 %vm3103_vm1, %v3102_v1  ;;  %v1986_v35 = vrot.slane %v1908_v28, 1  ;;  %v2054_v37 = vshrl.u32 %v1908_v28, 16  ;;  %v2123_v39 = vrot.slane %v1840_v27, 2  ;;  %v2124_v40 = vrot.slane %v1908_v28, 2 }
 0x864   : > { %2862 = vmatprep.subr.bf16.mxu0 %v3102_v1  ;;  %v1913_v42 = vrot.slane %v1911_v30, 1  ;;  %v2051_v43 = vrot.slane %v1909_v60, 1  ;;  %v2052_v17 = vrot.slane %v1911_v30, 2  ;;  %v2057_v46 = vrot.slane %v1916_v31, 2 }
 0x865   : > { %v1987_v44 = vsel %vm618_vm5, %v1985_v33, %v1986_v35  ;;  %v2056_v45 = vrot.slane %v2054_v37, 1  ;;  %v2125_v22 = vsel %vm758_vm7, %v2123_v39, %v2124_v40  ;;  %v1918_v48 = vrot.slane %v1916_v31, 1 }
 0x866   : > { %v1914_v47 = vor.u32 %v1913_v42, %v1909_v60  ;;  %v2053_v49 = vor.u32 %v2052_v17, %v2051_v43  ;;  %v2217_v56 = vrot.slane %v3308_v29, %v1899_v2  ;;  %v2616_v29 = vld [vmem:[%s3618_s9] ss:$0 sm:$0xff] }
 0x867   : > { %2863 = vmatpush3.bf16.msra.mxu0 %v3033_v34  ;;  %v2058_v51 = vor.u32 %v2057_v46, %v2056_v45 }
 0x868   : > { %2868 = vmatprep.subr.bf16.mxu0 %v3102_v1  ;;  %v1919_v52 = vsel %vm541_vm4, %v1914_v47, %v1918_v48  ;;  %v3092_v47 = vld [vmem:[%s3187_s20] sm:$0xff] }
 0x869   : > { %v2059_v53 = vsel %vm685_vm6, %v2053_v49, %v2058_v51 }
 0x86e   : > { %2865 = vmatmul.mubr.msk.bf16.vlgmr.msra.gmra.mrb[16].mxu0 %vm484_vm3, %v1919_v52  ;;  %v3093_v52 = vld [vmem:[%s3187_s20 + $0x8] sm:$0xff] }
 0x86f   : > { %2869 = vmatpush3.bf16.msra.mxu0 %v3034_v55  ;;  %2872 = vmatprep.mubr.msk.bf16.mxu0 %vm3103_vm1, %v3102_v1 }
 0x870   : > { %2870 = vmatprep.subr.bf16.mxu0 %v3102_v1 }
 0x873   : > { %2871 = vmatpush3.bf16.msra.mxu0 %v3035_v57 }
 0x874   : > { %2876 = vmatprep.subr.bf16.mxu0 %v3102_v1 }
 0x87a   : > { %2873 = vmatmul.mubr.msk.bf16.vlgmr.msra.gmra.mrb[16].mxu0 %vm484_vm3, %v1987_v44 }
 0x87b   : > { %2877 = vmatpush3.bf16.msra.mxu0 %v3036_v58  ;;  %2880 = vmatprep.mubr.msk.bf16.mxu0 %vm3103_vm1, %v3102_v1 }
 0x87c   : > { %2878 = vmatprep.subr.bf16.mxu0 %v3102_v1 }
 0x87f   : > { %2879 = vmatpush3.bf16.msra.mxu0 %v3037_v62 }
 0x880   : > { %2884 = vmatprep.subr.bf16.mxu0 %v3102_v1 }
 0x886   : > { %2881 = vmatmul.mubr.msk.bf16.vlgmr.msra.gmra.mrb[16].mxu0 %vm484_vm3, %v2059_v53 }
 0x887   : > { %2885 = vmatpush3.bf16.msra.mxu0 %v3038_v63  ;;  %2888 = vmatprep.mubr.msk.bf16.mxu0 %vm3103_vm1, %v3102_v1 }
 0x888   : > { %2886 = vmatprep.subr.bf16.mxu0 %v3102_v1 }
 0x88b   : > { %2887 = vmatpush3.bf16.msra.mxu0 %v3039_v38 }
 0x892   : > { %2889 = vmatmul.mubr.msk.bf16.vlgmr.msra.gmra.mrb[16].mxu0 %vm484_vm3, %v2125_v22 }
 0x965   : > { %v2175_v41 = vpop.f32.mrb[16].mxu0 }
 0x966   : > { %v2914_v4 = vadd.f32 %v2175_v41, %v1900_v3  ;;  %v2890_v5 = vpop.f32.mrb[17].mxu0 }
 0x967   : > { %v2178_v6 = vpop.f32.mrb[18].mxu0 }
 0x968   : > { %v2607_v7 = vmul.f32 -1.442695, %v2914_v4  ;;  %v2915_v8 = vadd.f32 %v2178_v6, %v1900_v3  ;;  %v2891_v9 = vpop.f32.mrb[19].mxu0 }
 0x96a   : > { %3080 = vpow2.f32 %v2607_v7  ;;  %v2608_v10 = vmul.f32 -1.442695, %v2915_v8 }
 0x96c   : > { %3082 = vpow2.f32 %v2608_v10 }
 0x974   : > { %v3081_v12 = vpop.eup %3080 }
 0x975   : > { %v2192_v13 = vadd.f32 1.0, %v3081_v12 }
 0x976   : > { %v3083_v14 = vpop.eup %3082 }
 0x977   : > { %3084 = vrcp.f32 %v2192_v13  ;;  %v2193_v15 = vadd.f32 1.0, %v3083_v14 }
 0x979   : > { %3086 = vrcp.f32 %v2193_v15 }
 0x97a   : > { %3088 = vtanh.f32 %v2914_v4 }
 0x97b   : > { %3090 = vtanh.f32 %v2915_v8 }
 0x981   : > { %v3085_v61 = vpop.eup %3084 }
 0x982   : > { %2200 = vrot.lane.b32.xlu0 %v3085_v61, %s3105_s16 }
 0x983   : > { %v3087_v18 = vpop.eup %3086 }
 0x984   : > { %2202 = vrot.lane.b32.xlu1 %v3087_v18, %s3105_s16  ;;  %v3089_v21 = vpop.eup %3088 }
 0x985   : > { %v3091_v23 = vpop.eup %3090 }
 0x9f4   : > { %v2201_v19 = vpop.permute.xlu0 %2200 }
 0x9f5   : > { %v2206_v32 = vmul.f32 %v3089_v21, %v2201_v19 }
 0x9f6   : > { %v2203_v25 = vpop.permute.xlu1 %2202 }
 0x9f7   : > { %v2207_v50 = vmul.f32 %v3091_v23, %v2203_v25 }
 0x9f9   : > { %v2213_v26 = vpack.c.bf16 %v2207_v50, %v2206_v32 }
 0x9fb   : > { %2897 = vmatmul.mubr.msk.bf16.vlgmr.msra.gmra.mrb[12].mxu1 %vm484_vm3, %v2213_v26 }
 0x9fc   : > { %2904 = vmatprep.mubr.msk.bf16.mxu1 %vm3103_vm1, %v3102_v1  ;;  %2901 = vmatpush3.bf16.msra.mxu1 %v3042_v36 }
 0x9fd   : > { %2902 = vmatprep.subr.bf16.mxu1 %v3102_v1 }
 0xa00   : > { %2903 = vmatpush3.bf16.msra.mxu1 %v3043_v54 }
 0xace   : > { %v2267_v27 = vpop.f32.mrb[12].mxu1 }
 0xacf   : > { %v2268_v28 = vadd.f32 %v2267_v27, %v2217_v56  ;;  %v2898_v60 = vpop.f32.mrb[13].mxu1 }
 0xad0   : > { %v2270_v30 = vpop.f32.mrb[14].mxu1 }
 0xad1   : > { %v2274_v31 = vadd.f32 %v2268_v28, %v3504_v16  ;;  %v2271_v33 = vadd.f32 %v2270_v30, %v2217_v56  ;;  %v2899_v34 = vpop.f32.mrb[15].mxu1 }
 0xad3   : > { %v2275_v35 = vadd.f32 %v2271_v33, %v3508_v24  ;;  %v2276_v37 = vmul.f32 %v2274_v31, %v3206_v11 }
 0xad5   : > { %v2277_v39 = vmul.f32 %v2275_v35, %v3214_v20 }
 0xad7   : > { %v2282_v40 = vpack.c.bf16 %v2277_v39, %v2276_v37 }
 0xad9   : > { %2291 = vrot.lane.b32.xlu0 %v2282_v40, %s3105_s16  ;;  %s3106_s16 = smov 4  }
 0xb4b   : > { %v2292_v1 = vpop.permute.xlu0 %2291 }
 0xb4c   : > { %2905 = vmatmul.mubr.msk.bf16.vlgmr.msra.gmra.mrb[16].mxu1 %vm484_vm3, %v2292_v1 }
 0xc1f   : > { %v2342_v16 = vpop.f32.mrb[16].mxu1 }
 0xc20   : > { %v2343_v42 = vadd.f32 %v2616_v29, %v2342_v16  ;;  %v2906_v43 = vpop.f32.mrb[17].mxu1 }
 0xc21   : > { %v2345_v24 = vpop.f32.mrb[18].mxu1 }
 0xc22   : > { %v2349_v17 = vmul.f32 %v2343_v42, %v3206_v11  ;;  %v2346_v44 = vadd.f32 %v2616_v29, %v2345_v24  ;;  %v2907_v45 = vpop.f32.mrb[19].mxu1 }
 0xc24   : > { %v2350_v46 = vmul.f32 %v2346_v44, %v3214_v20  ;;  %2353 = vrot.lane.b32.xlu1 %v2349_v17, %s3106_s16 }
 0xc26   : > { %2355 = vrot.lane.b32.xlu0 %v2350_v46, %s3106_s16 }
 0xc96   : > { %v2354_v22 = vpop.permute.xlu1 %2353 }
 0xc97   : > { %v2359_v48 = vsub.f32 %v3092_v47, %v2354_v22 }
 0xc98   : > { %v2356_v49 = vpop.permute.xlu0 %2355 }
 0xc99   : > { %v2361_v51 = vmul.f32 %v2359_v48, %v3206_v11  ;;  %v2360_v53 = vsub.f32 %v3093_v52, %v2356_v49 }
 0xc9b   : > { %v2363_v55 = vsel %vm394_vm2, %v3092_v47, %v2361_v51  ;;  %v2362_v57 = vmul.f32 %v2360_v53, %v3214_v20 }
 0xc9c   : > { %2366 = vst.msk [vmem:[%s379_s21] sm:$0xff] %vm2365_vm8, %v2363_v55 }
 0xc9d   : > { %v2364_v58 = vsel %vm394_vm2, %v3093_v52, %v2362_v57 }
 0xc9e   : > { %2367 = vst.msk [vmem:[%s379_s21 + $0x8] sm:$0xff] %vm2365_vm8, %v2364_v58 }
 0xc9f PF: > { %s20_s13 = sadd.s32 1, %s3100_s13  }
 0xca0   : > { %p17_p4 = scmp.ge.s32.totalorder %s20_s13, 4  }
 0xca2   :  { %19 = sbr.rel (!%p17_p4) target bundleno = 1 (0x1), region = 115 }

// kernel: _lambda_.23
= control target key start
LH: loop header
LB: loop body
LE: loop exit
PB: predicated region body
PF: predicated region fallthrough
CT: control target
= control target key end

     0   :  { %s906_s9 = smov 0   ;;  %s1355_s0 = inlined_call_operand.vmem [shape: f32[2,64,8], index: 0, kind: input, shape index: {}]   ;;  %s1356_s1 = inlined_call_operand.vmem [shape: f32[7,8], index: 1, kind: input, shape index: {}]   ;;  %s1357_s2 = inlined_call_operand.vmem [shape: f32[2,64,1], index: 2, kind: output, shape index: {}]  }
   0x1 LB: > { %s846_s10 = sadd.s32 4294967295, %s889_s9   ;;  %p850_p0 = scmp.ge.s32.totalorder %s889_s9, 1  ;;  %s889_s9 = sphi %s906_s9, %s12_s9  }
   0x2   : > { %p112_p1 = scmp.lt.s32.totalorder %s889_s9, 3 }
   0x4   : > { %p113_p2 = pnand %p850_p0, %p112_p1 }
   0x5   : > { %p134_p3 = scmp.lt.s32.totalorder (!%p113_p2), %s846_s10, 1  ;;  %v220_v0 = vlaneseq (!%p113_p2)  ;;  %v921_v2 = vld [vmem:[%s1356_s1] sm:$0x7f] (!%p113_p2)  ;;  %vm192_vm0 = vcmask (!%p113_p2), 1042432   ;;  %vm232_vm1 = vcmask (!%p113_p2), 64512   ;;  %vm278_vm10 = vcmask (!%p113_p2), 64513  }
   0x6   : > { %116 = sbr.rel (%p113_p2) target bundleno = 309 (0x135), region = 28  ;;  %vm363_vm11 = vcmask (!%p113_p2), 64514   ;;  %vm303_vm12 = vcmask (!%p113_p2), 57344   ;;  %vm388_vm13 = vcmask (!%p113_p2), 58368   ;;  %vm448_vm14 = vcmask (!%p113_p2), 64515  }
   0x7   : > { %v916_v1 = vshrl.u32 (!%p113_p2), %v220_v0, 7  ;;  %vm533_vm15 = vcmask (!%p113_p2), 64516  }
   0x9   : > { %v222_v3 = vsub.s32 (!%p113_p2), 0, %v916_v1  ;;  %v522_v4 = vsub.s32 (!%p113_p2), 4, %v916_v1  ;;  %v607_v5 = vsub.s32 (!%p113_p2), 5, %v916_v1  ;;  %v691_v10 = vsub.s32 (!%p113_p2), 6, %v916_v1 }
   0xa   : > { %v267_v53 = vsub.s32 (!%p113_p2), 1, %v916_v1 }
   0xb   : > { %v937_v8 = vrot.slane (!%p113_p2), %v921_v2, %v222_v3  ;;  %v945_v17 = vrot.slane (!%p113_p2), %v921_v2, %v522_v4  ;;  %v948_v21 = vrot.slane (!%p113_p2), %v921_v2, %v607_v5  ;;  %v956_v41 = vrot.slane (!%p113_p2), %v921_v2, %v691_v10 }
   0xd   : > { %s1359_s10 = smov (!%p134_p3, %s846_s10), 1 }
   0xe   : > { %s857_s13 = sshll.u32 %s1359_s10, 6 }
   0xf   : > { %s930_s16 = scalar_lea.vmem %s1355_s0, %s857_s13  ;;  %s143_s19 = scalar_lea.vmem %s1357_s2, %s857_s13 }
  0x10   : > { %v145_v6 = vld [vmem:[%s930_s16 + $0x8] sm:$0xff]  ;;  %v146_v7 = vld [vmem:[%s930_s16 + $0x10] sm:$0xff]  ;;  %v144_v9 = vld [vmem:[%s930_s16] sm:$0xff] }
  0x11   : > { %v153_v11 = vmul.f32 0.5, %v145_v6  ;;  %v154_v12 = vmul.f32 0.5, %v146_v7  ;;  %v152_v13 = vmul.f32 0.5, %v144_v9  ;;  %v147_v14 = vld [vmem:[%s930_s16 + $0x18] sm:$0xff]  ;;  %v148_v15 = vld [vmem:[%s930_s16 + $0x20] sm:$0xff]  ;;  %v149_v16 = vld [vmem:[%s930_s16 + $0x28] sm:$0xff]  ;;  %v268_v7 = vrot.slane %v921_v2, %v267_v53 }
  0x12   : > { %v155_v18 = vmul.f32 0.5, %v147_v14  ;;  %v156_v19 = vmul.f32 0.5, %v148_v15  ;;  %v157_v20 = vmul.f32 0.5, %v149_v16  ;;  %v150_v28 = vld [vmem:[%s930_s16 + $0x30] sm:$0xff]  ;;  %v151_v29 = vld [vmem:[%s930_s16 + $0x38] sm:$0xff] }
  0x13   : > { %vm161_vm2 = vcmp.ge.f32.partialorder %v153_v11, 0.0  ;;  %vm162_vm3 = vcmp.ge.f32.partialorder %v154_v12, 0.0  ;;  %v169_v22 = vmul.f32 0.01, %v153_v11  ;;  %v170_v23 = vmul.f32 0.01, %v154_v12 }
  0x14   : > { %vm160_vm4 = vcmp.ge.f32.partialorder %v152_v13, 0.0  ;;  %v168_v24 = vmul.f32 0.01, %v152_v13  ;;  %vm163_vm5 = vcmp.ge.f32.partialorder %v155_v18, 0.0  ;;  %v171_v25 = vmul.f32 0.01, %v155_v18 }
  0x15   : > { %v177_v26 = vsel %vm161_vm2, %v153_v11, %v169_v22  ;;  %v178_v27 = vsel %vm162_vm3, %v154_v12, %v170_v23  ;;  %vm164_vm6 = vcmp.ge.f32.partialorder %v156_v19, 0.0  ;;  %vm165_vm7 = vcmp.ge.f32.partialorder %v157_v20, 0.0 }
  0x16   : > { %v194_v30 = vrot.slane %v177_v26, 5  ;;  %v196_v31 = vrot.slane %v178_v27, 5  ;;  %v176_v32 = vsel %vm160_vm4, %v152_v13, %v168_v24  ;;  %v179_v33 = vsel %vm163_vm5, %v155_v18, %v171_v25 }
  0x17   : > { %v193_v34 = vrot.slane %v176_v32, 5  ;;  %v198_v35 = vrot.slane %v179_v33, 5  ;;  %v172_v36 = vmul.f32 0.01, %v156_v19  ;;  %v173_v37 = vmul.f32 0.01, %v157_v20 }
  0x18   : > { %v953_v38 = vsel %vm192_vm0, %v194_v30, %v196_v31  ;;  %v158_v39 = vmul.f32 0.5, %v150_v28  ;;  %v159_v40 = vmul.f32 0.5, %v151_v29  ;;  %vm473_vm2 = vcmask 59392  }
  0x19   : > { %v226_v42 = vmul.f32 %v937_v8, %v953_v38  ;;  %v961_v43 = vsel %vm192_vm0, 0.0, %v193_v34  ;;  %v964_v44 = vsel %vm192_vm0, %v196_v31, %v198_v35  ;;  %v967_v45 = vsel %vm192_vm0, %v193_v34, %v194_v30 }
  0x1a   : > { %v224_v46 = vmul.f32 %v937_v8, %v961_v43  ;;  %v227_v47 = vmul.f32 %v937_v8, %v964_v44  ;;  %v225_v48 = vmul.f32 %v937_v8, %v967_v45  ;;  %v180_v49 = vsel %vm164_vm6, %v156_v19, %v172_v36 }
  0x1b   : > { %v239_v50 = vsel %vm232_vm1, %v226_v42, 0.0  ;;  %v181_v51 = vsel %vm165_vm7, %v157_v20, %v173_v37  ;;  %v200_v52 = vrot.slane %v180_v49, 5  ;;  %vm166_vm8 = vcmp.ge.f32.partialorder %v158_v39, 0.0 }
  0x1c   : > { %240 = vadd.xlane.f32.xlu1 %v239_v50  ;;  %v233_v54 = vsel %vm232_vm1, %v224_v46, 0.0  ;;  %v242_v55 = vsel %vm232_vm1, %v227_v47, 0.0  ;;  %v202_v56 = vrot.slane %v181_v51, 5  ;;  %vm167_vm9 = vcmp.ge.f32.partialorder %v159_v40, 0.0 }
  0x1d   : > { %234 = vadd.xlane.f32.xlu0 %v233_v54  ;;  %v982_v57 = vsel %vm192_vm0, %v198_v35, %v200_v52  ;;  %v174_v58 = vmul.f32 0.01, %v158_v39  ;;  %v175_v59 = vmul.f32 0.01, %v159_v40  ;;  %v236_v60 = vsel %vm232_vm1, %v225_v48, 0.0 }
  0x1e   : > { %v986_v61 = vsel %vm192_vm0, %v200_v52, %v202_v56  ;;  %v228_v62 = vmul.f32 %v937_v8, %v982_v57  ;;  %v270_v15 = vmul.f32 %v268_v7, %v967_v45  ;;  %v269_v18 = vmul.f32 %v268_v7, %v961_v43 }
  0x1f   : > { %v229_v63 = vmul.f32 %v937_v8, %v986_v61  ;;  %v182_v0 = vsel %vm166_vm8, %v158_v39, %v174_v58  ;;  %v183_v3 = vsel %vm167_vm9, %v159_v40, %v175_v59  ;;  %v352_v19 = vsub.s32 2, %v916_v1 }
  0x20   : > { %243 = vadd.xlane.f32.xlu1 %v242_v55  ;;  %v204_v4 = vrot.slane %v182_v0, 5  ;;  %v206_v5 = vrot.slane %v183_v3, 5  ;;  %v245_v9 = vsel %vm232_vm1, %v228_v62, 0.0  ;;  %v282_v20 = vsel %vm232_vm1, %v270_v15, 0.0 }
  0x21   : > { %237 = vadd.xlane.f32.xlu0 %v236_v60  ;;  %v248_v6 = vsel %vm232_vm1, %v229_v63, 0.0  ;;  %v272_v22 = vmul.f32 %v268_v7, %v964_v44  ;;  %v271_v23 = vmul.f32 %v268_v7, %v953_v38  ;;  %v274_v24 = vmul.f32 %v268_v7, %v986_v61 }
  0x22   : > { %v996_v10 = vsel %vm192_vm0, %v204_v4, %v206_v5  ;;  %v999_v11 = vsel %vm192_vm0, %v202_v56, %v204_v4  ;;  %v1015_v25 = vrot.slane %v921_v2, %v352_v19  ;;  %v273_v26 = vmul.f32 %v268_v7, %v982_v57 }
  0x23   : > { %v231_v12 = vmul.f32 %v937_v8, %v996_v10  ;;  %v230_v13 = vmul.f32 %v937_v8, %v999_v11  ;;  %v279_v8 = vsel %vm278_vm10, %v269_v18, 0.0  ;;  %v276_v27 = vmul.f32 %v268_v7, %v996_v10 }
  0x24   : > { %249 = vadd.xlane.f32.xlu1 %v248_v6  ;;  %v288_v28 = vsel %vm232_vm1, %v272_v22, 0.0  ;;  %v275_v29 = vmul.f32 %v268_v7, %v999_v11  ;;  %v285_v30 = vsel %vm232_vm1, %v271_v23, 0.0  ;;  %v294_v31 = vsel %vm232_vm1, %v274_v24, 0.0 }
  0x25   : > { %246 = vadd.xlane.f32.xlu0 %v245_v9  ;;  %v254_v14 = vsel %vm232_vm1, %v231_v12, 0.0  ;;  %v251_v16 = vsel %vm232_vm1, %v230_v13, 0.0  ;;  %v354_v32 = vmul.f32 %v1015_v25, %v961_v43  ;;  %v1027_v33 = vmul.f32 %v945_v17, %v961_v43 }
  0x26   : > { %v291_v34 = vsel %vm232_vm1, %v273_v26, 0.0  ;;  %v526_v35 = vmul.f32 %v945_v17, %v953_v38  ;;  %v525_v36 = vmul.f32 %v945_v17, %v967_v45  ;;  %v528_v37 = vmul.f32 %v945_v17, %v982_v57 }
  0x27   : > { %v300_v39 = vsel %vm232_vm1, %v276_v27, 0.0  ;;  %v1038_v40 = vsel %vm192_vm0, %v206_v5, 0.0  ;;  %v527_v42 = vmul.f32 %v945_v17, %v964_v44  ;;  %v530_v46 = vmul.f32 %v945_v17, %v999_v11 }
  0x28   : > { %255 = vadd.xlane.f32.xlu1 %v254_v14  ;;  %v297_v47 = vsel %vm232_vm1, %v275_v29, 0.0  ;;  %v1046_v48 = vsel %vm232_vm1, %v526_v35, 0.0  ;;  %v1049_v49 = vsel %vm232_vm1, %v525_v36, 0.0  ;;  %v1052_v50 = vsel %vm232_vm1, %v528_v37, 0.0 }
  0x29   : > { %252 = vadd.xlane.f32.xlu0 %v251_v16  ;;  %v364_v51 = vsel %vm363_vm11, %v354_v32, 0.0  ;;  %v1056_v52 = vsel %vm232_vm1, %v527_v42, 0.0  ;;  %v1059_v53 = vsel %vm232_vm1, %v530_v46, 0.0  ;;  %v529_v54 = vmul.f32 %v945_v17, %v986_v61 }
  0x2a   : > { %v531_v55 = vmul.f32 %v945_v17, %v996_v10  ;;  %v610_v56 = vmul.f32 %v948_v21, %v967_v45  ;;  %v1069_v58 = vmul.f32 %v948_v21, %v961_v43  ;;  %v612_v59 = vmul.f32 %v948_v21, %v964_v44 }
  0x2b   : > { %v277_v60 = vmul.f32 %v268_v7, %v1038_v40  ;;  %v1075_v62 = vsel %vm232_vm1, %v529_v54, 0.0  ;;  %v611_v63 = vmul.f32 %v948_v21, %v953_v38  ;;  %v614_v0 = vmul.f32 %v948_v21, %v986_v61 }
  0x2c   : > { %283 = vadd.xlane.f32.xlu1 %v282_v20  ;;  %v356_v3 = vmul.f32 %v1015_v25, %v953_v38  ;;  %v1084_v4 = vsel %vm232_vm1, %v531_v55, 0.0  ;;  %v1087_v5 = vsel %vm232_vm1, %v610_v56, 0.0  ;;  %v1090_v6 = vsel %vm232_vm1, %v612_v59, 0.0 }
  0x2d   : > { %280 = vadd.xlane.f32.xlu0 %v279_v8  ;;  %v1093_v7 = vsel %vm232_vm1, %v611_v63, 0.0  ;;  %v1096_v9 = vsel %vm232_vm1, %v614_v0, 0.0  ;;  %v613_v12 = vmul.f32 %v948_v21, %v982_v57  ;;  %v616_v13 = vmul.f32 %v948_v21, %v996_v10 }
  0x2e   : > { %v615_v14 = vmul.f32 %v948_v21, %v999_v11  ;;  %v1106_v15 = vmul.f32 %v956_v41, %v961_v43  ;;  %v1110_v16 = vmul.f32 %v948_v21, %v1038_v40  ;;  %v695_v18 = vmul.f32 %v956_v41, %v953_v38 }
  0x2f   : > { %v1115_v19 = vsel %vm232_vm1, %v613_v12, 0.0  ;;  %v1118_v20 = vsel %vm232_vm1, %v616_v13, 0.0  ;;  %v694_v22 = vmul.f32 %v956_v41, %v967_v45  ;;  %v697_v8 = vmul.f32 %v956_v41, %v982_v57 }
  0x30   : > { %289 = vadd.xlane.f32.xlu1 %v288_v28  ;;  %v304_v21 = vsel %vm303_vm12, %v277_v60, 0.0  ;;  %v355_v23 = vmul.f32 %v1015_v25, %v967_v45  ;;  %v1128_v24 = vsel %vm232_vm1, %v615_v14, 0.0  ;;  %v1131_v26 = vsel %vm232_vm1, %v695_v18, 0.0 }
  0x31   : > { %286 = vadd.xlane.f32.xlu0 %v285_v30  ;;  %v1134_v27 = vsel %vm232_vm1, %v694_v22, 0.0  ;;  %v1137_v28 = vsel %vm232_vm1, %v697_v8, 0.0  ;;  %v696_v29 = vmul.f32 %v956_v41, %v964_v44  ;;  %v699_v30 = vmul.f32 %v956_v41, %v999_v11 }
  0x32   : > { %v1147_v32 = vmul.f32 %v956_v41, %v1038_v40  ;;  %v370_v37 = vsel %vm232_vm1, %v356_v3, 0.0  ;;  %v360_v54 = vmul.f32 %v1015_v25, %v999_v11  ;;  %v437_v55 = vsub.s32 3, %v916_v1 }
  0x33   : > { %v1152_v35 = vsel %vm232_vm1, %v696_v29, 0.0  ;;  %v1155_v36 = vsel %vm232_vm1, %v699_v30, 0.0  ;;  %v359_v59 = vmul.f32 %v1015_v25, %v986_v61  ;;  %v362_v63 = vmul.f32 %v1015_v25, %v1038_v40 }
  0x34   : > { %295 = vadd.xlane.f32.xlu1 %v294_v31  ;;  %v698_v31 = vmul.f32 %v956_v41, %v986_v61  ;;  %v382_v60 = vsel %vm232_vm1, %v360_v54, 0.0  ;;  %v438_v0 = vrot.slane %v921_v2, %v437_v55  ;;  %v361_v1 = vmul.f32 %v1015_v25, %v996_v10 }
  0x35   : > { %292 = vadd.xlane.f32.xlu0 %v291_v34  ;;  %v700_v34 = vmul.f32 %v956_v41, %v996_v10  ;;  %v367_v41 = vsel %vm232_vm1, %v355_v23, 0.0  ;;  %v379_v3 = vsel %vm232_vm1, %v359_v59, 0.0  ;;  %v389_v12 = vsel %vm388_vm13, %v362_v63, 0.0 }
  0x36   : > { %v1161_v42 = vsel %vm232_vm1, %v698_v31, 0.0  ;;  %v440_v13 = vmul.f32 %v438_v0, %v967_v45  ;;  %v385_v14 = vsel %vm232_vm1, %v361_v1, 0.0  ;;  %v439_v18 = vmul.f32 %v438_v0, %v961_v43 }
  0x37   : > { %v1164_v46 = vsel %vm232_vm1, %v700_v34, 0.0  ;;  %v442_v22 = vmul.f32 %v438_v0, %v964_v44  ;;  %v444_v45 = vmul.f32 %v438_v0, %v986_v61  ;;  %v443_v43 = vmul.f32 %v438_v0, %v982_v57 }
  0x38   : > { %301 = vadd.xlane.f32.xlu1 %v300_v39  ;;  %v358_v39 = vmul.f32 %v1015_v25, %v982_v57  ;;  %v452_v2 = vsel %vm232_vm1, %v440_v13, 0.0  ;;  %v449_v8 = vsel %vm448_vm14, %v439_v18, 0.0  ;;  %v446_v30 = vmul.f32 %v438_v0, %v996_v10 }
  0x39   : > { %298 = vadd.xlane.f32.xlu0 %v297_v47  ;;  %v357_v47 = vmul.f32 %v1015_v25, %v964_v44  ;;  %v458_v25 = vsel %vm232_vm1, %v442_v22, 0.0  ;;  %v464_v29 = vsel %vm232_vm1, %v444_v45, 0.0  ;;  %v461_v44 = vsel %vm232_vm1, %v443_v43, 0.0 }
  0x3a   : > { %v470_v31 = vsel %vm232_vm1, %v446_v30, 0.0  ;;  %v447_v34 = vmul.f32 %v438_v0, %v1038_v40  ;;  %v534_v57 = vsel %vm533_vm15, %v1027_v33, 0.0  ;;  %v532_v10 = vmul.f32 %v945_v17, %v1038_v40 }
  0x3b   : > { %v373_v56 = vsel %vm232_vm1, %v357_v47, 0.0  ;;  %vm618_vm3 = vcmask 64517   ;;  %vm702_vm4 = vcmask 64518   ;;  %vm643_vm5 = vcmask 61440  }
  0x3c   : > { %365 = vadd.xlane.f32.xlu1 %v364_v51  ;;  %v376_v51 = vsel %vm232_vm1, %v358_v39, 0.0  ;;  %v619_v33 = vsel %vm618_vm3, %v1069_v58, 0.0  ;;  %v703_v17 = vsel %vm702_vm4, %v1106_v15, 0.0  ;;  %v644_v40 = vsel %vm643_vm5, %v1110_v16, 0.0 }
  0x3d   : > { %305 = vadd.xlane.f32.xlu0 %v304_v21  ;;  %v441_v21 = vmul.f32 %v438_v0, %v953_v38  ;;  %v445_v38 = vmul.f32 %v438_v0, %v999_v11  ;;  %vm727_vm6 = vcmask 62464   ;;  %vm316_vm7 = vcmask 1046528  }
  0x3e   : > { %vm401_vm8 = vcmask 1045504   ;;  %vm486_vm9 = vcmask 1044480   ;;  %vm571_vm10 = vcmask 1043456   ;;  %vm740_vm11 = vcmask 1041408  }
  0x3f   : > { %v455_v23 = vsel %vm232_vm1, %v441_v21, 0.0  ;;  %v467_v61 = vsel %vm232_vm1, %v445_v38, 0.0  ;;  %vm558_vm1 = vcmask 60416  }
  0x40   : > { %371 = vadd.xlane.f32.xlu1 %v370_v37  ;;  %v474_v37 = vsel %vm473_vm2, %v447_v34, 0.0  ;;  %v559_v11 = vsel %vm558_vm1, %v532_v10, 0.0 }
  0x41   : > { %368 = vadd.xlane.f32.xlu0 %v367_v41 }
  0x44   : > { %377 = vadd.xlane.f32.xlu1 %v376_v51 }
  0x45   : > { %374 = vadd.xlane.f32.xlu0 %v373_v56 }
  0x48   : > { %383 = vadd.xlane.f32.xlu1 %v382_v60 }
  0x49   : > { %380 = vadd.xlane.f32.xlu0 %v379_v3 }
  0x4c   : > { %390 = vadd.xlane.f32.xlu1 %v389_v12 }
  0x4d   : > { %386 = vadd.xlane.f32.xlu0 %v385_v14 }
  0x50   : > { %453 = vadd.xlane.f32.xlu1 %v452_v2 }
  0x51   : > { %450 = vadd.xlane.f32.xlu0 %v449_v8 }
  0x54   : > { %459 = vadd.xlane.f32.xlu1 %v458_v25 }
  0x55   : > { %456 = vadd.xlane.f32.xlu0 %v455_v23 }
  0x58   : > { %465 = vadd.xlane.f32.xlu1 %v464_v29 }
  0x59   : > { %462 = vadd.xlane.f32.xlu0 %v461_v44 }
  0x5c   : > { %471 = vadd.xlane.f32.xlu1 %v470_v31 }
  0x5d   : > { %468 = vadd.xlane.f32.xlu0 %v467_v61 }
  0x60   : > { %535 = vadd.xlane.f32.xlu1 %v534_v57 }
  0x61   : > { %475 = vadd.xlane.f32.xlu0 %v474_v37 }
  0x64   : > { %541 = vadd.xlane.f32.xlu1 %v1046_v48  ;;  %v728_v48 = vsel %vm727_vm6, %v1147_v32, 0.0 }
  0x65   : > { %538 = vadd.xlane.f32.xlu0 %v1049_v49 }
  0x68   : > { %547 = vadd.xlane.f32.xlu1 %v1052_v50 }
  0x69   : > { %544 = vadd.xlane.f32.xlu0 %v1056_v52 }
  0x6c   : > { %553 = vadd.xlane.f32.xlu1 %v1059_v53 }
  0x6d   : > { %550 = vadd.xlane.f32.xlu0 %v1075_v62 }
  0x70   : > { %560 = vadd.xlane.f32.xlu1 %v559_v11 }
  0x71   : > { %556 = vadd.xlane.f32.xlu0 %v1084_v4 }
  0x74   : > { %623 = vadd.xlane.f32.xlu1 %v1087_v5 }
  0x75   : > { %620 = vadd.xlane.f32.xlu0 %v619_v33 }
  0x78   : > { %629 = vadd.xlane.f32.xlu1 %v1090_v6 }
  0x79   : > { %626 = vadd.xlane.f32.xlu0 %v1093_v7 }
  0x7c   : > { %635 = vadd.xlane.f32.xlu1 %v1096_v9 }
  0x7d   : > { %632 = vadd.xlane.f32.xlu0 %v1115_v19 }
  0x80   : > { %641 = vadd.xlane.f32.xlu1 %v1118_v20 }
  0x81   : > { %638 = vadd.xlane.f32.xlu0 %v1128_v24 }
  0x84   : > { %704 = vadd.xlane.f32.xlu1 %v703_v17 }
  0x85   : > { %645 = vadd.xlane.f32.xlu0 %v644_v40 }
  0x88   : > { %710 = vadd.xlane.f32.xlu1 %v1131_v26 }
  0x89   : > { %707 = vadd.xlane.f32.xlu0 %v1134_v27 }
  0x8c   : > { %716 = vadd.xlane.f32.xlu1 %v1137_v28 }
  0x8d   : > { %713 = vadd.xlane.f32.xlu0 %v1152_v35 }
  0x90   : > { %722 = vadd.xlane.f32.xlu1 %v1155_v36 }
  0x91   : > { %719 = vadd.xlane.f32.xlu0 %v1161_v42 }
  0x94   : > { %729 = vadd.xlane.f32.xlu1 %v728_v48 }
  0x95   : > { %725 = vadd.xlane.f32.xlu0 %v1164_v46 }
  0xa9   : > { %v241_v49 = vpop.xlane.xlu1 %240 }
  0xaa   : > { %v235_v50 = vpop.xlane.xlu0 %234 }
  0xad   : > { %v244_v52 = vpop.xlane.xlu1 %243 }
  0xae   : > { %v238_v53 = vpop.xlane.xlu0 %237 }
  0xb1   : > { %v250_v58 = vpop.xlane.xlu1 %249 }
  0xb2   : > { %v247_v62 = vpop.xlane.xlu0 %246 }
  0xb5   : > { %v256_v4 = vpop.xlane.xlu1 %255 }
  0xb6   : > { %v253_v5 = vpop.xlane.xlu0 %252 }
  0xb9   : > { %v284_v6 = vpop.xlane.xlu1 %283 }
  0xba   : > { %v318_v7 = vrot.slane %v284_v6, 1  ;;  %v281_v9 = vpop.xlane.xlu0 %280 }
  0xbb   : > { %v317_v15 = vrot.slane %v281_v9, 1 }
  0xbd   : > { %v319_v16 = vsel %vm316_vm7, %v317_v15, %v318_v7  ;;  %v290_v19 = vpop.xlane.xlu1 %289 }
  0xbe   : > { %v342_v20 = vadd.f32 %v319_v16, %v235_v50  ;;  %v322_v24 = vrot.slane %v290_v19, 1  ;;  %v287_v26 = vpop.xlane.xlu0 %286 }
  0xbf   : > { %v320_v27 = vrot.slane %v287_v26, 1 }
  0xc1   : > { %v321_v28 = vsel %vm316_vm7, %v318_v7, %v320_v27  ;;  %v323_v32 = vsel %vm316_vm7, %v320_v27, %v322_v24  ;;  %v296_v35 = vpop.xlane.xlu1 %295 }
  0xc2   : > { %v343_v36 = vadd.f32 %v321_v28, %v238_v53  ;;  %v344_v39 = vadd.f32 %v323_v32, %v241_v49  ;;  %v326_v42 = vrot.slane %v296_v35, 1  ;;  %v293_v46 = vpop.xlane.xlu0 %292 }
  0xc3   : > { %v324_v41 = vrot.slane %v293_v46, 1 }
  0xc5   : > { %v325_v47 = vsel %vm316_vm7, %v322_v24, %v324_v41  ;;  %v327_v51 = vsel %vm316_vm7, %v324_v41, %v326_v42  ;;  %v302_v54 = vpop.xlane.xlu1 %301 }
  0xc6   : > { %v345_v55 = vadd.f32 %v325_v47, %v244_v52  ;;  %v346_v56 = vadd.f32 %v327_v51, %v247_v62  ;;  %v330_v59 = vrot.slane %v302_v54, 1  ;;  %v299_v60 = vpop.xlane.xlu0 %298 }
  0xc7   : > { %v328_v63 = vrot.slane %v299_v60, 1 }
  0xc9   : > { %v329_v0 = vsel %vm316_vm7, %v326_v42, %v328_v63  ;;  %v331_v3 = vsel %vm316_vm7, %v328_v63, %v330_v59  ;;  %v366_v1 = vpop.xlane.xlu1 %365 }
  0xca   : > { %v347_v12 = vadd.f32 %v329_v0, %v250_v58  ;;  %v348_v13 = vadd.f32 %v331_v3, %v253_v5  ;;  %v306_v14 = vpop.xlane.xlu0 %305  ;;  %v402_v45 = vrot.slane %v366_v1, 2 }
  0xcb   : > { %v332_v18 = vrot.slane %v306_v14, 1 }
  0xcd   : > { %v333_v2 = vsel %vm316_vm7, %v330_v59, %v332_v18  ;;  %v372_v22 = vpop.xlane.xlu1 %371 }
  0xce   : > { %v349_v8 = vadd.f32 %v333_v2, %v256_v4  ;;  %v405_v21 = vrot.slane %v372_v22, 2  ;;  %v369_v25 = vpop.xlane.xlu0 %368 }
  0xcf   : > { %v403_v23 = vrot.slane %v369_v25, 2 }
  0xd1   : > { %v404_v43 = vsel %vm401_vm8, %v402_v45, %v403_v23  ;;  %v406_v29 = vsel %vm401_vm8, %v403_v23, %v405_v21  ;;  %v378_v30 = vpop.xlane.xlu1 %377 }
  0xd2   : > { %v1238_v44 = vadd.f32 %v404_v43, %v342_v20  ;;  %v1240_v38 = vadd.f32 %v406_v29, %v343_v36  ;;  %v409_v31 = vrot.slane %v378_v30, 2  ;;  %v375_v61 = vpop.xlane.xlu0 %374 }
  0xd3   : > { %v407_v34 = vrot.slane %v375_v61, 2 }
  0xd5   : > { %v408_v57 = vsel %vm401_vm8, %v405_v21, %v407_v34  ;;  %v410_v37 = vsel %vm401_vm8, %v407_v34, %v409_v31  ;;  %v384_v10 = vpop.xlane.xlu1 %383 }
  0xd6   : > { %v1244_v11 = vadd.f32 %v408_v57, %v344_v39  ;;  %v1246_v33 = vadd.f32 %v410_v37, %v345_v55  ;;  %v413_v17 = vrot.slane %v384_v10, 2  ;;  %v381_v40 = vpop.xlane.xlu0 %380 }
  0xd7   : > { %v411_v48 = vrot.slane %v381_v40, 2 }
  0xd9   : > { %v412_v49 = vsel %vm401_vm8, %v409_v31, %v411_v48  ;;  %v414_v50 = vsel %vm401_vm8, %v411_v48, %v413_v17  ;;  %v391_v52 = vpop.xlane.xlu1 %390 }
  0xda   : > { %v1250_v53 = vadd.f32 %v412_v49, %v346_v56  ;;  %v1252_v58 = vadd.f32 %v414_v50, %v347_v12  ;;  %v417_v62 = vrot.slane %v391_v52, 2  ;;  %v387_v4 = vpop.xlane.xlu0 %386 }
  0xdb   : > { %v415_v5 = vrot.slane %v387_v4, 2 }
  0xdd   : > { %v416_v6 = vsel %vm401_vm8, %v413_v17, %v415_v5  ;;  %v418_v7 = vsel %vm401_vm8, %v415_v5, %v417_v62  ;;  %v454_v9 = vpop.xlane.xlu1 %453 }
  0xde   : > { %v1256_v15 = vadd.f32 %v416_v6, %v348_v13  ;;  %v1258_v16 = vadd.f32 %v418_v7, %v349_v8  ;;  %v451_v19 = vpop.xlane.xlu0 %450  ;;  %v488_v0 = vrot.slane %v454_v9, 3 }
  0xdf   : > { %v487_v3 = vrot.slane %v451_v19, 3 }
  0xe1   : > { %v460_v20 = vpop.xlane.xlu1 %459  ;;  %v489_v18 = vsel %vm486_vm9, %v487_v3, %v488_v0 }
  0xe2   : > { %v457_v24 = vpop.xlane.xlu0 %456  ;;  %v492_v12 = vrot.slane %v460_v20, 3  ;;  %v512_v30 = vadd.f32 %v489_v18, %v1238_v44 }
  0xe3   : > { %v490_v1 = vrot.slane %v457_v24, 3 }
  0xe5   : > { %v466_v26 = vpop.xlane.xlu1 %465  ;;  %v491_v2 = vsel %vm486_vm9, %v488_v0, %v490_v1  ;;  %v493_v21 = vsel %vm486_vm9, %v490_v1, %v492_v12 }
  0xe6   : > { %v463_v27 = vpop.xlane.xlu0 %462  ;;  %v496_v22 = vrot.slane %v466_v26, 3  ;;  %v513_v31 = vadd.f32 %v491_v2, %v1240_v38  ;;  %v514_v37 = vadd.f32 %v493_v21, %v1244_v11 }
  0xe7   : > { %v494_v8 = vrot.slane %v463_v27, 3 }
  0xe9   : > { %v1260_v28 = vpop.xlane.xlu1 %471  ;;  %v495_v10 = vsel %vm486_vm9, %v492_v12, %v494_v8  ;;  %v497_v17 = vsel %vm486_vm9, %v494_v8, %v496_v22 }
  0xea   : > { %v469_v32 = vpop.xlane.xlu0 %468  ;;  %v500_v25 = vrot.slane %v1260_v28, 3  ;;  %v515_v5 = vadd.f32 %v495_v10, %v1246_v33  ;;  %v516_v20 = vadd.f32 %v497_v17, %v1250_v53 }
  0xeb   : > { %v498_v45 = vrot.slane %v469_v32, 3 }
  0xed   : > { %v536_v35 = vpop.xlane.xlu1 %535  ;;  %v499_v48 = vsel %vm486_vm9, %v496_v22, %v498_v45  ;;  %v501_v49 = vsel %vm486_vm9, %v498_v45, %v500_v25 }
  0xee   : > { %v476_v36 = vpop.xlane.xlu0 %475  ;;  %v572_v61 = vrot.slane %v536_v35, 4  ;;  %v517_v24 = vadd.f32 %v499_v48, %v1252_v58  ;;  %v518_v26 = vadd.f32 %v501_v49, %v1256_v15 }
  0xef   : > { %v502_v44 = vrot.slane %v476_v36, 3 }
  0xf1   : > { %v542_v39 = vpop.xlane.xlu1 %541  ;;  %v503_v28 = vsel %vm486_vm9, %v500_v25, %v502_v44 }
  0xf2   : > { %v539_v42 = vpop.xlane.xlu0 %538  ;;  %v575_v43 = vrot.slane %v542_v39, 4 }
  0xf3   : > { %v573_v23 = vrot.slane %v539_v42, 4 }
  0xf5   : > { %v1262_v46 = vpop.xlane.xlu1 %547  ;;  %v574_v38 = vsel %vm571_vm10, %v572_v61, %v573_v23  ;;  %v576_v50 = vsel %vm571_vm10, %v573_v23, %v575_v43 }
  0xf6   : > { %v545_v41 = vpop.xlane.xlu0 %544  ;;  %v579_v40 = vrot.slane %v1262_v46, 4  ;;  %v597_v32 = vadd.f32 %v574_v38, %v512_v30  ;;  %v598_v33 = vadd.f32 %v576_v50, %v513_v31  ;;  %v519_v50 = vadd.f32 %v503_v28, %v1258_v16 }
  0xf7   : > { %v577_v34 = vrot.slane %v545_v41, 4 }
  0xf9   : > { %v1264_v47 = vpop.xlane.xlu1 %553  ;;  %v578_v6 = vsel %vm571_vm10, %v575_v43, %v577_v34  ;;  %v580_v27 = vsel %vm571_vm10, %v577_v34, %v579_v40 }
  0xfa   : > { %v1266_v51 = vpop.xlane.xlu0 %550  ;;  %v583_v7 = vrot.slane %v1264_v47, 4  ;;  %v599_v36 = vadd.f32 %v578_v6, %v514_v37  ;;  %v600_v41 = vadd.f32 %v580_v27, %v515_v5 }
  0xfb   : > { %v581_v9 = vrot.slane %v1266_v51, 4 }
  0xfd   : > { %v1268_v54 = vpop.xlane.xlu1 %560  ;;  %v582_v58 = vsel %vm571_vm10, %v579_v40, %v581_v9  ;;  %v584_v15 = vsel %vm571_vm10, %v581_v9, %v583_v7 }
  0xfe   : > { %v1270_v55 = vpop.xlane.xlu0 %556  ;;  %v602_v40 = vadd.f32 %v584_v15, %v517_v24 }
 0x101   : > { %v624_v56 = vpop.xlane.xlu1 %623 }
 0x102   : > { %v621_v59 = vpop.xlane.xlu0 %620  ;;  %v657_v52 = vrot.slane %v624_v56, 5  ;;  %v585_v56 = vrot.slane %v1270_v55, 4  ;;  %v587_v55 = vrot.slane %v1268_v54, 4 }
 0x103   : > { %v656_v62 = vrot.slane %v621_v59, 5 }
 0x104   : > { %v586_v23 = vsel %vm571_vm10, %v583_v7, %v585_v56 }
 0x105   : > { %v1272_v60 = vpop.xlane.xlu1 %629  ;;  %v658_v39 = vsel %vm192_vm0, %v656_v62, %v657_v52 }
 0x106   : > { %v1274_v63 = vpop.xlane.xlu0 %626  ;;  %v661_v35 = vrot.slane %v1272_v60, 5  ;;  %v681_v0 = vadd.f32 %v658_v39, %v597_v32 }
 0x107   : > { %v659_v4 = vrot.slane %v1274_v63, 5 }
 0x109   : > { %v1276_v13 = vpop.xlane.xlu1 %635  ;;  %v660_v42 = vsel %vm192_vm0, %v657_v52, %v659_v4  ;;  %v662_v3 = vsel %vm192_vm0, %v659_v4, %v661_v35  ;;  %v603_v52 = vadd.f32 %v586_v23, %v518_v26 }
 0x10a   : > { %v1278_v14 = vpop.xlane.xlu0 %632  ;;  %v665_v59 = vrot.slane %v1276_v13, 5  ;;  %v682_v1 = vadd.f32 %v660_v42, %v598_v33  ;;  %v683_v43 = vadd.f32 %v662_v3, %v599_v36 }
 0x10b   : > { %v663_v46 = vrot.slane %v1278_v14, 5  ;;  %v601_v14 = vadd.f32 %v582_v58, %v516_v20 }
 0x10d   : > { %v1284_v29 = vpop.xlane.xlu1 %641  ;;  %v664_v18 = vsel %vm192_vm0, %v661_v35, %v663_v46  ;;  %v666_v30 = vsel %vm192_vm0, %v663_v46, %v665_v59 }
 0x10e   : > { %v1288_v57 = vpop.xlane.xlu0 %638  ;;  %v684_v61 = vadd.f32 %v664_v18, %v600_v41  ;;  %v669_v34 = vrot.slane %v1284_v29, 5  ;;  %v588_v29 = vsel %vm571_vm10, %v585_v56, %v587_v55  ;;  %v685_v4 = vadd.f32 %v666_v30, %v601_v14 }
 0x10f   : > { %v667_v12 = vrot.slane %v1288_v57, 5  ;;  %v604_v20 = vadd.f32 %v588_v29, %v519_v50 }
 0x111   : > { %v705_v11 = vpop.xlane.xlu1 %704  ;;  %v668_v57 = vsel %vm192_vm0, %v665_v59, %v667_v12 }
 0x112   : > { %v1303_v19 = vpop.xlane.xlu0 %645  ;;  %v741_v60 = vrot.slane %v705_v11, 6  ;;  %v670_v11 = vsel %vm192_vm0, %v667_v12, %v669_v34  ;;  %v686_v5 = vadd.f32 %v668_v57, %v602_v40 }
 0x113   : > { %v671_v37 = vrot.slane %v1303_v19, 5  ;;  %v687_v32 = vadd.f32 %v670_v11, %v603_v52 }
 0x115   : > { %v711_v53 = vpop.xlane.xlu1 %710  ;;  %v672_v6 = vsel %vm192_vm0, %v669_v34, %v671_v37  ;;  %vm782_vm0 = vcmask 7168  }
 0x116   : > { %v744_v47 = vrot.slane %v711_v53, 6  ;;  %v708_v51 = vpop.xlane.xlu0 %707  ;;  %v688_v33 = vadd.f32 %v672_v6, %v604_v20 }
 0x117   : > { %v742_v63 = vrot.slane %v708_v51, 6 }
 0x119   : > { %v743_v2 = vsel %vm740_vm11, %v741_v60, %v742_v63  ;;  %v745_v22 = vsel %vm740_vm11, %v742_v63, %v744_v47  ;;  %v717_v8 = vpop.xlane.xlu1 %716 }
 0x11a   : > { %v766_v21 = vadd.f32 %v743_v2, %v681_v0  ;;  %v767_v13 = vadd.f32 %v745_v22, %v682_v1  ;;  %v748_v25 = vrot.slane %v717_v8, 6  ;;  %v714_v45 = vpop.xlane.xlu0 %713 }
 0x11b   : > { %v746_v31 = vrot.slane %v714_v45, 6 }
 0x11c   : > { %867 = vtanh.f32 %v766_v21 }
 0x11d   : > { %869 = vtanh.f32 %v767_v13  ;;  %v747_v54 = vsel %vm740_vm11, %v744_v47, %v746_v31  ;;  %v749_v10 = vsel %vm740_vm11, %v746_v31, %v748_v25  ;;  %v723_v17 = vpop.xlane.xlu1 %722 }
 0x11e   : > { %v768_v48 = vadd.f32 %v747_v54, %v683_v43  ;;  %v769_v49 = vadd.f32 %v749_v10, %v684_v61  ;;  %v752_v44 = vrot.slane %v723_v17, 6  ;;  %v720_v38 = vpop.xlane.xlu0 %719 }
 0x11f   : > { %v750_v62 = vrot.slane %v720_v38, 6 }
 0x120   : > { %871 = vtanh.f32 %v768_v48 }
 0x121   : > { %873 = vtanh.f32 %v769_v49  ;;  %v751_v7 = vsel %vm740_vm11, %v748_v25, %v750_v62  ;;  %v753_v9 = vsel %vm740_vm11, %v750_v62, %v752_v44  ;;  %v730_v19 = vpop.xlane.xlu1 %729 }
 0x122   : > { %v770_v16 = vadd.f32 %v751_v7, %v685_v4  ;;  %v771_v24 = vadd.f32 %v753_v9, %v686_v5  ;;  %v756_v27 = vrot.slane %v730_v19, 6  ;;  %v726_v26 = vpop.xlane.xlu0 %725 }
 0x123   : > { %v754_v28 = vrot.slane %v726_v26, 6 }
 0x124   : > { %875 = vtanh.f32 %v770_v16 }
 0x125   : > { %877 = vtanh.f32 %v771_v24  ;;  %v755_v35 = vsel %vm740_vm11, %v752_v44, %v754_v28  ;;  %v757_v36 = vsel %vm740_vm11, %v754_v28, %v756_v27 }
 0x126   : > { %v868_v39 = vpop.eup %867  ;;  %v772_v42 = vadd.f32 %v755_v35, %v687_v32  ;;  %v773_v46 = vadd.f32 %v757_v36, %v688_v33 }
 0x127   : > { %v870_v53 = vpop.eup %869  ;;  %783 = vst.msk [vmem:[%s143_s19] sm:$0xff] %vm782_vm0, %v868_v39 }
 0x128   : > { %784 = vst.msk [vmem:[%s143_s19 + $0x8] sm:$0xff] %vm782_vm0, %v870_v53  ;;  %879 = vtanh.f32 %v772_v42 }
 0x129   : > { %881 = vtanh.f32 %v773_v46 }
 0x12a   : > { %v872_v41 = vpop.eup %871 }
 0x12b   : > { %v874_v58 = vpop.eup %873  ;;  %785 = vst.msk [vmem:[%s143_s19 + $0x10] sm:$0xff] %vm782_vm0, %v872_v41 }
 0x12c   : > { %786 = vst.msk [vmem:[%s143_s19 + $0x18] sm:$0xff] %vm782_vm0, %v874_v58 }
 0x12e   : > { %v876_v15 = vpop.eup %875 }
 0x12f   : > { %v878_v47 = vpop.eup %877  ;;  %787 = vst.msk [vmem:[%s143_s19 + $0x20] sm:$0xff] %vm782_vm0, %v876_v15 }
 0x130   : > { %788 = vst.msk [vmem:[%s143_s19 + $0x28] sm:$0xff] %vm782_vm0, %v878_v47 }
 0x132   : > { %v880_v51 = vpop.eup %879 }
 0x133   : > { %v882_v56 = vpop.eup %881  ;;  %789 = vst.msk [vmem:[%s143_s19 + $0x30] sm:$0xff] %vm782_vm0, %v880_v51 }
 0x134   : > { %790 = vst.msk [vmem:[%s143_s19 + $0x38] sm:$0xff] %vm782_vm0, %v882_v56 }
 0x135 PF: > { %s12_s9 = sadd.s32 1, %s889_s9  }
 0x136   : > { %p9_p4 = scmp.ge.s32.totalorder %s12_s9, 4  }
 0x138   :  { %11 = sbr.rel (!%p9_p4) target bundleno = 1 (0x1), region = 58 }

// kernel: _lambda_.22
= control target key start
LH: loop header
LB: loop body
LE: loop exit
PB: predicated region body
PF: predicated region fallthrough
CT: control target
= control target key end

     0   :  { %s3368_s18 = smov 0   ;;  %s3916_s0 = inlined_call_operand.vmem [shape: f32[2,64,8], index: 0, kind: input, shape index: {}]   ;;  %s3917_s1 = inlined_call_operand.vmem [shape: bf16[10,8,8], index: 1, kind: input, shape index: {}]   ;;  %s3918_s2 = inlined_call_operand.vmem [shape: f32[2,8], index: 2, kind: input, shape index: {}]   ;;  %s3919_s3 = inlined_call_operand.vmem [shape: bf16[10,8,8], index: 3, kind: input, shape index: {}]   ;;  %s3920_s4 = inlined_call_operand.vmem [shape: f32[2,8], index: 4, kind: input, shape index: {}]   ;;  %s3921_s5 = inlined_call_operand.vmem [shape: f32[2,64,8], index: 5, kind: output, shape index: {}]  }
   0x1 LB: > { %s2727_s19 = sadd.s32 4294967295, %s3334_s18   ;;  %p2731_p0 = scmp.ge.s32.totalorder %s3334_s18, 1  ;;  %s3334_s18 = sphi %s3368_s18, %s15_s18  }
   0x2   : > { %p187_p1 = scmp.lt.s32.totalorder %s3334_s18, 3 }
   0x4   : > { %p188_p2 = pnand %p2731_p0, %p187_p1 }
   0x5   : > { %v295_v0 = vld [vmem:[%s3917_s1] sm:$0xf] (!%p188_p2)  ;;  %vm313_vm0 = vcmask (!%p188_p2), 1043456   ;;  %p215_p3 = scmp.lt.s32.totalorder (!%p188_p2), %s2727_s19, 1  ;;  %v2740_v2 = vld [vmem:[%s3917_s1 + $0x4] sm:$0xf] (!%p188_p2) }
   0x6   : > { %191 = sbr.rel (%p188_p2) target bundleno = 1197 (0x4ad), region = 40  ;;  %3298 = vmatprep.subr.msk.bf16.mxu0 (!%p188_p2), %vm313_vm0, %v295_v0  ;;  %v315_v1 = vsel (!%p188_p2), %vm313_vm0, %v295_v0, 0  ;;  %vm268_vm1 = vcmask (!%p188_p2), 1041408   ;;  %vm300_vm2 = vcmask (!%p188_p2), 64512   ;;  %v443_v6 = vsel (!%p188_p2), %vm313_vm0, %v2740_v2, 0 }
   0x7   : > { %2939 = vmatpush3.bf16.msra.mxu0 (!%p188_p2), %v315_v1  ;;  %v2745_v41 = vld [vmem:[%s3917_s1 + $0x8] sm:$0xf] (!%p188_p2)  ;;  %vm397_vm11 = vsmask.f32 (!%p188_p2), 7424  ;;  %vm525_vm12 = vcmask (!%p188_p2), 1046528   ;;  %vm737_vm14 = vcmask (!%p188_p2), 1045504  }
   0x8   : > { %3299 = vmatprep.subr.msk.bf16.mxu0 (!%p188_p2), %vm313_vm0, %v2740_v2  ;;  %vm625_vm13 = vsmask.f32 (!%p188_p2), 6400 }
   0xd   : > { %s3923_s19 = smov (!%p215_p3, %s2727_s19), 1 }
   0xe   : > { %s2836_s24 = sshll.u32 %s3923_s19, 6 }
   0xf   : > { %s219_s27 = scalar_lea.vmem %s3916_s0, %s2836_s24  ;;  %s224_s26 = scalar_lea.vmem %s3921_s5, %s2836_s24 }
  0x10   : > { %v3393_v3 = vld [vmem:[%s219_s27] sm:$0xff]  ;;  %v3395_v4 = vld [vmem:[%s219_s27 + $0x8] sm:$0xff]  ;;  %v3397_v5 = vld [vmem:[%s219_s27 + $0x10] sm:$0xff] }
  0x11   : > { %vm236_vm3 = vcmp.ge.f32.partialorder %v3393_v3, 0.0  ;;  %vm237_vm4 = vcmp.ge.f32.partialorder %v3395_v4, 0.0  ;;  %v244_v7 = vmul.f32 0.1, %v3393_v3  ;;  %v245_v8 = vmul.f32 0.1, %v3395_v4 }
  0x12   : > { %v3404_v9 = vld [vmem:[%s219_s27 + $0x18] sm:$0xff]  ;;  %vm238_vm5 = vcmp.ge.f32.partialorder %v3397_v5, 0.0  ;;  %v246_v10 = vmul.f32 0.1, %v3397_v5  ;;  %v3408_v11 = vld [vmem:[%s219_s27 + $0x20] sm:$0xff]  ;;  %v3410_v12 = vld [vmem:[%s219_s27 + $0x28] sm:$0xff] }
  0x13   : > { %v252_v13 = vsel %vm236_vm3, %v3393_v3, %v244_v7  ;;  %v253_v14 = vsel %vm237_vm4, %v3395_v4, %v245_v8  ;;  %vm239_vm6 = vcmp.ge.f32.partialorder %v3404_v9, 0.0  ;;  %v247_v15 = vmul.f32 0.1, %v3404_v9  ;;  %v3418_v19 = vld [vmem:[%s219_s27 + $0x30] sm:$0xff]  ;;  %v3423_v23 = vld [vmem:[%s219_s27 + $0x38] sm:$0xff] }
  0x14   : > { %v269_v16 = vrot.slane %v252_v13, 6  ;;  %v270_v17 = vrot.slane %v253_v14, 6  ;;  %v254_v18 = vsel %vm238_vm5, %v3397_v5, %v246_v10  ;;  %vm240_vm7 = vcmp.ge.f32.partialorder %v3408_v11, 0.0  ;;  %v2750_v13 = vld [vmem:[%s3917_s1 + $0xc] sm:$0xf] }
  0x15   : > { %v255_v20 = vsel %vm239_vm6, %v3404_v9, %v247_v15  ;;  %v272_v21 = vrot.slane %v254_v18, 6  ;;  %vm241_vm8 = vcmp.ge.f32.partialorder %v3410_v12, 0.0  ;;  %v248_v22 = vmul.f32 0.1, %v3408_v11 }
  0x16   : > { %v271_v24 = vsel %vm268_vm1, %v269_v16, %v270_v17  ;;  %v293_v25 = vsel %vm268_vm1, 0.0, %v269_v16  ;;  %v274_v26 = vrot.slane %v255_v20, 6  ;;  %v249_v27 = vmul.f32 0.1, %v3410_v12 }
  0x17   : > { %v3428_v28 = vpack.c.bf16 %v271_v24, %v293_v25  ;;  %v273_v29 = vsel %vm268_vm1, %v270_v17, %v272_v21  ;;  %v256_v30 = vsel %vm240_vm7, %v3408_v11, %v248_v22  ;;  %vm242_vm9 = vcmp.ge.f32.partialorder %v3418_v19, 0.0 }
  0x18   : > { %v275_v31 = vsel %vm268_vm1, %v272_v21, %v274_v26  ;;  %v257_v32 = vsel %vm241_vm8, %v3410_v12, %v249_v27  ;;  %v276_v33 = vrot.slane %v256_v30, 6  ;;  %vm243_vm10 = vcmp.ge.f32.partialorder %v3423_v23, 0.0 }
  0x19   : > { %2940 = vmatprep.mubr.msk.bf16.mxu0 %vm300_vm2, %v3428_v28  ;;  %v3438_v34 = vpack.c.bf16 %v275_v31, %v273_v29  ;;  %v278_v35 = vrot.slane %v257_v32, 6  ;;  %v250_v36 = vmul.f32 0.1, %v3418_v19  ;;  %v251_v37 = vmul.f32 0.1, %v3423_v23 }
  0x1a   : > { %v277_v38 = vsel %vm268_vm1, %v274_v26, %v276_v33  ;;  %v398_v39 = vshrl.u32 %v3428_v28, 16  ;;  %v400_v40 = vshll.u32 %v3428_v28, 16  ;;  %v548_v8 = vsel %vm313_vm0, %v2745_v41, 0  ;;  %v2755_v32 = vld [vmem:[%s3917_s1 + $0x10] sm:$0xf] }
  0x1b   : > { %2941 = vmatmul.mubr.msk.bf16.vlgmr.msra.gmra.mrb[0].mxu0 %vm300_vm2, %v3438_v34  ;;  %v279_v42 = vsel %vm268_vm1, %v276_v33, %v278_v35  ;;  %v258_v43 = vsel %vm242_vm9, %v3418_v19, %v250_v36  ;;  %v259_v44 = vsel %vm243_vm10, %v3423_v23, %v251_v37  ;;  %v404_v45 = vshll.u32 %v3438_v34, 16 }
  0x1c   : > { %2949 = vmatpush3.bf16.msra.mxu0 %v443_v6  ;;  %v3456_v46 = vpack.c.bf16 %v279_v42, %v277_v38  ;;  %v280_v47 = vrot.slane %v258_v43, 6  ;;  %v282_v48 = vrot.slane %v259_v44, 6  ;;  %v402_v49 = vrot.slane %v400_v40, 1 }
  0x1d   : > { %v406_v50 = vrot.slane %v404_v45, 1  ;;  %3300 = vmatprep.subr.msk.bf16.mxu0 %vm313_vm0, %v2745_v41  ;;  %v408_v56 = vshrl.u32 %v3438_v34, 16  ;;  %v526_v16 = vrot.slane %v3428_v28, 1  ;;  %v527_v17 = vrot.slane %v3438_v34, 1 }
  0x1e   : > { %2944 = vmatprep.mubr.msk.bf16.mxu0 %vm300_vm2, %v3456_v46  ;;  %v281_v51 = vsel %vm268_vm1, %v278_v35, %v280_v47  ;;  %v283_v52 = vsel %vm268_vm1, %v280_v47, %v282_v48  ;;  %v403_v53 = vor.u32 %v402_v49, %v398_v39  ;;  %v411_v55 = vshll.u32 %v3456_v46, 16 }
  0x1f   : > { %v3463_v54 = vpack.c.bf16 %v283_v52, %v281_v51  ;;  %v415_v58 = vshrl.u32 %v3456_v46, 16  ;;  %v294_v60 = vsel %vm268_vm1, %v282_v48, 0.0  ;;  %v410_v62 = vor.u32 %v408_v56, %v406_v50 }
  0x20   : > { %v407_v57 = vsel %vm397_vm11, %v403_v53, %v406_v50  ;;  %v413_v61 = vrot.slane %v411_v55, 1  ;;  %v3474_v63 = vpack.c.bf16 %v294_v60, %v294_v60  ;;  %v528_v20 = vsel %vm525_vm12, %v526_v16, %v527_v17 }
  0x21   : > { %v418_v59 = vshll.u32 %v3463_v54, 16  ;;  %v422_v6 = vshrl.u32 %v3463_v54, 16  ;;  %v529_v21 = vrot.slane %v3456_v46, 1  ;;  %v531_v22 = vrot.slane %v3463_v54, 1 }
  0x22   : > { %v417_v0 = vor.u32 %v415_v58, %v413_v61  ;;  %v414_v2 = vsel %vm397_vm11, %v410_v62, %v413_v61  ;;  %v426_v7 = vshll.u32 %v3474_v63, 16  ;;  %v660_v25 = vsel %vm313_vm0, %v2750_v13, 0  ;;  %v2764_v62 = vld [vmem:[%s3919_s3 + $0x4] sm:$0xf] }
  0x23   : > { %2945 = vmatmul.mubr.msk.bf16.gmra.mrb[4].mxu0 %vm300_vm2, %v3463_v54  ;;  %v420_v1 = vrot.slane %v418_v59, 1  ;;  %v530_v24 = vsel %vm525_vm12, %v527_v17, %v529_v21  ;;  %v626_v26 = vrot.slane %v398_v39, 1  ;;  %v532_v27 = vsel %vm525_vm12, %v529_v21, %v531_v22 }
  0x24   : > { %2950 = vmatprep.mubr.msk.bf16.mxu0 %vm300_vm2, %v407_v57  ;;  %v428_v15 = vrot.slane %v426_v7, 1  ;;  %v627_v29 = vrot.slane %v400_v40, 2  ;;  %v629_v30 = vrot.slane %v408_v56, 1  ;;  %v630_v31 = vrot.slane %v404_v45, 2 }
  0x25   : > { %v421_v10 = vsel %vm397_vm11, %v417_v0, %v420_v1  ;;  %v424_v14 = vor.u32 %v422_v6, %v420_v1  ;;  %v533_v33 = vrot.slane %v3474_v63, 1  ;;  %v633_v37 = vrot.slane %v415_v58, 1 }
  0x26   : > { %v628_v35 = vor.u32 %v627_v29, %v626_v26  ;;  %v631_v36 = vor.u32 %v630_v31, %v629_v30  ;;  %v634_v39 = vrot.slane %v411_v55, 2  ;;  %v637_v41 = vrot.slane %v422_v6, 1 }
  0x27   : > { %v429_v18 = vsel %vm397_vm11, %v424_v14, %v428_v15  ;;  %v534_v38 = vsel %vm525_vm12, %v531_v22, %v533_v33  ;;  %v638_v42 = vrot.slane %v418_v59, 2  ;;  %v641_v44 = vshrl.u32 %v3474_v63, 16 }
  0x28   : > { %v632_v40 = vsel %vm625_vm13, %v628_v35, %v631_v36  ;;  %v635_v43 = vor.u32 %v634_v39, %v633_v37  ;;  %v644_v49 = vrot.slane %v426_v7, 2  ;;  %v760_v50 = vsel %vm313_vm0, %v2755_v32, 0 }
  0x29   : > { %v639_v45 = vor.u32 %v638_v42, %v637_v41  ;;  %v643_v48 = vrot.slane %v641_v44, 1  ;;  %v738_v53 = vrot.slane %v3428_v28, 2  ;;  %v739_v55 = vrot.slane %v3438_v34, 2  ;;  %v2769_v42 = vld [vmem:[%s3919_s3 + $0x8] sm:$0xf] }
  0x2a   : > { %v636_v47 = vsel %vm625_vm13, %v631_v36, %v635_v43  ;;  %v741_v58 = vrot.slane %v3456_v46, 2  ;;  %v743_v59 = vrot.slane %v3463_v54, 2  ;;  %v745_v28 = vrot.slane %v3474_v63, 2  ;;  %v893_v46 = vld [vmem:[%s3919_s3] sm:$0xf] }
  0x2b   : > { %2951 = vmatmul.mubr.msk.bf16.vlgmr.msra.gmra.mrb[0].mxu0 %vm300_vm2, %v414_v2  ;;  %v640_v51 = vsel %vm625_vm13, %v635_v43, %v639_v45  ;;  %v645_v52 = vor.u32 %v644_v49, %v643_v48  ;;  %v740_v57 = vsel %vm737_vm14, %v738_v53, %v739_v55  ;;  %3303 = vmatprep.subr.msk.bf16.mxu1 %vm313_vm0, %v893_v46  ;;  %v911_v54 = vsel %vm313_vm0, %v893_v46, 0  ;;  %v3545_v2 = vld [vmem:[%s3918_s2] sm:$0x3] }
  0x2c   : > { %2959 = vmatpush3.bf16.msra.mxu0 %v548_v8  ;;  %2954 = vmatprep.mubr.msk.bf16.mxu0 %vm300_vm2, %v421_v10  ;;  %v742_v60 = vsel %vm737_vm14, %v739_v55, %v741_v58  ;;  %v744_v61 = vsel %vm737_vm14, %v741_v58, %v743_v59  ;;  %v746_v34 = vsel %vm737_vm14, %v743_v59, %v745_v28  ;;  %v382_v63 = vlaneseq }
  0x2d   : > { %3301 = vmatprep.subr.msk.bf16.mxu0 %vm313_vm0, %v2750_v13  ;;  %v646_v56 = vsel %vm625_vm13, %v639_v45, %v645_v52  ;;  %2989 = vmatpush3.bf16.msra.mxu1 %v911_v54  ;;  %v1038_v41 = vsel %vm313_vm0, %v2764_v62, 0  ;;  %v3563_v55 = vsel %vm313_vm0, %v2769_v42, 0 }
  0x2e   : > { %3304 = vmatprep.subr.msk.bf16.mxu1 %vm313_vm0, %v2764_v62  ;;  %v3539_v0 = vshrl.u32 %v382_v63, 7 }
  0x30   : > { %v384_v1 = vsub.s32 0, %v3539_v0 }
  0x32   : > { %v385_v6 = vrot.slane %v3545_v2, %v384_v1 }
  0x33   : > { %2955 = vmatmul.mubr.msk.bf16.gmra.mrb[4].mxu0 %vm300_vm2, %v429_v18 }
  0x34   : > { %2960 = vmatprep.mubr.msk.bf16.mxu0 %vm300_vm2, %v528_v20 }
  0x3b   : > { %2961 = vmatmul.mubr.msk.bf16.vlgmr.msra.gmra.mrb[0].mxu0 %vm300_vm2, %v530_v24 }
  0x3c   : > { %2969 = vmatpush3.bf16.msra.mxu0 %v660_v25  ;;  %2964 = vmatprep.mubr.msk.bf16.mxu0 %vm300_vm2, %v532_v27 }
  0x3d   : > { %3302 = vmatprep.subr.msk.bf16.mxu0 %vm313_vm0, %v2755_v32 }
  0x43   : > { %2965 = vmatmul.mubr.msk.bf16.gmra.mrb[4].mxu0 %vm300_vm2, %v534_v38 }
  0x44   : > { %2970 = vmatprep.mubr.msk.bf16.mxu0 %vm300_vm2, %v632_v40 }
  0x4b   : > { %2971 = vmatmul.mubr.msk.bf16.vlgmr.msra.gmra.mrb[0].mxu0 %vm300_vm2, %v636_v47 }
  0x4c   : > { %2979 = vmatpush3.bf16.msra.mxu0 %v760_v50  ;;  %2974 = vmatprep.mubr.msk.bf16.mxu0 %vm300_vm2, %v640_v51 }
  0x53   : > { %2975 = vmatmul.mubr.msk.bf16.gmra.mrb[4].mxu0 %vm300_vm2, %v646_v56 }
  0x54   : > { %2980 = vmatprep.mubr.msk.bf16.mxu0 %vm300_vm2, %v740_v57 }
  0x5b   : > { %2981 = vmatmul.mubr.msk.bf16.vlgmr.msra.gmra.mrb[0].mxu0 %vm300_vm2, %v742_v60 }
  0x5c   : > { %2984 = vmatprep.mubr.msk.bf16.mxu0 %vm300_vm2, %v744_v61 }
  0x63   : > { %2985 = vmatmul.mubr.msk.bf16.gmra.mrb[4].mxu0 %vm300_vm2, %v746_v34 }
 0x12e   : > { %v2982_v7 = vpop.f32.mrb[0].mxu0 }
 0x12f   : > { %v3138_v8 = vadd.f32 %v2982_v7, %v385_v6  ;;  %v796_v10 = vpop.f32.mrb[1].mxu0 }
 0x130   : > { %v3139_v13 = vadd.f32 %v796_v10, %v385_v6  ;;  %v2983_v14 = vpop.f32.mrb[2].mxu0 }
 0x131   : > { %vm837_vm15 = vcmp.ge.f32.partialorder %v3138_v8, 0.0  ;;  %v845_v15 = vmul.f32 0.1, %v3138_v8  ;;  %v3140_v16 = vadd.f32 %v2983_v14, %v385_v6  ;;  %v799_v17 = vpop.f32.mrb[3].mxu0 }
 0x132   : > { %vm835_vm3 = vcmp.ge.f32.partialorder %v3139_v13, 0.0  ;;  %v843_v18 = vmul.f32 0.1, %v3139_v13  ;;  %v3141_v20 = vadd.f32 %v799_v17, %v385_v6 }
 0x133   : > { %v853_v21 = vsel %vm837_vm15, %v3138_v8, %v845_v15  ;;  %vm838_vm4 = vcmp.ge.f32.partialorder %v3140_v16, 0.0  ;;  %v846_v22 = vmul.f32 0.1, %v3140_v16 }
 0x134   : > { %v851_v24 = vsel %vm835_vm3, %v3139_v13, %v843_v18  ;;  %vm836_vm5 = vcmp.ge.f32.partialorder %v3141_v20, 0.0  ;;  %v844_v25 = vmul.f32 0.1, %v3141_v20  ;;  %v870_v29 = vrot.slane %v853_v21, 6 }
 0x135   : > { %v867_v26 = vrot.slane %v851_v24, 6  ;;  %v854_v27 = vsel %vm838_vm4, %v3140_v16, %v846_v22 }
 0x136   : > { %v872_v30 = vrot.slane %v854_v27, 6  ;;  %v852_v31 = vsel %vm836_vm5, %v3141_v20, %v844_v25  ;;  %v2986_v32 = vpop.f32.mrb[4].mxu0 }
 0x137   : > { %v868_v33 = vrot.slane %v852_v31, 6  ;;  %v3142_v35 = vadd.f32 %v2986_v32, %v385_v6  ;;  %v812_v36 = vpop.f32.mrb[5].mxu0  ;;  %v891_v37 = vsel %vm268_vm1, 0.0, %v867_v26 }
 0x138   : > { %v873_v38 = vsel %vm268_vm1, %v870_v29, %v872_v30  ;;  %v3143_v39 = vadd.f32 %v812_v36, %v385_v6  ;;  %v2987_v40 = vpop.f32.mrb[6].mxu0 }
 0x139   : > { %v869_v43 = vsel %vm268_vm1, %v867_v26, %v868_v33  ;;  %v871_v44 = vsel %vm268_vm1, %v868_v33, %v870_v29  ;;  %vm841_vm6 = vcmp.ge.f32.partialorder %v3142_v35, 0.0  ;;  %v849_v45 = vmul.f32 0.1, %v3142_v35  ;;  %v815_v47 = vpop.f32.mrb[7].mxu0 }
 0x13a   : > { %v3558_v48 = vpack.c.bf16 %v869_v43, %v891_v37  ;;  %v3560_v49 = vpack.c.bf16 %v873_v38, %v871_v44  ;;  %vm839_vm7 = vcmp.ge.f32.partialorder %v3143_v39, 0.0  ;;  %v847_v50 = vmul.f32 0.1, %v3143_v39 }
 0x13b   : > { %v857_v51 = vsel %vm841_vm6, %v3142_v35, %v849_v45  ;;  %v3144_v52 = vadd.f32 %v2987_v40, %v385_v6  ;;  %v3145_v53 = vadd.f32 %v815_v47, %v385_v6 }
 0x13c   : > { %v878_v56 = vrot.slane %v857_v51, 6  ;;  %v855_v57 = vsel %vm839_vm7, %v3143_v39, %v847_v50  ;;  %2990 = vmatprep.mubr.msk.bf16.mxu1 %vm300_vm2, %v3558_v48  ;;  %v993_v58 = vshrl.u32 %v3558_v48, 16  ;;  %v995_v59 = vshll.u32 %v3558_v48, 16 }
 0x13d   : > { %v874_v60 = vrot.slane %v855_v57, 6  ;;  %vm842_vm8 = vcmp.ge.f32.partialorder %v3144_v52, 0.0  ;;  %v850_v61 = vmul.f32 0.1, %v3144_v52  ;;  %vm840_vm9 = vcmp.ge.f32.partialorder %v3145_v53, 0.0  ;;  %2991 = vmatmul.mubr.msk.bf16.vlgmr.msra.gmra.mrb[0].mxu1 %vm300_vm2, %v3560_v49 }
 0x13e   : > { %v848_v28 = vmul.f32 0.1, %v3145_v53  ;;  %2999 = vmatpush3.bf16.msra.mxu1 %v1038_v41  ;;  %v997_v34 = vrot.slane %v995_v59, 1  ;;  %v999_v46 = vshll.u32 %v3560_v49, 16  ;;  %v1003_v54 = vshrl.u32 %v3560_v49, 16 }
 0x13f   : > { %v875_v62 = vsel %vm268_vm1, %v872_v30, %v874_v60  ;;  %v858_v63 = vsel %vm842_vm8, %v3144_v52, %v850_v61  ;;  %3305 = vmatprep.subr.msk.bf16.mxu1 %vm313_vm0, %v2769_v42  ;;  %v1120_v6 = vrot.slane %v3558_v48, 1  ;;  %v1121_v7 = vrot.slane %v3560_v49, 1 }
 0x140   : > { %v880_v8 = vrot.slane %v858_v63, 6  ;;  %v856_v10 = vsel %vm840_vm9, %v3145_v53, %v848_v28  ;;  %v998_v13 = vor.u32 %v997_v34, %v993_v58  ;;  %v1001_v14 = vrot.slane %v999_v46, 1 }
 0x141   : > { %v876_v15 = vrot.slane %v856_v10, 6  ;;  %v3578_v16 = vsel %vm525_vm12, %v1120_v6, %v1121_v7  ;;  %v1219_v17 = vrot.slane %v993_v58, 1  ;;  %v1220_v18 = vrot.slane %v995_v59, 2 }
 0x142   : > { %v881_v20 = vsel %vm268_vm1, %v878_v56, %v880_v8  ;;  %v892_v21 = vsel %vm268_vm1, %v880_v8, 0.0  ;;  %v1002_v22 = vsel %vm397_vm11, %v998_v13, %v1001_v14  ;;  %v1005_v24 = vor.u32 %v1003_v54, %v1001_v14 }
 0x143   : > { %v992_v25 = vpack.c.bf16 %v892_v21, %v892_v21  ;;  %v877_v26 = vsel %vm268_vm1, %v874_v60, %v876_v15  ;;  %v879_v27 = vsel %vm268_vm1, %v876_v15, %v878_v56  ;;  %v1221_v29 = vor.u32 %v1220_v18, %v1219_v17  ;;  %v2774_v17 = vld [vmem:[%s3919_s3 + $0xc] sm:$0xf] }
 0x144   : > { %v896_v30 = vpack.c.bf16 %v877_v26, %v875_v62  ;;  %v897_v31 = vpack.c.bf16 %v881_v20, %v879_v27  ;;  %v1222_v32 = vrot.slane %v1003_v54, 1  ;;  %v1223_v33 = vrot.slane %v999_v46, 2  ;;  %v2779_v27 = vld [vmem:[%s3919_s3 + $0x10] sm:$0xf] }
 0x145   : > { %v1021_v35 = vshll.u32 %v992_v25, 16  ;;  %v1127_v36 = vrot.slane %v992_v25, 1  ;;  %v1234_v37 = vshrl.u32 %v992_v25, 16  ;;  %v1330_v38 = vrot.slane %v3558_v48, 2 }
 0x146   : > { %2994 = vmatprep.mubr.msk.bf16.mxu1 %vm300_vm2, %v896_v30  ;;  %v1006_v39 = vshll.u32 %v896_v30, 16  ;;  %v1010_v40 = vshrl.u32 %v896_v30, 16  ;;  %v1013_v41 = vshll.u32 %v897_v31, 16  ;;  %v1017_v42 = vshrl.u32 %v897_v31, 16 }
 0x147   : > { %2995 = vmatmul.mubr.msk.bf16.gmra.mrb[4].mxu1 %vm300_vm2, %v897_v31  ;;  %v1023_v43 = vrot.slane %v1021_v35, 1  ;;  %v1123_v44 = vrot.slane %v896_v30, 1  ;;  %v1125_v45 = vrot.slane %v897_v31, 1  ;;  %v1224_v47 = vor.u32 %v1223_v33, %v1222_v32  ;;  %v3651_v33 = vld [vmem:[%s3920_s4] sm:$0x3] }
 0x148   : > { %3000 = vmatprep.mubr.msk.bf16.mxu1 %vm300_vm2, %v1002_v22  ;;  %v1008_v50 = vrot.slane %v1006_v39, 1  ;;  %v1015_v51 = vrot.slane %v1013_v41, 1  ;;  %v1226_v52 = vrot.slane %v1010_v40, 1  ;;  %v1227_v53 = vrot.slane %v1006_v39, 2 }
 0x149   : > { %v1124_v48 = vsel %vm525_vm12, %v1121_v7, %v1123_v44  ;;  %v1126_v56 = vsel %vm525_vm12, %v1123_v44, %v1125_v45  ;;  %v1128_v57 = vsel %vm525_vm12, %v1125_v45, %v1127_v36  ;;  %v1225_v58 = vsel %vm625_vm13, %v1221_v29, %v1224_v47 }
 0x14a   : > { %v1009_v59 = vsel %vm397_vm11, %v1005_v24, %v1008_v50  ;;  %v1012_v60 = vor.u32 %v1010_v40, %v1008_v50  ;;  %v1019_v61 = vor.u32 %v1017_v42, %v1015_v51  ;;  %v1228_v28 = vor.u32 %v1227_v53, %v1226_v52 }
 0x14b   : > { %v1230_v34 = vrot.slane %v1017_v42, 1  ;;  %v1231_v46 = vrot.slane %v1013_v41, 2  ;;  %v1236_v54 = vrot.slane %v1234_v37, 1  ;;  %v1237_v62 = vrot.slane %v1021_v35, 2 }
 0x14c   : > { %v1016_v63 = vsel %vm397_vm11, %v1012_v60, %v1015_v51  ;;  %v1024_v6 = vsel %vm397_vm11, %v1019_v61, %v1023_v43  ;;  %v1229_v7 = vsel %vm625_vm13, %v1224_v47, %v1228_v28  ;;  %v1331_v8 = vrot.slane %v3560_v49, 2 }
 0x14d   : > { %v1232_v10 = vor.u32 %v1231_v46, %v1230_v34  ;;  %v1238_v13 = vor.u32 %v1237_v62, %v1236_v54  ;;  %v1333_v14 = vrot.slane %v896_v30, 2  ;;  %v1335_v15 = vrot.slane %v897_v31, 2  ;;  %v3639_v30 = vld [vmem:[%s3917_s1 + $0x18] sm:$0xf]  ;;  %v2809_v31 = vld [vmem:[%s3919_s3 + $0x14] sm:$0xf] }
 0x14e   : > { %v1332_v18 = vsel %vm737_vm14, %v1330_v38, %v1331_v8  ;;  %v1337_v20 = vrot.slane %v992_v25, 2  ;;  %v1253_v25 = vsel %vm313_vm0, %v2774_v17, 0  ;;  %v2140_v32 = vsel %vm313_vm0, %v2809_v31, 0 }
 0x14f   : > { %3001 = vmatmul.mubr.msk.bf16.vlgmr.msra.gmra.mrb[0].mxu1 %vm300_vm2, %v1009_v59  ;;  %v1233_v21 = vsel %vm625_vm13, %v1228_v28, %v1232_v10  ;;  %v1239_v22 = vsel %vm625_vm13, %v1232_v10, %v1238_v13  ;;  %v1334_v24 = vsel %vm737_vm14, %v1331_v8, %v1333_v14  ;;  %v1336_v49 = vsel %vm737_vm14, %v1333_v14, %v1335_v15 }
 0x150   : > { %3009 = vmatpush3.bf16.msra.mxu1 %v3563_v55  ;;  %3004 = vmatprep.mubr.msk.bf16.mxu1 %vm300_vm2, %v1016_v63  ;;  %v1338_v26 = vsel %vm737_vm14, %v1335_v15, %v1337_v20  ;;  %v1352_v55 = vsel %vm313_vm0, %v2779_v27, 0  ;;  %v981_v35 = vrot.slane %v3651_v33, %v384_v1  ;;  %vm1730_vm9 = vcmask 1044480  }
 0x151   : > { %3306 = vmatprep.subr.msk.bf16.mxu1 %vm313_vm0, %v2774_v17 }
 0x157   : > { %3005 = vmatmul.mubr.msk.bf16.gmra.mrb[4].mxu1 %vm300_vm2, %v1024_v6 }
 0x158   : > { %3010 = vmatprep.mubr.msk.bf16.mxu1 %vm300_vm2, %v3578_v16  ;;  %v2784_v16 = vld [vmem:[%s3917_s1 + $0x14] sm:$0xf] }
 0x159   : > { %3308 = vmatprep.subr.msk.bf16.mxu0 %vm313_vm0, %v2784_v16  ;;  %v1513_v29 = vsel %vm313_vm0, %v2784_v16, 0 }
 0x15a   : > { %3039 = vmatpush3.bf16.msra.mxu0 %v1513_v29  ;;  %v2794_v29 = vld [vmem:[%s3917_s1 + $0x1c] sm:$0xf] }
 0x15b   : > { %3309 = vmatprep.subr.msk.bf16.mxu0 %vm313_vm0, %v3639_v30 }
 0x15f   : > { %3011 = vmatmul.mubr.msk.bf16.vlgmr.msra.gmra.mrb[0].mxu1 %vm300_vm2, %v1124_v48 }
 0x160   : > { %3019 = vmatpush3.bf16.msra.mxu1 %v1253_v25  ;;  %3014 = vmatprep.mubr.msk.bf16.mxu1 %vm300_vm2, %v1126_v56 }
 0x161   : > { %3307 = vmatprep.subr.msk.bf16.mxu1 %vm313_vm0, %v2779_v27 }
 0x167   : > { %3015 = vmatmul.mubr.msk.bf16.gmra.mrb[4].mxu1 %vm300_vm2, %v1128_v57 }
 0x168   : > { %3020 = vmatprep.mubr.msk.bf16.mxu1 %vm300_vm2, %v1225_v58 }
 0x16f   : > { %3021 = vmatmul.mubr.msk.bf16.vlgmr.msra.gmra.mrb[0].mxu1 %vm300_vm2, %v1229_v7 }
 0x170   : > { %3029 = vmatpush3.bf16.msra.mxu1 %v1352_v55  ;;  %3024 = vmatprep.mubr.msk.bf16.mxu1 %vm300_vm2, %v1233_v21 }
 0x171   : > { %3313 = vmatprep.subr.msk.bf16.mxu1 %vm313_vm0, %v2809_v31 }
 0x177   : > { %3025 = vmatmul.mubr.msk.bf16.gmra.mrb[4].mxu1 %vm300_vm2, %v1239_v22 }
 0x178   : > { %3030 = vmatprep.mubr.msk.bf16.mxu1 %vm300_vm2, %v1332_v18 }
 0x17f   : > { %3031 = vmatmul.mubr.msk.bf16.vlgmr.msra.gmra.mrb[0].mxu1 %vm300_vm2, %v1334_v24 }
 0x180   : > { %3034 = vmatprep.mubr.msk.bf16.mxu1 %vm300_vm2, %v1336_v49  ;;  %3089 = vmatpush3.bf16.msra.mxu1 %v2140_v32 }
 0x187   : > { %3035 = vmatmul.mubr.msk.bf16.gmra.mrb[4].mxu1 %vm300_vm2, %v1338_v26 }
 0x252   : > { %v3032_v36 = vpop.f32.mrb[0].mxu1 }
 0x253   : > { %v3146_v37 = vadd.f32 %v3032_v36, %v981_v35  ;;  %v1388_v38 = vpop.f32.mrb[1].mxu1 }
 0x254   : > { %v3147_v39 = vadd.f32 %v1388_v38, %v981_v35  ;;  %v3033_v40 = vpop.f32.mrb[2].mxu1 }
 0x255   : > { %v3657_v41 = vadd.f32 %v3146_v37, %v3397_v5  ;;  %v3148_v42 = vadd.f32 %v3033_v40, %v981_v35  ;;  %v1391_v43 = vpop.f32.mrb[3].mxu1 }
 0x256   : > { %v3660_v44 = vadd.f32 %v3147_v39, %v3393_v3  ;;  %v3149_v45 = vadd.f32 %v1391_v43, %v981_v35 }
 0x257   : > { %vm1437_vm10 = vcmp.ge.f32.partialorder %v3657_v41, 0.0  ;;  %v1445_v47 = vmul.f32 0.1, %v3657_v41  ;;  %v3665_v1 = vadd.f32 %v3148_v42, %v3404_v9 }
 0x258   : > { %vm1435_vm15 = vcmp.ge.f32.partialorder %v3660_v44, 0.0  ;;  %v1443_v50 = vmul.f32 0.1, %v3660_v44  ;;  %v3670_v5 = vadd.f32 %v3149_v45, %v3395_v4 }
 0x259   : > { %v1453_v51 = vsel %vm1437_vm10, %v3657_v41, %v1445_v47  ;;  %vm1438_vm3 = vcmp.ge.f32.partialorder %v3665_v1, 0.0  ;;  %v1446_v3 = vmul.f32 0.1, %v3665_v1 }
 0x25a   : > { %v1451_v52 = vsel %vm1435_vm15, %v3660_v44, %v1443_v50  ;;  %vm1436_vm4 = vcmp.ge.f32.partialorder %v3670_v5, 0.0  ;;  %v1444_v9 = vmul.f32 0.1, %v3670_v5  ;;  %v3036_v53 = vpop.f32.mrb[4].mxu1  ;;  %v1471_v4 = vrot.slane %v1453_v51, 2 }
 0x25b   : > { %v1454_v48 = vsel %vm1438_vm3, %v3665_v1, %v1446_v3  ;;  %v3150_v56 = vadd.f32 %v3036_v53, %v981_v35  ;;  %v1404_v57 = vpop.f32.mrb[5].mxu1  ;;  %v1468_v58 = vrot.slane %v1451_v52, 2 }
 0x25c   : > { %v1473_v59 = vrot.slane %v1454_v48, 2  ;;  %v1452_v60 = vsel %vm1436_vm4, %v3670_v5, %v1444_v9  ;;  %v3151_v61 = vadd.f32 %v1404_v57, %v981_v35  ;;  %v3037_v28 = vpop.f32.mrb[6].mxu1 }
 0x25d   : > { %v1469_v34 = vrot.slane %v1452_v60, 2  ;;  %v3681_v46 = vadd.f32 %v3150_v56, %v3418_v19  ;;  %v3152_v54 = vadd.f32 %v3037_v28, %v981_v35  ;;  %v1407_v62 = vpop.f32.mrb[7].mxu1  ;;  %v1492_v8 = vsel %vm737_vm14, 0.0, %v1468_v58 }
 0x25e   : > { %v3684_v63 = vadd.f32 %v3151_v61, %v3408_v11  ;;  %v3153_v6 = vadd.f32 %v1407_v62, %v981_v35  ;;  %v3687_v7 = vsel %vm737_vm14, %v1471_v4, %v1473_v59  ;;  %v1753_v62 = vsel %vm313_vm0, %v2794_v29, 0 }
 0x25f   : > { %vm1441_vm5 = vcmp.ge.f32.partialorder %v3681_v46, 0.0  ;;  %v1449_v10 = vmul.f32 0.1, %v3681_v46  ;;  %v3693_v13 = vadd.f32 %v3152_v54, %v3423_v23  ;;  %v3696_v19 = vsel %vm737_vm14, %v1468_v58, %v1469_v34 }
 0x260   : > { %vm1439_vm6 = vcmp.ge.f32.partialorder %v3684_v63, 0.0  ;;  %v1447_v11 = vmul.f32 0.1, %v3684_v63  ;;  %v3701_v14 = vadd.f32 %v3153_v6, %v3410_v12  ;;  %v3704_v15 = vsel %vm737_vm14, %v1469_v34, %v1471_v4 }
 0x261   : > { %v1457_v17 = vsel %vm1441_vm5, %v3681_v46, %v1449_v10  ;;  %vm1442_vm7 = vcmp.ge.f32.partialorder %v3693_v13, 0.0  ;;  %v1450_v23 = vmul.f32 0.1, %v3693_v13  ;;  %v3710_v18 = vpack.c.bf16 %v3696_v19, %v1492_v8 }
 0x262   : > { %v1455_v20 = vsel %vm1439_vm6, %v3684_v63, %v1447_v11  ;;  %vm1440_vm8 = vcmp.ge.f32.partialorder %v3701_v14, 0.0  ;;  %v1448_v21 = vmul.f32 0.1, %v3701_v14  ;;  %v1648_v12 = vsel %vm313_vm0, %v3639_v30, 0  ;;  %v2799_v11 = vld [vmem:[%s3917_s1 + $0x20] sm:$0xf] }
 0x263   : > { %v1479_v22 = vrot.slane %v1457_v17, 2  ;;  %v1475_v24 = vrot.slane %v1455_v20, 2  ;;  %v1458_v49 = vsel %vm1442_vm7, %v3693_v13, %v1450_v23  ;;  %v3720_v26 = vpack.c.bf16 %v3687_v7, %v3704_v15  ;;  %3040 = vmatprep.mubr.msk.bf16.mxu0 %vm300_vm2, %v3710_v18 }
 0x264   : > { %v1481_v25 = vrot.slane %v1458_v49, 2  ;;  %v1456_v27 = vsel %vm1440_vm8, %v3701_v14, %v1448_v21  ;;  %v1595_v55 = vshrl.u32 %v3710_v18, 16  ;;  %v1598_v16 = vshll.u32 %v3710_v18, 16 }
 0x265   : > { %v1477_v30 = vrot.slane %v1456_v27, 2  ;;  %3041 = vmatmul.mubr.msk.bf16.vlgmr.msra.gmra.mrb[8].mxu0 %vm300_vm2, %v3720_v26  ;;  %v1602_v31 = vshrl.u32 %v3720_v26, 16  ;;  %v1605_v32 = vshll.u32 %v3720_v26, 16  ;;  %v1476_v37 = vsel %vm737_vm14, %v1473_v59, %v1475_v24 }
 0x266   : > { %3049 = vmatpush3.bf16.msra.mxu0 %v1648_v12  ;;  %v3735_v35 = vsel %vm737_vm14, %v1479_v22, %v1481_v25  ;;  %v1597_v36 = vrot.slane %v1595_v55, 1  ;;  %v1600_v43 = vrot.slane %v1598_v16, 2  ;;  %v1493_v45 = vsel %vm737_vm14, %v1481_v25, 0.0  ;;  %v2804_v16 = vld [vmem:[%s3917_s1 + $0x24] sm:$0xf] }
 0x267   : > { %v1478_v38 = vsel %vm737_vm14, %v1475_v24, %v1477_v30  ;;  %v1480_v39 = vsel %vm737_vm14, %v1477_v30, %v1479_v22  ;;  %3310 = vmatprep.subr.msk.bf16.mxu0 %vm313_vm0, %v2794_v29  ;;  %v1604_v47 = vrot.slane %v1602_v31, 1  ;;  %v1607_v50 = vrot.slane %v1605_v32, 2 }
 0x268   : > { %v1498_v40 = vpack.c.bf16 %v1478_v38, %v1476_v37  ;;  %v3742_v42 = vpack.c.bf16 %v3735_v35, %v1480_v39  ;;  %v1601_v51 = vor.u32 %v1600_v43, %v1597_v36  ;;  %v1594_v56 = vpack.c.bf16 %v1493_v45, %v1493_v45 }
 0x269   : > { %v1608_v53 = vor.u32 %v1607_v50, %v1604_v47  ;;  %v1731_v20 = vrot.slane %v3710_v18, 3  ;;  %v1732_v21 = vrot.slane %v3720_v26, 3  ;;  %v1830_v24 = vpack.c.bf16 %v3704_v15, %v3696_v19 }
 0x26a   : > { %3044 = vmatprep.mubr.msk.bf16.mxu0 %vm300_vm2, %v1498_v40  ;;  %v1610_v3 = vshrl.u32 %v1498_v40, 16  ;;  %v1613_v52 = vshll.u32 %v1498_v40, 16  ;;  %v1618_v9 = vshrl.u32 %v3742_v42, 16  ;;  %v1621_v48 = vshll.u32 %v3742_v42, 16 }
 0x26b   : > { %v1609_v4 = vsel %vm625_vm13, %v1601_v51, %v1608_v53  ;;  %v1627_v28 = vshrl.u32 %v1594_v56, 16  ;;  %v1630_v34 = vshll.u32 %v1594_v56, 16  ;;  %v1733_v22 = vsel %vm1730_vm9, %v1731_v20, %v1732_v21 }
 0x26c   : > { %v1612_v57 = vrot.slane %v1610_v3, 1  ;;  %v1615_v58 = vrot.slane %v1613_v52, 2  ;;  %v1620_v59 = vrot.slane %v1618_v9, 1  ;;  %v1623_v60 = vrot.slane %v1621_v48, 2 }
 0x26d   : > { %3045 = vmatmul.mubr.msk.bf16.gmra.mrb[12].mxu0 %vm300_vm2, %v3742_v42  ;;  %v1629_v8 = vrot.slane %v1627_v28, 1  ;;  %v1632_v10 = vrot.slane %v1630_v34, 2  ;;  %v1734_v49 = vrot.slane %v1498_v40, 3  ;;  %v1831_v25 = vpack.c.bf16 %v1476_v37, %v3687_v7 }
 0x26e   : > { %3050 = vmatprep.mubr.msk.bf16.mxu0 %vm300_vm2, %v1609_v4  ;;  %v1616_v61 = vor.u32 %v1615_v58, %v1612_v57  ;;  %v1624_v54 = vor.u32 %v1623_v60, %v1620_v59  ;;  %v1736_v27 = vrot.slane %v3742_v42, 3  ;;  %v1884_v18 = vsel %vm313_vm0, %v2799_v11, 0 }
 0x26f   : > { %v1633_v23 = vor.u32 %v1632_v10, %v1629_v8  ;;  %v1838_v26 = vshll.u32 %v1830_v24, 16  ;;  %v1735_v55 = vsel %vm1730_vm9, %v1732_v21, %v1734_v49  ;;  %v1832_v29 = vpack.c.bf16 %v1480_v39, %v1478_v38  ;;  %v2814_v10 = vld [vmem:[%s3919_s3 + $0x18] sm:$0xf] }
 0x270   : > { %v1617_v6 = vsel %vm625_vm13, %v1608_v53, %v1616_v61  ;;  %v1625_v17 = vsel %vm625_vm13, %v1616_v61, %v1624_v54  ;;  %v1737_v30 = vsel %vm1730_vm9, %v1734_v49, %v1736_v27  ;;  %v1843_v19 = vshll.u32 %v1831_v25, 16  ;;  %3314 = vmatprep.subr.msk.bf16.mxu1 %vm313_vm0, %v2814_v10 }
 0x271   : > { %v1634_v12 = vsel %vm625_vm13, %v1624_v54, %v1633_v23  ;;  %v1840_v7 = vrot.slane %v1838_v26, 1  ;;  %v1738_v15 = vrot.slane %v1594_v56, 3  ;;  %v1836_v31 = vshrl.u32 %v1830_v24, 16 }
 0x272   : > { %v1845_v32 = vrot.slane %v1843_v19, 1  ;;  %v1851_v36 = vshll.u32 %v1832_v29, 16  ;;  %v1833_v37 = vpack.c.bf16 %v1493_v45, %v3735_v35  ;;  %v1847_v43 = vshrl.u32 %v1831_v25, 16 }
 0x273   : > { %v1841_v40 = vor.u32 %v1840_v7, %v1836_v31  ;;  %v1739_v38 = vsel %vm1730_vm9, %v1736_v27, %v1738_v15  ;;  %v1855_v47 = vshrl.u32 %v1832_v29, 16  ;;  %v1988_v52 = vsel %vm313_vm0, %v2804_v16, 0 }
 0x274   : > { %v1853_v42 = vrot.slane %v1851_v36, 1  ;;  %v1859_v50 = vshll.u32 %v1833_v37, 16  ;;  %v1849_v51 = vor.u32 %v1847_v43, %v1845_v32  ;;  %v1863_v53 = vshrl.u32 %v1833_v37, 16 }
 0x275   : > { %3051 = vmatmul.mubr.msk.bf16.vlgmr.msra.gmra.mrb[8].mxu0 %vm300_vm2, %v1617_v6  ;;  %v1846_v39 = vsel %vm397_vm11, %v1841_v40, %v1845_v32  ;;  %v3336_v56 = vmov 0   ;;  %v1967_v58 = vrot.slane %v1831_v25, 2  ;;  %v1966_v4 = vrot.slane %v1830_v24, 2 }
 0x276   : > { %3059 = vmatpush3.bf16.msra.mxu0 %v1753_v62  ;;  %3054 = vmatprep.mubr.msk.bf16.mxu0 %vm300_vm2, %v1625_v17  ;;  %v1857_v3 = vor.u32 %v1855_v47, %v1853_v42  ;;  %v1861_v9 = vrot.slane %v1859_v50, 1  ;;  %v1854_v35 = vsel %vm397_vm11, %v1849_v51, %v1853_v42  ;;  %v1869_v57 = vrot.slane %v3336_v56, 1  ;;  %v2819_v47 = vld [vmem:[%s3919_s3 + $0x1c] sm:$0xf] }
 0x277   : > { %3311 = vmatprep.subr.msk.bf16.mxu0 %vm313_vm0, %v2799_v11  ;;  %v1968_v60 = vsel %vm737_vm14, %v1966_v4, %v1967_v58  ;;  %v1969_v61 = vrot.slane %v1832_v29, 2  ;;  %v1971_v28 = vrot.slane %v1833_v37, 2  ;;  %v3337_v62 = vmov 0.0|0.0  }
 0x278   : > { %v1862_v45 = vsel %vm397_vm11, %v1857_v3, %v1861_v9  ;;  %v1865_v48 = vor.u32 %v1863_v53, %v1861_v9  ;;  %v1973_v6 = vrot.slane %v3337_v62, 2  ;;  %v1582_v11 = vsub.s32 1, %v3539_v0 }
 0x279   : > { %v1970_v34 = vsel %vm737_vm14, %v1967_v58, %v1969_v61  ;;  %v1972_v54 = vsel %vm737_vm14, %v1969_v61, %v1971_v28  ;;  %v2267_v43 = vsel %vm313_vm0, %v2814_v10, 0 }
 0x27a   : > { %v1870_v59 = vsel %vm397_vm11, %v1865_v48, %v1869_v57  ;;  %v1974_v8 = vsel %vm737_vm14, %v1971_v28, %v1973_v6  ;;  %v1583_v17 = vrot.slane %v3545_v2, %v1582_v11  ;;  %v3821_v57 = vsel %vm313_vm0, %v2819_v47, 0 }
 0x27d   : > { %3055 = vmatmul.mubr.msk.bf16.gmra.mrb[12].mxu0 %vm300_vm2, %v1634_v12 }
 0x27e   : > { %3060 = vmatprep.mubr.msk.bf16.mxu0 %vm300_vm2, %v1733_v22 }
 0x285   : > { %3061 = vmatmul.mubr.msk.bf16.vlgmr.msra.gmra.mrb[8].mxu0 %vm300_vm2, %v1735_v55 }
 0x286   : > { %3069 = vmatpush3.bf16.msra.mxu0 %v1884_v18  ;;  %3064 = vmatprep.mubr.msk.bf16.mxu0 %vm300_vm2, %v1737_v30 }
 0x287   : > { %3312 = vmatprep.subr.msk.bf16.mxu0 %vm313_vm0, %v2804_v16 }
 0x28d   : > { %3065 = vmatmul.mubr.msk.bf16.gmra.mrb[12].mxu0 %vm300_vm2, %v1739_v38 }
 0x28e   : > { %3070 = vmatprep.mubr.msk.bf16.mxu0 %vm300_vm2, %v1846_v39 }
 0x295   : > { %3071 = vmatmul.mubr.msk.bf16.vlgmr.msra.gmra.mrb[8].mxu0 %vm300_vm2, %v1854_v35 }
 0x296   : > { %3079 = vmatpush3.bf16.msra.mxu0 %v1988_v52  ;;  %3074 = vmatprep.mubr.msk.bf16.mxu0 %vm300_vm2, %v1862_v45 }
 0x29d   : > { %3075 = vmatmul.mubr.msk.bf16.gmra.mrb[12].mxu0 %vm300_vm2, %v1870_v59 }
 0x29e   : > { %3080 = vmatprep.mubr.msk.bf16.mxu0 %vm300_vm2, %v1968_v60 }
 0x2a5   : > { %3081 = vmatmul.mubr.msk.bf16.vlgmr.msra.gmra.mrb[8].mxu0 %vm300_vm2, %v1970_v34 }
 0x2a6   : > { %3084 = vmatprep.mubr.msk.bf16.mxu0 %vm300_vm2, %v1972_v54 }
 0x2ad   : > { %3085 = vmatmul.mubr.msk.bf16.gmra.mrb[12].mxu0 %vm300_vm2, %v1974_v8 }
 0x378   : > { %v3082_v23 = vpop.f32.mrb[8].mxu0 }
 0x379   : > { %v3154_v20 = vadd.f32 %v3082_v23, %v1583_v17  ;;  %v2024_v21 = vpop.f32.mrb[9].mxu0 }
 0x37a   : > { %v3155_v12 = vadd.f32 %v2024_v21, %v1583_v17  ;;  %v3083_v22 = vpop.f32.mrb[10].mxu0 }
 0x37b   : > { %vm2065_vm10 = vcmp.ge.f32.partialorder %v3154_v20, 0.0  ;;  %v2073_v24 = vmul.f32 0.1, %v3154_v20  ;;  %v3156_v49 = vadd.f32 %v3083_v22, %v1583_v17  ;;  %v2027_v25 = vpop.f32.mrb[11].mxu0 }
 0x37c   : > { %vm2063_vm15 = vcmp.ge.f32.partialorder %v3155_v12, 0.0  ;;  %v2071_v27 = vmul.f32 0.1, %v3155_v12  ;;  %v3157_v18 = vadd.f32 %v2027_v25, %v1583_v17 }
 0x37d   : > { %v2081_v26 = vsel %vm2065_vm10, %v3154_v20, %v2073_v24  ;;  %vm2066_vm3 = vcmp.ge.f32.partialorder %v3156_v49, 0.0  ;;  %v2074_v55 = vmul.f32 0.1, %v3156_v49 }
 0x37e   : > { %v2079_v16 = vsel %vm2063_vm15, %v3155_v12, %v2071_v27  ;;  %vm2064_vm4 = vcmp.ge.f32.partialorder %v3157_v18, 0.0  ;;  %v2072_v29 = vmul.f32 0.1, %v3157_v18  ;;  %v2098_v19 = vrot.slane %v2081_v26, 6 }
 0x37f   : > { %v2095_v30 = vrot.slane %v2079_v16, 6  ;;  %v2082_v2 = vsel %vm2066_vm3, %v3156_v49, %v2074_v55 }
 0x380   : > { %v2100_v7 = vrot.slane %v2082_v2, 6  ;;  %v2080_v15 = vsel %vm2064_vm4, %v3157_v18, %v2072_v29  ;;  %v3086_v31 = vpop.f32.mrb[12].mxu0 }
 0x381   : > { %v2096_v32 = vrot.slane %v2080_v15, 6  ;;  %v3158_v36 = vadd.f32 %v3086_v31, %v1583_v17  ;;  %v2040_v37 = vpop.f32.mrb[13].mxu0  ;;  %v2119_v40 = vsel %vm268_vm1, 0.0, %v2095_v30 }
 0x382   : > { %v2101_v38 = vsel %vm268_vm1, %v2098_v19, %v2100_v7  ;;  %v3159_v39 = vadd.f32 %v2040_v37, %v1583_v17  ;;  %v3087_v42 = vpop.f32.mrb[14].mxu0 }
 0x383   : > { %v2097_v50 = vsel %vm268_vm1, %v2095_v30, %v2096_v32  ;;  %v2099_v51 = vsel %vm268_vm1, %v2096_v32, %v2098_v19  ;;  %vm2069_vm5 = vcmp.ge.f32.partialorder %v3158_v36, 0.0  ;;  %v2077_v3 = vmul.f32 0.1, %v3158_v36  ;;  %v2043_v52 = vpop.f32.mrb[15].mxu0 }
 0x384   : > { %v3816_v9 = vpack.c.bf16 %v2097_v50, %v2119_v40  ;;  %v3818_v35 = vpack.c.bf16 %v2101_v38, %v2099_v51  ;;  %vm2067_vm6 = vcmp.ge.f32.partialorder %v3159_v39, 0.0  ;;  %v2075_v45 = vmul.f32 0.1, %v3159_v39 }
 0x385   : > { %v2085_v53 = vsel %vm2069_vm5, %v3158_v36, %v2077_v3  ;;  %v3160_v48 = vadd.f32 %v3087_v42, %v1583_v17  ;;  %v3161_v56 = vadd.f32 %v2043_v52, %v1583_v17 }
 0x386   : > { %v2106_v58 = vrot.slane %v2085_v53, 6  ;;  %v2083_v4 = vsel %vm2067_vm6, %v3159_v39, %v2075_v45  ;;  %3090 = vmatprep.mubr.msk.bf16.mxu1 %vm300_vm2, %v3816_v9  ;;  %v2222_v59 = vshrl.u32 %v3816_v9, 16  ;;  %v2224_v60 = vshll.u32 %v3816_v9, 16 }
 0x387   : > { %v2102_v61 = vrot.slane %v2083_v4, 6  ;;  %vm2070_vm7 = vcmp.ge.f32.partialorder %v3160_v48, 0.0  ;;  %v2078_v28 = vmul.f32 0.1, %v3160_v48  ;;  %vm2068_vm8 = vcmp.ge.f32.partialorder %v3161_v56, 0.0  ;;  %3091 = vmatmul.mubr.msk.bf16.vlgmr.msra.gmra.mrb[8].mxu1 %vm300_vm2, %v3818_v35 }
 0x388   : > { %v2076_v34 = vmul.f32 0.1, %v3161_v56  ;;  %3099 = vmatpush3.bf16.msra.mxu1 %v2267_v43  ;;  %v2226_v54 = vrot.slane %v2224_v60, 1  ;;  %v2228_v62 = vshll.u32 %v3818_v35, 16  ;;  %v2232_v6 = vshrl.u32 %v3818_v35, 16 }
 0x389   : > { %v2103_v8 = vsel %vm268_vm1, %v2100_v7, %v2102_v61  ;;  %v2086_v10 = vsel %vm2070_vm7, %v3160_v48, %v2078_v28  ;;  %3315 = vmatprep.subr.msk.bf16.mxu1 %vm313_vm0, %v2819_v47  ;;  %v2349_v17 = vrot.slane %v3816_v9, 1  ;;  %v2350_v23 = vrot.slane %v3818_v35, 1 }
 0x38a   : > { %v2108_v20 = vrot.slane %v2086_v10, 6  ;;  %v2084_v21 = vsel %vm2068_vm8, %v3161_v56, %v2076_v34  ;;  %v2227_v12 = vor.u32 %v2226_v54, %v2222_v59  ;;  %v2230_v22 = vrot.slane %v2228_v62, 1 }
 0x38b   : > { %v2104_v24 = vrot.slane %v2084_v21, 6  ;;  %v3836_v49 = vsel %vm525_vm12, %v2349_v17, %v2350_v23  ;;  %v2448_v25 = vrot.slane %v2222_v59, 1  ;;  %v2449_v27 = vrot.slane %v2224_v60, 2 }
 0x38c   : > { %v2109_v18 = vsel %vm268_vm1, %v2106_v58, %v2108_v20  ;;  %v2120_v26 = vsel %vm268_vm1, %v2108_v20, 0.0  ;;  %v2231_v55 = vsel %vm397_vm11, %v2227_v12, %v2230_v22  ;;  %v2234_v16 = vor.u32 %v2232_v6, %v2230_v22 }
 0x38d   : > { %v2221_v29 = vpack.c.bf16 %v2120_v26, %v2120_v26  ;;  %v2105_v30 = vsel %vm268_vm1, %v2102_v61, %v2104_v24  ;;  %v2107_v2 = vsel %vm268_vm1, %v2104_v24, %v2106_v58  ;;  %v2450_v19 = vor.u32 %v2449_v27, %v2448_v25  ;;  %v2824_v25 = vld [vmem:[%s3919_s3 + $0x20] sm:$0xf] }
 0x38e   : > { %v2125_v7 = vpack.c.bf16 %v2105_v30, %v2103_v8  ;;  %v2126_v15 = vpack.c.bf16 %v2109_v18, %v2107_v2  ;;  %v2451_v31 = vrot.slane %v2232_v6, 1  ;;  %v2452_v32 = vrot.slane %v2228_v62, 2  ;;  %v2829_v2 = vld [vmem:[%s3919_s3 + $0x24] sm:$0xf] }
 0x38f   : > { %v2250_v36 = vshll.u32 %v2221_v29, 16  ;;  %v2356_v37 = vrot.slane %v2221_v29, 1  ;;  %v2463_v40 = vshrl.u32 %v2221_v29, 16  ;;  %v2559_v38 = vrot.slane %v3816_v9, 2 }
 0x390   : > { %3094 = vmatprep.mubr.msk.bf16.mxu1 %vm300_vm2, %v2125_v7  ;;  %v2235_v39 = vshll.u32 %v2125_v7, 16  ;;  %v2239_v42 = vshrl.u32 %v2125_v7, 16  ;;  %v2242_v43 = vshll.u32 %v2126_v15, 16  ;;  %v2246_v47 = vshrl.u32 %v2126_v15, 16 }
 0x391   : > { %3095 = vmatmul.mubr.msk.bf16.gmra.mrb[12].mxu1 %vm300_vm2, %v2126_v15  ;;  %v2252_v50 = vrot.slane %v2250_v36, 1  ;;  %v2352_v51 = vrot.slane %v2125_v7, 1  ;;  %v2354_v3 = vrot.slane %v2126_v15, 1  ;;  %v2453_v52 = vor.u32 %v2452_v32, %v2451_v31 }
 0x392   : > { %3100 = vmatprep.mubr.msk.bf16.mxu1 %vm300_vm2, %v2231_v55  ;;  %v2237_v45 = vrot.slane %v2235_v39, 1  ;;  %v2244_v53 = vrot.slane %v2242_v43, 1  ;;  %v2455_v48 = vrot.slane %v2239_v42, 1  ;;  %v2456_v56 = vrot.slane %v2235_v39, 2 }
 0x393   : > { %v2353_v9 = vsel %vm525_vm12, %v2350_v23, %v2352_v51  ;;  %v2355_v58 = vsel %vm525_vm12, %v2352_v51, %v2354_v3  ;;  %v2357_v4 = vsel %vm525_vm12, %v2354_v3, %v2356_v37  ;;  %v2454_v59 = vsel %vm625_vm13, %v2450_v19, %v2453_v52 }
 0x394   : > { %v2238_v60 = vsel %vm397_vm11, %v2234_v16, %v2237_v45  ;;  %v2241_v61 = vor.u32 %v2239_v42, %v2237_v45  ;;  %v2248_v28 = vor.u32 %v2246_v47, %v2244_v53  ;;  %v2457_v34 = vor.u32 %v2456_v56, %v2455_v48 }
 0x395   : > { %v2459_v54 = vrot.slane %v2246_v47, 1  ;;  %v2460_v62 = vrot.slane %v2242_v43, 2  ;;  %v2465_v6 = vrot.slane %v2463_v40, 1  ;;  %v2466_v8 = vrot.slane %v2250_v36, 2 }
 0x396   : > { %v2245_v10 = vsel %vm397_vm11, %v2241_v61, %v2244_v53  ;;  %v2253_v17 = vsel %vm397_vm11, %v2248_v28, %v2252_v50  ;;  %v2458_v23 = vsel %vm625_vm13, %v2453_v52, %v2457_v34  ;;  %v2560_v20 = vrot.slane %v3818_v35, 2 }
 0x397   : > { %v2461_v21 = vor.u32 %v2460_v62, %v2459_v54  ;;  %v2467_v12 = vor.u32 %v2466_v8, %v2465_v6  ;;  %v2562_v22 = vrot.slane %v2125_v7, 2  ;;  %v2564_v24 = vrot.slane %v2126_v15, 2 }
 0x398   : > { %v2561_v27 = vsel %vm737_vm14, %v2559_v38, %v2560_v20  ;;  %v2566_v18 = vrot.slane %v2221_v29, 2  ;;  %v2482_v29 = vsel %vm313_vm0, %v2824_v25, 0 }
 0x399   : > { %3101 = vmatmul.mubr.msk.bf16.vlgmr.msra.gmra.mrb[8].mxu1 %vm300_vm2, %v2238_v60  ;;  %v2462_v26 = vsel %vm625_vm13, %v2457_v34, %v2461_v21  ;;  %v2468_v55 = vsel %vm625_vm13, %v2461_v21, %v2467_v12  ;;  %v2563_v16 = vsel %vm737_vm14, %v2560_v20, %v2562_v22  ;;  %v2565_v35 = vsel %vm737_vm14, %v2562_v22, %v2564_v24 }
 0x39a   : > { %3109 = vmatpush3.bf16.msra.mxu1 %v3821_v57  ;;  %3104 = vmatprep.mubr.msk.bf16.mxu1 %vm300_vm2, %v2245_v10  ;;  %v2567_v30 = vsel %vm737_vm14, %v2564_v24, %v2566_v18  ;;  %v2581_v57 = vsel %vm313_vm0, %v2829_v2, 0 }
 0x39b   : > { %3316 = vmatprep.subr.msk.bf16.mxu1 %vm313_vm0, %v2824_v25 }
 0x3a1   : > { %3105 = vmatmul.mubr.msk.bf16.gmra.mrb[12].mxu1 %vm300_vm2, %v2253_v17 }
 0x3a2   : > { %3110 = vmatprep.mubr.msk.bf16.mxu1 %vm300_vm2, %v3836_v49  ;;  %v2210_v49 = vrot.slane %v3651_v33, %v1582_v11 }
 0x3a9   : > { %3111 = vmatmul.mubr.msk.bf16.vlgmr.msra.gmra.mrb[8].mxu1 %vm300_vm2, %v2353_v9 }
 0x3aa   : > { %3119 = vmatpush3.bf16.msra.mxu1 %v2482_v29  ;;  %3114 = vmatprep.mubr.msk.bf16.mxu1 %vm300_vm2, %v2355_v58 }
 0x3ab   : > { %3317 = vmatprep.subr.msk.bf16.mxu1 %vm313_vm0, %v2829_v2 }
 0x3b1   : > { %3115 = vmatmul.mubr.msk.bf16.gmra.mrb[12].mxu1 %vm300_vm2, %v2357_v4 }
 0x3b2   : > { %3120 = vmatprep.mubr.msk.bf16.mxu1 %vm300_vm2, %v2454_v59 }
 0x3b9   : > { %3121 = vmatmul.mubr.msk.bf16.vlgmr.msra.gmra.mrb[8].mxu1 %vm300_vm2, %v2458_v23 }
 0x3ba   : > { %3129 = vmatpush3.bf16.msra.mxu1 %v2581_v57  ;;  %3124 = vmatprep.mubr.msk.bf16.mxu1 %vm300_vm2, %v2462_v26 }
 0x3c1   : > { %3125 = vmatmul.mubr.msk.bf16.gmra.mrb[12].mxu1 %vm300_vm2, %v2468_v55 }
 0x3c2   : > { %3130 = vmatprep.mubr.msk.bf16.mxu1 %vm300_vm2, %v2561_v27 }
 0x3c9   : > { %3131 = vmatmul.mubr.msk.bf16.vlgmr.msra.gmra.mrb[8].mxu1 %vm300_vm2, %v2563_v16 }
 0x3ca   : > { %3134 = vmatprep.mubr.msk.bf16.mxu1 %vm300_vm2, %v2565_v35 }
 0x3d1   : > { %3135 = vmatmul.mubr.msk.bf16.gmra.mrb[12].mxu1 %vm300_vm2, %v2567_v30 }
 0x49c   : > { %v3132_v19 = vpop.f32.mrb[8].mxu1 }
 0x49d   : > { %v3162_v7 = vadd.f32 %v3132_v19, %v2210_v49  ;;  %v2617_v15 = vpop.f32.mrb[9].mxu1 }
 0x49e   : > { %v3163_v31 = vadd.f32 %v2617_v15, %v2210_v49  ;;  %v3133_v32 = vpop.f32.mrb[10].mxu1 }
 0x49f   : > { %v2658_v36 = vadd.f32 %v3162_v7, %v3657_v41  ;;  %v3164_v37 = vadd.f32 %v3133_v32, %v2210_v49  ;;  %v2620_v40 = vpop.f32.mrb[11].mxu1 }
 0x4a0   : > { %v2656_v38 = vadd.f32 %v3163_v31, %v3660_v44  ;;  %v3165_v39 = vadd.f32 %v2620_v40, %v2210_v49 }
 0x4a1   : > { %2666 = vst.msk [vmem:[%s224_s26 + $0x10] sm:$0xff] %vm300_vm2, %v2658_v36  ;;  %v2659_v0 = vadd.f32 %v3164_v37, %v3665_v1 }
 0x4a2   : > { %2664 = vst.msk [vmem:[%s224_s26] sm:$0xff] %vm300_vm2, %v2656_v38  ;;  %v2657_v33 = vadd.f32 %v3165_v39, %v3670_v5 }
 0x4a3   : > { %2667 = vst.msk [vmem:[%s224_s26 + $0x18] sm:$0xff] %vm300_vm2, %v2659_v0 }
 0x4a4   : > { %2665 = vst.msk [vmem:[%s224_s26 + $0x8] sm:$0xff] %vm300_vm2, %v2657_v33  ;;  %v3136_v11 = vpop.f32.mrb[12].mxu1 }
 0x4a5   : > { %v3166_v42 = vadd.f32 %v3136_v11, %v2210_v49  ;;  %v2633_v41 = vpop.f32.mrb[13].mxu1 }
 0x4a6   : > { %v3167_v43 = vadd.f32 %v2633_v41, %v2210_v49  ;;  %v3137_v47 = vpop.f32.mrb[14].mxu1 }
 0x4a7   : > { %v2662_v44 = vadd.f32 %v3166_v42, %v3681_v46  ;;  %v3168_v50 = vadd.f32 %v3137_v47, %v2210_v49  ;;  %v2636_v51 = vpop.f32.mrb[15].mxu1 }
 0x4a8   : > { %v2660_v3 = vadd.f32 %v3167_v43, %v3684_v63  ;;  %v3169_v1 = vadd.f32 %v2636_v51, %v2210_v49 }
 0x4a9   : > { %2670 = vst.msk [vmem:[%s224_s26 + $0x30] sm:$0xff] %vm300_vm2, %v2662_v44  ;;  %v2663_v5 = vadd.f32 %v3168_v50, %v3693_v13 }
 0x4aa   : > { %2668 = vst.msk [vmem:[%s224_s26 + $0x20] sm:$0xff] %vm300_vm2, %v2660_v3  ;;  %v2661_v52 = vadd.f32 %v3169_v1, %v3701_v14 }
 0x4ab   : > { %2671 = vst.msk [vmem:[%s224_s26 + $0x38] sm:$0xff] %vm300_vm2, %v2663_v5 }
 0x4ac   : > { %2669 = vst.msk [vmem:[%s224_s26 + $0x28] sm:$0xff] %vm300_vm2, %v2661_v52 }
 0x4ad PF: > { %s15_s18 = sadd.s32 1, %s3334_s18  }
 0x4ae   : > { %p12_p4 = scmp.ge.s32.totalorder %s15_s18, 4  }
 0x4b0   :  { %14 = sbr.rel (!%p12_p4) target bundleno = 1 (0x1), region = 88 }

// kernel: _lambda_.21
= control target key start
LH: loop header
LB: loop body
LE: loop exit
PB: predicated region body
PF: predicated region fallthrough
CT: control target
= control target key end

     0   :  { %s2266_s18 = smov 0   ;;  %s2606_s0 = inlined_call_operand.vmem [shape: f32[2,64,8], index: 0, kind: input, shape index: {}]   ;;  %s2607_s1 = inlined_call_operand.vmem [shape: bf16[6,8,8], index: 1, kind: input, shape index: {}]   ;;  %s2608_s2 = inlined_call_operand.vmem [shape: f32[2,8], index: 2, kind: input, shape index: {}]   ;;  %s2609_s3 = inlined_call_operand.vmem [shape: bf16[6,8,8], index: 3, kind: input, shape index: {}]   ;;  %s2610_s4 = inlined_call_operand.vmem [shape: f32[2,8], index: 4, kind: input, shape index: {}]   ;;  %s2611_s5 = inlined_call_operand.vmem [shape: f32[2,64,8], index: 5, kind: output, shape index: {}]  }
   0x1 LB: > { %s1861_s19 = sadd.s32 4294967295, %s2234_s18   ;;  %p1865_p0 = scmp.ge.s32.totalorder %s2234_s18, 1  ;;  %s2234_s18 = sphi %s2266_s18, %s15_s18  }
   0x2   : > { %p187_p1 = scmp.lt.s32.totalorder %s2234_s18, 3 }
   0x4   : > { %p188_p2 = pnand %p1865_p0, %p187_p1 }
   0x5   : > { %v295_v0 = vld [vmem:[%s2607_s1] sm:$0xf] (!%p188_p2)  ;;  %vm313_vm0 = vcmask (!%p188_p2), 1043456   ;;  %p215_p3 = scmp.lt.s32.totalorder (!%p188_p2), %s1861_s19, 1  ;;  %v1874_v2 = vld [vmem:[%s2607_s1 + $0x4] sm:$0xf] (!%p188_p2) }
   0x6   : > { %191 = sbr.rel (%p188_p2) target bundleno = 1069 (0x42d), region = 40  ;;  %2208 = vmatprep.subr.msk.bf16.mxu0 (!%p188_p2), %vm313_vm0, %v295_v0  ;;  %v315_v1 = vsel (!%p188_p2), %vm313_vm0, %v295_v0, 0  ;;  %vm268_vm1 = vcmask (!%p188_p2), 1040384   ;;  %vm300_vm2 = vcmask (!%p188_p2), 64512   ;;  %v443_v6 = vsel (!%p188_p2), %vm313_vm0, %v1874_v2, 0 }
   0x7   : > { %1993 = vmatpush3.bf16.msra.mxu0 (!%p188_p2), %v315_v1  ;;  %v1879_v41 = vld [vmem:[%s2607_s1 + $0x8] sm:$0xf] (!%p188_p2)  ;;  %vm397_vm11 = vsmask.f32 (!%p188_p2), 7424  ;;  %vm525_vm12 = vcmask (!%p188_p2), 1046528  }
   0x8   : > { %2209 = vmatprep.subr.msk.bf16.mxu0 (!%p188_p2), %vm313_vm0, %v1874_v2 }
   0xd   : > { %s2613_s19 = smov (!%p215_p3, %s1861_s19), 1 }
   0xe   : > { %s1930_s24 = sshll.u32 %s2613_s19, 6 }
   0xf   : > { %s219_s27 = scalar_lea.vmem %s2606_s0, %s1930_s24  ;;  %s224_s7 = scalar_lea.vmem %s2611_s5, %s1930_s24 }
  0x10   : > { %v2291_v3 = vld [vmem:[%s219_s27] sm:$0xff]  ;;  %v2293_v4 = vld [vmem:[%s219_s27 + $0x8] sm:$0xff]  ;;  %v2295_v5 = vld [vmem:[%s219_s27 + $0x10] sm:$0xff] }
  0x11   : > { %vm236_vm3 = vcmp.ge.f32.partialorder %v2291_v3, 0.0  ;;  %vm237_vm4 = vcmp.ge.f32.partialorder %v2293_v4, 0.0  ;;  %v244_v7 = vmul.f32 0.1, %v2291_v3  ;;  %v245_v8 = vmul.f32 0.1, %v2293_v4 }
  0x12   : > { %v2302_v9 = vld [vmem:[%s219_s27 + $0x18] sm:$0xff]  ;;  %vm238_vm5 = vcmp.ge.f32.partialorder %v2295_v5, 0.0  ;;  %v246_v10 = vmul.f32 0.1, %v2295_v5  ;;  %v2306_v11 = vld [vmem:[%s219_s27 + $0x20] sm:$0xff]  ;;  %v2308_v12 = vld [vmem:[%s219_s27 + $0x28] sm:$0xff] }
  0x13   : > { %v252_v13 = vsel %vm236_vm3, %v2291_v3, %v244_v7  ;;  %v253_v14 = vsel %vm237_vm4, %v2293_v4, %v245_v8  ;;  %vm239_vm6 = vcmp.ge.f32.partialorder %v2302_v9, 0.0  ;;  %v247_v15 = vmul.f32 0.1, %v2302_v9  ;;  %v2316_v19 = vld [vmem:[%s219_s27 + $0x30] sm:$0xff]  ;;  %v2321_v23 = vld [vmem:[%s219_s27 + $0x38] sm:$0xff] }
  0x14   : > { %v269_v16 = vrot.slane %v252_v13, 7  ;;  %v270_v17 = vrot.slane %v253_v14, 7  ;;  %v254_v18 = vsel %vm238_vm5, %v2295_v5, %v246_v10  ;;  %vm240_vm7 = vcmp.ge.f32.partialorder %v2306_v11, 0.0 }
  0x15   : > { %v255_v20 = vsel %vm239_vm6, %v2302_v9, %v247_v15  ;;  %v272_v21 = vrot.slane %v254_v18, 7  ;;  %vm241_vm8 = vcmp.ge.f32.partialorder %v2308_v12, 0.0  ;;  %v248_v22 = vmul.f32 0.1, %v2306_v11 }
  0x16   : > { %v271_v24 = vsel %vm268_vm1, %v269_v16, %v270_v17  ;;  %v293_v25 = vsel %vm268_vm1, 0.0, %v269_v16  ;;  %v274_v26 = vrot.slane %v255_v20, 7  ;;  %v249_v27 = vmul.f32 0.1, %v2308_v12 }
  0x17   : > { %v2326_v28 = vpack.c.bf16 %v271_v24, %v293_v25  ;;  %v273_v29 = vsel %vm268_vm1, %v270_v17, %v272_v21  ;;  %v256_v30 = vsel %vm240_vm7, %v2306_v11, %v248_v22  ;;  %vm242_vm9 = vcmp.ge.f32.partialorder %v2316_v19, 0.0 }
  0x18   : > { %v275_v31 = vsel %vm268_vm1, %v272_v21, %v274_v26  ;;  %v257_v32 = vsel %vm241_vm8, %v2308_v12, %v249_v27  ;;  %v276_v33 = vrot.slane %v256_v30, 7  ;;  %vm243_vm10 = vcmp.ge.f32.partialorder %v2321_v23, 0.0  ;;  %v681_v27 = vld [vmem:[%s2609_s3] sm:$0xf] }
  0x19   : > { %1994 = vmatprep.mubr.msk.bf16.mxu0 %vm300_vm2, %v2326_v28  ;;  %v297_v34 = vpack.c.bf16 %v275_v31, %v273_v29  ;;  %v278_v35 = vrot.slane %v257_v32, 7  ;;  %v250_v36 = vmul.f32 0.1, %v2316_v19  ;;  %v251_v37 = vmul.f32 0.1, %v2321_v23  ;;  %2211 = vmatprep.subr.msk.bf16.mxu1 %vm313_vm0, %v681_v27 }
  0x1a   : > { %v277_v38 = vsel %vm268_vm1, %v274_v26, %v276_v33  ;;  %v398_v39 = vshrl.u32 %v2326_v28, 16  ;;  %v400_v40 = vshll.u32 %v2326_v28, 16  ;;  %v548_v8 = vsel %vm313_vm0, %v1879_v41, 0  ;;  %v1888_v29 = vld [vmem:[%s2609_s3 + $0x4] sm:$0xf] }
  0x1b   : > { %1995 = vmatmul.mubr.msk.bf16.vlgmr.msra.gmra.mrb[0].mxu0 %vm300_vm2, %v297_v34  ;;  %v279_v42 = vsel %vm268_vm1, %v276_v33, %v278_v35  ;;  %v258_v43 = vsel %vm242_vm9, %v2316_v19, %v250_v36  ;;  %v259_v44 = vsel %vm243_vm10, %v2321_v23, %v251_v37  ;;  %v404_v45 = vshll.u32 %v297_v34, 16  ;;  %v2389_v33 = vld [vmem:[%s2608_s2] sm:$0x3] }
  0x1c   : > { %2003 = vmatpush3.bf16.msra.mxu0 %v443_v6  ;;  %v298_v46 = vpack.c.bf16 %v279_v42, %v277_v38  ;;  %v280_v47 = vrot.slane %v258_v43, 7  ;;  %v282_v48 = vrot.slane %v259_v44, 7  ;;  %v402_v49 = vrot.slane %v400_v40, 1 }
  0x1d   : > { %v406_v50 = vrot.slane %v404_v45, 1  ;;  %2210 = vmatprep.subr.msk.bf16.mxu0 %vm313_vm0, %v1879_v41  ;;  %v408_v56 = vshrl.u32 %v297_v34, 16  ;;  %v526_v15 = vrot.slane %v2326_v28, 1  ;;  %v527_v16 = vrot.slane %v297_v34, 1 }
  0x1e   : > { %1998 = vmatprep.mubr.msk.bf16.mxu0 %vm300_vm2, %v298_v46  ;;  %v281_v51 = vsel %vm268_vm1, %v278_v35, %v280_v47  ;;  %v283_v52 = vsel %vm268_vm1, %v280_v47, %v282_v48  ;;  %v403_v53 = vor.u32 %v402_v49, %v398_v39  ;;  %v411_v55 = vshll.u32 %v298_v46, 16 }
  0x1f   : > { %v299_v54 = vpack.c.bf16 %v283_v52, %v281_v51  ;;  %v415_v58 = vshrl.u32 %v298_v46, 16  ;;  %v294_v60 = vsel %vm268_vm1, %v282_v48, 0.0  ;;  %v410_v62 = vor.u32 %v408_v56, %v406_v50 }
  0x20   : > { %v407_v57 = vsel %vm397_vm11, %v403_v53, %v406_v50  ;;  %v413_v61 = vrot.slane %v411_v55, 1  ;;  %v396_v63 = vpack.c.bf16 %v294_v60, %v294_v60  ;;  %v528_v18 = vsel %vm525_vm12, %v526_v15, %v527_v16 }
  0x21   : > { %v418_v59 = vshll.u32 %v299_v54, 16  ;;  %v422_v6 = vshrl.u32 %v299_v54, 16  ;;  %v529_v20 = vrot.slane %v298_v46, 1  ;;  %v531_v21 = vrot.slane %v299_v54, 1 }
  0x22   : > { %v417_v0 = vor.u32 %v415_v58, %v413_v61  ;;  %v414_v2 = vsel %vm397_vm11, %v410_v62, %v413_v61  ;;  %v426_v7 = vshll.u32 %v396_v63, 16  ;;  %v533_v25 = vrot.slane %v396_v63, 1 }
  0x23   : > { %1999 = vmatmul.mubr.msk.bf16.gmra.mrb[4].mxu0 %vm300_vm2, %v299_v54  ;;  %v420_v1 = vrot.slane %v418_v59, 1  ;;  %v530_v22 = vsel %vm525_vm12, %v527_v16, %v529_v20  ;;  %v532_v24 = vsel %vm525_vm12, %v529_v20, %v531_v21  ;;  %v699_v28 = vsel %vm313_vm0, %v681_v27, 0 }
  0x24   : > { %2004 = vmatprep.mubr.msk.bf16.mxu0 %vm300_vm2, %v407_v57  ;;  %v428_v14 = vrot.slane %v426_v7, 1  ;;  %v534_v26 = vsel %vm525_vm12, %v531_v21, %v533_v25  ;;  %2023 = vmatpush3.bf16.msra.mxu1 %v699_v28  ;;  %v382_v30 = vlaneseq  ;;  %v826_v16 = vsel %vm313_vm0, %v1888_v29, 0 }
  0x25   : > { %v421_v10 = vsel %vm397_vm11, %v417_v0, %v420_v1  ;;  %v424_v13 = vor.u32 %v422_v6, %v420_v1  ;;  %2212 = vmatprep.subr.msk.bf16.mxu1 %vm313_vm0, %v1888_v29 }
  0x26   : > { %v2383_v31 = vshrl.u32 %v382_v30, 7 }
  0x27   : > { %v429_v17 = vsel %vm397_vm11, %v424_v13, %v428_v14 }
  0x28   : > { %v384_v32 = vsub.s32 0, %v2383_v31 }
  0x2a   : > { %v385_v34 = vrot.slane %v2389_v33, %v384_v32 }
  0x2b   : > { %2005 = vmatmul.mubr.msk.bf16.vlgmr.msra.gmra.mrb[0].mxu0 %vm300_vm2, %v414_v2 }
  0x2c   : > { %2013 = vmatpush3.bf16.msra.mxu0 %v548_v8  ;;  %2008 = vmatprep.mubr.msk.bf16.mxu0 %vm300_vm2, %v421_v10 }
  0x33   : > { %2009 = vmatmul.mubr.msk.bf16.gmra.mrb[4].mxu0 %vm300_vm2, %v429_v17 }
  0x34   : > { %2014 = vmatprep.mubr.msk.bf16.mxu0 %vm300_vm2, %v528_v18 }
  0x3b   : > { %2015 = vmatmul.mubr.msk.bf16.vlgmr.msra.gmra.mrb[0].mxu0 %vm300_vm2, %v530_v22 }
  0x3c   : > { %2018 = vmatprep.mubr.msk.bf16.mxu0 %vm300_vm2, %v532_v24 }
  0x43   : > { %2019 = vmatmul.mubr.msk.bf16.gmra.mrb[4].mxu0 %vm300_vm2, %v534_v26  ;;  %v1893_v26 = vld [vmem:[%s2609_s3 + $0x8] sm:$0xf] }
 0x10e   : > { %v2016_v35 = vpop.f32.mrb[0].mxu0 }
 0x10f   : > { %v2112_v36 = vadd.f32 %v2016_v35, %v385_v34  ;;  %v584_v37 = vpop.f32.mrb[1].mxu0 }
 0x110   : > { %v2113_v38 = vadd.f32 %v584_v37, %v385_v34  ;;  %v2017_v39 = vpop.f32.mrb[2].mxu0 }
 0x111   : > { %vm625_vm13 = vcmp.ge.f32.partialorder %v2112_v36, 0.0  ;;  %v633_v40 = vmul.f32 0.1, %v2112_v36  ;;  %v2114_v41 = vadd.f32 %v2017_v39, %v385_v34  ;;  %v587_v42 = vpop.f32.mrb[3].mxu0 }
 0x112   : > { %vm623_vm14 = vcmp.ge.f32.partialorder %v2113_v38, 0.0  ;;  %v631_v43 = vmul.f32 0.1, %v2113_v38  ;;  %v2115_v44 = vadd.f32 %v587_v42, %v385_v34 }
 0x113   : > { %v641_v45 = vsel %vm625_vm13, %v2112_v36, %v633_v40  ;;  %vm626_vm15 = vcmp.ge.f32.partialorder %v2114_v41, 0.0  ;;  %v634_v46 = vmul.f32 0.1, %v2114_v41 }
 0x114   : > { %v639_v47 = vsel %vm623_vm14, %v2113_v38, %v631_v43  ;;  %vm624_vm3 = vcmp.ge.f32.partialorder %v2115_v44, 0.0  ;;  %v632_v48 = vmul.f32 0.1, %v2115_v44  ;;  %v658_v51 = vrot.slane %v641_v45, 7 }
 0x115   : > { %v655_v49 = vrot.slane %v639_v47, 7  ;;  %v642_v50 = vsel %vm626_vm15, %v2114_v41, %v634_v46  ;;  %vm1045_vm14 = vcmask 1042432  }
 0x116   : > { %v660_v52 = vrot.slane %v642_v50, 7  ;;  %v640_v53 = vsel %vm624_vm3, %v2115_v44, %v632_v48  ;;  %v2020_v54 = vpop.f32.mrb[4].mxu0 }
 0x117   : > { %v656_v55 = vrot.slane %v640_v53, 7  ;;  %v2116_v56 = vadd.f32 %v2020_v54, %v385_v34  ;;  %v600_v57 = vpop.f32.mrb[5].mxu0  ;;  %v679_v58 = vsel %vm268_vm1, 0.0, %v655_v49 }
 0x118   : > { %v2117_v59 = vadd.f32 %v600_v57, %v385_v34  ;;  %v2021_v60 = vpop.f32.mrb[6].mxu0  ;;  %v661_v61 = vsel %vm268_vm1, %v658_v51, %v660_v52 }
 0x119   : > { %vm629_vm4 = vcmp.ge.f32.partialorder %v2116_v56, 0.0  ;;  %v637_v62 = vmul.f32 0.1, %v2116_v56  ;;  %v2118_v63 = vadd.f32 %v2021_v60, %v385_v34  ;;  %v603_v0 = vpop.f32.mrb[7].mxu0  ;;  %v657_v1 = vsel %vm268_vm1, %v655_v49, %v656_v55 }
 0x11a   : > { %vm627_vm5 = vcmp.ge.f32.partialorder %v2117_v59, 0.0  ;;  %v635_v2 = vmul.f32 0.1, %v2117_v59  ;;  %v2119_v6 = vadd.f32 %v603_v0, %v385_v34  ;;  %v682_v7 = vpack.c.bf16 %v657_v1, %v679_v58 }
 0x11b   : > { %v645_v8 = vsel %vm629_vm4, %v2116_v56, %v637_v62  ;;  %vm630_vm6 = vcmp.ge.f32.partialorder %v2118_v63, 0.0  ;;  %v638_v10 = vmul.f32 0.1, %v2118_v63  ;;  %v659_v13 = vsel %vm268_vm1, %v656_v55, %v658_v51 }
 0x11c   : > { %v643_v14 = vsel %vm627_vm5, %v2117_v59, %v635_v2  ;;  %vm628_vm7 = vcmp.ge.f32.partialorder %v2119_v6, 0.0  ;;  %v636_v15 = vmul.f32 0.1, %v2119_v6  ;;  %2024 = vmatprep.mubr.msk.bf16.mxu1 %vm300_vm2, %v682_v7  ;;  %v666_v17 = vrot.slane %v645_v8, 7 }
 0x11d   : > { %v662_v18 = vrot.slane %v643_v14, 7  ;;  %v646_v20 = vsel %vm630_vm6, %v2118_v63, %v638_v10  ;;  %v683_v21 = vpack.c.bf16 %v661_v61, %v659_v13  ;;  %v783_v25 = vshll.u32 %v682_v7, 16  ;;  %v1898_v10 = vld [vmem:[%s2607_s1 + $0xc] sm:$0xf]  ;;  %v1903_v14 = vld [vmem:[%s2607_s1 + $0x10] sm:$0xf] }
 0x11e   : > { %v668_v22 = vrot.slane %v646_v20, 7  ;;  %v644_v24 = vsel %vm628_vm7, %v2119_v6, %v636_v15  ;;  %v908_v27 = vrot.slane %v682_v7, 1  ;;  %v781_v34 = vshrl.u32 %v682_v7, 16  ;;  %2214 = vmatprep.subr.msk.bf16.mxu0 %vm313_vm0, %v1898_v10  ;;  %v1913_v15 = vld [vmem:[%s2609_s3 + $0xc] sm:$0xf] }
 0x11f   : > { %v664_v28 = vrot.slane %v644_v24, 7  ;;  %2025 = vmatmul.mubr.msk.bf16.vlgmr.msra.gmra.mrb[0].mxu1 %vm300_vm2, %v683_v21  ;;  %v663_v30 = vsel %vm268_vm1, %v660_v52, %v662_v18  ;;  %v787_v35 = vshll.u32 %v683_v21, 16  ;;  %v785_v37 = vrot.slane %v783_v25, 1 }
 0x120   : > { %v680_v29 = vsel %vm268_vm1, %v668_v22, 0.0  ;;  %2033 = vmatpush3.bf16.msra.mxu1 %v826_v16  ;;  %v669_v36 = vsel %vm268_vm1, %v666_v17, %v668_v22  ;;  %v909_v38 = vrot.slane %v683_v21, 1  ;;  %v791_v47 = vshrl.u32 %v683_v21, 16 }
 0x121   : > { %v780_v39 = vpack.c.bf16 %v680_v29, %v680_v29  ;;  %v665_v40 = vsel %vm268_vm1, %v662_v18, %v664_v28  ;;  %v667_v41 = vsel %vm268_vm1, %v664_v28, %v666_v17  ;;  %v789_v42 = vrot.slane %v787_v35, 1  ;;  %2213 = vmatprep.subr.msk.bf16.mxu1 %vm313_vm0, %v1893_v26  ;;  %v2446_v17 = vld [vmem:[%s2610_s4] sm:$0x3] }
 0x122   : > { %v684_v43 = vpack.c.bf16 %v665_v40, %v663_v30  ;;  %v685_v44 = vpack.c.bf16 %v669_v36, %v667_v41  ;;  %v786_v45 = vor.u32 %v785_v37, %v781_v34  ;;  %v910_v46 = vsel %vm525_vm12, %v908_v27, %v909_v38 }
 0x123   : > { %v915_v48 = vrot.slane %v780_v39, 1  ;;  %v809_v52 = vshll.u32 %v780_v39, 16  ;;  %v793_v53 = vor.u32 %v791_v47, %v789_v42  ;;  %v930_v8 = vsel %vm313_vm0, %v1893_v26, 0 }
 0x124   : > { %2028 = vmatprep.mubr.msk.bf16.mxu1 %vm300_vm2, %v684_v43  ;;  %v790_v49 = vsel %vm397_vm11, %v786_v45, %v789_v42  ;;  %v794_v50 = vshll.u32 %v684_v43, 16  ;;  %v801_v51 = vshll.u32 %v685_v44, 16  ;;  %v911_v54 = vrot.slane %v684_v43, 1 }
 0x125   : > { %v913_v55 = vrot.slane %v685_v44, 1  ;;  %v798_v57 = vshrl.u32 %v684_v43, 16  ;;  %v805_v59 = vshrl.u32 %v685_v44, 16  ;;  %v811_v2 = vrot.slane %v809_v52, 1 }
 0x126   : > { %v796_v56 = vrot.slane %v794_v50, 1  ;;  %v803_v58 = vrot.slane %v801_v51, 1  ;;  %v912_v60 = vsel %vm525_vm12, %v909_v38, %v911_v54  ;;  %v1091_v13 = vsel %vm313_vm0, %v1898_v10, 0 }
 0x127   : > { %2029 = vmatmul.mubr.msk.bf16.gmra.mrb[4].mxu1 %vm300_vm2, %v685_v44  ;;  %v914_v61 = vsel %vm525_vm12, %v911_v54, %v913_v55  ;;  %v916_v62 = vsel %vm525_vm12, %v913_v55, %v915_v48  ;;  %2053 = vmatpush3.bf16.msra.mxu0 %v1091_v13  ;;  %v1484_v16 = vsel %vm313_vm0, %v1913_v15, 0  ;;  %v769_v18 = vrot.slane %v2446_v17, %v384_v32 }
 0x128   : > { %2034 = vmatprep.mubr.msk.bf16.mxu1 %vm300_vm2, %v790_v49  ;;  %v797_v63 = vsel %vm397_vm11, %v793_v53, %v796_v56  ;;  %v800_v0 = vor.u32 %v798_v57, %v796_v56  ;;  %v807_v1 = vor.u32 %v805_v59, %v803_v58  ;;  %2215 = vmatprep.subr.msk.bf16.mxu0 %vm313_vm0, %v1903_v14  ;;  %v1227_v50 = vsel %vm313_vm0, %v1903_v14, 0 }
 0x129   : > { %vm1173_vm6 = vsmask.f32 6400  ;;  %vm1309_vm7 = vcmask 1044480  }
 0x12a   : > { %v804_v6 = vsel %vm397_vm11, %v800_v0, %v803_v58  ;;  %v812_v7 = vsel %vm397_vm11, %v807_v1, %v811_v2 }
 0x12f   : > { %2035 = vmatmul.mubr.msk.bf16.vlgmr.msra.gmra.mrb[0].mxu1 %vm300_vm2, %v797_v63 }
 0x130   : > { %2043 = vmatpush3.bf16.msra.mxu1 %v930_v8  ;;  %2038 = vmatprep.mubr.msk.bf16.mxu1 %vm300_vm2, %v804_v6 }
 0x131   : > { %2217 = vmatprep.subr.msk.bf16.mxu1 %vm313_vm0, %v1913_v15 }
 0x137   : > { %2039 = vmatmul.mubr.msk.bf16.gmra.mrb[4].mxu1 %vm300_vm2, %v812_v7 }
 0x138   : > { %2044 = vmatprep.mubr.msk.bf16.mxu1 %vm300_vm2, %v910_v46 }
 0x13f   : > { %2045 = vmatmul.mubr.msk.bf16.vlgmr.msra.gmra.mrb[0].mxu1 %vm300_vm2, %v912_v60 }
 0x140   : > { %2048 = vmatprep.mubr.msk.bf16.mxu1 %vm300_vm2, %v914_v61  ;;  %2083 = vmatpush3.bf16.msra.mxu1 %v1484_v16  ;;  %v1908_v16 = vld [vmem:[%s2607_s1 + $0x14] sm:$0xf] }
 0x147   : > { %2049 = vmatmul.mubr.msk.bf16.gmra.mrb[4].mxu1 %vm300_vm2, %v916_v62 }
 0x212   : > { %v2046_v20 = vpop.f32.mrb[0].mxu1 }
 0x213   : > { %v2120_v21 = vadd.f32 %v2046_v20, %v769_v18  ;;  %v966_v22 = vpop.f32.mrb[1].mxu1 }
 0x214   : > { %v2121_v24 = vadd.f32 %v966_v22, %v769_v18  ;;  %v2047_v25 = vpop.f32.mrb[2].mxu1 }
 0x215   : > { %v2452_v26 = vadd.f32 %v2120_v21, %v2295_v5  ;;  %v2122_v27 = vadd.f32 %v2047_v25, %v769_v18  ;;  %v969_v28 = vpop.f32.mrb[3].mxu1 }
 0x216   : > { %v2455_v30 = vadd.f32 %v2121_v24, %v2291_v3  ;;  %v2123_v34 = vadd.f32 %v969_v28, %v769_v18 }
 0x217   : > { %vm1015_vm8 = vcmp.ge.f32.partialorder %v2452_v26, 0.0  ;;  %v1023_v35 = vmul.f32 0.1, %v2452_v26  ;;  %v2460_v32 = vadd.f32 %v2122_v27, %v2302_v9 }
 0x218   : > { %vm1013_vm9 = vcmp.ge.f32.partialorder %v2455_v30, 0.0  ;;  %v1021_v29 = vmul.f32 0.1, %v2455_v30  ;;  %v2465_v5 = vadd.f32 %v2123_v34, %v2293_v4 }
 0x219   : > { %v1031_v36 = vsel %vm1015_vm8, %v2452_v26, %v1023_v35  ;;  %vm1016_vm10 = vcmp.ge.f32.partialorder %v2460_v32, 0.0  ;;  %v1024_v3 = vmul.f32 0.1, %v2460_v32 }
 0x21a   : > { %vm1014_vm13 = vcmp.ge.f32.partialorder %v2465_v5, 0.0  ;;  %v1022_v37 = vmul.f32 0.1, %v2465_v5  ;;  %v2050_v38 = vpop.f32.mrb[4].mxu1  ;;  %v1029_v9 = vsel %vm1013_vm9, %v2455_v30, %v1021_v29  ;;  %v1049_v4 = vrot.slane %v1031_v36, 5 }
 0x21b   : > { %v1032_v39 = vsel %vm1016_vm10, %v2460_v32, %v1024_v3  ;;  %v2124_v40 = vadd.f32 %v2050_v38, %v769_v18  ;;  %v982_v41 = vpop.f32.mrb[5].mxu1  ;;  %v1046_v54 = vrot.slane %v1029_v9, 5 }
 0x21c   : > { %v1051_v42 = vrot.slane %v1032_v39, 5  ;;  %v1030_v43 = vsel %vm1014_vm13, %v2465_v5, %v1022_v37  ;;  %v2125_v44 = vadd.f32 %v982_v41, %v769_v18  ;;  %v2051_v45 = vpop.f32.mrb[6].mxu1 }
 0x21d   : > { %v1047_v46 = vrot.slane %v1030_v43, 5  ;;  %v2476_v47 = vadd.f32 %v2124_v40, %v2316_v19  ;;  %v2126_v48 = vadd.f32 %v2051_v45, %v769_v18  ;;  %v985_v49 = vpop.f32.mrb[7].mxu1  ;;  %v1070_v63 = vsel %vm1045_vm14, 0.0, %v1046_v54 }
 0x21e   : > { %v1052_v51 = vsel %vm1045_vm14, %v1049_v4, %v1051_v42  ;;  %v2481_v52 = vadd.f32 %v2125_v44, %v2306_v11  ;;  %v2127_v53 = vadd.f32 %v985_v49, %v769_v18 }
 0x21f   : > { %v1050_v55 = vsel %vm1045_vm14, %v1047_v46, %v1049_v4  ;;  %vm1019_vm15 = vcmp.ge.f32.partialorder %v2476_v47, 0.0  ;;  %v1027_v56 = vmul.f32 0.1, %v2476_v47  ;;  %v2487_v19 = vadd.f32 %v2126_v48, %v2321_v23 }
 0x220   : > { %v2489_v57 = vpack.c.bf16 %v1052_v51, %v1050_v55  ;;  %vm1017_vm3 = vcmp.ge.f32.partialorder %v2481_v52, 0.0  ;;  %v1025_v58 = vmul.f32 0.1, %v2481_v52  ;;  %v2494_v11 = vadd.f32 %v2127_v53, %v2308_v12 }
 0x221   : > { %v1035_v59 = vsel %vm1019_vm15, %v2476_v47, %v1027_v56  ;;  %vm1020_vm4 = vcmp.ge.f32.partialorder %v2487_v19, 0.0  ;;  %v1028_v60 = vmul.f32 0.1, %v2487_v19  ;;  %v1048_v61 = vsel %vm1045_vm14, %v1046_v54, %v1047_v46 }
 0x222   : > { %v1033_v23 = vsel %vm1017_vm3, %v2481_v52, %v1025_v58  ;;  %vm1018_vm5 = vcmp.ge.f32.partialorder %v2494_v11, 0.0  ;;  %v1026_v62 = vmul.f32 0.1, %v2494_v11  ;;  %v1074_v1 = vpack.c.bf16 %v1048_v61, %v1070_v63 }
 0x223   : > { %v1053_v0 = vrot.slane %v1033_v23, 5  ;;  %v1036_v12 = vsel %vm1020_vm4, %v2487_v19, %v1028_v60  ;;  %v1181_v2 = vshrl.u32 %v2489_v57, 16  ;;  %v1057_v6 = vrot.slane %v1035_v59, 5 }
 0x224   : > { %v1059_v7 = vrot.slane %v1036_v12, 5  ;;  %v1034_v8 = vsel %vm1018_vm5, %v2494_v11, %v1026_v62  ;;  %v1184_v10 = vshll.u32 %v2489_v57, 16  ;;  %2054 = vmatprep.mubr.msk.bf16.mxu0 %vm300_vm2, %v1074_v1  ;;  %v1174_v14 = vshrl.u32 %v1074_v1, 16 }
 0x225   : > { %v1055_v13 = vrot.slane %v1034_v8, 5  ;;  %v1177_v15 = vshll.u32 %v1074_v1, 16  ;;  %2055 = vmatmul.mubr.msk.bf16.vlgmr.msra.gmra.mrb[8].mxu0 %vm300_vm2, %v2489_v57  ;;  %v1183_v20 = vrot.slane %v1181_v2, 1  ;;  %v1054_v22 = vsel %vm1045_vm14, %v1051_v42, %v1053_v0 }
 0x226   : > { %v1060_v18 = vsel %vm1045_vm14, %v1057_v6, %v1059_v7  ;;  %v1186_v21 = vrot.slane %v1184_v10, 2  ;;  %2063 = vmatpush3.bf16.msra.mxu0 %v1227_v50  ;;  %v1176_v27 = vrot.slane %v1174_v14, 1  ;;  %v1071_v29 = vsel %vm1045_vm14, %v1059_v7, 0.0 }
 0x227   : > { %v1056_v24 = vsel %vm1045_vm14, %v1053_v0, %v1055_v13  ;;  %v1058_v25 = vsel %vm1045_vm14, %v1055_v13, %v1057_v6  ;;  %v1179_v35 = vrot.slane %v1177_v15, 2  ;;  %2216 = vmatprep.subr.msk.bf16.mxu0 %vm313_vm0, %v1908_v16  ;;  %v1172_v40 = vpack.c.bf16 %v1071_v29, %v1071_v29 }
 0x228   : > { %v1076_v28 = vpack.c.bf16 %v1056_v24, %v1054_v22  ;;  %v1077_v34 = vpack.c.bf16 %v1060_v18, %v1058_v25  ;;  %v1187_v36 = vor.u32 %v1186_v21, %v1183_v20  ;;  %v1332_v50 = vsel %vm313_vm0, %v1908_v16, 0 }
 0x229   : > { %v1180_v3 = vor.u32 %v1179_v35, %v1176_v27  ;;  %v1206_v46 = vshrl.u32 %v1172_v40, 16  ;;  %v1209_v48 = vshll.u32 %v1172_v40, 16  ;;  %v1310_v58 = vrot.slane %v1074_v1, 3 }
 0x22a   : > { %2058 = vmatprep.mubr.msk.bf16.mxu0 %vm300_vm2, %v1076_v28  ;;  %v1189_v37 = vshrl.u32 %v1076_v28, 16  ;;  %v1192_v38 = vshll.u32 %v1076_v28, 16  ;;  %v1197_v9 = vshrl.u32 %v1077_v34, 16  ;;  %v1200_v39 = vshll.u32 %v1077_v34, 16 }
 0x22b   : > { %v1188_v42 = vsel %vm1173_vm6, %v1180_v3, %v1187_v36  ;;  %v1208_v53 = vrot.slane %v1206_v46, 1  ;;  %v1211_v54 = vrot.slane %v1209_v48, 2  ;;  %v1311_v59 = vrot.slane %v2489_v57, 3  ;;  %v1918_v57 = vld [vmem:[%s2609_s3 + $0x10] sm:$0xf] }
 0x22c   : > { %v1191_v41 = vrot.slane %v1189_v37, 1  ;;  %v1194_v4 = vrot.slane %v1192_v38, 2  ;;  %v1199_v43 = vrot.slane %v1197_v9, 1  ;;  %v1202_v44 = vrot.slane %v1200_v39, 2  ;;  %2218 = vmatprep.subr.msk.bf16.mxu1 %vm313_vm0, %v1918_v57 }
 0x22d   : > { %2059 = vmatmul.mubr.msk.bf16.gmra.mrb[12].mxu0 %vm300_vm2, %v1077_v34  ;;  %v1212_v56 = vor.u32 %v1211_v54, %v1208_v53  ;;  %v1312_v61 = vsel %vm1309_vm7, %v1310_v58, %v1311_v59  ;;  %v1313_v23 = vrot.slane %v1076_v28, 3  ;;  %v1315_v62 = vrot.slane %v1077_v34, 3 }
 0x22e   : > { %2064 = vmatprep.mubr.msk.bf16.mxu0 %vm300_vm2, %v1188_v42  ;;  %v1195_v45 = vor.u32 %v1194_v4, %v1191_v41  ;;  %v1203_v49 = vor.u32 %v1202_v44, %v1199_v43  ;;  %v1317_v12 = vrot.slane %v1172_v40, 3  ;;  %v1160_v2 = vsub.s32 1, %v2383_v31 }
 0x22f   : > { %v1314_v63 = vsel %vm1309_vm7, %v1311_v59, %v1313_v23  ;;  %v1316_v0 = vsel %vm1309_vm7, %v1313_v23, %v1315_v62  ;;  %v1611_v41 = vsel %vm313_vm0, %v1918_v57, 0 }
 0x230   : > { %v1196_v51 = vsel %vm1173_vm6, %v1187_v36, %v1195_v45  ;;  %v1204_v55 = vsel %vm1173_vm6, %v1195_v45, %v1203_v49  ;;  %v1213_v60 = vsel %vm1173_vm6, %v1203_v49, %v1212_v56  ;;  %v1318_v1 = vsel %vm1309_vm7, %v1315_v62, %v1317_v12 }
 0x231   : > { %v1161_v6 = vrot.slane %v2389_v33, %v1160_v2 }
 0x235   : > { %2065 = vmatmul.mubr.msk.bf16.vlgmr.msra.gmra.mrb[8].mxu0 %vm300_vm2, %v1196_v51 }
 0x236   : > { %2073 = vmatpush3.bf16.msra.mxu0 %v1332_v50  ;;  %2068 = vmatprep.mubr.msk.bf16.mxu0 %vm300_vm2, %v1204_v55 }
 0x23d   : > { %2069 = vmatmul.mubr.msk.bf16.gmra.mrb[12].mxu0 %vm300_vm2, %v1213_v60 }
 0x23e   : > { %2074 = vmatprep.mubr.msk.bf16.mxu0 %vm300_vm2, %v1312_v61 }
 0x245   : > { %2075 = vmatmul.mubr.msk.bf16.vlgmr.msra.gmra.mrb[8].mxu0 %vm300_vm2, %v1314_v63 }
 0x246   : > { %2078 = vmatprep.mubr.msk.bf16.mxu0 %vm300_vm2, %v1316_v0 }
 0x24d   : > { %2079 = vmatmul.mubr.msk.bf16.gmra.mrb[12].mxu0 %vm300_vm2, %v1318_v1 }
 0x318   : > { %v2076_v7 = vpop.f32.mrb[8].mxu0 }
 0x319   : > { %v2128_v8 = vadd.f32 %v2076_v7, %v1161_v6  ;;  %v1368_v10 = vpop.f32.mrb[9].mxu0 }
 0x31a   : > { %v2129_v13 = vadd.f32 %v1368_v10, %v1161_v6  ;;  %v2077_v14 = vpop.f32.mrb[10].mxu0 }
 0x31b   : > { %vm1409_vm8 = vcmp.ge.f32.partialorder %v2128_v8, 0.0  ;;  %v1417_v15 = vmul.f32 0.1, %v2128_v8  ;;  %v2130_v16 = vadd.f32 %v2077_v14, %v1161_v6  ;;  %v1371_v18 = vpop.f32.mrb[11].mxu0 }
 0x31c   : > { %vm1407_vm9 = vcmp.ge.f32.partialorder %v2129_v13, 0.0  ;;  %v1415_v20 = vmul.f32 0.1, %v2129_v13  ;;  %v2131_v21 = vadd.f32 %v1371_v18, %v1161_v6 }
 0x31d   : > { %v1425_v22 = vsel %vm1409_vm8, %v2128_v8, %v1417_v15  ;;  %vm1410_vm10 = vcmp.ge.f32.partialorder %v2130_v16, 0.0  ;;  %v1418_v24 = vmul.f32 0.1, %v2130_v16 }
 0x31e   : > { %vm1408_vm13 = vcmp.ge.f32.partialorder %v2131_v21, 0.0  ;;  %v1416_v25 = vmul.f32 0.1, %v2131_v21  ;;  %v1423_v27 = vsel %vm1407_vm9, %v2129_v13, %v1415_v20  ;;  %v1442_v33 = vrot.slane %v1425_v22, 7 }
 0x31f   : > { %v1426_v28 = vsel %vm1410_vm10, %v2130_v16, %v1418_v24  ;;  %v1439_v38 = vrot.slane %v1423_v27, 7 }
 0x320   : > { %v1444_v34 = vrot.slane %v1426_v28, 7  ;;  %v1424_v35 = vsel %vm1408_vm13, %v2131_v21, %v1416_v25  ;;  %v2080_v29 = vpop.f32.mrb[12].mxu0 }
 0x321   : > { %v1440_v36 = vrot.slane %v1424_v35, 7  ;;  %v2132_v3 = vadd.f32 %v2080_v29, %v1161_v6  ;;  %v1384_v37 = vpop.f32.mrb[13].mxu0  ;;  %v1463_v53 = vsel %vm268_vm1, 0.0, %v1439_v38 }
 0x322   : > { %v1445_v9 = vsel %vm268_vm1, %v1442_v33, %v1444_v34  ;;  %v2133_v39 = vadd.f32 %v1384_v37, %v1161_v6  ;;  %v2081_v40 = vpop.f32.mrb[14].mxu0 }
 0x323   : > { %v1443_v4 = vsel %vm268_vm1, %v1440_v36, %v1442_v33  ;;  %vm1413_vm14 = vcmp.ge.f32.partialorder %v2132_v3, 0.0  ;;  %v1421_v42 = vmul.f32 0.1, %v2132_v3  ;;  %v2134_v43 = vadd.f32 %v2081_v40, %v1161_v6  ;;  %v1387_v44 = vpop.f32.mrb[15].mxu0 }
 0x324   : > { %v1468_v45 = vpack.c.bf16 %v1445_v9, %v1443_v4  ;;  %vm1411_vm15 = vcmp.ge.f32.partialorder %v2133_v39, 0.0  ;;  %v1419_v46 = vmul.f32 0.1, %v2133_v39  ;;  %v2135_v48 = vadd.f32 %v1387_v44, %v1161_v6  ;;  %v1923_v6 = vld [vmem:[%s2609_s3 + $0x14] sm:$0xf] }
 0x325   : > { %v1429_v49 = vsel %vm1413_vm14, %v2132_v3, %v1421_v42  ;;  %vm1414_vm3 = vcmp.ge.f32.partialorder %v2134_v43, 0.0  ;;  %v1422_v50 = vmul.f32 0.1, %v2134_v43  ;;  %v1441_v51 = vsel %vm268_vm1, %v1439_v38, %v1440_v36 }
 0x326   : > { %v1427_v54 = vsel %vm1411_vm15, %v2133_v39, %v1419_v46  ;;  %vm1412_vm4 = vcmp.ge.f32.partialorder %v2135_v48, 0.0  ;;  %v1420_v55 = vmul.f32 0.1, %v2135_v48  ;;  %v1467_v59 = vpack.c.bf16 %v1441_v51, %v1463_v53 }
 0x327   : > { %v1446_v56 = vrot.slane %v1427_v54, 7  ;;  %v1430_v58 = vsel %vm1414_vm3, %v2134_v43, %v1422_v50  ;;  %v1572_v60 = vshll.u32 %v1468_v45, 16  ;;  %v1450_v61 = vrot.slane %v1429_v49, 7 }
 0x328   : > { %v1452_v23 = vrot.slane %v1430_v58, 7  ;;  %v1428_v62 = vsel %vm1412_vm4, %v2135_v48, %v1420_v55  ;;  %v1694_v63 = vrot.slane %v1468_v45, 1  ;;  %2084 = vmatprep.mubr.msk.bf16.mxu1 %vm300_vm2, %v1467_v59  ;;  %v1566_v1 = vshrl.u32 %v1467_v59, 16 }
 0x329   : > { %v1448_v0 = vrot.slane %v1428_v62, 7  ;;  %v1447_v12 = vsel %vm268_vm1, %v1444_v34, %v1446_v56  ;;  %v1568_v57 = vshll.u32 %v1467_v59, 16  ;;  %2085 = vmatmul.mubr.msk.bf16.vlgmr.msra.gmra.mrb[8].mxu1 %vm300_vm2, %v1468_v45  ;;  %v1574_v10 = vrot.slane %v1572_v60, 1 }
 0x32a   : > { %v1464_v7 = vsel %vm268_vm1, %v1452_v23, 0.0  ;;  %v1453_v8 = vsel %vm268_vm1, %v1450_v61, %v1452_v23  ;;  %v1693_v13 = vrot.slane %v1467_v59, 1  ;;  %2093 = vmatpush3.bf16.msra.mxu1 %v1611_v41  ;;  %v1576_v25 = vshrl.u32 %v1468_v45, 16 }
 0x32b   : > { %v1565_v14 = vpack.c.bf16 %v1464_v7, %v1464_v7  ;;  %v1449_v15 = vsel %vm268_vm1, %v1446_v56, %v1448_v0  ;;  %v1451_v16 = vsel %vm268_vm1, %v1448_v0, %v1450_v61  ;;  %v1570_v18 = vrot.slane %v1568_v57, 1  ;;  %2219 = vmatprep.subr.msk.bf16.mxu1 %vm313_vm0, %v1923_v6 }
 0x32c   : > { %v1469_v20 = vpack.c.bf16 %v1449_v15, %v1447_v12  ;;  %v1470_v21 = vpack.c.bf16 %v1453_v8, %v1451_v16  ;;  %v1695_v22 = vsel %vm525_vm12, %v1693_v13, %v1694_v63  ;;  %v1578_v29 = vor.u32 %v1576_v25, %v1574_v10 }
 0x32d   : > { %v1571_v24 = vor.u32 %v1570_v18, %v1566_v1  ;;  %v1700_v27 = vrot.slane %v1565_v14, 1  ;;  %v1594_v34 = vshll.u32 %v1565_v14, 16  ;;  %v1715_v49 = vsel %vm313_vm0, %v1923_v6, 0 }
 0x32e   : > { %2088 = vmatprep.mubr.msk.bf16.mxu1 %vm300_vm2, %v1469_v20  ;;  %v1579_v28 = vshll.u32 %v1469_v20, 16  ;;  %v1586_v33 = vshll.u32 %v1470_v21, 16  ;;  %v1696_v36 = vrot.slane %v1469_v20, 1  ;;  %v1698_v3 = vrot.slane %v1470_v21, 1 }
 0x32f   : > { %v1575_v35 = vsel %vm397_vm11, %v1571_v24, %v1574_v10  ;;  %v1583_v38 = vshrl.u32 %v1469_v20, 16  ;;  %v1590_v39 = vshrl.u32 %v1470_v21, 16  ;;  %v1596_v45 = vrot.slane %v1594_v34, 1 }
 0x330   : > { %v1581_v37 = vrot.slane %v1579_v28, 1  ;;  %v1588_v9 = vrot.slane %v1586_v33, 1  ;;  %v1697_v40 = vsel %vm525_vm12, %v1694_v63, %v1696_v36  ;;  %v1699_v41 = vsel %vm525_vm12, %v1696_v36, %v1698_v3 }
 0x331   : > { %v1701_v4 = vsel %vm525_vm12, %v1698_v3, %v1700_v27  ;;  %2089 = vmatmul.mubr.msk.bf16.gmra.mrb[12].mxu1 %vm300_vm2, %v1470_v21  ;;  %v1554_v50 = vrot.slane %v2446_v17, %v1160_v2 }
 0x332   : > { %v1582_v42 = vsel %vm397_vm11, %v1578_v29, %v1581_v37  ;;  %v1585_v43 = vor.u32 %v1583_v38, %v1581_v37  ;;  %v1592_v44 = vor.u32 %v1590_v39, %v1588_v9  ;;  %2094 = vmatprep.mubr.msk.bf16.mxu1 %vm300_vm2, %v1575_v35 }
 0x334   : > { %v1589_v46 = vsel %vm397_vm11, %v1585_v43, %v1588_v9  ;;  %v1597_v48 = vsel %vm397_vm11, %v1592_v44, %v1596_v45 }
 0x339   : > { %2095 = vmatmul.mubr.msk.bf16.vlgmr.msra.gmra.mrb[8].mxu1 %vm300_vm2, %v1582_v42 }
 0x33a   : > { %2103 = vmatpush3.bf16.msra.mxu1 %v1715_v49  ;;  %2098 = vmatprep.mubr.msk.bf16.mxu1 %vm300_vm2, %v1589_v46 }
 0x341   : > { %2099 = vmatmul.mubr.msk.bf16.gmra.mrb[12].mxu1 %vm300_vm2, %v1597_v48 }
 0x342   : > { %2104 = vmatprep.mubr.msk.bf16.mxu1 %vm300_vm2, %v1695_v22 }
 0x349   : > { %2105 = vmatmul.mubr.msk.bf16.vlgmr.msra.gmra.mrb[8].mxu1 %vm300_vm2, %v1697_v40 }
 0x34a   : > { %2108 = vmatprep.mubr.msk.bf16.mxu1 %vm300_vm2, %v1699_v41 }
 0x351   : > { %2109 = vmatmul.mubr.msk.bf16.gmra.mrb[12].mxu1 %vm300_vm2, %v1701_v4 }
 0x41c   : > { %v2106_v51 = vpop.f32.mrb[8].mxu1 }
 0x41d   : > { %v2136_v53 = vadd.f32 %v2106_v51, %v1554_v50  ;;  %v1751_v54 = vpop.f32.mrb[9].mxu1 }
 0x41e   : > { %v2137_v55 = vadd.f32 %v1751_v54, %v1554_v50  ;;  %v2107_v56 = vpop.f32.mrb[10].mxu1 }
 0x41f   : > { %v1792_v58 = vadd.f32 %v2136_v53, %v2452_v26  ;;  %v2138_v59 = vadd.f32 %v2107_v56, %v1554_v50  ;;  %v1754_v60 = vpop.f32.mrb[11].mxu1 }
 0x420   : > { %v1790_v61 = vadd.f32 %v2137_v55, %v2455_v30  ;;  %v2139_v23 = vadd.f32 %v1754_v60, %v1554_v50 }
 0x421   : > { %1800 = vst.msk [vmem:[%s224_s7 + $0x10] sm:$0xff] %vm300_vm2, %v1792_v58  ;;  %v1793_v31 = vadd.f32 %v2138_v59, %v2460_v32 }
 0x422   : > { %1798 = vst.msk [vmem:[%s224_s7] sm:$0xff] %vm300_vm2, %v1790_v61  ;;  %v1791_v17 = vadd.f32 %v2139_v23, %v2465_v5 }
 0x423   : > { %1801 = vst.msk [vmem:[%s224_s7 + $0x18] sm:$0xff] %vm300_vm2, %v1793_v31 }
 0x424   : > { %1799 = vst.msk [vmem:[%s224_s7 + $0x8] sm:$0xff] %vm300_vm2, %v1791_v17  ;;  %v2110_v2 = vpop.f32.mrb[12].mxu1 }
 0x425   : > { %v2140_v62 = vadd.f32 %v2110_v2, %v1554_v50  ;;  %v1767_v26 = vpop.f32.mrb[13].mxu1 }
 0x426   : > { %v2141_v63 = vadd.f32 %v1767_v26, %v1554_v50  ;;  %v2111_v0 = vpop.f32.mrb[14].mxu1 }
 0x427   : > { %v1796_v30 = vadd.f32 %v2140_v62, %v2476_v47  ;;  %v2142_v12 = vadd.f32 %v2111_v0, %v1554_v50  ;;  %v1770_v1 = vpop.f32.mrb[15].mxu1 }
 0x428   : > { %v1794_v57 = vadd.f32 %v2141_v63, %v2481_v52  ;;  %v2143_v32 = vadd.f32 %v1770_v1, %v1554_v50 }
 0x429   : > { %1804 = vst.msk [vmem:[%s224_s7 + $0x30] sm:$0xff] %vm300_vm2, %v1796_v30  ;;  %v1797_v5 = vadd.f32 %v2142_v12, %v2487_v19 }
 0x42a   : > { %1802 = vst.msk [vmem:[%s224_s7 + $0x20] sm:$0xff] %vm300_vm2, %v1794_v57  ;;  %v1795_v6 = vadd.f32 %v2143_v32, %v2494_v11 }
 0x42b   : > { %1805 = vst.msk [vmem:[%s224_s7 + $0x38] sm:$0xff] %vm300_vm2, %v1797_v5 }
 0x42c   : > { %1803 = vst.msk [vmem:[%s224_s7 + $0x28] sm:$0xff] %vm300_vm2, %v1795_v6 }
 0x42d PF: > { %s15_s18 = sadd.s32 1, %s2234_s18  }
 0x42e   : > { %p12_p4 = scmp.ge.s32.totalorder %s15_s18, 4  }
 0x430   :  { %14 = sbr.rel (!%p12_p4) target bundleno = 1 (0x1), region = 80 }

</bundles_post_ra>
